<compile_context>
chip_gen: v6e
topology: v6e:2x2x1
jax: 0.10.0
libtpu: 0.0.40
codegen_flags: <defaults>
</compile_context>

<pallas_src>
import math
import jax
import jax.numpy as jnp
from jax import lax
from jax.experimental import pallas as pl
from jax.experimental.pallas import tpu as pltpu

F32 = jnp.float32
BF16 = jnp.bfloat16

WEIGHT_ORDER = (
    'w3', 'skip_w', 'skip_id', 'bn_gamma', 'bn_beta', 'ln_mask', 'ln_inv_cnt',
    'w_in_x', 'w_in_z', 'dw_conv_w', 'dw_conv_b', 'w_xdt', 'w_xb', 'w_xc',
    'w_dt', 'dt_bias', 'a_neg', 'd_vec', 'w_out', 'ln_w', 'ln_b',
)


# ---------------------------------------------------------------------------
# Fused kernel: one grid step = one TCSSM layer (CNN branch + Mamba branch),
# both streams and all batches processed in a single (2*B*T, Cmax) slab.
# ---------------------------------------------------------------------------
def make_fused_kernel(n_layers, B, T, Cmax, Dmax, d_state, d_conv, dt_rank,
                      bn_eps=1e-5, ln_eps=1e-6):
    BT = B * T
    R = 2 * BT                                   # rows: [stream, batch, time]

    def sigmoid(v):
        return 1.0 / (1.0 + jnp.exp(-v))

    def softplus(v):                              # stable, no log1p lowering needed
        return jnp.maximum(v, 0.0) + jnp.log(1.0 + jnp.exp(-jnp.abs(v)))

    def kernel(x_ref, w3_ref, skipw_ref, skipid_ref, gamma_ref, beta_ref,
               lnmask_ref, lninv_ref, winx_ref, winz_ref, dwcw_ref, dwcb_ref,
               wxdt_ref, wxb_ref, wxc_ref, wdt_ref, dtb_ref, aneg_ref,
               dvec_ref, wout_ref, lnw_ref, lnb_ref, out_ref):
        l = pl.program_id(0)

        # Layer 0: load the (channel-padded) network input into the resident
        # activation buffer (out_ref has a constant block index -> stays in VMEM
        # across the layer grid and carries the activation between layers).
        @pl.when(l == 0)
        def _():
            out_ref[...] = x_ref[...]

        x = out_ref[...]                                        # (R, Cmax) f32

        # time index within each sequence (same for both streams/batches)
        t_col = lax.broadcasted_iota(jnp.int32, (R, 1), 0) % T

        def shift_prev(v, d):       # out[r] = v[r-d] within the sequence, else 0
            return jnp.where(t_col >= d, pltpu.roll(v, d, axis=0), 0.0)

        def shift_next(v, d):       # out[r] = v[r+d] within the sequence, else 0
            return jnp.where(t_col <= T - 1 - d, pltpu.roll(v, R - d, axis=0), 0.0)

        # ----------------- MMCNNEncoderLayer branch -----------------
        # Conv1d(k=3, pad=1, no bias) over time as ONE matmul per stream on the
        # tap-concatenated input; BN (training-mode batch stats, per stream),
        # ReLU, Dropout(0)=id, + skip (1x1 conv or identity via per-layer flag).
        xcat = jnp.concatenate([shift_prev(x, 1), x, shift_next(x, 1)],
                               axis=1).astype(BF16)             # (R, 3*Cmax)
        x_bf = x.astype(BF16)
        w3 = w3_ref[0]                                          # (2, 3*Cmax, Cmax) bf16
        skw = skipw_ref[0]                                      # (2, Cmax, Cmax) bf16
        id_flag = skipid_ref[0]                                 # (1, 1): 1.0 -> identity skip
        gam = gamma_ref[0]                                      # (2, 1, Cmax)
        bet = beta_ref[0]

        res_parts = []
        for s in range(2):                                      # per stream (aligned rows)
            r0, r1 = s * BT, (s + 1) * BT
            y = jnp.dot(xcat[r0:r1], w3[s], preferred_element_type=F32)   # (BT, Cmax)
            mean = jnp.mean(y, axis=0, keepdims=True)
            var = jnp.mean(jnp.square(y - mean), axis=0, keepdims=True)
            scale = gam[s] * lax.rsqrt(var + bn_eps)
            shift = bet[s] - mean * scale
            yn = jnp.maximum(y * scale + shift, 0.0)
            skip = id_flag * x[r0:r1] + jnp.dot(x_bf[r0:r1], skw[s],
                                                preferred_element_type=F32)
            res_parts.append(yn + skip)
        res = jnp.concatenate(res_parts, axis=0)                # (R, Cmax) f32

        # -------- MMMambaEncoderLayer: out = res + LayerNorm(Mamba(res)) --------
        res_bf = res.astype(BF16)
        xpart = jnp.dot(res_bf, winx_ref[0], preferred_element_type=F32)  # (R, Dmax)
        z = jnp.dot(res_bf, winz_ref[0], preferred_element_type=F32)      # (R, Dmax)

        # causal depthwise conv over time (left pad d_conv-1), sequence-segmented
        cw = dwcw_ref[0]                                        # (d_conv, Dmax)
        xconv = xpart * cw[d_conv - 1:d_conv, :]
        for k in range(d_conv - 1):
            xconv = xconv + shift_prev(xpart, d_conv - 1 - k) * cw[k:k + 1, :]
        xconv = xconv + dwcb_ref[0]
        xsil = xconv * sigmoid(xconv)                           # SiLU

        # input-dependent SSM parameters (dt path kept fully in f32)
        dt_low = jnp.dot(xsil, wxdt_ref[0], preferred_element_type=F32)   # (R, dt_rank)
        Bmat = jnp.dot(xsil, wxb_ref[0], preferred_element_type=F32)      # (R, d_state)
        Cmat = jnp.dot(xsil, wxc_ref[0], preferred_element_type=F32)      # (R, d_state)
        dt = softplus(jnp.dot(dt_low, wdt_ref[0], preferred_element_type=F32)
                      + dtb_ref[0])                                        # (R, Dmax)

        # selective scan, one (R, Dmax) strip per SSM state:
        #   h[t] = exp(dt[t]*A_s) * h[t-1] + (dt[t]*x[t]) * B_s[t]
        # segmented log2(T)-depth Hillis-Steele scan; sequence starts handled by t_col.
        a_rows = aneg_ref[0]                                    # (d_state, Dmax), A = -exp(A_log)
        dtx = dt * xsil
        y_ssm = dvec_ref[0] * xsil
        for s in range(d_state):
            a_op = jnp.exp(dt * a_rows[s:s + 1, :])             # (R, Dmax), <= 1
            b_op = dtx * Bmat[:, s:s + 1]
            dstep = 1
            while dstep < T:
                a_sh = jnp.where(t_col >= dstep, pltpu.roll(a_op, dstep, axis=0), 1.0)
                b_sh = jnp.where(t_col >= dstep, pltpu.roll(b_op, dstep, axis=0), 0.0)
                b_op = a_op * b_sh + b_op                       # uses pre-update a_op
                a_op = a_op * a_sh
                dstep *= 2
            y_ssm = y_ssm + Cmat[:, s:s + 1] * b_op             # C_s[t] * h_s[t]

        y_gated = y_ssm * (z * sigmoid(z))
        mo = jnp.dot(y_gated.astype(BF16), wout_ref[0],
                     preferred_element_type=F32)                # (R, Cmax)

        # LayerNorm(eps=1e-6) over the layer's *valid* channels (mask handles the
        # channel padding of the fused-layer layout) + residual, per stream.
        cmask = lnmask_ref[0]                                   # (1, Cmax)
        inv_cnt = lninv_ref[0]                                  # (1, 1)
        lnw = lnw_ref[0]                                        # (2, 1, Cmax)
        lnb = lnb_ref[0]
        out_parts = []
        for s in range(2):
            r0, r1 = s * BT, (s + 1) * BT
            mo_s = mo[r0:r1]
            mu = jnp.sum(mo_s * cmask, axis=-1, keepdims=True) * inv_cnt
            dev = (mo_s - mu) * cmask
            var = jnp.sum(dev * dev, axis=-1, keepdims=True) * inv_cnt
            ln = dev * lax.rsqrt(var + ln_eps) * lnw[s] + lnb[s]
            out_parts.append(res[r0:r1] + ln)
        out_ref[...] = jnp.concatenate(out_parts, axis=0)       # carries to next layer

    return kernel


# ---------------------------------------------------------------------------
# Host wrapper: one pallas_call for the whole TCSSM forward
# ---------------------------------------------------------------------------
def tcssm_forward(primary_x, secondary_x, params):
    cfg = params['config']
    weights = params['weights']
    B, T, cin0 = primary_x.shape
    BT = B * T
    Cmax, Dmax = cfg['Cmax'], cfg['Dmax']
    n_layers = cfg['n_layers']

    x = jnp.concatenate([primary_x.reshape(BT, cin0),
                         secondary_x.reshape(BT, cin0)], axis=0).astype(F32)
    x = jnp.pad(x, ((0, 0), (0, Cmax - cin0)))                  # channel-pad to Cmax

    kern = make_fused_kernel(n_layers, B, T, Cmax, Dmax,
                             cfg['d_state'], cfg['d_conv'], cfg['dt_rank'])

    def layer_spec(shape):            # weights stacked over the layer grid axis
        rest = (0,) * (len(shape) - 1)
        return pl.BlockSpec((1,) + tuple(shape[1:]),
                            lambda l, _r=rest: (l,) + _r)

    def whole_spec(shape):            # constant block -> VMEM-resident across layers
        zeros = (0,) * len(shape)
        return pl.BlockSpec(tuple(shape), lambda l, _z=zeros: _z)

    wlist = [weights[k] for k in WEIGHT_ORDER]
    out = pl.pallas_call(
        kern,
        out_shape=jax.ShapeDtypeStruct((2 * BT, Cmax), F32),
        grid=(n_layers,),
        in_specs=[whole_spec(x.shape)] + [layer_spec(a.shape) for a in wlist],
        out_specs=whole_spec((2 * BT, Cmax)),
        compiler_params=pltpu.CompilerParams(
            dimension_semantics=("arbitrary",)),                # layers are sequential
    )(x, *wlist)

    cout = cfg['out_channels'][-1]
    out = out[:, :cout].reshape(2, B, T, cout)
    return out[0], out[1]


# ---------------------------------------------------------------------------
# deterministic synthetic parameter init (matches module shapes; per-layer
# weights zero-padded to (Cmax, Dmax) and stacked along the layer axis)
# ---------------------------------------------------------------------------
def init_tcssm_params(key, input_size, output_sizes,
                      d_state=8, d_conv=4, expand=2, dt_rank=8):
    n_layers = len(output_sizes)
    Cmax = max([input_size] + list(output_sizes))
    Dmax = expand * max(output_sizes)
    acc = {k: [] for k in WEIGHT_ORDER}

    cin = input_size
    for cout in output_sizes:
        d_inner = expand * cout
        key, k_conv, k_skip, k_m = jax.random.split(key, 4)
        km = jax.random.split(k_m, 8)

        # ----- CNN branch (per-stream weights: [primary, secondary]) -----
        a = math.sqrt(6.0 / (3 * cin + 3 * cout))               # xavier_uniform
        w = jax.random.uniform(k_conv, (2, 3, cin, cout), F32, -a, a)
        w3 = jnp.zeros((2, 3 * Cmax, Cmax), F32)
        for tap in range(3):                                    # tap k multiplies x[t-1+k]
            w3 = w3.at[:, tap * Cmax:tap * Cmax + cin, :cout].set(w[:, tap])
        acc['w3'].append(w3.astype(BF16))

        if cin != cout:                                         # 1x1 skip conv
            sk = jax.random.normal(k_skip, (2, cin, cout), F32) / math.sqrt(cin)
            skw = jnp.zeros((2, Cmax, Cmax), F32).at[:, :cin, :cout].set(sk)
            flag = 0.0
        else:                                                   # identity skip
            skw = jnp.zeros((2, Cmax, Cmax), F32)
            flag = 1.0
        acc['skip_w'].append(skw.astype(BF16))
        acc['skip_id'].append(jnp.full((1, 1), flag, F32))
        acc['bn_gamma'].append(jnp.zeros((2, 1, Cmax), F32).at[:, :, :cout].set(1.0))
        acc['bn_beta'].append(jnp.zeros((2, 1, Cmax), F32))
        acc['ln_mask'].append(jnp.zeros((1, Cmax), F32).at[:, :cout].set(1.0))
        acc['ln_inv_cnt'].append(jnp.full((1, 1), 1.0 / cout, F32))

        # ----- Mamba (shared across streams; d_model = cout) -----
        acc['w_in_x'].append(jnp.zeros((Cmax, Dmax), F32).at[:cout, :d_inner].set(
            jax.random.normal(km[0], (cout, d_inner), F32) / math.sqrt(cout)).astype(BF16))
        acc['w_in_z'].append(jnp.zeros((Cmax, Dmax), F32).at[:cout, :d_inner].set(
            jax.random.normal(km[1], (cout, d_inner), F32) / math.sqrt(cout)).astype(BF16))
        acc['dw_conv_w'].append(jnp.zeros((d_conv, Dmax), F32).at[:, :d_inner].set(
            jax.random.normal(km[2], (d_conv, d_inner), F32) / math.sqrt(d_conv)))
        acc['dw_conv_b'].append(jnp.zeros((1, Dmax), F32))
        acc['w_xdt'].append(jnp.zeros((Dmax, dt_rank), F32).at[:d_inner, :].set(
            jax.random.normal(km[3], (d_inner, dt_rank), F32) / math.sqrt(d_inner)))
        acc['w_xb'].append(jnp.zeros((Dmax, d_state), F32).at[:d_inner, :].set(
            jax.random.normal(km[4], (d_inner, d_state), F32) / math.sqrt(d_inner)))
        acc['w_xc'].append(jnp.zeros((Dmax, d_state), F32).at[:d_inner, :].set(
            jax.random.normal(km[5], (d_inner, d_state), F32) / math.sqrt(d_inner)))
        acc['w_dt'].append(jnp.zeros((dt_rank, Dmax), F32).at[:, :d_inner].set(
            jax.random.normal(km[6], (dt_rank, d_inner), F32) / math.sqrt(dt_rank)))
        acc['dt_bias'].append(jnp.zeros((1, Dmax), F32).at[:, :d_inner].set(
            math.log(math.expm1(0.01))))
        a_log = jnp.log(jnp.broadcast_to(
            jnp.arange(1, d_state + 1, dtype=F32), (d_inner, d_state)))
        acc['a_neg'].append(jnp.zeros((d_state, Dmax), F32).at[:, :d_inner].set(
            (-jnp.exp(a_log)).T))
        acc['d_vec'].append(jnp.zeros((1, Dmax), F32).at[:, :d_inner].set(1.0))
        acc['w_out'].append(jnp.zeros((Dmax, Cmax), F32).at[:d_inner, :cout].set(
            jax.random.normal(km[7], (d_inner, cout), F32) / math.sqrt(d_inner)).astype(BF16))
        acc['ln_w'].append(jnp.zeros((2, 1, Cmax), F32).at[:, :, :cout].set(1.0))
        acc['ln_b'].append(jnp.zeros((2, 1, Cmax), F32))

        cin = cout

    weights = {k: jnp.stack(v, axis=0) for k, v in acc.items()}
    config = dict(n_layers=n_layers, Cmax=Cmax, Dmax=Dmax, d_state=d_state,
                  d_conv=d_conv, dt_rank=dt_rank, out_channels=tuple(output_sizes))
    return dict(config=config, weights=weights)


if __name__ == "__main__":
    key = jax.random.PRNGKey(0)
    B, T = 2, 16
    input_size = 8
    output_sizes = [16, 32, 32]

    k_in, k_par = jax.random.split(key)
    k1, k2 = jax.random.split(k_in)
    primary_x = jax.random.normal(k1, (B, T, input_size), F32)
    secondary_x = jax.random.normal(k2, (B, T, input_size), F32)

    params = init_tcssm_params(k_par, input_size, output_sizes)
    p_out, s_out = tcssm_forward(primary_x, secondary_x, params)
    jax.block_until_ready((p_out, s_out))

    assert p_out.shape == (B, T, output_sizes[-1])
    assert s_out.shape == (B, T, output_sizes[-1])
    assert bool(jnp.all(jnp.isfinite(p_out))) and bool(jnp.all(jnp.isfinite(s_out)))
    print("KERNEL_OK")
</pallas_src>

<mosaic_0001>
module attributes {stable_mosaic.version = 11 : i64} {
  func.func @kernel(%arg0: i32, %arg1: memref<64x32xf32, #tpu.memory_space<vmem>>, %arg2: memref<1x2x96x32xbf16, #tpu.memory_space<vmem>>, %arg3: memref<1x2x32x32xbf16, #tpu.memory_space<vmem>>, %arg4: memref<1x1x1xf32, #tpu.memory_space<vmem>>, %arg5: memref<1x2x1x32xf32, #tpu.memory_space<vmem>>, %arg6: memref<1x2x1x32xf32, #tpu.memory_space<vmem>>, %arg7: memref<1x1x32xf32, #tpu.memory_space<vmem>>, %arg8: memref<1x1x1xf32, #tpu.memory_space<vmem>>, %arg9: memref<1x32x64xbf16, #tpu.memory_space<vmem>>, %arg10: memref<1x32x64xbf16, #tpu.memory_space<vmem>>, %arg11: memref<1x4x64xf32, #tpu.memory_space<vmem>>, %arg12: memref<1x1x64xf32, #tpu.memory_space<vmem>>, %arg13: memref<1x64x8xf32, #tpu.memory_space<vmem>>, %arg14: memref<1x64x8xf32, #tpu.memory_space<vmem>>, %arg15: memref<1x64x8xf32, #tpu.memory_space<vmem>>, %arg16: memref<1x8x64xf32, #tpu.memory_space<vmem>>, %arg17: memref<1x1x64xf32, #tpu.memory_space<vmem>>, %arg18: memref<1x8x64xf32, #tpu.memory_space<vmem>>, %arg19: memref<1x1x64xf32, #tpu.memory_space<vmem>>, %arg20: memref<1x64x32xbf16, #tpu.memory_space<vmem>>, %arg21: memref<1x2x1x32xf32, #tpu.memory_space<vmem>>, %arg22: memref<1x2x1x32xf32, #tpu.memory_space<vmem>>, %arg23: memref<64x32xf32, #tpu.memory_space<vmem>>) attributes {dimension_semantics = [#tpu.dimension_semantics<arbitrary>], iteration_bounds = array<i64: 3>, scalar_prefetch = 0 : i64, scratch_operands = 0 : i64, tpu.core_type = #tpu.core_type<tc>, window_params = [{pipeline_mode = #tpu.pipeline_mode<synchronous>, transform_indices = @transform_0, window_bounds = array<i64: 64, 32>}, {transform_indices = @transform_1, window_bounds = array<i64: 1, 2, 96, 32>}, {transform_indices = @transform_2, window_bounds = array<i64: 1, 2, 32, 32>}, {transform_indices = @transform_3, window_bounds = array<i64: 1, 1, 1>}, {transform_indices = @transform_4, window_bounds = array<i64: 1, 2, 1, 32>}, {transform_indices = @transform_5, window_bounds = array<i64: 1, 2, 1, 32>}, {transform_indices = @transform_6, window_bounds = array<i64: 1, 1, 32>}, {transform_indices = @transform_7, window_bounds = array<i64: 1, 1, 1>}, {transform_indices = @transform_8, window_bounds = array<i64: 1, 32, 64>}, {transform_indices = @transform_9, window_bounds = array<i64: 1, 32, 64>}, {transform_indices = @transform_10, window_bounds = array<i64: 1, 4, 64>}, {transform_indices = @transform_11, window_bounds = array<i64: 1, 1, 64>}, {transform_indices = @transform_12, window_bounds = array<i64: 1, 64, 8>}, {transform_indices = @transform_13, window_bounds = array<i64: 1, 64, 8>}, {transform_indices = @transform_14, window_bounds = array<i64: 1, 64, 8>}, {transform_indices = @transform_15, window_bounds = array<i64: 1, 8, 64>}, {transform_indices = @transform_16, window_bounds = array<i64: 1, 1, 64>}, {transform_indices = @transform_17, window_bounds = array<i64: 1, 8, 64>}, {transform_indices = @transform_18, window_bounds = array<i64: 1, 1, 64>}, {transform_indices = @transform_19, window_bounds = array<i64: 1, 64, 32>}, {transform_indices = @transform_20, window_bounds = array<i64: 1, 2, 1, 32>}, {transform_indices = @transform_21, window_bounds = array<i64: 1, 2, 1, 32>}, {pipeline_mode = #tpu.pipeline_mode<synchronous>, transform_indices = @transform_22, window_bounds = array<i64: 64, 32>}]} {
    %c0_i32 = arith.constant 0 : i32
    %0 = arith.cmpi eq, %arg0, %c0_i32 : i32
    %1 = arith.extui %0 : i1 to i32
    %c0_i32_0 = arith.constant 0 : i32
    %2 = arith.cmpi ne, %1, %c0_i32_0 : i32
    scf.if %2 {
      %c0_291 = arith.constant 0 : index
      %c0_292 = arith.constant 0 : index
      %872 = vector.load %arg1[%c0_291, %c0_292] : memref<64x32xf32, #tpu.memory_space<vmem>>, vector<64x32xf32>
      %c0_293 = arith.constant 0 : index
      %c0_294 = arith.constant 0 : index
      %873 = vector.load %arg23[%c0_293, %c0_294] : memref<64x32xf32, #tpu.memory_space<vmem>>, vector<64x32xf32>
      tpu.vector_store %arg23[%c0_293, %c0_294], %872 {strides = array<i32>} : memref<64x32xf32, #tpu.memory_space<vmem>>, vector<64x32xf32>,
    } else {
    }
    %c0 = arith.constant 0 : index
    %c0_1 = arith.constant 0 : index
    %3 = vector.load %arg23[%c0, %c0_1] : memref<64x32xf32, #tpu.memory_space<vmem>>, vector<64x32xf32>
    %4 = tpu.iota {dimensions = array<i32: 0>} : vector<64x1xi32>
    %c16_i32 = arith.constant 16 : i32
    %c0_i32_2 = arith.constant 0 : i32
    %5 = arith.cmpi eq, %c16_i32, %c0_i32_2 : i32
    %c1_i32 = arith.constant 1 : i32
    %6 = arith.select %5, %c1_i32, %c16_i32 : i32
    %7 = vector.broadcast %6 : i32 to vector<64x1xi32>
    %8 = arith.remsi %4, %7 : vector<64x1xi32>
    %c0_i32_3 = arith.constant 0 : i32
    %9 = vector.broadcast %c0_i32_3 : i32 to vector<64x1xi32>
    %10 = arith.cmpi ne, %8, %9 : vector<64x1xi32>
    %c0_i32_4 = arith.constant 0 : i32
    %11 = vector.broadcast %c0_i32_4 : i32 to vector<64x1xi32>
    %12 = arith.cmpi slt, %8, %11 : vector<64x1xi32>
    %c0_i32_5 = arith.constant 0 : i32
    %13 = arith.cmpi slt, %6, %c0_i32_5 : i32
    %14 = vector.broadcast %13 : i1 to vector<64x1xi1>
    %15 = vector.broadcast %14 : vector<64x1xi1> to vector<64x1xi1>
    %16 = arith.xori %12, %15 : vector<64x1xi1>
    %17 = arith.andi %16, %10 : vector<64x1xi1>
    %18 = vector.broadcast %6 : i32 to vector<64x1xi32>
    %19 = arith.addi %8, %18 : vector<64x1xi32>
    %20 = arith.select %17, %19, %8 : vector<64x1xi1>, vector<64x1xi32>
    %c1_i32_6 = arith.constant 1 : i32
    %21 = vector.broadcast %c1_i32_6 : i32 to vector<64x1xi32>
    %22 = arith.cmpi sge, %20, %21 : vector<64x1xi32>
    %c1_i32_7 = arith.constant 1 : i32
    %23 = tpu.dynamic_rotate %3 by %c1_i32_7 dim 0 : vector<64x32xf32>, i32 -> vector<64x32xf32>
    %cst = arith.constant 0.000000e+00 : f32
    %24 = vector.shape_cast %22 : vector<64x1xi1> to vector<64x1xi1>
    %25 = vector.broadcast %24 : vector<64x1xi1> to vector<64x32xi1>
    %26 = vector.broadcast %cst : f32 to vector<64x32xf32>
    %27 = arith.select %25, %23, %26 : vector<64x32xi1>, vector<64x32xf32>
    %c14_i32 = arith.constant 14 : i32
    %28 = vector.broadcast %c14_i32 : i32 to vector<64x1xi32>
    %29 = arith.cmpi sle, %20, %28 : vector<64x1xi32>
    %c63_i32 = arith.constant 63 : i32
    %30 = tpu.dynamic_rotate %3 by %c63_i32 dim 0 : vector<64x32xf32>, i32 -> vector<64x32xf32>
    %cst_8 = arith.constant 0.000000e+00 : f32
    %31 = vector.shape_cast %29 : vector<64x1xi1> to vector<64x1xi1>
    %32 = vector.broadcast %31 : vector<64x1xi1> to vector<64x32xi1>
    %33 = vector.broadcast %cst_8 : f32 to vector<64x32xf32>
    %34 = arith.select %32, %30, %33 : vector<64x32xi1>, vector<64x32xf32>
    %35 = tpu.concatenate %27, %3, %34 in 1 : vector<64x32xf32>, vector<64x32xf32>, vector<64x32xf32> -> vector<64x96xf32>
    %36 = arith.truncf %35 : vector<64x96xf32> to vector<64x96xbf16>
    %37 = arith.truncf %3 : vector<64x32xf32> to vector<64x32xbf16>
    %c0_9 = arith.constant 0 : index
    %c0_10 = arith.constant 0 : index
    %c0_11 = arith.constant 0 : index
    %c0_12 = arith.constant 0 : index
    %38 = vector.load %arg2[%c0_9, %c0_10, %c0_11, %c0_12] : memref<1x2x96x32xbf16, #tpu.memory_space<vmem>>, vector<1x2x96x32xbf16>
    %39 = vector.shape_cast %38 : vector<1x2x96x32xbf16> to vector<2x96x32xbf16>
    %c0_13 = arith.constant 0 : index
    %c0_14 = arith.constant 0 : index
    %c0_15 = arith.constant 0 : index
    %c0_16 = arith.constant 0 : index
    %40 = vector.load %arg3[%c0_13, %c0_14, %c0_15, %c0_16] : memref<1x2x32x32xbf16, #tpu.memory_space<vmem>>, vector<1x2x32x32xbf16>
    %41 = vector.shape_cast %40 : vector<1x2x32x32xbf16> to vector<2x32x32xbf16>
    %c0_17 = arith.constant 0 : index
    %c0_18 = arith.constant 0 : index
    %c0_19 = arith.constant 0 : index
    %42 = vector.load %arg4[%c0_17, %c0_18, %c0_19] : memref<1x1x1xf32, #tpu.memory_space<vmem>>, vector<1x1x1xf32>
    %43 = vector.shape_cast %42 : vector<1x1x1xf32> to vector<1x1xf32>
    %c0_20 = arith.constant 0 : index
    %c0_21 = arith.constant 0 : index
    %c0_22 = arith.constant 0 : index
    %c0_23 = arith.constant 0 : index
    %44 = vector.load %arg5[%c0_20, %c0_21, %c0_22, %c0_23] : memref<1x2x1x32xf32, #tpu.memory_space<vmem>>, vector<1x2x1x32xf32>
    %45 = vector.shape_cast %44 : vector<1x2x1x32xf32> to vector<2x1x32xf32>
    %c0_24 = arith.constant 0 : index
    %c0_25 = arith.constant 0 : index
    %c0_26 = arith.constant 0 : index
    %c0_27 = arith.constant 0 : index
    %46 = vector.load %arg6[%c0_24, %c0_25, %c0_26, %c0_27] : memref<1x2x1x32xf32, #tpu.memory_space<vmem>>, vector<1x2x1x32xf32>
    %47 = vector.shape_cast %46 : vector<1x2x1x32xf32> to vector<2x1x32xf32>
    %48 = vector.extract_strided_slice %36 {offsets = [0, 0], sizes = [32, 96], strides = [1, 1]} : vector<64x96xbf16> to vector<32x96xbf16>
    %49 = vector.extract_strided_slice %39 {offsets = [0, 0, 0], sizes = [1, 96, 32], strides = [1, 1, 1]} : vector<2x96x32xbf16> to vector<1x96x32xbf16>
    %50 = vector.shape_cast %49 : vector<1x96x32xbf16> to vector<96x32xbf16>
    %cst_28 = arith.constant dense<0.000000e+00> : vector<32x32xf32>
    %51 = tpu.matmul %48, %50, %cst_28 {dimension_numbers = #tpu.dot_dimension_numbers<[1], [0], [0], [1], [0, 0, 1, 1], [], []>} : vector<32x96xbf16>, vector<96x32xbf16>, vector<32x32xf32> -> vector<32x32xf32>
    %cst_29 = arith.constant dense<0.000000e+00> : vector<32xf32>
    %52 = vector.multi_reduction <add>, %51, %cst_29 [0] : vector<32x32xf32> to vector<32xf32>
    %53 = vector.shape_cast %52 : vector<32xf32> to vector<1x32xf32>
    %cst_30 = arith.constant 3.200000e+01 : f32
    %54 = vector.broadcast %cst_30 : f32 to vector<1x32xf32>
    %55 = arith.divf %53, %54 : vector<1x32xf32>
    %56 = vector.broadcast %55 : vector<1x32xf32> to vector<32x32xf32>
    %57 = arith.subf %51, %56 : vector<32x32xf32>
    %58 = arith.mulf %57, %57 : vector<32x32xf32>
    %cst_31 = arith.constant dense<0.000000e+00> : vector<32xf32>
    %59 = vector.multi_reduction <add>, %58, %cst_31 [0] : vector<32x32xf32> to vector<32xf32>
    %60 = vector.shape_cast %59 : vector<32xf32> to vector<1x32xf32>
    %cst_32 = arith.constant 3.200000e+01 : f32
    %61 = vector.broadcast %cst_32 : f32 to vector<1x32xf32>
    %62 = arith.divf %60, %61 : vector<1x32xf32>
    %63 = vector.extract_strided_slice %45 {offsets = [0, 0, 0], sizes = [1, 1, 32], strides = [1, 1, 1]} : vector<2x1x32xf32> to vector<1x1x32xf32>
    %64 = vector.shape_cast %63 : vector<1x1x32xf32> to vector<1x32xf32>
    %cst_33 = arith.constant 9.99999974E-6 : f32
    %65 = vector.broadcast %cst_33 : f32 to vector<1x32xf32>
    %66 = arith.addf %62, %65 : vector<1x32xf32>
    %67 = math.rsqrt %66 : vector<1x32xf32>
    %68 = arith.mulf %64, %67 : vector<1x32xf32>
    %69 = vector.extract_strided_slice %47 {offsets = [0, 0, 0], sizes = [1, 1, 32], strides = [1, 1, 1]} : vector<2x1x32xf32> to vector<1x1x32xf32>
    %70 = vector.shape_cast %69 : vector<1x1x32xf32> to vector<1x32xf32>
    %71 = arith.mulf %55, %68 : vector<1x32xf32>
    %72 = arith.subf %70, %71 : vector<1x32xf32>
    %73 = vector.broadcast %68 : vector<1x32xf32> to vector<32x32xf32>
    %74 = arith.mulf %51, %73 : vector<32x32xf32>
    %75 = vector.broadcast %72 : vector<1x32xf32> to vector<32x32xf32>
    %76 = arith.addf %74, %75 : vector<32x32xf32>
    %cst_34 = arith.constant 0.000000e+00 : f32
    %77 = vector.broadcast %cst_34 : f32 to vector<32x32xf32>
    %78 = arith.maximumf %76, %77 : vector<32x32xf32>
    %79 = vector.extract_strided_slice %3 {offsets = [0, 0], sizes = [32, 32], strides = [1, 1]} : vector<64x32xf32> to vector<32x32xf32>
    %80 = vector.broadcast %43 : vector<1x1xf32> to vector<32x32xf32>
    %81 = arith.mulf %80, %79 : vector<32x32xf32>
    %82 = vector.extract_strided_slice %37 {offsets = [0, 0], sizes = [32, 32], strides = [1, 1]} : vector<64x32xbf16> to vector<32x32xbf16>
    %83 = vector.extract_strided_slice %41 {offsets = [0, 0, 0], sizes = [1, 32, 32], strides = [1, 1, 1]} : vector<2x32x32xbf16> to vector<1x32x32xbf16>
    %84 = vector.shape_cast %83 : vector<1x32x32xbf16> to vector<32x32xbf16>
    %cst_35 = arith.constant dense<0.000000e+00> : vector<32x32xf32>
    %85 = tpu.matmul %82, %84, %cst_35 {dimension_numbers = #tpu.dot_dimension_numbers<[1], [0], [0], [1], [0, 0, 1, 1], [], []>} : vector<32x32xbf16>, vector<32x32xbf16>, vector<32x32xf32> -> vector<32x32xf32>
    %86 = arith.addf %81, %85 : vector<32x32xf32>
    %87 = arith.addf %78, %86 : vector<32x32xf32>
    %88 = vector.extract_strided_slice %36 {offsets = [32, 0], sizes = [32, 96], strides = [1, 1]} : vector<64x96xbf16> to vector<32x96xbf16>
    %89 = vector.extract_strided_slice %39 {offsets = [1, 0, 0], sizes = [1, 96, 32], strides = [1, 1, 1]} : vector<2x96x32xbf16> to vector<1x96x32xbf16>
    %90 = vector.shape_cast %89 : vector<1x96x32xbf16> to vector<96x32xbf16>
    %cst_36 = arith.constant dense<0.000000e+00> : vector<32x32xf32>
    %91 = tpu.matmul %88, %90, %cst_36 {dimension_numbers = #tpu.dot_dimension_numbers<[1], [0], [0], [1], [0, 0, 1, 1], [], []>} : vector<32x96xbf16>, vector<96x32xbf16>, vector<32x32xf32> -> vector<32x32xf32>
    %cst_37 = arith.constant dense<0.000000e+00> : vector<32xf32>
    %92 = vector.multi_reduction <add>, %91, %cst_37 [0] : vector<32x32xf32> to vector<32xf32>
    %93 = vector.shape_cast %92 : vector<32xf32> to vector<1x32xf32>
    %cst_38 = arith.constant 3.200000e+01 : f32
    %94 = vector.broadcast %cst_38 : f32 to vector<1x32xf32>
    %95 = arith.divf %93, %94 : vector<1x32xf32>
    %96 = vector.broadcast %95 : vector<1x32xf32> to vector<32x32xf32>
    %97 = arith.subf %91, %96 : vector<32x32xf32>
    %98 = arith.mulf %97, %97 : vector<32x32xf32>
    %cst_39 = arith.constant dense<0.000000e+00> : vector<32xf32>
    %99 = vector.multi_reduction <add>, %98, %cst_39 [0] : vector<32x32xf32> to vector<32xf32>
    %100 = vector.shape_cast %99 : vector<32xf32> to vector<1x32xf32>
    %cst_40 = arith.constant 3.200000e+01 : f32
    %101 = vector.broadcast %cst_40 : f32 to vector<1x32xf32>
    %102 = arith.divf %100, %101 : vector<1x32xf32>
    %103 = vector.extract_strided_slice %45 {offsets = [1, 0, 0], sizes = [1, 1, 32], strides = [1, 1, 1]} : vector<2x1x32xf32> to vector<1x1x32xf32>
    %104 = vector.shape_cast %103 : vector<1x1x32xf32> to vector<1x32xf32>
    %cst_41 = arith.constant 9.99999974E-6 : f32
    %105 = vector.broadcast %cst_41 : f32 to vector<1x32xf32>
    %106 = arith.addf %102, %105 : vector<1x32xf32>
    %107 = math.rsqrt %106 : vector<1x32xf32>
    %108 = arith.mulf %104, %107 : vector<1x32xf32>
    %109 = vector.extract_strided_slice %47 {offsets = [1, 0, 0], sizes = [1, 1, 32], strides = [1, 1, 1]} : vector<2x1x32xf32> to vector<1x1x32xf32>
    %110 = vector.shape_cast %109 : vector<1x1x32xf32> to vector<1x32xf32>
    %111 = arith.mulf %95, %108 : vector<1x32xf32>
    %112 = arith.subf %110, %111 : vector<1x32xf32>
    %113 = vector.broadcast %108 : vector<1x32xf32> to vector<32x32xf32>
    %114 = arith.mulf %91, %113 : vector<32x32xf32>
    %115 = vector.broadcast %112 : vector<1x32xf32> to vector<32x32xf32>
    %116 = arith.addf %114, %115 : vector<32x32xf32>
    %cst_42 = arith.constant 0.000000e+00 : f32
    %117 = vector.broadcast %cst_42 : f32 to vector<32x32xf32>
    %118 = arith.maximumf %116, %117 : vector<32x32xf32>
    %119 = vector.extract_strided_slice %3 {offsets = [32, 0], sizes = [32, 32], strides = [1, 1]} : vector<64x32xf32> to vector<32x32xf32>
    %120 = vector.broadcast %43 : vector<1x1xf32> to vector<32x32xf32>
    %121 = arith.mulf %120, %119 : vector<32x32xf32>
    %122 = vector.extract_strided_slice %37 {offsets = [32, 0], sizes = [32, 32], strides = [1, 1]} : vector<64x32xbf16> to vector<32x32xbf16>
    %123 = vector.extract_strided_slice %41 {offsets = [1, 0, 0], sizes = [1, 32, 32], strides = [1, 1, 1]} : vector<2x32x32xbf16> to vector<1x32x32xbf16>
    %124 = vector.shape_cast %123 : vector<1x32x32xbf16> to vector<32x32xbf16>
    %cst_43 = arith.constant dense<0.000000e+00> : vector<32x32xf32>
    %125 = tpu.matmul %122, %124, %cst_43 {dimension_numbers = #tpu.dot_dimension_numbers<[1], [0], [0], [1], [0, 0, 1, 1], [], []>} : vector<32x32xbf16>, vector<32x32xbf16>, vector<32x32xf32> -> vector<32x32xf32>
    %126 = arith.addf %121, %125 : vector<32x32xf32>
    %127 = arith.addf %118, %126 : vector<32x32xf32>
    %128 = tpu.concatenate %87, %127 in 0 : vector<32x32xf32>, vector<32x32xf32> -> vector<64x32xf32>
    %129 = arith.truncf %128 : vector<64x32xf32> to vector<64x32xbf16>
    %c0_44 = arith.constant 0 : index
    %c0_45 = arith.constant 0 : index
    %c0_46 = arith.constant 0 : index
    %130 = vector.load %arg9[%c0_44, %c0_45, %c0_46] : memref<1x32x64xbf16, #tpu.memory_space<vmem>>, vector<1x32x64xbf16>
    %131 = vector.shape_cast %130 : vector<1x32x64xbf16> to vector<32x64xbf16>
    %cst_47 = arith.constant dense<0.000000e+00> : vector<64x64xf32>
    %132 = tpu.matmul %129, %131, %cst_47 {dimension_numbers = #tpu.dot_dimension_numbers<[1], [0], [0], [1], [0, 0, 1, 1], [], []>} : vector<64x32xbf16>, vector<32x64xbf16>, vector<64x64xf32> -> vector<64x64xf32>
    %c0_48 = arith.constant 0 : index
    %c0_49 = arith.constant 0 : index
    %c0_50 = arith.constant 0 : index
    %133 = vector.load %arg10[%c0_48, %c0_49, %c0_50] : memref<1x32x64xbf16, #tpu.memory_space<vmem>>, vector<1x32x64xbf16>
    %134 = vector.shape_cast %133 : vector<1x32x64xbf16> to vector<32x64xbf16>
    %cst_51 = arith.constant dense<0.000000e+00> : vector<64x64xf32>
    %135 = tpu.matmul %129, %134, %cst_51 {dimension_numbers = #tpu.dot_dimension_numbers<[1], [0], [0], [1], [0, 0, 1, 1], [], []>} : vector<64x32xbf16>, vector<32x64xbf16>, vector<64x64xf32> -> vector<64x64xf32>
    %c0_52 = arith.constant 0 : index
    %c0_53 = arith.constant 0 : index
    %c0_54 = arith.constant 0 : index
    %136 = vector.load %arg11[%c0_52, %c0_53, %c0_54] : memref<1x4x64xf32, #tpu.memory_space<vmem>>, vector<1x4x64xf32>
    %137 = vector.shape_cast %136 : vector<1x4x64xf32> to vector<4x64xf32>
    %138 = vector.extract_strided_slice %137 {offsets = [3, 0], sizes = [1, 64], strides = [1, 1]} : vector<4x64xf32> to vector<1x64xf32>
    %139 = vector.broadcast %138 : vector<1x64xf32> to vector<64x64xf32>
    %140 = arith.mulf %132, %139 : vector<64x64xf32>
    %c3_i32 = arith.constant 3 : i32
    %141 = vector.broadcast %c3_i32 : i32 to vector<64x1xi32>
    %142 = arith.cmpi sge, %20, %141 : vector<64x1xi32>
    %c3_i32_55 = arith.constant 3 : i32
    %143 = tpu.dynamic_rotate %132 by %c3_i32_55 dim 0 : vector<64x64xf32>, i32 -> vector<64x64xf32>
    %cst_56 = arith.constant 0.000000e+00 : f32
    %144 = vector.shape_cast %142 : vector<64x1xi1> to vector<64x1xi1>
    %145 = vector.broadcast %144 : vector<64x1xi1> to vector<64x64xi1>
    %146 = vector.broadcast %cst_56 : f32 to vector<64x64xf32>
    %147 = arith.select %145, %143, %146 : vector<64x64xi1>, vector<64x64xf32>
    %148 = vector.extract_strided_slice %137 {offsets = [0, 0], sizes = [1, 64], strides = [1, 1]} : vector<4x64xf32> to vector<1x64xf32>
    %149 = vector.broadcast %148 : vector<1x64xf32> to vector<64x64xf32>
    %150 = arith.mulf %147, %149 : vector<64x64xf32>
    %151 = arith.addf %140, %150 : vector<64x64xf32>
    %c2_i32 = arith.constant 2 : i32
    %152 = vector.broadcast %c2_i32 : i32 to vector<64x1xi32>
    %153 = arith.cmpi sge, %20, %152 : vector<64x1xi32>
    %c2_i32_57 = arith.constant 2 : i32
    %154 = tpu.dynamic_rotate %132 by %c2_i32_57 dim 0 : vector<64x64xf32>, i32 -> vector<64x64xf32>
    %cst_58 = arith.constant 0.000000e+00 : f32
    %155 = vector.shape_cast %153 : vector<64x1xi1> to vector<64x1xi1>
    %156 = vector.broadcast %155 : vector<64x1xi1> to vector<64x64xi1>
    %157 = vector.broadcast %cst_58 : f32 to vector<64x64xf32>
    %158 = arith.select %156, %154, %157 : vector<64x64xi1>, vector<64x64xf32>
    %159 = vector.extract_strided_slice %137 {offsets = [1, 0], sizes = [1, 64], strides = [1, 1]} : vector<4x64xf32> to vector<1x64xf32>
    %160 = vector.broadcast %159 : vector<1x64xf32> to vector<64x64xf32>
    %161 = arith.mulf %158, %160 : vector<64x64xf32>
    %162 = arith.addf %151, %161 : vector<64x64xf32>
    %c1_i32_59 = arith.constant 1 : i32
    %163 = vector.broadcast %c1_i32_59 : i32 to vector<64x1xi32>
    %164 = arith.cmpi sge, %20, %163 : vector<64x1xi32>
    %c1_i32_60 = arith.constant 1 : i32
    %165 = tpu.dynamic_rotate %132 by %c1_i32_60 dim 0 : vector<64x64xf32>, i32 -> vector<64x64xf32>
    %cst_61 = arith.constant 0.000000e+00 : f32
    %166 = vector.shape_cast %164 : vector<64x1xi1> to vector<64x1xi1>
    %167 = vector.broadcast %166 : vector<64x1xi1> to vector<64x64xi1>
    %168 = vector.broadcast %cst_61 : f32 to vector<64x64xf32>
    %169 = arith.select %167, %165, %168 : vector<64x64xi1>, vector<64x64xf32>
    %170 = vector.extract_strided_slice %137 {offsets = [2, 0], sizes = [1, 64], strides = [1, 1]} : vector<4x64xf32> to vector<1x64xf32>
    %171 = vector.broadcast %170 : vector<1x64xf32> to vector<64x64xf32>
    %172 = arith.mulf %169, %171 : vector<64x64xf32>
    %173 = arith.addf %162, %172 : vector<64x64xf32>
    %c0_62 = arith.constant 0 : index
    %c0_63 = arith.constant 0 : index
    %c0_64 = arith.constant 0 : index
    %174 = vector.load %arg12[%c0_62, %c0_63, %c0_64] : memref<1x1x64xf32, #tpu.memory_space<vmem>>, vector<1x1x64xf32>
    %175 = vector.shape_cast %174 : vector<1x1x64xf32> to vector<1x64xf32>
    %176 = vector.broadcast %175 : vector<1x64xf32> to vector<64x64xf32>
    %177 = arith.addf %173, %176 : vector<64x64xf32>
    %cst_65 = arith.constant 0.000000e+00 : f32
    %178 = vector.broadcast %cst_65 : f32 to vector<64x64xf32>
    %179 = arith.subf %178, %177 : vector<64x64xf32>
    %180 = math.exp %179 : vector<64x64xf32>
    %cst_66 = arith.constant 1.000000e+00 : f32
    %181 = vector.broadcast %cst_66 : f32 to vector<64x64xf32>
    %182 = arith.addf %181, %180 : vector<64x64xf32>
    %cst_67 = arith.constant 1.000000e+00 : f32
    %183 = vector.broadcast %cst_67 : f32 to vector<64x64xf32>
    %184 = arith.divf %183, %182 : vector<64x64xf32>
    %185 = arith.mulf %177, %184 : vector<64x64xf32>
    %c0_68 = arith.constant 0 : index
    %c0_69 = arith.constant 0 : index
    %c0_70 = arith.constant 0 : index
    %186 = vector.load %arg13[%c0_68, %c0_69, %c0_70] : memref<1x64x8xf32, #tpu.memory_space<vmem>>, vector<1x64x8xf32>
    %187 = vector.shape_cast %186 : vector<1x64x8xf32> to vector<64x8xf32>
    %cst_71 = arith.constant dense<0.000000e+00> : vector<64x8xf32>
    %188 = tpu.matmul %185, %187, %cst_71 {dimension_numbers = #tpu.dot_dimension_numbers<[1], [0], [0], [1], [0, 0, 1, 1], [], []>} : vector<64x64xf32>, vector<64x8xf32>, vector<64x8xf32> -> vector<64x8xf32>
    %c0_72 = arith.constant 0 : index
    %c0_73 = arith.constant 0 : index
    %c0_74 = arith.constant 0 : index
    %189 = vector.load %arg14[%c0_72, %c0_73, %c0_74] : memref<1x64x8xf32, #tpu.memory_space<vmem>>, vector<1x64x8xf32>
    %190 = vector.shape_cast %189 : vector<1x64x8xf32> to vector<64x8xf32>
    %cst_75 = arith.constant dense<0.000000e+00> : vector<64x8xf32>
    %191 = tpu.matmul %185, %190, %cst_75 {dimension_numbers = #tpu.dot_dimension_numbers<[1], [0], [0], [1], [0, 0, 1, 1], [], []>} : vector<64x64xf32>, vector<64x8xf32>, vector<64x8xf32> -> vector<64x8xf32>
    %c0_76 = arith.constant 0 : index
    %c0_77 = arith.constant 0 : index
    %c0_78 = arith.constant 0 : index
    %192 = vector.load %arg15[%c0_76, %c0_77, %c0_78] : memref<1x64x8xf32, #tpu.memory_space<vmem>>, vector<1x64x8xf32>
    %193 = vector.shape_cast %192 : vector<1x64x8xf32> to vector<64x8xf32>
    %cst_79 = arith.constant dense<0.000000e+00> : vector<64x8xf32>
    %194 = tpu.matmul %185, %193, %cst_79 {dimension_numbers = #tpu.dot_dimension_numbers<[1], [0], [0], [1], [0, 0, 1, 1], [], []>} : vector<64x64xf32>, vector<64x8xf32>, vector<64x8xf32> -> vector<64x8xf32>
    %c0_80 = arith.constant 0 : index
    %c0_81 = arith.constant 0 : index
    %c0_82 = arith.constant 0 : index
    %195 = vector.load %arg16[%c0_80, %c0_81, %c0_82] : memref<1x8x64xf32, #tpu.memory_space<vmem>>, vector<1x8x64xf32>
    %196 = vector.shape_cast %195 : vector<1x8x64xf32> to vector<8x64xf32>
    %cst_83 = arith.constant dense<0.000000e+00> : vector<64x64xf32>
    %197 = tpu.matmul %188, %196, %cst_83 {dimension_numbers = #tpu.dot_dimension_numbers<[1], [0], [0], [1], [0, 0, 1, 1], [], []>} : vector<64x8xf32>, vector<8x64xf32>, vector<64x64xf32> -> vector<64x64xf32>
    %c0_84 = arith.constant 0 : index
    %c0_85 = arith.constant 0 : index
    %c0_86 = arith.constant 0 : index
    %198 = vector.load %arg17[%c0_84, %c0_85, %c0_86] : memref<1x1x64xf32, #tpu.memory_space<vmem>>, vector<1x1x64xf32>
    %199 = vector.shape_cast %198 : vector<1x1x64xf32> to vector<1x64xf32>
    %200 = vector.broadcast %199 : vector<1x64xf32> to vector<64x64xf32>
    %201 = arith.addf %197, %200 : vector<64x64xf32>
    %cst_87 = arith.constant 0.000000e+00 : f32
    %202 = vector.broadcast %cst_87 : f32 to vector<64x64xf32>
    %203 = arith.maximumf %201, %202 : vector<64x64xf32>
    %204 = math.absf %201 : vector<64x64xf32>
    %cst_88 = arith.constant 0.000000e+00 : f32
    %205 = vector.broadcast %cst_88 : f32 to vector<64x64xf32>
    %206 = arith.subf %205, %204 : vector<64x64xf32>
    %207 = math.exp %206 : vector<64x64xf32>
    %cst_89 = arith.constant 1.000000e+00 : f32
    %208 = vector.broadcast %cst_89 : f32 to vector<64x64xf32>
    %209 = arith.addf %208, %207 : vector<64x64xf32>
    %210 = math.log %209 : vector<64x64xf32>
    %211 = arith.addf %203, %210 : vector<64x64xf32>
    %c0_90 = arith.constant 0 : index
    %c0_91 = arith.constant 0 : index
    %c0_92 = arith.constant 0 : index
    %212 = vector.load %arg18[%c0_90, %c0_91, %c0_92] : memref<1x8x64xf32, #tpu.memory_space<vmem>>, vector<1x8x64xf32>
    %213 = vector.shape_cast %212 : vector<1x8x64xf32> to vector<8x64xf32>
    %214 = arith.mulf %211, %185 : vector<64x64xf32>
    %c0_93 = arith.constant 0 : index
    %c0_94 = arith.constant 0 : index
    %c0_95 = arith.constant 0 : index
    %215 = vector.load %arg19[%c0_93, %c0_94, %c0_95] : memref<1x1x64xf32, #tpu.memory_space<vmem>>, vector<1x1x64xf32>
    %216 = vector.shape_cast %215 : vector<1x1x64xf32> to vector<1x64xf32>
    %217 = vector.broadcast %216 : vector<1x64xf32> to vector<64x64xf32>
    %218 = arith.mulf %217, %185 : vector<64x64xf32>
    %219 = vector.extract_strided_slice %213 {offsets = [0, 0], sizes = [1, 64], strides = [1, 1]} : vector<8x64xf32> to vector<1x64xf32>
    %220 = vector.broadcast %219 : vector<1x64xf32> to vector<64x64xf32>
    %221 = arith.mulf %211, %220 : vector<64x64xf32>
    %222 = math.exp %221 : vector<64x64xf32>
    %223 = vector.extract_strided_slice %191 {offsets = [0, 0], sizes = [64, 1], strides = [1, 1]} : vector<64x8xf32> to vector<64x1xf32>
    %224 = vector.broadcast %223 : vector<64x1xf32> to vector<64x64xf32>
    %225 = arith.mulf %214, %224 : vector<64x64xf32>
    %c1_i32_96 = arith.constant 1 : i32
    %226 = vector.broadcast %c1_i32_96 : i32 to vector<64x1xi32>
    %227 = arith.cmpi sge, %20, %226 : vector<64x1xi32>
    %c1_i32_97 = arith.constant 1 : i32
    %228 = tpu.dynamic_rotate %222 by %c1_i32_97 dim 0 : vector<64x64xf32>, i32 -> vector<64x64xf32>
    %cst_98 = arith.constant 1.000000e+00 : f32
    %229 = vector.shape_cast %227 : vector<64x1xi1> to vector<64x1xi1>
    %230 = vector.broadcast %229 : vector<64x1xi1> to vector<64x64xi1>
    %231 = vector.broadcast %cst_98 : f32 to vector<64x64xf32>
    %232 = arith.select %230, %228, %231 : vector<64x64xi1>, vector<64x64xf32>
    %c1_i32_99 = arith.constant 1 : i32
    %233 = vector.broadcast %c1_i32_99 : i32 to vector<64x1xi32>
    %234 = arith.cmpi sge, %20, %233 : vector<64x1xi32>
    %c1_i32_100 = arith.constant 1 : i32
    %235 = tpu.dynamic_rotate %225 by %c1_i32_100 dim 0 : vector<64x64xf32>, i32 -> vector<64x64xf32>
    %cst_101 = arith.constant 0.000000e+00 : f32
    %236 = vector.shape_cast %234 : vector<64x1xi1> to vector<64x1xi1>
    %237 = vector.broadcast %236 : vector<64x1xi1> to vector<64x64xi1>
    %238 = vector.broadcast %cst_101 : f32 to vector<64x64xf32>
    %239 = arith.select %237, %235, %238 : vector<64x64xi1>, vector<64x64xf32>
    %240 = arith.mulf %222, %239 : vector<64x64xf32>
    %241 = arith.addf %240, %225 : vector<64x64xf32>
    %242 = arith.mulf %222, %232 : vector<64x64xf32>
    %c2_i32_102 = arith.constant 2 : i32
    %243 = vector.broadcast %c2_i32_102 : i32 to vector<64x1xi32>
    %244 = arith.cmpi sge, %20, %243 : vector<64x1xi32>
    %c2_i32_103 = arith.constant 2 : i32
    %245 = tpu.dynamic_rotate %242 by %c2_i32_103 dim 0 : vector<64x64xf32>, i32 -> vector<64x64xf32>
    %cst_104 = arith.constant 1.000000e+00 : f32
    %246 = vector.shape_cast %244 : vector<64x1xi1> to vector<64x1xi1>
    %247 = vector.broadcast %246 : vector<64x1xi1> to vector<64x64xi1>
    %248 = vector.broadcast %cst_104 : f32 to vector<64x64xf32>
    %249 = arith.select %247, %245, %248 : vector<64x64xi1>, vector<64x64xf32>
    %c2_i32_105 = arith.constant 2 : i32
    %250 = vector.broadcast %c2_i32_105 : i32 to vector<64x1xi32>
    %251 = arith.cmpi sge, %20, %250 : vector<64x1xi32>
    %c2_i32_106 = arith.constant 2 : i32
    %252 = tpu.dynamic_rotate %241 by %c2_i32_106 dim 0 : vector<64x64xf32>, i32 -> vector<64x64xf32>
    %cst_107 = arith.constant 0.000000e+00 : f32
    %253 = vector.shape_cast %251 : vector<64x1xi1> to vector<64x1xi1>
    %254 = vector.broadcast %253 : vector<64x1xi1> to vector<64x64xi1>
    %255 = vector.broadcast %cst_107 : f32 to vector<64x64xf32>
    %256 = arith.select %254, %252, %255 : vector<64x64xi1>, vector<64x64xf32>
    %257 = arith.mulf %242, %256 : vector<64x64xf32>
    %258 = arith.addf %257, %241 : vector<64x64xf32>
    %259 = arith.mulf %242, %249 : vector<64x64xf32>
    %c4_i32 = arith.constant 4 : i32
    %260 = vector.broadcast %c4_i32 : i32 to vector<64x1xi32>
    %261 = arith.cmpi sge, %20, %260 : vector<64x1xi32>
    %c4_i32_108 = arith.constant 4 : i32
    %262 = tpu.dynamic_rotate %259 by %c4_i32_108 dim 0 : vector<64x64xf32>, i32 -> vector<64x64xf32>
    %cst_109 = arith.constant 1.000000e+00 : f32
    %263 = vector.shape_cast %261 : vector<64x1xi1> to vector<64x1xi1>
    %264 = vector.broadcast %263 : vector<64x1xi1> to vector<64x64xi1>
    %265 = vector.broadcast %cst_109 : f32 to vector<64x64xf32>
    %266 = arith.select %264, %262, %265 : vector<64x64xi1>, vector<64x64xf32>
    %c4_i32_110 = arith.constant 4 : i32
    %267 = vector.broadcast %c4_i32_110 : i32 to vector<64x1xi32>
    %268 = arith.cmpi sge, %20, %267 : vector<64x1xi32>
    %c4_i32_111 = arith.constant 4 : i32
    %269 = tpu.dynamic_rotate %258 by %c4_i32_111 dim 0 : vector<64x64xf32>, i32 -> vector<64x64xf32>
    %cst_112 = arith.constant 0.000000e+00 : f32
    %270 = vector.shape_cast %268 : vector<64x1xi1> to vector<64x1xi1>
    %271 = vector.broadcast %270 : vector<64x1xi1> to vector<64x64xi1>
    %272 = vector.broadcast %cst_112 : f32 to vector<64x64xf32>
    %273 = arith.select %271, %269, %272 : vector<64x64xi1>, vector<64x64xf32>
    %274 = arith.mulf %259, %273 : vector<64x64xf32>
    %275 = arith.addf %274, %258 : vector<64x64xf32>
    %276 = arith.mulf %259, %266 : vector<64x64xf32>
    %c8_i32 = arith.constant 8 : i32
    %277 = vector.broadcast %c8_i32 : i32 to vector<64x1xi32>
    %278 = arith.cmpi sge, %20, %277 : vector<64x1xi32>
    %c8_i32_113 = arith.constant 8 : i32
    %279 = tpu.dynamic_rotate %275 by %c8_i32_113 dim 0 : vector<64x64xf32>, i32 -> vector<64x64xf32>
    %cst_114 = arith.constant 0.000000e+00 : f32
    %280 = vector.shape_cast %278 : vector<64x1xi1> to vector<64x1xi1>
    %281 = vector.broadcast %280 : vector<64x1xi1> to vector<64x64xi1>
    %282 = vector.broadcast %cst_114 : f32 to vector<64x64xf32>
    %283 = arith.select %281, %279, %282 : vector<64x64xi1>, vector<64x64xf32>
    %284 = arith.mulf %276, %283 : vector<64x64xf32>
    %285 = arith.addf %284, %275 : vector<64x64xf32>
    %286 = vector.extract_strided_slice %194 {offsets = [0, 0], sizes = [64, 1], strides = [1, 1]} : vector<64x8xf32> to vector<64x1xf32>
    %287 = vector.broadcast %286 : vector<64x1xf32> to vector<64x64xf32>
    %288 = arith.mulf %287, %285 : vector<64x64xf32>
    %289 = arith.addf %218, %288 : vector<64x64xf32>
    %290 = vector.extract_strided_slice %213 {offsets = [1, 0], sizes = [1, 64], strides = [1, 1]} : vector<8x64xf32> to vector<1x64xf32>
    %291 = vector.broadcast %290 : vector<1x64xf32> to vector<64x64xf32>
    %292 = arith.mulf %211, %291 : vector<64x64xf32>
    %293 = math.exp %292 : vector<64x64xf32>
    %294 = vector.extract_strided_slice %191 {offsets = [0, 1], sizes = [64, 1], strides = [1, 1]} : vector<64x8xf32> to vector<64x1xf32>
    %295 = vector.broadcast %294 : vector<64x1xf32> to vector<64x64xf32>
    %296 = arith.mulf %214, %295 : vector<64x64xf32>
    %c1_i32_115 = arith.constant 1 : i32
    %297 = vector.broadcast %c1_i32_115 : i32 to vector<64x1xi32>
    %298 = arith.cmpi sge, %20, %297 : vector<64x1xi32>
    %c1_i32_116 = arith.constant 1 : i32
    %299 = tpu.dynamic_rotate %293 by %c1_i32_116 dim 0 : vector<64x64xf32>, i32 -> vector<64x64xf32>
    %cst_117 = arith.constant 1.000000e+00 : f32
    %300 = vector.shape_cast %298 : vector<64x1xi1> to vector<64x1xi1>
    %301 = vector.broadcast %300 : vector<64x1xi1> to vector<64x64xi1>
    %302 = vector.broadcast %cst_117 : f32 to vector<64x64xf32>
    %303 = arith.select %301, %299, %302 : vector<64x64xi1>, vector<64x64xf32>
    %c1_i32_118 = arith.constant 1 : i32
    %304 = vector.broadcast %c1_i32_118 : i32 to vector<64x1xi32>
    %305 = arith.cmpi sge, %20, %304 : vector<64x1xi32>
    %c1_i32_119 = arith.constant 1 : i32
    %306 = tpu.dynamic_rotate %296 by %c1_i32_119 dim 0 : vector<64x64xf32>, i32 -> vector<64x64xf32>
    %cst_120 = arith.constant 0.000000e+00 : f32
    %307 = vector.shape_cast %305 : vector<64x1xi1> to vector<64x1xi1>
    %308 = vector.broadcast %307 : vector<64x1xi1> to vector<64x64xi1>
    %309 = vector.broadcast %cst_120 : f32 to vector<64x64xf32>
    %310 = arith.select %308, %306, %309 : vector<64x64xi1>, vector<64x64xf32>
    %311 = arith.mulf %293, %310 : vector<64x64xf32>
    %312 = arith.addf %311, %296 : vector<64x64xf32>
    %313 = arith.mulf %293, %303 : vector<64x64xf32>
    %c2_i32_121 = arith.constant 2 : i32
    %314 = vector.broadcast %c2_i32_121 : i32 to vector<64x1xi32>
    %315 = arith.cmpi sge, %20, %314 : vector<64x1xi32>
    %c2_i32_122 = arith.constant 2 : i32
    %316 = tpu.dynamic_rotate %313 by %c2_i32_122 dim 0 : vector<64x64xf32>, i32 -> vector<64x64xf32>
    %cst_123 = arith.constant 1.000000e+00 : f32
    %317 = vector.shape_cast %315 : vector<64x1xi1> to vector<64x1xi1>
    %318 = vector.broadcast %317 : vector<64x1xi1> to vector<64x64xi1>
    %319 = vector.broadcast %cst_123 : f32 to vector<64x64xf32>
    %320 = arith.select %318, %316, %319 : vector<64x64xi1>, vector<64x64xf32>
    %c2_i32_124 = arith.constant 2 : i32
    %321 = vector.broadcast %c2_i32_124 : i32 to vector<64x1xi32>
    %322 = arith.cmpi sge, %20, %321 : vector<64x1xi32>
    %c2_i32_125 = arith.constant 2 : i32
    %323 = tpu.dynamic_rotate %312 by %c2_i32_125 dim 0 : vector<64x64xf32>, i32 -> vector<64x64xf32>
    %cst_126 = arith.constant 0.000000e+00 : f32
    %324 = vector.shape_cast %322 : vector<64x1xi1> to vector<64x1xi1>
    %325 = vector.broadcast %324 : vector<64x1xi1> to vector<64x64xi1>
    %326 = vector.broadcast %cst_126 : f32 to vector<64x64xf32>
    %327 = arith.select %325, %323, %326 : vector<64x64xi1>, vector<64x64xf32>
    %328 = arith.mulf %313, %327 : vector<64x64xf32>
    %329 = arith.addf %328, %312 : vector<64x64xf32>
    %330 = arith.mulf %313, %320 : vector<64x64xf32>
    %c4_i32_127 = arith.constant 4 : i32
    %331 = vector.broadcast %c4_i32_127 : i32 to vector<64x1xi32>
    %332 = arith.cmpi sge, %20, %331 : vector<64x1xi32>
    %c4_i32_128 = arith.constant 4 : i32
    %333 = tpu.dynamic_rotate %330 by %c4_i32_128 dim 0 : vector<64x64xf32>, i32 -> vector<64x64xf32>
    %cst_129 = arith.constant 1.000000e+00 : f32
    %334 = vector.shape_cast %332 : vector<64x1xi1> to vector<64x1xi1>
    %335 = vector.broadcast %334 : vector<64x1xi1> to vector<64x64xi1>
    %336 = vector.broadcast %cst_129 : f32 to vector<64x64xf32>
    %337 = arith.select %335, %333, %336 : vector<64x64xi1>, vector<64x64xf32>
    %c4_i32_130 = arith.constant 4 : i32
    %338 = vector.broadcast %c4_i32_130 : i32 to vector<64x1xi32>
    %339 = arith.cmpi sge, %20, %338 : vector<64x1xi32>
    %c4_i32_131 = arith.constant 4 : i32
    %340 = tpu.dynamic_rotate %329 by %c4_i32_131 dim 0 : vector<64x64xf32>, i32 -> vector<64x64xf32>
    %cst_132 = arith.constant 0.000000e+00 : f32
    %341 = vector.shape_cast %339 : vector<64x1xi1> to vector<64x1xi1>
    %342 = vector.broadcast %341 : vector<64x1xi1> to vector<64x64xi1>
    %343 = vector.broadcast %cst_132 : f32 to vector<64x64xf32>
    %344 = arith.select %342, %340, %343 : vector<64x64xi1>, vector<64x64xf32>
    %345 = arith.mulf %330, %344 : vector<64x64xf32>
    %346 = arith.addf %345, %329 : vector<64x64xf32>
    %347 = arith.mulf %330, %337 : vector<64x64xf32>
    %c8_i32_133 = arith.constant 8 : i32
    %348 = vector.broadcast %c8_i32_133 : i32 to vector<64x1xi32>
    %349 = arith.cmpi sge, %20, %348 : vector<64x1xi32>
    %c8_i32_134 = arith.constant 8 : i32
    %350 = tpu.dynamic_rotate %346 by %c8_i32_134 dim 0 : vector<64x64xf32>, i32 -> vector<64x64xf32>
    %cst_135 = arith.constant 0.000000e+00 : f32
    %351 = vector.shape_cast %349 : vector<64x1xi1> to vector<64x1xi1>
    %352 = vector.broadcast %351 : vector<64x1xi1> to vector<64x64xi1>
    %353 = vector.broadcast %cst_135 : f32 to vector<64x64xf32>
    %354 = arith.select %352, %350, %353 : vector<64x64xi1>, vector<64x64xf32>
    %355 = arith.mulf %347, %354 : vector<64x64xf32>
    %356 = arith.addf %355, %346 : vector<64x64xf32>
    %357 = vector.extract_strided_slice %194 {offsets = [0, 1], sizes = [64, 1], strides = [1, 1]} : vector<64x8xf32> to vector<64x1xf32>
    %358 = vector.broadcast %357 : vector<64x1xf32> to vector<64x64xf32>
    %359 = arith.mulf %358, %356 : vector<64x64xf32>
    %360 = arith.addf %289, %359 : vector<64x64xf32>
    %361 = vector.extract_strided_slice %213 {offsets = [2, 0], sizes = [1, 64], strides = [1, 1]} : vector<8x64xf32> to vector<1x64xf32>
    %362 = vector.broadcast %361 : vector<1x64xf32> to vector<64x64xf32>
    %363 = arith.mulf %211, %362 : vector<64x64xf32>
    %364 = math.exp %363 : vector<64x64xf32>
    %365 = vector.extract_strided_slice %191 {offsets = [0, 2], sizes = [64, 1], strides = [1, 1]} : vector<64x8xf32> to vector<64x1xf32>
    %366 = vector.broadcast %365 : vector<64x1xf32> to vector<64x64xf32>
    %367 = arith.mulf %214, %366 : vector<64x64xf32>
    %c1_i32_136 = arith.constant 1 : i32
    %368 = vector.broadcast %c1_i32_136 : i32 to vector<64x1xi32>
    %369 = arith.cmpi sge, %20, %368 : vector<64x1xi32>
    %c1_i32_137 = arith.constant 1 : i32
    %370 = tpu.dynamic_rotate %364 by %c1_i32_137 dim 0 : vector<64x64xf32>, i32 -> vector<64x64xf32>
    %cst_138 = arith.constant 1.000000e+00 : f32
    %371 = vector.shape_cast %369 : vector<64x1xi1> to vector<64x1xi1>
    %372 = vector.broadcast %371 : vector<64x1xi1> to vector<64x64xi1>
    %373 = vector.broadcast %cst_138 : f32 to vector<64x64xf32>
    %374 = arith.select %372, %370, %373 : vector<64x64xi1>, vector<64x64xf32>
    %c1_i32_139 = arith.constant 1 : i32
    %375 = vector.broadcast %c1_i32_139 : i32 to vector<64x1xi32>
    %376 = arith.cmpi sge, %20, %375 : vector<64x1xi32>
    %c1_i32_140 = arith.constant 1 : i32
    %377 = tpu.dynamic_rotate %367 by %c1_i32_140 dim 0 : vector<64x64xf32>, i32 -> vector<64x64xf32>
    %cst_141 = arith.constant 0.000000e+00 : f32
    %378 = vector.shape_cast %376 : vector<64x1xi1> to vector<64x1xi1>
    %379 = vector.broadcast %378 : vector<64x1xi1> to vector<64x64xi1>
    %380 = vector.broadcast %cst_141 : f32 to vector<64x64xf32>
    %381 = arith.select %379, %377, %380 : vector<64x64xi1>, vector<64x64xf32>
    %382 = arith.mulf %364, %381 : vector<64x64xf32>
    %383 = arith.addf %382, %367 : vector<64x64xf32>
    %384 = arith.mulf %364, %374 : vector<64x64xf32>
    %c2_i32_142 = arith.constant 2 : i32
    %385 = vector.broadcast %c2_i32_142 : i32 to vector<64x1xi32>
    %386 = arith.cmpi sge, %20, %385 : vector<64x1xi32>
    %c2_i32_143 = arith.constant 2 : i32
    %387 = tpu.dynamic_rotate %384 by %c2_i32_143 dim 0 : vector<64x64xf32>, i32 -> vector<64x64xf32>
    %cst_144 = arith.constant 1.000000e+00 : f32
    %388 = vector.shape_cast %386 : vector<64x1xi1> to vector<64x1xi1>
    %389 = vector.broadcast %388 : vector<64x1xi1> to vector<64x64xi1>
    %390 = vector.broadcast %cst_144 : f32 to vector<64x64xf32>
    %391 = arith.select %389, %387, %390 : vector<64x64xi1>, vector<64x64xf32>
    %c2_i32_145 = arith.constant 2 : i32
    %392 = vector.broadcast %c2_i32_145 : i32 to vector<64x1xi32>
    %393 = arith.cmpi sge, %20, %392 : vector<64x1xi32>
    %c2_i32_146 = arith.constant 2 : i32
    %394 = tpu.dynamic_rotate %383 by %c2_i32_146 dim 0 : vector<64x64xf32>, i32 -> vector<64x64xf32>
    %cst_147 = arith.constant 0.000000e+00 : f32
    %395 = vector.shape_cast %393 : vector<64x1xi1> to vector<64x1xi1>
    %396 = vector.broadcast %395 : vector<64x1xi1> to vector<64x64xi1>
    %397 = vector.broadcast %cst_147 : f32 to vector<64x64xf32>
    %398 = arith.select %396, %394, %397 : vector<64x64xi1>, vector<64x64xf32>
    %399 = arith.mulf %384, %398 : vector<64x64xf32>
    %400 = arith.addf %399, %383 : vector<64x64xf32>
    %401 = arith.mulf %384, %391 : vector<64x64xf32>
    %c4_i32_148 = arith.constant 4 : i32
    %402 = vector.broadcast %c4_i32_148 : i32 to vector<64x1xi32>
    %403 = arith.cmpi sge, %20, %402 : vector<64x1xi32>
    %c4_i32_149 = arith.constant 4 : i32
    %404 = tpu.dynamic_rotate %401 by %c4_i32_149 dim 0 : vector<64x64xf32>, i32 -> vector<64x64xf32>
    %cst_150 = arith.constant 1.000000e+00 : f32
    %405 = vector.shape_cast %403 : vector<64x1xi1> to vector<64x1xi1>
    %406 = vector.broadcast %405 : vector<64x1xi1> to vector<64x64xi1>
    %407 = vector.broadcast %cst_150 : f32 to vector<64x64xf32>
    %408 = arith.select %406, %404, %407 : vector<64x64xi1>, vector<64x64xf32>
    %c4_i32_151 = arith.constant 4 : i32
    %409 = vector.broadcast %c4_i32_151 : i32 to vector<64x1xi32>
    %410 = arith.cmpi sge, %20, %409 : vector<64x1xi32>
    %c4_i32_152 = arith.constant 4 : i32
    %411 = tpu.dynamic_rotate %400 by %c4_i32_152 dim 0 : vector<64x64xf32>, i32 -> vector<64x64xf32>
    %cst_153 = arith.constant 0.000000e+00 : f32
    %412 = vector.shape_cast %410 : vector<64x1xi1> to vector<64x1xi1>
    %413 = vector.broadcast %412 : vector<64x1xi1> to vector<64x64xi1>
    %414 = vector.broadcast %cst_153 : f32 to vector<64x64xf32>
    %415 = arith.select %413, %411, %414 : vector<64x64xi1>, vector<64x64xf32>
    %416 = arith.mulf %401, %415 : vector<64x64xf32>
    %417 = arith.addf %416, %400 : vector<64x64xf32>
    %418 = arith.mulf %401, %408 : vector<64x64xf32>
    %c8_i32_154 = arith.constant 8 : i32
    %419 = vector.broadcast %c8_i32_154 : i32 to vector<64x1xi32>
    %420 = arith.cmpi sge, %20, %419 : vector<64x1xi32>
    %c8_i32_155 = arith.constant 8 : i32
    %421 = tpu.dynamic_rotate %417 by %c8_i32_155 dim 0 : vector<64x64xf32>, i32 -> vector<64x64xf32>
    %cst_156 = arith.constant 0.000000e+00 : f32
    %422 = vector.shape_cast %420 : vector<64x1xi1> to vector<64x1xi1>
    %423 = vector.broadcast %422 : vector<64x1xi1> to vector<64x64xi1>
    %424 = vector.broadcast %cst_156 : f32 to vector<64x64xf32>
    %425 = arith.select %423, %421, %424 : vector<64x64xi1>, vector<64x64xf32>
    %426 = arith.mulf %418, %425 : vector<64x64xf32>
    %427 = arith.addf %426, %417 : vector<64x64xf32>
    %428 = vector.extract_strided_slice %194 {offsets = [0, 2], sizes = [64, 1], strides = [1, 1]} : vector<64x8xf32> to vector<64x1xf32>
    %429 = vector.broadcast %428 : vector<64x1xf32> to vector<64x64xf32>
    %430 = arith.mulf %429, %427 : vector<64x64xf32>
    %431 = arith.addf %360, %430 : vector<64x64xf32>
    %432 = vector.extract_strided_slice %213 {offsets = [3, 0], sizes = [1, 64], strides = [1, 1]} : vector<8x64xf32> to vector<1x64xf32>
    %433 = vector.broadcast %432 : vector<1x64xf32> to vector<64x64xf32>
    %434 = arith.mulf %211, %433 : vector<64x64xf32>
    %435 = math.exp %434 : vector<64x64xf32>
    %436 = vector.extract_strided_slice %191 {offsets = [0, 3], sizes = [64, 1], strides = [1, 1]} : vector<64x8xf32> to vector<64x1xf32>
    %437 = vector.broadcast %436 : vector<64x1xf32> to vector<64x64xf32>
    %438 = arith.mulf %214, %437 : vector<64x64xf32>
    %c1_i32_157 = arith.constant 1 : i32
    %439 = vector.broadcast %c1_i32_157 : i32 to vector<64x1xi32>
    %440 = arith.cmpi sge, %20, %439 : vector<64x1xi32>
    %c1_i32_158 = arith.constant 1 : i32
    %441 = tpu.dynamic_rotate %435 by %c1_i32_158 dim 0 : vector<64x64xf32>, i32 -> vector<64x64xf32>
    %cst_159 = arith.constant 1.000000e+00 : f32
    %442 = vector.shape_cast %440 : vector<64x1xi1> to vector<64x1xi1>
    %443 = vector.broadcast %442 : vector<64x1xi1> to vector<64x64xi1>
    %444 = vector.broadcast %cst_159 : f32 to vector<64x64xf32>
    %445 = arith.select %443, %441, %444 : vector<64x64xi1>, vector<64x64xf32>
    %c1_i32_160 = arith.constant 1 : i32
    %446 = vector.broadcast %c1_i32_160 : i32 to vector<64x1xi32>
    %447 = arith.cmpi sge, %20, %446 : vector<64x1xi32>
    %c1_i32_161 = arith.constant 1 : i32
    %448 = tpu.dynamic_rotate %438 by %c1_i32_161 dim 0 : vector<64x64xf32>, i32 -> vector<64x64xf32>
    %cst_162 = arith.constant 0.000000e+00 : f32
    %449 = vector.shape_cast %447 : vector<64x1xi1> to vector<64x1xi1>
    %450 = vector.broadcast %449 : vector<64x1xi1> to vector<64x64xi1>
    %451 = vector.broadcast %cst_162 : f32 to vector<64x64xf32>
    %452 = arith.select %450, %448, %451 : vector<64x64xi1>, vector<64x64xf32>
    %453 = arith.mulf %435, %452 : vector<64x64xf32>
    %454 = arith.addf %453, %438 : vector<64x64xf32>
    %455 = arith.mulf %435, %445 : vector<64x64xf32>
    %c2_i32_163 = arith.constant 2 : i32
    %456 = vector.broadcast %c2_i32_163 : i32 to vector<64x1xi32>
    %457 = arith.cmpi sge, %20, %456 : vector<64x1xi32>
    %c2_i32_164 = arith.constant 2 : i32
    %458 = tpu.dynamic_rotate %455 by %c2_i32_164 dim 0 : vector<64x64xf32>, i32 -> vector<64x64xf32>
    %cst_165 = arith.constant 1.000000e+00 : f32
    %459 = vector.shape_cast %457 : vector<64x1xi1> to vector<64x1xi1>
    %460 = vector.broadcast %459 : vector<64x1xi1> to vector<64x64xi1>
    %461 = vector.broadcast %cst_165 : f32 to vector<64x64xf32>
    %462 = arith.select %460, %458, %461 : vector<64x64xi1>, vector<64x64xf32>
    %c2_i32_166 = arith.constant 2 : i32
    %463 = vector.broadcast %c2_i32_166 : i32 to vector<64x1xi32>
    %464 = arith.cmpi sge, %20, %463 : vector<64x1xi32>
    %c2_i32_167 = arith.constant 2 : i32
    %465 = tpu.dynamic_rotate %454 by %c2_i32_167 dim 0 : vector<64x64xf32>, i32 -> vector<64x64xf32>
    %cst_168 = arith.constant 0.000000e+00 : f32
    %466 = vector.shape_cast %464 : vector<64x1xi1> to vector<64x1xi1>
    %467 = vector.broadcast %466 : vector<64x1xi1> to vector<64x64xi1>
    %468 = vector.broadcast %cst_168 : f32 to vector<64x64xf32>
    %469 = arith.select %467, %465, %468 : vector<64x64xi1>, vector<64x64xf32>
    %470 = arith.mulf %455, %469 : vector<64x64xf32>
    %471 = arith.addf %470, %454 : vector<64x64xf32>
    %472 = arith.mulf %455, %462 : vector<64x64xf32>
    %c4_i32_169 = arith.constant 4 : i32
    %473 = vector.broadcast %c4_i32_169 : i32 to vector<64x1xi32>
    %474 = arith.cmpi sge, %20, %473 : vector<64x1xi32>
    %c4_i32_170 = arith.constant 4 : i32
    %475 = tpu.dynamic_rotate %472 by %c4_i32_170 dim 0 : vector<64x64xf32>, i32 -> vector<64x64xf32>
    %cst_171 = arith.constant 1.000000e+00 : f32
    %476 = vector.shape_cast %474 : vector<64x1xi1> to vector<64x1xi1>
    %477 = vector.broadcast %476 : vector<64x1xi1> to vector<64x64xi1>
    %478 = vector.broadcast %cst_171 : f32 to vector<64x64xf32>
    %479 = arith.select %477, %475, %478 : vector<64x64xi1>, vector<64x64xf32>
    %c4_i32_172 = arith.constant 4 : i32
    %480 = vector.broadcast %c4_i32_172 : i32 to vector<64x1xi32>
    %481 = arith.cmpi sge, %20, %480 : vector<64x1xi32>
    %c4_i32_173 = arith.constant 4 : i32
    %482 = tpu.dynamic_rotate %471 by %c4_i32_173 dim 0 : vector<64x64xf32>, i32 -> vector<64x64xf32>
    %cst_174 = arith.constant 0.000000e+00 : f32
    %483 = vector.shape_cast %481 : vector<64x1xi1> to vector<64x1xi1>
    %484 = vector.broadcast %483 : vector<64x1xi1> to vector<64x64xi1>
    %485 = vector.broadcast %cst_174 : f32 to vector<64x64xf32>
    %486 = arith.select %484, %482, %485 : vector<64x64xi1>, vector<64x64xf32>
    %487 = arith.mulf %472, %486 : vector<64x64xf32>
    %488 = arith.addf %487, %471 : vector<64x64xf32>
    %489 = arith.mulf %472, %479 : vector<64x64xf32>
    %c8_i32_175 = arith.constant 8 : i32
    %490 = vector.broadcast %c8_i32_175 : i32 to vector<64x1xi32>
    %491 = arith.cmpi sge, %20, %490 : vector<64x1xi32>
    %c8_i32_176 = arith.constant 8 : i32
    %492 = tpu.dynamic_rotate %488 by %c8_i32_176 dim 0 : vector<64x64xf32>, i32 -> vector<64x64xf32>
    %cst_177 = arith.constant 0.000000e+00 : f32
    %493 = vector.shape_cast %491 : vector<64x1xi1> to vector<64x1xi1>
    %494 = vector.broadcast %493 : vector<64x1xi1> to vector<64x64xi1>
    %495 = vector.broadcast %cst_177 : f32 to vector<64x64xf32>
    %496 = arith.select %494, %492, %495 : vector<64x64xi1>, vector<64x64xf32>
    %497 = arith.mulf %489, %496 : vector<64x64xf32>
    %498 = arith.addf %497, %488 : vector<64x64xf32>
    %499 = vector.extract_strided_slice %194 {offsets = [0, 3], sizes = [64, 1], strides = [1, 1]} : vector<64x8xf32> to vector<64x1xf32>
    %500 = vector.broadcast %499 : vector<64x1xf32> to vector<64x64xf32>
    %501 = arith.mulf %500, %498 : vector<64x64xf32>
    %502 = arith.addf %431, %501 : vector<64x64xf32>
    %503 = vector.extract_strided_slice %213 {offsets = [4, 0], sizes = [1, 64], strides = [1, 1]} : vector<8x64xf32> to vector<1x64xf32>
    %504 = vector.broadcast %503 : vector<1x64xf32> to vector<64x64xf32>
    %505 = arith.mulf %211, %504 : vector<64x64xf32>
    %506 = math.exp %505 : vector<64x64xf32>
    %507 = vector.extract_strided_slice %191 {offsets = [0, 4], sizes = [64, 1], strides = [1, 1]} : vector<64x8xf32> to vector<64x1xf32>
    %508 = vector.broadcast %507 : vector<64x1xf32> to vector<64x64xf32>
    %509 = arith.mulf %214, %508 : vector<64x64xf32>
    %c1_i32_178 = arith.constant 1 : i32
    %510 = vector.broadcast %c1_i32_178 : i32 to vector<64x1xi32>
    %511 = arith.cmpi sge, %20, %510 : vector<64x1xi32>
    %c1_i32_179 = arith.constant 1 : i32
    %512 = tpu.dynamic_rotate %506 by %c1_i32_179 dim 0 : vector<64x64xf32>, i32 -> vector<64x64xf32>
    %cst_180 = arith.constant 1.000000e+00 : f32
    %513 = vector.shape_cast %511 : vector<64x1xi1> to vector<64x1xi1>
    %514 = vector.broadcast %513 : vector<64x1xi1> to vector<64x64xi1>
    %515 = vector.broadcast %cst_180 : f32 to vector<64x64xf32>
    %516 = arith.select %514, %512, %515 : vector<64x64xi1>, vector<64x64xf32>
    %c1_i32_181 = arith.constant 1 : i32
    %517 = vector.broadcast %c1_i32_181 : i32 to vector<64x1xi32>
    %518 = arith.cmpi sge, %20, %517 : vector<64x1xi32>
    %c1_i32_182 = arith.constant 1 : i32
    %519 = tpu.dynamic_rotate %509 by %c1_i32_182 dim 0 : vector<64x64xf32>, i32 -> vector<64x64xf32>
    %cst_183 = arith.constant 0.000000e+00 : f32
    %520 = vector.shape_cast %518 : vector<64x1xi1> to vector<64x1xi1>
    %521 = vector.broadcast %520 : vector<64x1xi1> to vector<64x64xi1>
    %522 = vector.broadcast %cst_183 : f32 to vector<64x64xf32>
    %523 = arith.select %521, %519, %522 : vector<64x64xi1>, vector<64x64xf32>
    %524 = arith.mulf %506, %523 : vector<64x64xf32>
    %525 = arith.addf %524, %509 : vector<64x64xf32>
    %526 = arith.mulf %506, %516 : vector<64x64xf32>
    %c2_i32_184 = arith.constant 2 : i32
    %527 = vector.broadcast %c2_i32_184 : i32 to vector<64x1xi32>
    %528 = arith.cmpi sge, %20, %527 : vector<64x1xi32>
    %c2_i32_185 = arith.constant 2 : i32
    %529 = tpu.dynamic_rotate %526 by %c2_i32_185 dim 0 : vector<64x64xf32>, i32 -> vector<64x64xf32>
    %cst_186 = arith.constant 1.000000e+00 : f32
    %530 = vector.shape_cast %528 : vector<64x1xi1> to vector<64x1xi1>
    %531 = vector.broadcast %530 : vector<64x1xi1> to vector<64x64xi1>
    %532 = vector.broadcast %cst_186 : f32 to vector<64x64xf32>
    %533 = arith.select %531, %529, %532 : vector<64x64xi1>, vector<64x64xf32>
    %c2_i32_187 = arith.constant 2 : i32
    %534 = vector.broadcast %c2_i32_187 : i32 to vector<64x1xi32>
    %535 = arith.cmpi sge, %20, %534 : vector<64x1xi32>
    %c2_i32_188 = arith.constant 2 : i32
    %536 = tpu.dynamic_rotate %525 by %c2_i32_188 dim 0 : vector<64x64xf32>, i32 -> vector<64x64xf32>
    %cst_189 = arith.constant 0.000000e+00 : f32
    %537 = vector.shape_cast %535 : vector<64x1xi1> to vector<64x1xi1>
    %538 = vector.broadcast %537 : vector<64x1xi1> to vector<64x64xi1>
    %539 = vector.broadcast %cst_189 : f32 to vector<64x64xf32>
    %540 = arith.select %538, %536, %539 : vector<64x64xi1>, vector<64x64xf32>
    %541 = arith.mulf %526, %540 : vector<64x64xf32>
    %542 = arith.addf %541, %525 : vector<64x64xf32>
    %543 = arith.mulf %526, %533 : vector<64x64xf32>
    %c4_i32_190 = arith.constant 4 : i32
    %544 = vector.broadcast %c4_i32_190 : i32 to vector<64x1xi32>
    %545 = arith.cmpi sge, %20, %544 : vector<64x1xi32>
    %c4_i32_191 = arith.constant 4 : i32
    %546 = tpu.dynamic_rotate %543 by %c4_i32_191 dim 0 : vector<64x64xf32>, i32 -> vector<64x64xf32>
    %cst_192 = arith.constant 1.000000e+00 : f32
    %547 = vector.shape_cast %545 : vector<64x1xi1> to vector<64x1xi1>
    %548 = vector.broadcast %547 : vector<64x1xi1> to vector<64x64xi1>
    %549 = vector.broadcast %cst_192 : f32 to vector<64x64xf32>
    %550 = arith.select %548, %546, %549 : vector<64x64xi1>, vector<64x64xf32>
    %c4_i32_193 = arith.constant 4 : i32
    %551 = vector.broadcast %c4_i32_193 : i32 to vector<64x1xi32>
    %552 = arith.cmpi sge, %20, %551 : vector<64x1xi32>
    %c4_i32_194 = arith.constant 4 : i32
    %553 = tpu.dynamic_rotate %542 by %c4_i32_194 dim 0 : vector<64x64xf32>, i32 -> vector<64x64xf32>
    %cst_195 = arith.constant 0.000000e+00 : f32
    %554 = vector.shape_cast %552 : vector<64x1xi1> to vector<64x1xi1>
    %555 = vector.broadcast %554 : vector<64x1xi1> to vector<64x64xi1>
    %556 = vector.broadcast %cst_195 : f32 to vector<64x64xf32>
    %557 = arith.select %555, %553, %556 : vector<64x64xi1>, vector<64x64xf32>
    %558 = arith.mulf %543, %557 : vector<64x64xf32>
    %559 = arith.addf %558, %542 : vector<64x64xf32>
    %560 = arith.mulf %543, %550 : vector<64x64xf32>
    %c8_i32_196 = arith.constant 8 : i32
    %561 = vector.broadcast %c8_i32_196 : i32 to vector<64x1xi32>
    %562 = arith.cmpi sge, %20, %561 : vector<64x1xi32>
    %c8_i32_197 = arith.constant 8 : i32
    %563 = tpu.dynamic_rotate %559 by %c8_i32_197 dim 0 : vector<64x64xf32>, i32 -> vector<64x64xf32>
    %cst_198 = arith.constant 0.000000e+00 : f32
    %564 = vector.shape_cast %562 : vector<64x1xi1> to vector<64x1xi1>
    %565 = vector.broadcast %564 : vector<64x1xi1> to vector<64x64xi1>
    %566 = vector.broadcast %cst_198 : f32 to vector<64x64xf32>
    %567 = arith.select %565, %563, %566 : vector<64x64xi1>, vector<64x64xf32>
    %568 = arith.mulf %560, %567 : vector<64x64xf32>
    %569 = arith.addf %568, %559 : vector<64x64xf32>
    %570 = vector.extract_strided_slice %194 {offsets = [0, 4], sizes = [64, 1], strides = [1, 1]} : vector<64x8xf32> to vector<64x1xf32>
    %571 = vector.broadcast %570 : vector<64x1xf32> to vector<64x64xf32>
    %572 = arith.mulf %571, %569 : vector<64x64xf32>
    %573 = arith.addf %502, %572 : vector<64x64xf32>
    %574 = vector.extract_strided_slice %213 {offsets = [5, 0], sizes = [1, 64], strides = [1, 1]} : vector<8x64xf32> to vector<1x64xf32>
    %575 = vector.broadcast %574 : vector<1x64xf32> to vector<64x64xf32>
    %576 = arith.mulf %211, %575 : vector<64x64xf32>
    %577 = math.exp %576 : vector<64x64xf32>
    %578 = vector.extract_strided_slice %191 {offsets = [0, 5], sizes = [64, 1], strides = [1, 1]} : vector<64x8xf32> to vector<64x1xf32>
    %579 = vector.broadcast %578 : vector<64x1xf32> to vector<64x64xf32>
    %580 = arith.mulf %214, %579 : vector<64x64xf32>
    %c1_i32_199 = arith.constant 1 : i32
    %581 = vector.broadcast %c1_i32_199 : i32 to vector<64x1xi32>
    %582 = arith.cmpi sge, %20, %581 : vector<64x1xi32>
    %c1_i32_200 = arith.constant 1 : i32
    %583 = tpu.dynamic_rotate %577 by %c1_i32_200 dim 0 : vector<64x64xf32>, i32 -> vector<64x64xf32>
    %cst_201 = arith.constant 1.000000e+00 : f32
    %584 = vector.shape_cast %582 : vector<64x1xi1> to vector<64x1xi1>
    %585 = vector.broadcast %584 : vector<64x1xi1> to vector<64x64xi1>
    %586 = vector.broadcast %cst_201 : f32 to vector<64x64xf32>
    %587 = arith.select %585, %583, %586 : vector<64x64xi1>, vector<64x64xf32>
    %c1_i32_202 = arith.constant 1 : i32
    %588 = vector.broadcast %c1_i32_202 : i32 to vector<64x1xi32>
    %589 = arith.cmpi sge, %20, %588 : vector<64x1xi32>
    %c1_i32_203 = arith.constant 1 : i32
    %590 = tpu.dynamic_rotate %580 by %c1_i32_203 dim 0 : vector<64x64xf32>, i32 -> vector<64x64xf32>
    %cst_204 = arith.constant 0.000000e+00 : f32
    %591 = vector.shape_cast %589 : vector<64x1xi1> to vector<64x1xi1>
    %592 = vector.broadcast %591 : vector<64x1xi1> to vector<64x64xi1>
    %593 = vector.broadcast %cst_204 : f32 to vector<64x64xf32>
    %594 = arith.select %592, %590, %593 : vector<64x64xi1>, vector<64x64xf32>
    %595 = arith.mulf %577, %594 : vector<64x64xf32>
    %596 = arith.addf %595, %580 : vector<64x64xf32>
    %597 = arith.mulf %577, %587 : vector<64x64xf32>
    %c2_i32_205 = arith.constant 2 : i32
    %598 = vector.broadcast %c2_i32_205 : i32 to vector<64x1xi32>
    %599 = arith.cmpi sge, %20, %598 : vector<64x1xi32>
    %c2_i32_206 = arith.constant 2 : i32
    %600 = tpu.dynamic_rotate %597 by %c2_i32_206 dim 0 : vector<64x64xf32>, i32 -> vector<64x64xf32>
    %cst_207 = arith.constant 1.000000e+00 : f32
    %601 = vector.shape_cast %599 : vector<64x1xi1> to vector<64x1xi1>
    %602 = vector.broadcast %601 : vector<64x1xi1> to vector<64x64xi1>
    %603 = vector.broadcast %cst_207 : f32 to vector<64x64xf32>
    %604 = arith.select %602, %600, %603 : vector<64x64xi1>, vector<64x64xf32>
    %c2_i32_208 = arith.constant 2 : i32
    %605 = vector.broadcast %c2_i32_208 : i32 to vector<64x1xi32>
    %606 = arith.cmpi sge, %20, %605 : vector<64x1xi32>
    %c2_i32_209 = arith.constant 2 : i32
    %607 = tpu.dynamic_rotate %596 by %c2_i32_209 dim 0 : vector<64x64xf32>, i32 -> vector<64x64xf32>
    %cst_210 = arith.constant 0.000000e+00 : f32
    %608 = vector.shape_cast %606 : vector<64x1xi1> to vector<64x1xi1>
    %609 = vector.broadcast %608 : vector<64x1xi1> to vector<64x64xi1>
    %610 = vector.broadcast %cst_210 : f32 to vector<64x64xf32>
    %611 = arith.select %609, %607, %610 : vector<64x64xi1>, vector<64x64xf32>
    %612 = arith.mulf %597, %611 : vector<64x64xf32>
    %613 = arith.addf %612, %596 : vector<64x64xf32>
    %614 = arith.mulf %597, %604 : vector<64x64xf32>
    %c4_i32_211 = arith.constant 4 : i32
    %615 = vector.broadcast %c4_i32_211 : i32 to vector<64x1xi32>
    %616 = arith.cmpi sge, %20, %615 : vector<64x1xi32>
    %c4_i32_212 = arith.constant 4 : i32
    %617 = tpu.dynamic_rotate %614 by %c4_i32_212 dim 0 : vector<64x64xf32>, i32 -> vector<64x64xf32>
    %cst_213 = arith.constant 1.000000e+00 : f32
    %618 = vector.shape_cast %616 : vector<64x1xi1> to vector<64x1xi1>
    %619 = vector.broadcast %618 : vector<64x1xi1> to vector<64x64xi1>
    %620 = vector.broadcast %cst_213 : f32 to vector<64x64xf32>
    %621 = arith.select %619, %617, %620 : vector<64x64xi1>, vector<64x64xf32>
    %c4_i32_214 = arith.constant 4 : i32
    %622 = vector.broadcast %c4_i32_214 : i32 to vector<64x1xi32>
    %623 = arith.cmpi sge, %20, %622 : vector<64x1xi32>
    %c4_i32_215 = arith.constant 4 : i32
    %624 = tpu.dynamic_rotate %613 by %c4_i32_215 dim 0 : vector<64x64xf32>, i32 -> vector<64x64xf32>
    %cst_216 = arith.constant 0.000000e+00 : f32
    %625 = vector.shape_cast %623 : vector<64x1xi1> to vector<64x1xi1>
    %626 = vector.broadcast %625 : vector<64x1xi1> to vector<64x64xi1>
    %627 = vector.broadcast %cst_216 : f32 to vector<64x64xf32>
    %628 = arith.select %626, %624, %627 : vector<64x64xi1>, vector<64x64xf32>
    %629 = arith.mulf %614, %628 : vector<64x64xf32>
    %630 = arith.addf %629, %613 : vector<64x64xf32>
    %631 = arith.mulf %614, %621 : vector<64x64xf32>
    %c8_i32_217 = arith.constant 8 : i32
    %632 = vector.broadcast %c8_i32_217 : i32 to vector<64x1xi32>
    %633 = arith.cmpi sge, %20, %632 : vector<64x1xi32>
    %c8_i32_218 = arith.constant 8 : i32
    %634 = tpu.dynamic_rotate %630 by %c8_i32_218 dim 0 : vector<64x64xf32>, i32 -> vector<64x64xf32>
    %cst_219 = arith.constant 0.000000e+00 : f32
    %635 = vector.shape_cast %633 : vector<64x1xi1> to vector<64x1xi1>
    %636 = vector.broadcast %635 : vector<64x1xi1> to vector<64x64xi1>
    %637 = vector.broadcast %cst_219 : f32 to vector<64x64xf32>
    %638 = arith.select %636, %634, %637 : vector<64x64xi1>, vector<64x64xf32>
    %639 = arith.mulf %631, %638 : vector<64x64xf32>
    %640 = arith.addf %639, %630 : vector<64x64xf32>
    %641 = vector.extract_strided_slice %194 {offsets = [0, 5], sizes = [64, 1], strides = [1, 1]} : vector<64x8xf32> to vector<64x1xf32>
    %642 = vector.broadcast %641 : vector<64x1xf32> to vector<64x64xf32>
    %643 = arith.mulf %642, %640 : vector<64x64xf32>
    %644 = arith.addf %573, %643 : vector<64x64xf32>
    %645 = vector.extract_strided_slice %213 {offsets = [6, 0], sizes = [1, 64], strides = [1, 1]} : vector<8x64xf32> to vector<1x64xf32>
    %646 = vector.broadcast %645 : vector<1x64xf32> to vector<64x64xf32>
    %647 = arith.mulf %211, %646 : vector<64x64xf32>
    %648 = math.exp %647 : vector<64x64xf32>
    %649 = vector.extract_strided_slice %191 {offsets = [0, 6], sizes = [64, 1], strides = [1, 1]} : vector<64x8xf32> to vector<64x1xf32>
    %650 = vector.broadcast %649 : vector<64x1xf32> to vector<64x64xf32>
    %651 = arith.mulf %214, %650 : vector<64x64xf32>
    %c1_i32_220 = arith.constant 1 : i32
    %652 = vector.broadcast %c1_i32_220 : i32 to vector<64x1xi32>
    %653 = arith.cmpi sge, %20, %652 : vector<64x1xi32>
    %c1_i32_221 = arith.constant 1 : i32
    %654 = tpu.dynamic_rotate %648 by %c1_i32_221 dim 0 : vector<64x64xf32>, i32 -> vector<64x64xf32>
    %cst_222 = arith.constant 1.000000e+00 : f32
    %655 = vector.shape_cast %653 : vector<64x1xi1> to vector<64x1xi1>
    %656 = vector.broadcast %655 : vector<64x1xi1> to vector<64x64xi1>
    %657 = vector.broadcast %cst_222 : f32 to vector<64x64xf32>
    %658 = arith.select %656, %654, %657 : vector<64x64xi1>, vector<64x64xf32>
    %c1_i32_223 = arith.constant 1 : i32
    %659 = vector.broadcast %c1_i32_223 : i32 to vector<64x1xi32>
    %660 = arith.cmpi sge, %20, %659 : vector<64x1xi32>
    %c1_i32_224 = arith.constant 1 : i32
    %661 = tpu.dynamic_rotate %651 by %c1_i32_224 dim 0 : vector<64x64xf32>, i32 -> vector<64x64xf32>
    %cst_225 = arith.constant 0.000000e+00 : f32
    %662 = vector.shape_cast %660 : vector<64x1xi1> to vector<64x1xi1>
    %663 = vector.broadcast %662 : vector<64x1xi1> to vector<64x64xi1>
    %664 = vector.broadcast %cst_225 : f32 to vector<64x64xf32>
    %665 = arith.select %663, %661, %664 : vector<64x64xi1>, vector<64x64xf32>
    %666 = arith.mulf %648, %665 : vector<64x64xf32>
    %667 = arith.addf %666, %651 : vector<64x64xf32>
    %668 = arith.mulf %648, %658 : vector<64x64xf32>
    %c2_i32_226 = arith.constant 2 : i32
    %669 = vector.broadcast %c2_i32_226 : i32 to vector<64x1xi32>
    %670 = arith.cmpi sge, %20, %669 : vector<64x1xi32>
    %c2_i32_227 = arith.constant 2 : i32
    %671 = tpu.dynamic_rotate %668 by %c2_i32_227 dim 0 : vector<64x64xf32>, i32 -> vector<64x64xf32>
    %cst_228 = arith.constant 1.000000e+00 : f32
    %672 = vector.shape_cast %670 : vector<64x1xi1> to vector<64x1xi1>
    %673 = vector.broadcast %672 : vector<64x1xi1> to vector<64x64xi1>
    %674 = vector.broadcast %cst_228 : f32 to vector<64x64xf32>
    %675 = arith.select %673, %671, %674 : vector<64x64xi1>, vector<64x64xf32>
    %c2_i32_229 = arith.constant 2 : i32
    %676 = vector.broadcast %c2_i32_229 : i32 to vector<64x1xi32>
    %677 = arith.cmpi sge, %20, %676 : vector<64x1xi32>
    %c2_i32_230 = arith.constant 2 : i32
    %678 = tpu.dynamic_rotate %667 by %c2_i32_230 dim 0 : vector<64x64xf32>, i32 -> vector<64x64xf32>
    %cst_231 = arith.constant 0.000000e+00 : f32
    %679 = vector.shape_cast %677 : vector<64x1xi1> to vector<64x1xi1>
    %680 = vector.broadcast %679 : vector<64x1xi1> to vector<64x64xi1>
    %681 = vector.broadcast %cst_231 : f32 to vector<64x64xf32>
    %682 = arith.select %680, %678, %681 : vector<64x64xi1>, vector<64x64xf32>
    %683 = arith.mulf %668, %682 : vector<64x64xf32>
    %684 = arith.addf %683, %667 : vector<64x64xf32>
    %685 = arith.mulf %668, %675 : vector<64x64xf32>
    %c4_i32_232 = arith.constant 4 : i32
    %686 = vector.broadcast %c4_i32_232 : i32 to vector<64x1xi32>
    %687 = arith.cmpi sge, %20, %686 : vector<64x1xi32>
    %c4_i32_233 = arith.constant 4 : i32
    %688 = tpu.dynamic_rotate %685 by %c4_i32_233 dim 0 : vector<64x64xf32>, i32 -> vector<64x64xf32>
    %cst_234 = arith.constant 1.000000e+00 : f32
    %689 = vector.shape_cast %687 : vector<64x1xi1> to vector<64x1xi1>
    %690 = vector.broadcast %689 : vector<64x1xi1> to vector<64x64xi1>
    %691 = vector.broadcast %cst_234 : f32 to vector<64x64xf32>
    %692 = arith.select %690, %688, %691 : vector<64x64xi1>, vector<64x64xf32>
    %c4_i32_235 = arith.constant 4 : i32
    %693 = vector.broadcast %c4_i32_235 : i32 to vector<64x1xi32>
    %694 = arith.cmpi sge, %20, %693 : vector<64x1xi32>
    %c4_i32_236 = arith.constant 4 : i32
    %695 = tpu.dynamic_rotate %684 by %c4_i32_236 dim 0 : vector<64x64xf32>, i32 -> vector<64x64xf32>
    %cst_237 = arith.constant 0.000000e+00 : f32
    %696 = vector.shape_cast %694 : vector<64x1xi1> to vector<64x1xi1>
    %697 = vector.broadcast %696 : vector<64x1xi1> to vector<64x64xi1>
    %698 = vector.broadcast %cst_237 : f32 to vector<64x64xf32>
    %699 = arith.select %697, %695, %698 : vector<64x64xi1>, vector<64x64xf32>
    %700 = arith.mulf %685, %699 : vector<64x64xf32>
    %701 = arith.addf %700, %684 : vector<64x64xf32>
    %702 = arith.mulf %685, %692 : vector<64x64xf32>
    %c8_i32_238 = arith.constant 8 : i32
    %703 = vector.broadcast %c8_i32_238 : i32 to vector<64x1xi32>
    %704 = arith.cmpi sge, %20, %703 : vector<64x1xi32>
    %c8_i32_239 = arith.constant 8 : i32
    %705 = tpu.dynamic_rotate %701 by %c8_i32_239 dim 0 : vector<64x64xf32>, i32 -> vector<64x64xf32>
    %cst_240 = arith.constant 0.000000e+00 : f32
    %706 = vector.shape_cast %704 : vector<64x1xi1> to vector<64x1xi1>
    %707 = vector.broadcast %706 : vector<64x1xi1> to vector<64x64xi1>
    %708 = vector.broadcast %cst_240 : f32 to vector<64x64xf32>
    %709 = arith.select %707, %705, %708 : vector<64x64xi1>, vector<64x64xf32>
    %710 = arith.mulf %702, %709 : vector<64x64xf32>
    %711 = arith.addf %710, %701 : vector<64x64xf32>
    %712 = vector.extract_strided_slice %194 {offsets = [0, 6], sizes = [64, 1], strides = [1, 1]} : vector<64x8xf32> to vector<64x1xf32>
    %713 = vector.broadcast %712 : vector<64x1xf32> to vector<64x64xf32>
    %714 = arith.mulf %713, %711 : vector<64x64xf32>
    %715 = arith.addf %644, %714 : vector<64x64xf32>
    %716 = vector.extract_strided_slice %213 {offsets = [7, 0], sizes = [1, 64], strides = [1, 1]} : vector<8x64xf32> to vector<1x64xf32>
    %717 = vector.broadcast %716 : vector<1x64xf32> to vector<64x64xf32>
    %718 = arith.mulf %211, %717 : vector<64x64xf32>
    %719 = math.exp %718 : vector<64x64xf32>
    %720 = vector.extract_strided_slice %191 {offsets = [0, 7], sizes = [64, 1], strides = [1, 1]} : vector<64x8xf32> to vector<64x1xf32>
    %721 = vector.broadcast %720 : vector<64x1xf32> to vector<64x64xf32>
    %722 = arith.mulf %214, %721 : vector<64x64xf32>
    %c1_i32_241 = arith.constant 1 : i32
    %723 = vector.broadcast %c1_i32_241 : i32 to vector<64x1xi32>
    %724 = arith.cmpi sge, %20, %723 : vector<64x1xi32>
    %c1_i32_242 = arith.constant 1 : i32
    %725 = tpu.dynamic_rotate %719 by %c1_i32_242 dim 0 : vector<64x64xf32>, i32 -> vector<64x64xf32>
    %cst_243 = arith.constant 1.000000e+00 : f32
    %726 = vector.shape_cast %724 : vector<64x1xi1> to vector<64x1xi1>
    %727 = vector.broadcast %726 : vector<64x1xi1> to vector<64x64xi1>
    %728 = vector.broadcast %cst_243 : f32 to vector<64x64xf32>
    %729 = arith.select %727, %725, %728 : vector<64x64xi1>, vector<64x64xf32>
    %c1_i32_244 = arith.constant 1 : i32
    %730 = vector.broadcast %c1_i32_244 : i32 to vector<64x1xi32>
    %731 = arith.cmpi sge, %20, %730 : vector<64x1xi32>
    %c1_i32_245 = arith.constant 1 : i32
    %732 = tpu.dynamic_rotate %722 by %c1_i32_245 dim 0 : vector<64x64xf32>, i32 -> vector<64x64xf32>
    %cst_246 = arith.constant 0.000000e+00 : f32
    %733 = vector.shape_cast %731 : vector<64x1xi1> to vector<64x1xi1>
    %734 = vector.broadcast %733 : vector<64x1xi1> to vector<64x64xi1>
    %735 = vector.broadcast %cst_246 : f32 to vector<64x64xf32>
    %736 = arith.select %734, %732, %735 : vector<64x64xi1>, vector<64x64xf32>
    %737 = arith.mulf %719, %736 : vector<64x64xf32>
    %738 = arith.addf %737, %722 : vector<64x64xf32>
    %739 = arith.mulf %719, %729 : vector<64x64xf32>
    %c2_i32_247 = arith.constant 2 : i32
    %740 = vector.broadcast %c2_i32_247 : i32 to vector<64x1xi32>
    %741 = arith.cmpi sge, %20, %740 : vector<64x1xi32>
    %c2_i32_248 = arith.constant 2 : i32
    %742 = tpu.dynamic_rotate %739 by %c2_i32_248 dim 0 : vector<64x64xf32>, i32 -> vector<64x64xf32>
    %cst_249 = arith.constant 1.000000e+00 : f32
    %743 = vector.shape_cast %741 : vector<64x1xi1> to vector<64x1xi1>
    %744 = vector.broadcast %743 : vector<64x1xi1> to vector<64x64xi1>
    %745 = vector.broadcast %cst_249 : f32 to vector<64x64xf32>
    %746 = arith.select %744, %742, %745 : vector<64x64xi1>, vector<64x64xf32>
    %c2_i32_250 = arith.constant 2 : i32
    %747 = vector.broadcast %c2_i32_250 : i32 to vector<64x1xi32>
    %748 = arith.cmpi sge, %20, %747 : vector<64x1xi32>
    %c2_i32_251 = arith.constant 2 : i32
    %749 = tpu.dynamic_rotate %738 by %c2_i32_251 dim 0 : vector<64x64xf32>, i32 -> vector<64x64xf32>
    %cst_252 = arith.constant 0.000000e+00 : f32
    %750 = vector.shape_cast %748 : vector<64x1xi1> to vector<64x1xi1>
    %751 = vector.broadcast %750 : vector<64x1xi1> to vector<64x64xi1>
    %752 = vector.broadcast %cst_252 : f32 to vector<64x64xf32>
    %753 = arith.select %751, %749, %752 : vector<64x64xi1>, vector<64x64xf32>
    %754 = arith.mulf %739, %753 : vector<64x64xf32>
    %755 = arith.addf %754, %738 : vector<64x64xf32>
    %756 = arith.mulf %739, %746 : vector<64x64xf32>
    %c4_i32_253 = arith.constant 4 : i32
    %757 = vector.broadcast %c4_i32_253 : i32 to vector<64x1xi32>
    %758 = arith.cmpi sge, %20, %757 : vector<64x1xi32>
    %c4_i32_254 = arith.constant 4 : i32
    %759 = tpu.dynamic_rotate %756 by %c4_i32_254 dim 0 : vector<64x64xf32>, i32 -> vector<64x64xf32>
    %cst_255 = arith.constant 1.000000e+00 : f32
    %760 = vector.shape_cast %758 : vector<64x1xi1> to vector<64x1xi1>
    %761 = vector.broadcast %760 : vector<64x1xi1> to vector<64x64xi1>
    %762 = vector.broadcast %cst_255 : f32 to vector<64x64xf32>
    %763 = arith.select %761, %759, %762 : vector<64x64xi1>, vector<64x64xf32>
    %c4_i32_256 = arith.constant 4 : i32
    %764 = vector.broadcast %c4_i32_256 : i32 to vector<64x1xi32>
    %765 = arith.cmpi sge, %20, %764 : vector<64x1xi32>
    %c4_i32_257 = arith.constant 4 : i32
    %766 = tpu.dynamic_rotate %755 by %c4_i32_257 dim 0 : vector<64x64xf32>, i32 -> vector<64x64xf32>
    %cst_258 = arith.constant 0.000000e+00 : f32
    %767 = vector.shape_cast %765 : vector<64x1xi1> to vector<64x1xi1>
    %768 = vector.broadcast %767 : vector<64x1xi1> to vector<64x64xi1>
    %769 = vector.broadcast %cst_258 : f32 to vector<64x64xf32>
    %770 = arith.select %768, %766, %769 : vector<64x64xi1>, vector<64x64xf32>
    %771 = arith.mulf %756, %770 : vector<64x64xf32>
    %772 = arith.addf %771, %755 : vector<64x64xf32>
    %773 = arith.mulf %756, %763 : vector<64x64xf32>
    %c8_i32_259 = arith.constant 8 : i32
    %774 = vector.broadcast %c8_i32_259 : i32 to vector<64x1xi32>
    %775 = arith.cmpi sge, %20, %774 : vector<64x1xi32>
    %c8_i32_260 = arith.constant 8 : i32
    %776 = tpu.dynamic_rotate %772 by %c8_i32_260 dim 0 : vector<64x64xf32>, i32 -> vector<64x64xf32>
    %cst_261 = arith.constant 0.000000e+00 : f32
    %777 = vector.shape_cast %775 : vector<64x1xi1> to vector<64x1xi1>
    %778 = vector.broadcast %777 : vector<64x1xi1> to vector<64x64xi1>
    %779 = vector.broadcast %cst_261 : f32 to vector<64x64xf32>
    %780 = arith.select %778, %776, %779 : vector<64x64xi1>, vector<64x64xf32>
    %781 = arith.mulf %773, %780 : vector<64x64xf32>
    %782 = arith.addf %781, %772 : vector<64x64xf32>
    %783 = vector.extract_strided_slice %194 {offsets = [0, 7], sizes = [64, 1], strides = [1, 1]} : vector<64x8xf32> to vector<64x1xf32>
    %784 = vector.broadcast %783 : vector<64x1xf32> to vector<64x64xf32>
    %785 = arith.mulf %784, %782 : vector<64x64xf32>
    %786 = arith.addf %715, %785 : vector<64x64xf32>
    %cst_262 = arith.constant 0.000000e+00 : f32
    %787 = vector.broadcast %cst_262 : f32 to vector<64x64xf32>
    %788 = arith.subf %787, %135 : vector<64x64xf32>
    %789 = math.exp %788 : vector<64x64xf32>
    %cst_263 = arith.constant 1.000000e+00 : f32
    %790 = vector.broadcast %cst_263 : f32 to vector<64x64xf32>
    %791 = arith.addf %790, %789 : vector<64x64xf32>
    %cst_264 = arith.constant 1.000000e+00 : f32
    %792 = vector.broadcast %cst_264 : f32 to vector<64x64xf32>
    %793 = arith.divf %792, %791 : vector<64x64xf32>
    %794 = arith.mulf %135, %793 : vector<64x64xf32>
    %795 = arith.mulf %786, %794 : vector<64x64xf32>
    %796 = arith.truncf %795 : vector<64x64xf32> to vector<64x64xbf16>
    %c0_265 = arith.constant 0 : index
    %c0_266 = arith.constant 0 : index
    %c0_267 = arith.constant 0 : index
    %797 = vector.load %arg20[%c0_265, %c0_266, %c0_267] : memref<1x64x32xbf16, #tpu.memory_space<vmem>>, vector<1x64x32xbf16>
    %798 = vector.shape_cast %797 : vector<1x64x32xbf16> to vector<64x32xbf16>
    %cst_268 = arith.constant dense<0.000000e+00> : vector<64x32xf32>
    %799 = tpu.matmul %796, %798, %cst_268 {dimension_numbers = #tpu.dot_dimension_numbers<[1], [0], [0], [1], [0, 0, 1, 1], [], []>} : vector<64x64xbf16>, vector<64x32xbf16>, vector<64x32xf32> -> vector<64x32xf32>
    %c0_269 = arith.constant 0 : index
    %c0_270 = arith.constant 0 : index
    %c0_271 = arith.constant 0 : index
    %800 = vector.load %arg7[%c0_269, %c0_270, %c0_271] : memref<1x1x32xf32, #tpu.memory_space<vmem>>, vector<1x1x32xf32>
    %801 = vector.shape_cast %800 : vector<1x1x32xf32> to vector<1x32xf32>
    %c0_272 = arith.constant 0 : index
    %c0_273 = arith.constant 0 : index
    %c0_274 = arith.constant 0 : index
    %802 = vector.load %arg8[%c0_272, %c0_273, %c0_274] : memref<1x1x1xf32, #tpu.memory_space<vmem>>, vector<1x1x1xf32>
    %803 = vector.shape_cast %802 : vector<1x1x1xf32> to vector<1x1xf32>
    %c0_275 = arith.constant 0 : index
    %c0_276 = arith.constant 0 : index
    %c0_277 = arith.constant 0 : index
    %c0_278 = arith.constant 0 : index
    %804 = vector.load %arg21[%c0_275, %c0_276, %c0_277, %c0_278] : memref<1x2x1x32xf32, #tpu.memory_space<vmem>>, vector<1x2x1x32xf32>
    %805 = vector.shape_cast %804 : vector<1x2x1x32xf32> to vector<2x1x32xf32>
    %c0_279 = arith.constant 0 : index
    %c0_280 = arith.constant 0 : index
    %c0_281 = arith.constant 0 : index
    %c0_282 = arith.constant 0 : index
    %806 = vector.load %arg22[%c0_279, %c0_280, %c0_281, %c0_282] : memref<1x2x1x32xf32, #tpu.memory_space<vmem>>, vector<1x2x1x32xf32>
    %807 = vector.shape_cast %806 : vector<1x2x1x32xf32> to vector<2x1x32xf32>
    %808 = vector.extract_strided_slice %799 {offsets = [0, 0], sizes = [32, 32], strides = [1, 1]} : vector<64x32xf32> to vector<32x32xf32>
    %809 = vector.broadcast %801 : vector<1x32xf32> to vector<32x32xf32>
    %810 = arith.mulf %808, %809 : vector<32x32xf32>
    %cst_283 = arith.constant dense<0.000000e+00> : vector<32xf32>
    %811 = vector.multi_reduction <add>, %810, %cst_283 [1] : vector<32x32xf32> to vector<32xf32>
    %812 = vector.shape_cast %811 : vector<32xf32> to vector<32x1xf32>
    %813 = vector.broadcast %803 : vector<1x1xf32> to vector<32x1xf32>
    %814 = arith.mulf %812, %813 : vector<32x1xf32>
    %815 = vector.broadcast %814 : vector<32x1xf32> to vector<32x32xf32>
    %816 = arith.subf %808, %815 : vector<32x32xf32>
    %817 = vector.broadcast %801 : vector<1x32xf32> to vector<32x32xf32>
    %818 = arith.mulf %816, %817 : vector<32x32xf32>
    %819 = arith.mulf %818, %818 : vector<32x32xf32>
    %cst_284 = arith.constant dense<0.000000e+00> : vector<32xf32>
    %820 = vector.multi_reduction <add>, %819, %cst_284 [1] : vector<32x32xf32> to vector<32xf32>
    %821 = vector.shape_cast %820 : vector<32xf32> to vector<32x1xf32>
    %822 = vector.broadcast %803 : vector<1x1xf32> to vector<32x1xf32>
    %823 = arith.mulf %821, %822 : vector<32x1xf32>
    %cst_285 = arith.constant 9.99999997E-7 : f32
    %824 = vector.broadcast %cst_285 : f32 to vector<32x1xf32>
    %825 = arith.addf %823, %824 : vector<32x1xf32>
    %826 = math.rsqrt %825 : vector<32x1xf32>
    %827 = vector.broadcast %826 : vector<32x1xf32> to vector<32x32xf32>
    %828 = arith.mulf %818, %827 : vector<32x32xf32>
    %829 = vector.extract_strided_slice %805 {offsets = [0, 0, 0], sizes = [1, 1, 32], strides = [1, 1, 1]} : vector<2x1x32xf32> to vector<1x1x32xf32>
    %830 = vector.shape_cast %829 : vector<1x1x32xf32> to vector<1x32xf32>
    %831 = vector.broadcast %830 : vector<1x32xf32> to vector<32x32xf32>
    %832 = arith.mulf %828, %831 : vector<32x32xf32>
    %833 = vector.extract_strided_slice %807 {offsets = [0, 0, 0], sizes = [1, 1, 32], strides = [1, 1, 1]} : vector<2x1x32xf32> to vector<1x1x32xf32>
    %834 = vector.shape_cast %833 : vector<1x1x32xf32> to vector<1x32xf32>
    %835 = vector.broadcast %834 : vector<1x32xf32> to vector<32x32xf32>
    %836 = arith.addf %832, %835 : vector<32x32xf32>
    %837 = vector.extract_strided_slice %128 {offsets = [0, 0], sizes = [32, 32], strides = [1, 1]} : vector<64x32xf32> to vector<32x32xf32>
    %838 = arith.addf %837, %836 : vector<32x32xf32>
    %839 = vector.extract_strided_slice %799 {offsets = [32, 0], sizes = [32, 32], strides = [1, 1]} : vector<64x32xf32> to vector<32x32xf32>
    %840 = vector.broadcast %801 : vector<1x32xf32> to vector<32x32xf32>
    %841 = arith.mulf %839, %840 : vector<32x32xf32>
    %cst_286 = arith.constant dense<0.000000e+00> : vector<32xf32>
    %842 = vector.multi_reduction <add>, %841, %cst_286 [1] : vector<32x32xf32> to vector<32xf32>
    %843 = vector.shape_cast %842 : vector<32xf32> to vector<32x1xf32>
    %844 = vector.broadcast %803 : vector<1x1xf32> to vector<32x1xf32>
    %845 = arith.mulf %843, %844 : vector<32x1xf32>
    %846 = vector.broadcast %845 : vector<32x1xf32> to vector<32x32xf32>
    %847 = arith.subf %839, %846 : vector<32x32xf32>
    %848 = vector.broadcast %801 : vector<1x32xf32> to vector<32x32xf32>
    %849 = arith.mulf %847, %848 : vector<32x32xf32>
    %850 = arith.mulf %849, %849 : vector<32x32xf32>
    %cst_287 = arith.constant dense<0.000000e+00> : vector<32xf32>
    %851 = vector.multi_reduction <add>, %850, %cst_287 [1] : vector<32x32xf32> to vector<32xf32>
    %852 = vector.shape_cast %851 : vector<32xf32> to vector<32x1xf32>
    %853 = vector.broadcast %803 : vector<1x1xf32> to vector<32x1xf32>
    %854 = arith.mulf %852, %853 : vector<32x1xf32>
    %cst_288 = arith.constant 9.99999997E-7 : f32
    %855 = vector.broadcast %cst_288 : f32 to vector<32x1xf32>
    %856 = arith.addf %854, %855 : vector<32x1xf32>
    %857 = math.rsqrt %856 : vector<32x1xf32>
    %858 = vector.broadcast %857 : vector<32x1xf32> to vector<32x32xf32>
    %859 = arith.mulf %849, %858 : vector<32x32xf32>
    %860 = vector.extract_strided_slice %805 {offsets = [1, 0, 0], sizes = [1, 1, 32], strides = [1, 1, 1]} : vector<2x1x32xf32> to vector<1x1x32xf32>
    %861 = vector.shape_cast %860 : vector<1x1x32xf32> to vector<1x32xf32>
    %862 = vector.broadcast %861 : vector<1x32xf32> to vector<32x32xf32>
    %863 = arith.mulf %859, %862 : vector<32x32xf32>
    %864 = vector.extract_strided_slice %807 {offsets = [1, 0, 0], sizes = [1, 1, 32], strides = [1, 1, 1]} : vector<2x1x32xf32> to vector<1x1x32xf32>
    %865 = vector.shape_cast %864 : vector<1x1x32xf32> to vector<1x32xf32>
    %866 = vector.broadcast %865 : vector<1x32xf32> to vector<32x32xf32>
    %867 = arith.addf %863, %866 : vector<32x32xf32>
    %868 = vector.extract_strided_slice %128 {offsets = [32, 0], sizes = [32, 32], strides = [1, 1]} : vector<64x32xf32> to vector<32x32xf32>
    %869 = arith.addf %868, %867 : vector<32x32xf32>
    %870 = tpu.concatenate %838, %869 in 0 : vector<32x32xf32>, vector<32x32xf32> -> vector<64x32xf32>
    %c0_289 = arith.constant 0 : index
    %c0_290 = arith.constant 0 : index
    %871 = vector.load %arg23[%c0_289, %c0_290] : memref<64x32xf32, #tpu.memory_space<vmem>>, vector<64x32xf32>
    tpu.vector_store %arg23[%c0_289, %c0_290], %870 {strides = array<i32>} : memref<64x32xf32, #tpu.memory_space<vmem>>, vector<64x32xf32>,
    return
  }
  func.func @transform_0(%arg0: i32) -> (i32, i32) {
    %c0_i32 = arith.constant 0 : i32
    %c0_i32_0 = arith.constant 0 : i32
    %c0_i32_1 = arith.constant 0 : i32
    return %c0_i32, %c0_i32_0 : i32, i32
  }
  func.func @transform_1(%arg0: i32) -> (i32, i32, i32, i32) {
    %c0_i32 = arith.constant 0 : i32
    %c0_i32_0 = arith.constant 0 : i32
    %c0_i32_1 = arith.constant 0 : i32
    %c0_i32_2 = arith.constant 0 : i32
    return %arg0, %c0_i32, %c0_i32_0, %c0_i32_1 : i32, i32, i32, i32
  }
  func.func @transform_2(%arg0: i32) -> (i32, i32, i32, i32) {
    %c0_i32 = arith.constant 0 : i32
    %c0_i32_0 = arith.constant 0 : i32
    %c0_i32_1 = arith.constant 0 : i32
    %c0_i32_2 = arith.constant 0 : i32
    return %arg0, %c0_i32, %c0_i32_0, %c0_i32_1 : i32, i32, i32, i32
  }
  func.func @transform_3(%arg0: i32) -> (i32, i32, i32) {
    %c0_i32 = arith.constant 0 : i32
    %c0_i32_0 = arith.constant 0 : i32
    %c0_i32_1 = arith.constant 0 : i32
    return %arg0, %c0_i32, %c0_i32_0 : i32, i32, i32
  }
  func.func @transform_4(%arg0: i32) -> (i32, i32, i32, i32) {
    %c0_i32 = arith.constant 0 : i32
    %c0_i32_0 = arith.constant 0 : i32
    %c0_i32_1 = arith.constant 0 : i32
    %c0_i32_2 = arith.constant 0 : i32
    return %arg0, %c0_i32, %c0_i32_0, %c0_i32_1 : i32, i32, i32, i32
  }
  func.func @transform_5(%arg0: i32) -> (i32, i32, i32, i32) {
    %c0_i32 = arith.constant 0 : i32
    %c0_i32_0 = arith.constant 0 : i32
    %c0_i32_1 = arith.constant 0 : i32
    %c0_i32_2 = arith.constant 0 : i32
    return %arg0, %c0_i32, %c0_i32_0, %c0_i32_1 : i32, i32, i32, i32
  }
  func.func @transform_6(%arg0: i32) -> (i32, i32, i32) {
    %c0_i32 = arith.constant 0 : i32
    %c0_i32_0 = arith.constant 0 : i32
    %c0_i32_1 = arith.constant 0 : i32
    return %arg0, %c0_i32, %c0_i32_0 : i32, i32, i32
  }
  func.func @transform_7(%arg0: i32) -> (i32, i32, i32) {
    %c0_i32 = arith.constant 0 : i32
    %c0_i32_0 = arith.constant 0 : i32
    %c0_i32_1 = arith.constant 0 : i32
    return %arg0, %c0_i32, %c0_i32_0 : i32, i32, i32
  }
  func.func @transform_8(%arg0: i32) -> (i32, i32, i32) {
    %c0_i32 = arith.constant 0 : i32
    %c0_i32_0 = arith.constant 0 : i32
    %c0_i32_1 = arith.constant 0 : i32
    return %arg0, %c0_i32, %c0_i32_0 : i32, i32, i32
  }
  func.func @transform_9(%arg0: i32) -> (i32, i32, i32) {
    %c0_i32 = arith.constant 0 : i32
    %c0_i32_0 = arith.constant 0 : i32
    %c0_i32_1 = arith.constant 0 : i32
    return %arg0, %c0_i32, %c0_i32_0 : i32, i32, i32
  }
  func.func @transform_10(%arg0: i32) -> (i32, i32, i32) {
    %c0_i32 = arith.constant 0 : i32
    %c0_i32_0 = arith.constant 0 : i32
    %c0_i32_1 = arith.constant 0 : i32
    return %arg0, %c0_i32, %c0_i32_0 : i32, i32, i32
  }
  func.func @transform_11(%arg0: i32) -> (i32, i32, i32) {
    %c0_i32 = arith.constant 0 : i32
    %c0_i32_0 = arith.constant 0 : i32
    %c0_i32_1 = arith.constant 0 : i32
    return %arg0, %c0_i32, %c0_i32_0 : i32, i32, i32
  }
  func.func @transform_12(%arg0: i32) -> (i32, i32, i32) {
    %c0_i32 = arith.constant 0 : i32
    %c0_i32_0 = arith.constant 0 : i32
    %c0_i32_1 = arith.constant 0 : i32
    return %arg0, %c0_i32, %c0_i32_0 : i32, i32, i32
  }
  func.func @transform_13(%arg0: i32) -> (i32, i32, i32) {
    %c0_i32 = arith.constant 0 : i32
    %c0_i32_0 = arith.constant 0 : i32
    %c0_i32_1 = arith.constant 0 : i32
    return %arg0, %c0_i32, %c0_i32_0 : i32, i32, i32
  }
  func.func @transform_14(%arg0: i32) -> (i32, i32, i32) {
    %c0_i32 = arith.constant 0 : i32
    %c0_i32_0 = arith.constant 0 : i32
    %c0_i32_1 = arith.constant 0 : i32
    return %arg0, %c0_i32, %c0_i32_0 : i32, i32, i32
  }
  func.func @transform_15(%arg0: i32) -> (i32, i32, i32) {
    %c0_i32 = arith.constant 0 : i32
    %c0_i32_0 = arith.constant 0 : i32
    %c0_i32_1 = arith.constant 0 : i32
    return %arg0, %c0_i32, %c0_i32_0 : i32, i32, i32
  }
  func.func @transform_16(%arg0: i32) -> (i32, i32, i32) {
    %c0_i32 = arith.constant 0 : i32
    %c0_i32_0 = arith.constant 0 : i32
    %c0_i32_1 = arith.constant 0 : i32
    return %arg0, %c0_i32, %c0_i32_0 : i32, i32, i32
  }
  func.func @transform_17(%arg0: i32) -> (i32, i32, i32) {
    %c0_i32 = arith.constant 0 : i32
    %c0_i32_0 = arith.constant 0 : i32
    %c0_i32_1 = arith.constant 0 : i32
    return %arg0, %c0_i32, %c0_i32_0 : i32, i32, i32
  }
  func.func @transform_18(%arg0: i32) -> (i32, i32, i32) {
    %c0_i32 = arith.constant 0 : i32
    %c0_i32_0 = arith.constant 0 : i32
    %c0_i32_1 = arith.constant 0 : i32
    return %arg0, %c0_i32, %c0_i32_0 : i32, i32, i32
  }
  func.func @transform_19(%arg0: i32) -> (i32, i32, i32) {
    %c0_i32 = arith.constant 0 : i32
    %c0_i32_0 = arith.constant 0 : i32
    %c0_i32_1 = arith.constant 0 : i32
    return %arg0, %c0_i32, %c0_i32_0 : i32, i32, i32
  }
  func.func @transform_20(%arg0: i32) -> (i32, i32, i32, i32) {
    %c0_i32 = arith.constant 0 : i32
    %c0_i32_0 = arith.constant 0 : i32
    %c0_i32_1 = arith.constant 0 : i32
    %c0_i32_2 = arith.constant 0 : i32
    return %arg0, %c0_i32, %c0_i32_0, %c0_i32_1 : i32, i32, i32, i32
  }
  func.func @transform_21(%arg0: i32) -> (i32, i32, i32, i32) {
    %c0_i32 = arith.constant 0 : i32
    %c0_i32_0 = arith.constant 0 : i32
    %c0_i32_1 = arith.constant 0 : i32
    %c0_i32_2 = arith.constant 0 : i32
    return %arg0, %c0_i32, %c0_i32_0, %c0_i32_1 : i32, i32, i32, i32
  }
  func.func @transform_22(%arg0: i32) -> (i32, i32) {
    %c0_i32 = arith.constant 0 : i32
    %c0_i32_0 = arith.constant 0 : i32
    %c0_i32_1 = arith.constant 0 : i32
    return %c0_i32, %c0_i32_0 : i32, i32
  }
}

</mosaic_0001>

<bundles_post_ra>
// kernel: tpu_custom_call.1
= control target key start
LH: loop header
LB: loop body
LE: loop exit
PB: predicated region body
PF: predicated region fallthrough
CT: control target
= control target key end

     0   :  { %s13270_s0 = inlined_call_operand.vmem [shape: f32[64,32], index: 0, kind: input, shape index: {}]   ;;  %s13271_s1 = inlined_call_operand.vmem [shape: bf16[3,2,96,32], index: 1, kind: input, shape index: {}]   ;;  %s13272_s2 = inlined_call_operand.vmem [shape: bf16[3,2,32,32], index: 2, kind: input, shape index: {}]   ;;  %s13273_s3 = inlined_call_operand.vmem [shape: f32[3,1,1], index: 3, kind: input, shape index: {}]   ;;  %s13274_s4 = inlined_call_operand.vmem [shape: f32[3,2,1,32], index: 4, kind: input, shape index: {}]   ;;  %s13275_s5 = inlined_call_operand.vmem [shape: f32[3,2,1,32], index: 5, kind: input, shape index: {}]   ;;  %s13276_s6 = inlined_call_operand.vmem [shape: f32[3,1,32], index: 6, kind: input, shape index: {}]   ;;  %s13277_s7 = inlined_call_operand.vmem [shape: f32[3,1,1], index: 7, kind: input, shape index: {}]   ;;  %s13278_s8 = inlined_call_operand.vmem [shape: bf16[3,32,64], index: 8, kind: input, shape index: {}]   ;;  %s13279_s9 = inlined_call_operand.vmem [shape: bf16[3,32,64], index: 9, kind: input, shape index: {}]   ;;  %s13280_s10 = inlined_call_operand.vmem [shape: f32[3,4,64], index: 10, kind: input, shape index: {}]   ;;  %s13281_s11 = inlined_call_operand.vmem [shape: f32[3,1,64], index: 11, kind: input, shape index: {}]   ;;  %s13282_s12 = inlined_call_operand.vmem [shape: f32[3,64,8], index: 12, kind: input, shape index: {}]   ;;  %s13283_s13 = inlined_call_operand.vmem [shape: f32[3,64,8], index: 13, kind: input, shape index: {}]   ;;  %s13284_s14 = inlined_call_operand.vmem [shape: f32[3,64,8], index: 14, kind: input, shape index: {}]   ;;  %s13285_s15 = inlined_call_operand.vmem [shape: f32[3,8,64], index: 15, kind: input, shape index: {}]   ;;  %s13286_s16 = inlined_call_operand.vmem [shape: f32[3,1,64], index: 16, kind: input, shape index: {}]   ;;  %s13287_s17 = inlined_call_operand.vmem [shape: f32[3,8,64], index: 17, kind: input, shape index: {}]   ;;  %s13288_s18 = inlined_call_operand.vmem [shape: f32[3,1,64], index: 18, kind: input, shape index: {}]   ;;  %s13289_s19 = inlined_call_operand.vmem [shape: bf16[3,64,32], index: 19, kind: input, shape index: {}]   ;;  %s13290_s20 = inlined_call_operand.vmem [shape: f32[3,2,1,32], index: 20, kind: input, shape index: {}]   ;;  %s13291_s21 = inlined_call_operand.vmem [shape: f32[3,2,1,32], index: 21, kind: input, shape index: {}]   ;;  %s13292_s22 = inlined_call_operand.vmem [shape: f32[64,32], index: 22, kind: output, shape index: {}]  }
   0x1   :  { %13818 = sst [smem:[#allocation188_spill]] %s13270_s0 }
   0x2   :  { %13819 = sst [smem:[#allocation189_spill]] %s13271_s1 }
   0x3   :  { %13820 = sst [smem:[#allocation190_spill]] %s13272_s2 }
   0x4   :  { %13821 = sst [smem:[#allocation191_spill]] %s13273_s3  ;;  %s7507_s3 = smov 0  }
   0x5   :  { %13822 = sst [smem:[#allocation192_spill]] %s13274_s4 }
   0x6   :  { %13823 = sst [smem:[#allocation193_spill]] %s13275_s5 }
   0x7   :  { %13824 = sst [smem:[#allocation194_spill]] %s13276_s6 }
   0x8   :  { %13825 = sst [smem:[#allocation195_spill]] %s13277_s7 }
   0x9   :  { %13826 = sst [smem:[#allocation196_spill]] %s13278_s8 }
   0xa   :  { %13827 = sst [smem:[#allocation197_spill]] %s13279_s9 }
   0xb   :  { %13828 = sst [smem:[#allocation198_spill]] %s13280_s10 }
   0xc   :  { %13829 = sst [smem:[#allocation199_spill]] %s13281_s11 }
   0xd   :  { %13830 = sst [smem:[#allocation200_spill]] %s13282_s12 }
   0xe   :  { %13831 = sst [smem:[#allocation201_spill]] %s13283_s13 }
   0xf   :  { %13832 = sst [smem:[#allocation202_spill]] %s13284_s14 }
  0x10   :  { %13833 = sst [smem:[#allocation203_spill]] %s13285_s15 }
  0x11   :  { %13834 = sst [smem:[#allocation204_spill]] %s13287_s17 }
  0x12   :  { %13835 = sst [smem:[#allocation205_spill]] %s13288_s18 }
  0x13   :  { %13836 = sst [smem:[#allocation206_spill]] %s13289_s19 }
  0x14   :  { %13837 = sst [smem:[#allocation207_spill]] %s13290_s20 }
  0x15   :  { %13838 = sst [smem:[#allocation208_spill]] %s13291_s21 }
  0x16   :  { %13839 = sst [smem:[#allocation209_spill]] %s13292_s22 }
  0x17 LB: > { %13840 = sst [smem:[#allocation2_spill]] %s7380_s3  ;;  %s7513_s28 = sadd.s32 4294967295, %s7380_s3   ;;  %s7380_s3 = sphi %s7507_s3, %s32_s3  }
  0x18   : > { %13841 = sst [smem:[#allocation3_spill]] %s7513_s28  ;;  %p6511_p0 = scmp.ge.s32.totalorder %s7380_s3, 1 }
  0x19   : > { %p788_p1 = scmp.lt.s32.totalorder %s7380_s3, 4 }
  0x1b   : > { %p789_p2 = pnand %p6511_p0, %p788_p1 }
  0x1d   : > { %792 = sbr.rel (%p789_p2) target bundleno = 2582 (0xa16), region = 108 }
  0x22   : > { %p926_p3 = scmp.lt.s32.totalorder %s7513_s28, 2  ;;  %s13842_s1 = sld [smem:[#allocation190_spill]] }
  0x23   : > { %s13845_s3 = sld [smem:[#allocation189_spill]] }
  0x24   : > { %s7519_s29 = scalar_select %p926_p3, %s7513_s28, 2 }
  0x25   : > { %s13846_s19 = sld [smem:[#allocation192_spill]] }
  0x26   : > { %s6917_s30 = smul.u32 96, %s7519_s29  ;;  %s6623_s4 = sshll.u32 %s7519_s29, 5 }
  0x27   : > { %s6515_s28 = sshll.u32 %s7519_s29, 1  ;;  %s13847_s23 = sld [smem:[#allocation193_spill]] }
  0x28   : > { %s7526_s5 = scalar_lea.vmem %s13842_s1, %s6623_s4  ;;  %s6521_s27 = sshll.u32 %s7519_s29, 2 }
  0x29   : > { %13843 = sst [smem:[#allocation4_spill]] %s7526_s5  ;;  %s7535_s22 = scalar_lea.vmem %s13845_s3, %s6917_s30 }
  0x2a   : > { %s6624_s30 = sshll.u32 %s7519_s29, 4  ;;  %s13851_s8 = sld [smem:[#allocation196_spill]] }
  0x2b   : > { %s7541_s18 = scalar_lea.vmem %s13846_s19, %s6515_s28  ;;  %s13852_s9 = sld [smem:[#allocation197_spill]] }
  0x2c   : > { %s13853_s10 = sld [smem:[#allocation198_spill]]  ;;  %s6626_s3 = sshll.u32 %s7519_s29, 6 }
  0x2d   : > { %s7546_s1 = scalar_lea.vmem %s13847_s23, %s6515_s28  ;;  %s6528_s25 = sshll.u32 %s7519_s29, 3 }
  0x2e   : > { %13848 = sst [smem:[#allocation5_spill]] %s7546_s1 }
  0x2f   : > { %s13856_s12 = sld [smem:[#allocation200_spill]] }
  0x30   : > { %s7561_s21 = scalar_lea.vmem %s13851_s8, %s6624_s30  ;;  %s13857_s13 = sld [smem:[#allocation201_spill]] }
  0x31   : > { %s7566_s23 = scalar_lea.vmem %s13852_s9, %s6624_s30  ;;  %s13858_s14 = sld [smem:[#allocation202_spill]] }
  0x32   : > { %s7571_s24 = scalar_lea.vmem %s13853_s10, %s6521_s27  ;;  %s13859_s15 = sld [smem:[#allocation203_spill]] }
  0x33   : > { %13854 = sst [smem:[#allocation6_spill]] %s7571_s24 }
  0x34   : > { %s13862_s11 = sld [smem:[#allocation205_spill]] }
  0x35   : > { %s7582_s19 = scalar_lea.vmem %s13856_s12, %s6626_s3  ;;  %s13861_s12 = sld [smem:[#allocation204_spill]] }
  0x36   : > { %s7587_s30 = scalar_lea.vmem %s13857_s13, %s6626_s3  ;;  %s13865_s7 = sld [smem:[#allocation208_spill]] }
  0x37   : > { %s7592_s27 = scalar_lea.vmem %s13858_s14, %s6626_s3  ;;  %s13863_s14 = sld [smem:[#allocation206_spill]] }
  0x38   : > { %s7597_s6 = scalar_lea.vmem %s13859_s15, %s6528_s25  ;;  %s13864_s15 = sld [smem:[#allocation207_spill]] }
  0x39   : > { %13860 = sst [smem:[#allocation7_spill]] %s7597_s6 }
  0x3a   : > { %s998_s0 = scalar_lea.vmem %s13862_s11, %s7519_s29 }
  0x3b   : > { %s7606_s8 = scalar_lea.vmem %s13861_s12, %s6528_s25  ;;  %s13866_s12 = sld [smem:[#allocation3_spill]] }
  0x3c   : > { %s7625_s10 = scalar_lea.vmem %s13865_s7, %s6515_s28 }
  0x3d   : > { %s7615_s24 = scalar_lea.vmem %s13863_s14, %s6623_s4 }
  0x3e   : > { %s7620_s6 = scalar_lea.vmem %s13864_s15, %s6515_s28 }
  0x41   : > { %p6534_p4 = scmp.ne.s32.totalorder %s13866_s12, 0 }
  0x42   : > { %s13867_s25 = sld [smem:[#allocation188_spill]] (!%p6534_p4) }
  0x43   : > { %1016 = sbr.rel (%p6534_p4) target bundleno = 77 (0x4d), region = 112  ;;  %s13868_s28 = sld [smem:[#allocation209_spill]] (!%p6534_p4) }
  0x48   : > { %v1017_v0 = vld [vmem:[%s13867_s25] sm:$0xff]  ;;  %vm1025_vm0 = vcmask 261120   ;;  %v1018_v1 = vld [vmem:[%s13867_s25 + $0x8] sm:$0xff]  ;;  %v1019_v2 = vld [vmem:[%s13867_s25 + $0x10] sm:$0xff] }
  0x49   : > { %1026 = vst.msk [vmem:[%s13868_s28] sm:$0xff] %vm1025_vm0, %v1017_v0  ;;  %1027 = vst.msk [vmem:[%s13868_s28 + $0x8] sm:$0xff] %vm1025_vm0, %v1018_v1  ;;  %v1020_v3 = vld [vmem:[%s13867_s25 + $0x18] sm:$0xff]  ;;  %v1021_v4 = vld [vmem:[%s13867_s25 + $0x20] sm:$0xff] }
  0x4a   : > { %1028 = vst.msk [vmem:[%s13868_s28 + $0x10] sm:$0xff] %vm1025_vm0, %v1019_v2  ;;  %v1022_v5 = vld [vmem:[%s13867_s25 + $0x28] sm:$0xff]  ;;  %1029 = vst.msk [vmem:[%s13868_s28 + $0x18] sm:$0xff] %vm1025_vm0, %v1020_v3  ;;  %v1023_v6 = vld [vmem:[%s13867_s25 + $0x30] sm:$0xff] }
  0x4b   : > { %1030 = vst.msk [vmem:[%s13868_s28 + $0x20] sm:$0xff] %vm1025_vm0, %v1021_v4  ;;  %1031 = vst.msk [vmem:[%s13868_s28 + $0x28] sm:$0xff] %vm1025_vm0, %v1022_v5  ;;  %v1024_v7 = vld [vmem:[%s13867_s25 + $0x38] sm:$0xff] }
  0x4c   : > { %1032 = vst.msk [vmem:[%s13868_s28 + $0x30] sm:$0xff] %vm1025_vm0, %v1023_v6  ;;  %1033 = vst.msk [vmem:[%s13868_s28 + $0x38] sm:$0xff] %vm1025_vm0, %v1024_v7 }
  0x4d PF: > { %s13869_s20 = sld [smem:[#allocation209_spill]]  ;;  %v1042_v11 = vlaneseq  ;;  %vm1309_vm1 = vcmask 261120   ;;  %s7382_s15 = smov 32   ;;  %v7108_v40 = vld [vmem:[%s7535_s22 + $0x28] sm:$0xff]   ;;  %v7109_v47 = vld [vmem:[%s7535_s22 + $0x20] sm:$0xff]   ;;  %v7110_v54 = vld [vmem:[%s7535_s22 + $0x18] sm:$0xff]  }
  0x4e   : > { %s13870_s5 = sld [smem:[#allocation4_spill]]  ;;  %6731 = vmatprep.subr.bf16.mxu0 %v7108_v40  ;;  %v7111_v56 = vld [vmem:[%s7535_s22 + $0x58] sm:$0xff]   ;;  %s7383_s17 = smov 64   ;;  %v7113_v58 = vld [vmem:[%s7535_s22 + $0x50] sm:$0xff]   ;;  %v7115_v63 = vld [vmem:[%s7535_s22 + $0x48] sm:$0xff]   ;;  %v13313_v7 = vmov 0  }
  0x4f   : > { %v7711_v19 = vshrl.u32 %v1042_v11, 7  ;;  %6732 = vmatpush3.bf16.msra.mxu0 %v7108_v40  ;;  %v7112_v61 = vld [vmem:[%s7535_s22 + $0x10] sm:$0xff]   ;;  %v7114_v2 = vld [vmem:[%s7535_s22 + $0x8] sm:$0xff]   ;;  %v7117_v4 = vld [vmem:[%s7535_s22 + $0x40] sm:$0xff]   ;;  %s13875_s28 = sld [smem:[#allocation191_spill]]  ;;  %6976 = vset.pattern.permute.xlu0 %v13313_v7  ;;  %vm1318_vm11 = vcmask 523264   ;;  %s13907_s9 = scalar_lea.vmem %s13286_s16, %s7519_s29 }
  0x50   : > { %6733 = vmatprep.subr.bf16.mxu0 %v7109_v47  ;;  %v7116_v5 = vld [vmem:[%s7535_s22] sm:$0xff]   ;;  %v7118_v11 = vld [vmem:[%s7535_s22 + $0x38] sm:$0xff]   ;;  %6977 = vset.pattern.permute.xlu1 %v13313_v7  ;;  %vm1408_vm12 = vcmask 785408   ;;  %s14935_s13 = sld [smem:[#allocation194_spill]] }
  0x51   : > { %v1044_v28 = vadd.s32 8, %v7711_v19  ;;  %vm1212_vm2 = vcmp.lt.s32.totalorder %v7711_v19, 7  ;;  %v1046_v29 = vadd.s32 24, %v7711_v19  ;;  %v1048_v30 = vadd.s32 40, %v7711_v19 }
  0x52   : > { %v1050_v42 = vadd.s32 56, %v7711_v19  ;;  %vm1163_vm7 = vcmp.lt.s32.totalorder %v7711_v19, 1  ;;  %vm2060_vm14 = vcmp.lt.s32.totalorder %v7711_v19, 3  ;;  %vm2129_vm15 = vcmp.lt.s32.totalorder %v7711_v19, 2 }
  0x53   : > { %v7679_v8 = vld [vmem:[%s13869_s20] sm:$0xff]  ;;  %v7684_v9 = vld [vmem:[%s13869_s20 + $0x8] sm:$0xff]  ;;  %v7689_v10 = vld [vmem:[%s13869_s20 + $0x10] sm:$0xff]  ;;  %v1062_v36 = vand.u32 15, %v1044_v28  ;;  %v1076_v37 = vand.u32 15, %v1046_v29  ;;  %v1090_v38 = vand.u32 15, %v1048_v30  ;;  %6734 = vmatpush3.bf16.msra.mxu0 %v7109_v47 }
  0x54   : > { %v6936_v12 = vpack.i.bf16 %v7684_v9, %v7679_v8  ;;  %v7696_v13 = vld [vmem:[%s13869_s20 + $0x18] sm:$0xff]  ;;  %v1204_v14 = vrot.slane %v7679_v8, 1  ;;  %v1205_v15 = vrot.slane %v7684_v9, 1  ;;  %v1206_v16 = vrot.slane %v7689_v10, 1  ;;  %v7704_v17 = vld [vmem:[%s13869_s20 + $0x20] sm:$0xff]  ;;  %v7709_v18 = vld [vmem:[%s13869_s20 + $0x28] sm:$0xff]  ;;  %6735 = vmatprep.subr.bf16.mxu0 %v7110_v54 }
  0x55   : > { %v1207_v20 = vrot.slane %v7696_v13, 1  ;;  %v7717_v21 = vld [vmem:[%s13869_s20 + $0x30] sm:$0xff]  ;;  %v7722_v22 = vld [vmem:[%s13869_s20 + $0x38] sm:$0xff]  ;;  %v6941_v23 = vpack.i.bf16 %v7696_v13, %v7689_v10  ;;  %v1208_v24 = vrot.slane %v7704_v17, 1  ;;  %v1209_v25 = vrot.slane %v7709_v18, 1  ;;  %v7106_v27 = vld [vmem:[%s13870_s5 + $0x8] sm:$0xff]   ;;  %s13876_s1 = scalar_lea.vmem %s13875_s28, %s7519_s29 }
  0x56   : > { %6937 = vrot.lane.b32.xlu0 %v6936_v12, %s7382_s15  ;;  %v1210_v26 = vrot.slane %v7717_v21, 1  ;;  %v1218_v31 = vsel %vm1212_vm2, %v1205_v15, %v1206_v16  ;;  %v1219_v32 = vsel %vm1212_vm2, %v1204_v14, %v1205_v15  ;;  %v6946_v33 = vpack.i.bf16 %v7709_v18, %v7704_v17  ;;  %6747 = vmatprep.subr.bf16.mxu1 %v7106_v27  ;;  %v7107_v35 = vld [vmem:[%s13870_s5] sm:$0xff]   ;;  %v7119_v12 = vld [vmem:[%s7535_s22 + $0x30] sm:$0xff]   ;;  %s13880_s22 = sld [smem:[#allocation5_spill]]  ;;  %s14936_s11 = scalar_lea.vmem %s14935_s13, %s7519_s29 }
  0x57   : > { %v1216_v34 = vsel %vm1212_vm2, %v1207_v20, %v1208_v24  ;;  %6748 = vmatpush3.bf16.msra.mxu1 %v7106_v27  ;;  %v1217_v41 = vsel %vm1212_vm2, %v1206_v16, %v1207_v20  ;;  %v1211_v43 = vrot.slane %v7722_v22, 1  ;;  %v1331_v44 = vpack.c.bf16 %v7684_v9, %v7679_v8  ;;  %6736 = vmatpush3.bf16.msra.mxu0 %v7110_v54  ;;  %v6543_v6 = vld [vmem:[%s13876_s1] ss:$0 sm:$0xff] }
  0x58   : > { %v1214_v39 = vsel %vm1212_vm2, %v1209_v25, %v1210_v26  ;;  %6749 = vmatprep.subr.bf16.mxu1 %v7107_v35  ;;  %vm1197_vm3 = vcmp.le.s32.totalorder %v1062_v36, 14  ;;  %vm7756_vm4 = vcmp.le.s32.totalorder %v1076_v37, 14  ;;  %vm1201_vm5 = vcmp.le.s32.totalorder %v1090_v38, 14  ;;  %6737 = vmatprep.subr.bf16.mxu0 %v7112_v61 }
  0x59   : > { %v1215_v46 = vsel %vm1212_vm2, %v1208_v24, %v1209_v25  ;;  %v1238_v48 = vsel %vm1197_vm3, %v1218_v31, 0.0  ;;  %v1240_v49 = vsel %vm7756_vm4, %v1216_v34, 0.0  ;;  %v1242_v50 = vsel %vm1201_vm5, %v1214_v39, 0.0  ;;  %6751 = vmatprep.mubr.msk.bf16.mxu1 %vm1309_vm1, %v1331_v44 }
  0x5a   : > { %6942 = vrot.lane.b32.xlu0 %v6941_v23, %s7382_s15  ;;  %v1332_v51 = vpack.c.bf16 %v7696_v13, %v7689_v10  ;;  %v6951_v52 = vpack.i.bf16 %v1238_v48, %v1219_v32  ;;  %v1104_v53 = vand.u32 15, %v1050_v42  ;;  %v6966_v55 = vpack.i.bf16 %v1242_v50, %v1215_v46 }
  0x5b   : > { %6750 = vmatpush3.bf16.msra.mxu1 %v7107_v35  ;;  %v6956_v57 = vpack.i.bf16 %v1240_v49, %v1217_v41  ;;  %v1220_v60 = vsel %vm1212_vm2, %v1211_v43, %v1204_v14  ;;  %v6961_v62 = vpack.i.bf16 %v7722_v22, %v7717_v21  ;;  %v1213_v0 = vsel %vm1212_vm2, %v1210_v26, %v1211_v43  ;;  %v7807_v14 = vld [vmem:[%s13870_s5 + $0x18] sm:$0xff]  }
  0x5c   : > { %6952 = vrot.lane.b32.xlu1 %v6951_v52, %s7383_s17  ;;  %vm7774_vm6 = vcmp.le.s32.totalorder %v1104_v53, 14  ;;  %6755 = vmatprep.subr.bf16.mxu1 %v7111_v56  ;;  %v1047_v15 = vadd.s32 32, %v7711_v19  ;;  %v7812_v16 = vand.u32 15, %v7711_v19  ;;  %v1155_v20 = vrot.slane %v7679_v8, 7 }
  0x5d   : > { %v1244_v1 = vsel %vm7774_vm6, %v1220_v60, 0.0  ;;  %6738 = vmatpush3.bf16.msra.mxu0 %v7112_v61  ;;  %v1162_v23 = vrot.slane %v7722_v22, 7  ;;  %v1045_v24 = vadd.s32 16, %v7711_v19  ;;  %v1159_v27 = vrot.slane %v7704_v17, 7 }
  0x5e   : > { %6947 = vrot.lane.b32.xlu0 %v6946_v33, %s7382_s15  ;;  %6752 = vmatmul.mubr.msk.bf16.vlgmr.msra.gmra.mxu1 %vm1309_vm1, %v1332_v51  ;;  %v6971_v3 = vpack.i.bf16 %v1244_v1, %v1213_v0  ;;  %13877 = vst [vmem:[#allocation8_spill] sm:$0xff] %v7812_v16  ;;  %v7818_v26 = vand.u32 15, %v1047_v15  ;;  %v1156_v28 = vrot.slane %v7684_v9, 7  ;;  %v1157_v29 = vrot.slane %v7689_v10, 7 }
  0x5f   : > { %6756 = vmatpush3.bf16.msra.mxu1 %v7111_v56  ;;  %6739 = vmatprep.subr.bf16.mxu0 %v7114_v2  ;;  %vm1147_vm8 = vcmp.ge.s32.totalorder %v7812_v16, 1  ;;  %v1171_v30 = vsel %vm1163_vm7, %v1162_v23, %v1155_v20  ;;  %v7828_v31 = vand.u32 15, %v1045_v24  ;;  %v1158_v32 = vrot.slane %v7696_v13, 7 }
  0x60   : > { %6957 = vrot.lane.b32.xlu1 %v6956_v57, %s7383_s17  ;;  %6757 = vmatprep.subr.bf16.mxu1 %v7113_v58  ;;  %13878 = vst [vmem:[#allocation9_spill] sm:$0xff] %v7818_v26  ;;  %v1160_v35 = vrot.slane %v7709_v18, 7  ;;  %vm1151_vm9 = vcmp.ge.s32.totalorder %v7818_v26, 1  ;;  %v1188_v38 = vsel %vm1147_vm8, %v1171_v30, 0.0  ;;  %v1169_v39 = vsel %vm1163_vm7, %v1156_v28, %v1157_v29 }
  0x61   : > { %6740 = vmatpush3.bf16.msra.mxu0 %v7114_v2  ;;  %v1167_v37 = vsel %vm1163_vm7, %v1158_v32, %v1159_v27  ;;  %v1170_v40 = vsel %vm1163_vm7, %v1155_v20, %v1156_v28  ;;  %vm1149_vm10 = vcmp.ge.s32.totalorder %v7828_v31, 1  ;;  %v1168_v41 = vsel %vm1163_vm7, %v1157_v29, %v1158_v32 }
  0x62   : > { %6967 = vrot.lane.b32.xlu0 %v6966_v55, %s7383_s17  ;;  %6741 = vmatprep.subr.bf16.mxu0 %v7116_v5  ;;  %v1049_v43 = vadd.s32 48, %v7711_v19  ;;  %v1166_v44 = vsel %vm1163_vm7, %v1159_v27, %v1160_v35  ;;  %v1192_v45 = vsel %vm1151_vm9, %v1167_v37, 0.0  ;;  %v1190_v53 = vsel %vm1149_vm10, %v1169_v39, 0.0 }
  0x63   : > { %6758 = vmatpush3.bf16.msra.mxu1 %v7113_v58  ;;  %v1161_v58 = vrot.slane %v7717_v21, 7  ;;  %vm2046_vm0 = vcmp.ge.s32.totalorder %v7828_v31, 3  ;;  %vm2048_vm2 = vcmp.ge.s32.totalorder %v7818_v26, 3  ;;  %vm2117_vm3 = vcmp.ge.s32.totalorder %v7818_v26, 2 }
  0x64   : > { %6962 = vrot.lane.b32.xlu1 %v6961_v62, %s7382_s15  ;;  %6759 = vmatprep.subr.bf16.mxu1 %v7115_v63  ;;  %v7854_v57 = vand.u32 15, %v1049_v43  ;;  %v1334_v43 = vpack.c.bf16 %v7722_v22, %v7717_v21  ;;  %vm2115_vm4 = vcmp.ge.s32.totalorder %v7828_v31, 2  ;;  %vm2044_vm5 = vcmp.ge.s32.totalorder %v7812_v16, 3  ;;  %s14937_s15 = sld [smem:[#allocation195_spill]] }
  0x65   : > { %6742 = vmatpush3.bf16.msra.mxu0 %v7116_v5  ;;  %v1164_v32 = vsel %vm1163_vm7, %v1161_v58, %v1162_v23  ;;  %vm2113_vm6 = vcmp.ge.s32.totalorder %v7812_v16, 2 }
  0x66   : > { %1536 = vperm.xlu0 %6976, %v6543_v6   ;;  %13879 = vst [vmem:[#allocation10_spill] sm:$0xff] %v7854_v57  ;;  %vm1153_vm13 = vcmp.ge.s32.totalorder %v7854_v57, 1 }
  0x67   : > { %6760 = vmatpush3.bf16.msra.mxu1 %v7115_v63 }
  0x68   : > { %6972 = vrot.lane.b32.xlu1 %v6971_v3, %s7383_s17  ;;  %6761 = vmatprep.subr.bf16.mxu1 %v7117_v4 }
  0x6a   : > { %s14938_s17 = scalar_lea.vmem %s14937_s15, %s7519_s29 }
  0x6b   : > { %6762 = vmatpush3.bf16.msra.mxu1 %v7117_v4 }
  0x6c   : > { %6763 = vmatprep.subr.bf16.mxu1 %v7118_v11 }
  0x6f   : > { %6764 = vmatpush3.bf16.msra.mxu1 %v7118_v11 }
  0x70   : > { %6765 = vmatprep.subr.bf16.mxu1 %v7119_v12 }
  0x73   : > { %6766 = vmatpush3.bf16.msra.mxu1 %v7119_v12 }
  0x74   : > { %6771 = vmatprep.subr.bf16.mxu1 %v7807_v14 }
  0xc8   : > { %v6938_v25 = vpop.permute.xlu0 %6937 }
  0xc9   : > { %v6939_v33 = vunpack.i.l.bf16 %v6938_v25  ;;  %v6940_v36 = vunpack.i.h.bf16 %v6938_v25  ;;  %v1165_v25 = vsel %vm1163_vm7, %v1160_v35, %v1161_v58 }
  0xcb   : > { %v1310_v47 = vsel %vm1309_vm1, %v1188_v38, %v6939_v33  ;;  %v1311_v52 = vsel %vm1309_vm1, %v1170_v40, %v6940_v36  ;;  %v1194_v33 = vsel %vm1153_vm13, %v1165_v25, 0.0 }
  0xcc   : > { %v6943_v34 = vpop.permute.xlu0 %6942 }
  0xcd   : > { %v6945_v42 = vunpack.i.h.bf16 %v6943_v34  ;;  %v6944_v48 = vunpack.i.l.bf16 %v6943_v34 }
  0xce   : > { %v6953_v49 = vpop.permute.xlu1 %6952 }
  0xcf   : > { %v6955_v54 = vunpack.i.h.bf16 %v6953_v49  ;;  %v6954_v55 = vunpack.i.l.bf16 %v6953_v49  ;;  %v1313_v56 = vsel %vm1309_vm1, %v1168_v41, %v6945_v42  ;;  %v1312_v0 = vsel %vm1309_vm1, %v1190_v53, %v6944_v48  ;;  %v7121_v42 = vld [vmem:[%s13870_s5 + $0x10] sm:$0xff]   ;;  %s13893_s5 = sld [smem:[#allocation7_spill]] }
  0xd0   : > { %v6948_v46 = vpop.permute.xlu0 %6947  ;;  %v1333_v41 = vpack.c.bf16 %v7709_v18, %v7704_v17 }
  0xd1   : > { %v6950_v50 = vunpack.i.h.bf16 %v6948_v46  ;;  %v6949_v51 = vunpack.i.l.bf16 %v6948_v46  ;;  %v1319_v61 = vsel %vm1318_vm11, %v1310_v47, %v6954_v55  ;;  %v1320_v62 = vsel %vm1318_vm11, %v1311_v52, %v6955_v54  ;;  %v7124_v46 = vld [vmem:[%s7561_s21] sm:$0xff]  }
  0xd2   : > { %v6958_v1 = vpop.permute.xlu1 %6957  ;;  %v1327_v2 = vpack.c.bf16 %v1320_v62, %v1319_v61  ;;  %v7125_v47 = vld [vmem:[%s7566_s23] sm:$0xff]  }
  0xd3   : > { %v1315_v59 = vsel %vm1309_vm1, %v1166_v44, %v6950_v50  ;;  %v1314_v60 = vsel %vm1309_vm1, %v1192_v45, %v6949_v51  ;;  %v6960_v5 = vunpack.i.h.bf16 %v6958_v1  ;;  %v6959_v6 = vunpack.i.l.bf16 %v6958_v1  ;;  %v7122_v44 = vld [vmem:[%s7561_s21 + $0x8] sm:$0xff]  }
  0xd4   : > { %v6968_v63 = vpop.permute.xlu0 %6967  ;;  %6743 = vmatprep.mubr.msk.bf16.mxu0 %vm1408_vm12, %v1327_v2  ;;  %v7123_v45 = vld [vmem:[%s7566_s23 + $0x8] sm:$0xff]   ;;  %6779 = vmatprep.subr.bf16.mxu0 %v7122_v44 }
  0xd5   : > { %v6970_v3 = vunpack.i.h.bf16 %v6968_v63  ;;  %v6969_v4 = vunpack.i.l.bf16 %v6968_v63  ;;  %v1322_v15 = vsel %vm1318_vm11, %v1313_v56, %v6960_v5  ;;  %v1321_v20 = vsel %vm1318_vm11, %v1312_v0, %v6959_v6 }
  0xd6   : > { %v6963_v27 = vpop.permute.xlu1 %6962  ;;  %v1328_v28 = vpack.c.bf16 %v1322_v15, %v1321_v20 }
  0xd7   : > { %v1323_v11 = vsel %vm1318_vm11, %v1314_v60, %v6969_v4  ;;  %v1324_v12 = vsel %vm1318_vm11, %v1315_v59, %v6970_v3  ;;  %v6965_v29 = vunpack.i.h.bf16 %v6963_v27  ;;  %v6964_v30 = vunpack.i.l.bf16 %v6963_v27 }
  0xd8   : > { %v1329_v24 = vpack.c.bf16 %v1324_v12, %v1323_v11  ;;  %6744 = vmatmul.mubr.msk.bf16.vlgmr.msra.gmra.mxu0 %vm1408_vm12, %v1328_v28 }
  0xd9   : > { %v1317_v37 = vsel %vm1309_vm1, %v1164_v32, %v6965_v29  ;;  %v1316_v38 = vsel %vm1309_vm1, %v1194_v33, %v6964_v30  ;;  %6780 = vmatpush3.bf16.msra.mxu0 %v7122_v44 }
  0xda   : > { %6767 = vmatprep.mubr.msk.bf16.mxu1 %vm1408_vm12, %v1329_v24  ;;  %v6973_v34 = vpop.permute.xlu1 %6972  ;;  %6781 = vmatprep.subr.bf16.mxu0 %v7124_v46 }
  0xdb   : > { %v6975_v36 = vunpack.i.h.bf16 %v6973_v34  ;;  %v6974_v35 = vunpack.i.l.bf16 %v6973_v34 }
  0xdd   : > { %v1325_v39 = vsel %vm1318_vm11, %v1316_v38, %v6974_v35  ;;  %v1326_v40 = vsel %vm1318_vm11, %v1317_v37, %v6975_v36  ;;  %6782 = vmatpush3.bf16.msra.mxu0 %v7124_v46 }
  0xde   : > { %v1330_v23 = vpack.c.bf16 %v1326_v40, %v1325_v39 }
  0xe0   : > { %6768 = vmatmul.mubr.msk.bf16.vlgmr.msra.gmra.mxu1 %vm1408_vm12, %v1330_v23  ;;  %vm2050_vm12 = vcmp.ge.s32.totalorder %v7854_v57, 3 }
  0xe1   : > { %6772 = vmatpush3.bf16.msra.mxu1 %v7807_v14  ;;  %6775 = vmatprep.mubr.msk.bf16.mxu1 %vm1309_vm1, %v1333_v41 }
  0xe2   : > { %6773 = vmatprep.subr.bf16.mxu1 %v7121_v42 }
  0xe5   : > { %6774 = vmatpush3.bf16.msra.mxu1 %v7121_v42 }
  0xe6   : > { %6791 = vmatprep.subr.bf16.mxu1 %v7123_v45 }
  0xe8   : > { %6776 = vmatmul.mubr.msk.bf16.vlgmr.msra.gmra.mxu1 %vm1309_vm1, %v1334_v43 }
  0xe9   : > { %6792 = vmatpush3.bf16.msra.mxu1 %v7123_v45 }
  0xea   : > { %6793 = vmatprep.subr.bf16.mxu1 %v7125_v47 }
  0xed   : > { %6794 = vmatpush3.bf16.msra.mxu1 %v7125_v47 }
 0x11e   : > { %v7895_v14 = vpop.f32.mrf.mxu1 }
 0x120   : > { %v7897_v48 = vpop.f32.mrf.mxu1 }
 0x122   : > { %v7901_v50 = vpop.f32.mrf.mxu1 }
 0x124   : > { %v7907_v53 = vpop.f32.mrf.mxu1 }
 0x198   : > { %v7899_v49 = vpop.f32.mrf.mxu0 }
 0x199   : > { %v1467_v60 = vsel %vm1309_vm1, %v7899_v49, 0.0 }
 0x19a   : > { %v7903_v51 = vpop.f32.mrf.mxu0 }
 0x19b   : > { %v1464_v55 = vsel %vm1309_vm1, %v7903_v51, 0.0 }
 0x19c   : > { %v7905_v52 = vpop.f32.mrf.mxu0 }
 0x19d   : > { %v1469_v63 = vsel %vm1309_vm1, %v7905_v52, 0.0 }
 0x19e   : > { %v7909_v54 = vpop.f32.mrf.mxu0 }
 0x19f   : > { %v1465_v56 = vsel %vm1309_vm1, %v7909_v54, 0.0 }
 0x1a0   : > { %v1466_v58 = vadd.f32 %v1465_v56, %v1464_v55  ;;  %v7915_v59 = vpop.f32.mrf.mxu1 }
 0x1a1   : > { %v1712_v12 = vsel %vm1309_vm1, %v7915_v59, 0.0 }
 0x1a2   : > { %v1468_v61 = vadd.f32 %v1467_v60, %v1466_v58  ;;  %v7919_v62 = vpop.f32.mrf.mxu1 }
 0x1a3   : > { %v1709_v4 = vsel %vm1309_vm1, %v7919_v62, 0.0 }
 0x1a4   : > { %v1470_v0 = vadd.f32 %v1469_v63, %v1468_v61  ;;  %v7923_v1 = vpop.f32.mrf.mxu1 }
 0x1a5   : > { %v1714_v24 = vsel %vm1309_vm1, %v7923_v1, 0.0 }
 0x1a6   : > { %v1471_v2 = vrot.slane %v1470_v0, 4  ;;  %v7925_v3 = vpop.f32.mrf.mxu1 }
 0x1a7   : > { %v1710_v5 = vsel %vm1309_vm1, %v7925_v3, 0.0 }
 0x1a8   : > { %v1472_v6 = vadd.f32 %v1471_v2, %v1470_v0  ;;  %v1711_v11 = vadd.f32 %v1710_v5, %v1709_v4 }
 0x1aa   : > { %v1473_v15 = vrot.slane %v1472_v6, 2  ;;  %v1713_v20 = vadd.f32 %v1712_v12, %v1711_v11 }
 0x1ac   : > { %v1474_v25 = vadd.f32 %v1473_v15, %v1472_v6  ;;  %v1715_v27 = vadd.f32 %v1714_v24, %v1713_v20 }
 0x1ae   : > { %v1475_v28 = vrot.slane %v1474_v25, 1  ;;  %v1716_v29 = vrot.slane %v1715_v27, 4 }
 0x1b0   : > { %v1476_v30 = vadd.f32 %v1475_v28, %v1474_v25  ;;  %v1717_v32 = vadd.f32 %v1716_v29, %v1715_v27 }
 0x1b2   : > { %v1478_v33 = vmul.f32 0.03125, %v1476_v30  ;;  %v1718_v34 = vrot.slane %v1717_v32, 2 }
 0x1b4   : > { %v1479_v36 = vsub.f32 %v7903_v51, %v1478_v33  ;;  %v1480_v35 = vsub.f32 %v7909_v54, %v1478_v33  ;;  %v1481_v37 = vsub.f32 %v7899_v49, %v1478_v33  ;;  %v1482_v38 = vsub.f32 %v7905_v52, %v1478_v33 }
 0x1b5   : > { %v1719_v39 = vadd.f32 %v1718_v34, %v1717_v32 }
 0x1b6   : > { %v1483_v40 = vmul.f32 %v1479_v36, %v1479_v36  ;;  %v1484_v41 = vmul.f32 %v1480_v35, %v1480_v35  ;;  %v1485_v23 = vmul.f32 %v1481_v37, %v1481_v37  ;;  %v1486_v43 = vmul.f32 %v1482_v38, %v1482_v38 }
 0x1b7   : > { %v1720_v42 = vrot.slane %v1719_v39, 1 }
 0x1b8   : > { %v1487_v44 = vsel %vm1309_vm1, %v1483_v40, 0.0  ;;  %v1488_v45 = vsel %vm1309_vm1, %v1484_v41, 0.0  ;;  %v1490_v55 = vsel %vm1309_vm1, %v1485_v23, 0.0  ;;  %v1492_v60 = vsel %vm1309_vm1, %v1486_v43, 0.0 }
 0x1b9   : > { %v1489_v46 = vadd.f32 %v1488_v45, %v1487_v44  ;;  %v1721_v47 = vadd.f32 %v1720_v42, %v1719_v39 }
 0x1bb   : > { %v1491_v56 = vadd.f32 %v1490_v55, %v1489_v46  ;;  %v7942_v58 = vmul.f32 0.03125, %v1721_v47  ;;  %v1368_v47 = vld [vmem:[%s7541_s18] sm:$0x1]  ;;  %v7959_v55 = vsub.s32 0, %v7711_v19 }
 0x1bd   : > { %v1493_v61 = vadd.f32 %v1492_v60, %v1491_v56  ;;  %v1723_v63 = vsub.f32 %v7919_v62, %v7942_v58  ;;  %v1724_v0 = vsub.f32 %v7925_v3, %v7942_v58  ;;  %v1725_v2 = vsub.f32 %v7915_v59, %v7942_v58  ;;  %v1537_v60 = vpop.permute.xlu0 %1536 }
 0x1be   : > { %v1726_v4 = vsub.f32 %v7923_v1, %v7942_v58 }
 0x1bf   : > { %v1494_v5 = vrot.slane %v1493_v61, 4  ;;  %v1727_v6 = vmul.f32 %v1723_v63, %v1723_v63  ;;  %v1728_v11 = vmul.f32 %v1724_v0, %v1724_v0  ;;  %v1729_v12 = vmul.f32 %v1725_v2, %v1725_v2  ;;  %v1370_v63 = vld [vmem:[%s13880_s22] sm:$0x1] }
 0x1c0   : > { %v1730_v20 = vmul.f32 %v1726_v4, %v1726_v4  ;;  %v6777_v4 = vpop.f32.mrf.mxu1 }
 0x1c1   : > { %v1495_v15 = vadd.f32 %v1494_v5, %v1493_v61  ;;  %v1731_v24 = vsel %vm1309_vm1, %v1727_v6, 0.0  ;;  %v1732_v25 = vsel %vm1309_vm1, %v1728_v11, 0.0  ;;  %v1734_v29 = vsel %vm1309_vm1, %v1729_v12, 0.0 }
 0x1c2   : > { %v1733_v27 = vadd.f32 %v1732_v25, %v1731_v24  ;;  %v1736_v34 = vsel %vm1309_vm1, %v1730_v20, 0.0  ;;  %v1541_v5 = vmul.f32 %v1537_v60, %v7689_v10  ;;  %v1542_v11 = vmul.f32 %v1537_v60, %v7696_v13  ;;  %v1369_v25 = vld [vmem:[%s7541_s18 + $0x1] sm:$0x1]  ;;  %v1830_v10 = vpop.f32.mrf.mxu1  ;;  %s13889_s18 = sld [smem:[#allocation6_spill]] }
 0x1c3   : > { %v1496_v28 = vrot.slane %v1495_v15, 2  ;;  %v1540_v12 = vmul.f32 %v1537_v60, %v7684_v9  ;;  %v1539_v20 = vmul.f32 %v1537_v60, %v7679_v8 }
 0x1c4   : > { %v1735_v30 = vadd.f32 %v1734_v29, %v1733_v27  ;;  %v1612_v29 = vadd.f32 %v7895_v14, %v1541_v5  ;;  %v1613_v8 = vadd.f32 %v7901_v50, %v1542_v11 }
 0x1c5   : > { %v1497_v32 = vadd.f32 %v1496_v28, %v1495_v15 }
 0x1c6   : > { %v1737_v36 = vadd.f32 %v1736_v34, %v1735_v30  ;;  %v1611_v34 = vadd.f32 %v7907_v53, %v1540_v12 }
 0x1c7   : > { %v1498_v35 = vrot.slane %v1497_v32, 1 }
 0x1c8   : > { %v1738_v37 = vrot.slane %v1737_v36, 4 }
 0x1c9   : > { %v1499_v38 = vadd.f32 %v1498_v35, %v1497_v32  ;;  %v1610_v35 = vadd.f32 %v7897_v48, %v1539_v20  ;;  %v1776_v48 = vmul.f32 %v1537_v60, %v7717_v21 }
 0x1ca   : > { %v1739_v39 = vadd.f32 %v1738_v37, %v1737_v36  ;;  %v1371_v37 = vld [vmem:[%s13880_s22 + $0x1] sm:$0x1] }
 0x1cb   : > { %v1500_v40 = vmul.f32 0.03125, %v1499_v38 }
 0x1cc   : > { %v1740_v41 = vrot.slane %v1739_v39, 2 }
 0x1cd   : > { %v1501_v23 = vadd.f32 1e-05, %v1500_v40  ;;  %v6778_v40 = vpop.f32.mrf.mxu1 }
 0x1ce   : > { %v1741_v42 = vadd.f32 %v1740_v41, %v1739_v39 }
 0x1cf   : > { %7130 = vrsqrt.f32 %v1501_v23 }
 0x1d0   : > { %v1742_v43 = vrot.slane %v1741_v42, 1 }
 0x1d2   : > { %v1743_v44 = vadd.f32 %v1742_v43, %v1741_v42  ;;  %v1774_v43 = vmul.f32 %v1537_v60, %v7704_v17 }
 0x1d4   : > { %v1744_v45 = vmul.f32 0.03125, %v1743_v44  ;;  %v1777_v44 = vmul.f32 %v1537_v60, %v7722_v22 }
 0x1d6   : > { %v1745_v46 = vadd.f32 1e-05, %v1744_v45  ;;  %v1775_v45 = vmul.f32 %v1537_v60, %v7709_v18 }
 0x1d8   : > { %7132 = vrsqrt.f32 %v1745_v46 }
 0x1dc   : > { %v7131_v56 = vpop.eup %7130 }
 0x1dd   : > { %v1503_v61 = vmul.f32 %v7131_v56, %v1368_v47 }
 0x1df   : > { %v1504_v0 = vmul.f32 %v1503_v61, %v1478_v33  ;;  %v1510_v2 = vrot.slane %v1503_v61, %v7959_v55 }
 0x1e1   : > { %v1505_v6 = vsub.f32 %v1370_v63, %v1504_v0  ;;  %v1513_v15 = vmul.f32 %v1510_v2, %v7909_v54  ;;  %v1512_v33 = vmul.f32 %v1510_v2, %v7903_v51  ;;  %v1514_v27 = vmul.f32 %v7899_v49, %v1510_v2  ;;  %v1833_v63 = vpop.f32.mrf.mxu1 }
 0x1e2   : > { %v1515_v28 = vmul.f32 %v7905_v52, %v1510_v2  ;;  %v1847_v0 = vadd.f32 %v6777_v4, %v1776_v48  ;;  %v1845_v2 = vadd.f32 %v1830_v10, %v1774_v43  ;;  %v1846_v5 = vadd.f32 %v1833_v63, %v1775_v45  ;;  %v2303_v10 = vld [vmem:[%s7582_s19 + $0x30] sm:$0xff]  ;;  %v2031_v48 = vld [vmem:[%s13889_s18] sm:$0xf] }
 0x1e3   : > { %v1520_v24 = vrot.slane %v1505_v6, %v7959_v55 }
 0x1e5   : > { %v7133_v13 = vpop.eup %7132  ;;  %v1523_v30 = vadd.f32 %v1520_v24, %v1513_v15  ;;  %v1522_v9 = vadd.f32 %v1520_v24, %v1512_v33  ;;  %v1524_v32 = vadd.f32 %v1520_v24, %v1514_v27  ;;  %v1525_v54 = vadd.f32 %v1520_v24, %v1515_v28  ;;  %v2441_v33 = vld [vmem:[%s7587_s30 + $0x38] sm:$0xff]  ;;  %v2440_v28 = vld [vmem:[%s7587_s30 + $0x30] sm:$0xff] }
 0x1e6   : > { %v1747_v36 = vmul.f32 %v7133_v13, %v1369_v25  ;;  %v2304_v27 = vld [vmem:[%s7582_s19 + $0x38] sm:$0xff]  ;;  %6831 = vmatprep.subr.mxu1 %v2441_v33  ;;  %v2302_v13 = vld [vmem:[%s7582_s19 + $0x28] sm:$0xff] }
 0x1e7   : > { %v1527_v51 = vmax.f32 %v1523_v30, 0.0  ;;  %v1526_v49 = vmax.f32 %v1522_v9, 0.0  ;;  %v1528_v38 = vmax.f32 %v1524_v32, 0.0  ;;  %v1529_v52 = vmax.f32 %v1525_v54, 0.0  ;;  %6803 = vmatprep.subr.mxu0 %v2304_v27  ;;  %v2438_v30 = vld [vmem:[%s7587_s30 + $0x20] sm:$0xff]  ;;  %v2437_v32 = vld [vmem:[%s7587_s30 + $0x18] sm:$0xff] }
 0x1e8   : > { %v1748_v39 = vmul.f32 %v1747_v36, %v7942_v58  ;;  %v1754_v14 = vrot.slane %v1747_v36, %v7959_v55  ;;  %v2301_v9 = vld [vmem:[%s7582_s19 + $0x20] sm:$0xff]  ;;  %v2300_v54 = vld [vmem:[%s7582_s19 + $0x18] sm:$0xff]  ;;  %v2435_v36 = vld [vmem:[%s7587_s30 + $0x8] sm:$0xff] }
 0x1e9   : > { %v7980_v41 = vadd.f32 %v1611_v34, %v1527_v51  ;;  %v7982_v23 = vadd.f32 %v1610_v35, %v1526_v49  ;;  %v7984_v50 = vadd.f32 %v1612_v29, %v1528_v38  ;;  %v7986_v53 = vadd.f32 %v1613_v8, %v1529_v52  ;;  %v2439_v29 = vld [vmem:[%s7587_s30 + $0x28] sm:$0xff]  ;;  %v2436_v8 = vld [vmem:[%s7587_s30 + $0x10] sm:$0xff]  ;;  %v2434_v51 = vld [vmem:[%s7587_s30] sm:$0xff] }
 0x1ea   : > { %v1749_v42 = vsub.f32 %v1371_v37, %v1748_v39  ;;  %v1757_v58 = vmul.f32 %v1754_v14, %v7925_v3  ;;  %v1758_v56 = vmul.f32 %v7915_v59, %v1754_v14  ;;  %v1756_v21 = vmul.f32 %v1754_v14, %v7919_v62  ;;  %v2299_v34 = vld [vmem:[%s7582_s19 + $0x10] sm:$0xff]  ;;  %v2298_v35 = vld [vmem:[%s7582_s19 + $0x8] sm:$0xff]  ;;  %v2297_v37 = vld [vmem:[%s7582_s19] sm:$0xff]  ;;  %s13890_s19 = sld [smem:[#allocation199_spill]] }
 0x1eb   : > { %13881 = vst [vmem:[#allocation11_spill] sm:$0xff] %v7980_v41  ;;  %13882 = vst [vmem:[#allocation12_spill] sm:$0xff] %v7982_v23  ;;  %v1853_v46 = vpack.c.bf16 %v7980_v41, %v7982_v23  ;;  %v1854_v47 = vpack.c.bf16 %v7986_v53, %v7984_v50  ;;  %v1759_v17 = vmul.f32 %v7923_v1, %v1754_v14  ;;  %v8038_v49 = vld [vmem:[%s7592_s27 + $0x38] sm:$0xff]  ;;  %v13303_v38 = vmov 6  }
 0x1ec   : > { %13883 = vst [vmem:[#allocation13_spill] sm:$0xff] %v7984_v50  ;;  %13884 = vst [vmem:[#allocation14_spill] sm:$0xff] %v7986_v53  ;;  %v1764_v61 = vrot.slane %v1749_v42, %v7959_v55  ;;  %v1848_v59 = vadd.f32 %v6778_v40, %v1777_v44  ;;  %6983 = vset.pattern.permute.xlu0 %v13303_v38  ;;  %v13302_v40 = vsub.s32 3, %v7711_v19 }
 0x1ed   : > { %6783 = vmatprep.mubr.msk.bf16.mxu0 %vm1309_vm1, %v1853_v46  ;;  %6795 = vmatprep.mubr.msk.bf16.mxu1 %vm1309_vm1, %v1853_v46 }
 0x1ee   : > { %v1768_v18 = vadd.f32 %v1764_v61, %v1758_v56  ;;  %v1766_v22 = vadd.f32 %v1764_v61, %v1756_v21  ;;  %v1769_v3 = vadd.f32 %v1764_v61, %v1759_v17  ;;  %v1767_v60 = vadd.f32 %v1764_v61, %v1757_v58  ;;  %6784 = vmatmul.mubr.msk.bf16.vlgmr.msra.gmra.mxu0 %vm1309_vm1, %v1854_v47 }
 0x1ef   : > { %6796 = vmatmul.mubr.msk.bf16.vlgmr.msra.gmra.mxu1 %vm1309_vm1, %v1854_v47  ;;  %6804 = vmatpush3.msra.mxu0 %v2304_v27  ;;  %v8056_v46 = vrot.slane %v2031_v48, %v13302_v40  ;;  %v8059_v47 = vrot.slane %v2031_v48, %v7959_v55  ;;  %v13301_v21 = vsub.s32 1, %v7711_v19  ;;  %v13300_v17 = vsub.s32 2, %v7711_v19 }
 0x1f0   : > { %v1772_v62 = vmax.f32 %v1768_v18, 0.0  ;;  %v1770_v1 = vmax.f32 %v1766_v22, 0.0  ;;  %v1773_v6 = vmax.f32 %v1769_v3, 0.0  ;;  %v1771_v11 = vmax.f32 %v1767_v60, 0.0  ;;  %6832 = vmatpush3.msra.mxu1 %v2441_v33  ;;  %6805 = vmatprep.subr.mxu0 %v2303_v10  ;;  %s13891_s30 = scalar_lea.vmem %s13890_s19, %s7519_s29 }
 0x1f1   : > { %6833 = vmatprep.subr.mxu1 %v2440_v28  ;;  %6806 = vmatpush3.msra.mxu0 %v2303_v10 }
 0x1f2   : > { %v8005_v12 = vadd.f32 %v1847_v0, %v1772_v62  ;;  %v8007_v15 = vadd.f32 %v1845_v2, %v1770_v1  ;;  %v8009_v20 = vadd.f32 %v1848_v59, %v1773_v6  ;;  %v8011_v4 = vadd.f32 %v1846_v5, %v1771_v11  ;;  %6834 = vmatpush3.msra.mxu1 %v2440_v28 }
 0x1f3   : > { %6835 = vmatprep.subr.mxu1 %v2439_v29  ;;  %6807 = vmatprep.subr.mxu0 %v2302_v13  ;;  %v8086_v1 = vrot.slane %v2031_v48, %v13301_v21  ;;  %v8090_v6 = vrot.slane %v2031_v48, %v13300_v17 }
 0x1f4   : > { %13885 = vst [vmem:[#allocation15_spill] sm:$0xff] %v8005_v12  ;;  %13886 = vst [vmem:[#allocation16_spill] sm:$0xff] %v8007_v15  ;;  %v1856_v24 = vpack.c.bf16 %v8009_v20, %v8005_v12  ;;  %v1855_v25 = vpack.c.bf16 %v8011_v4, %v8007_v15  ;;  %6836 = vmatpush3.msra.mxu1 %v2439_v29  ;;  %6808 = vmatpush3.msra.mxu0 %v2302_v13 }
 0x1f5   : > { %13887 = vst [vmem:[#allocation17_spill] sm:$0xff] %v8009_v20  ;;  %13888 = vst [vmem:[#allocation18_spill] sm:$0xff] %v8011_v4  ;;  %6837 = vmatprep.subr.mxu1 %v2438_v30  ;;  %6809 = vmatprep.subr.mxu0 %v2301_v9 }
 0x1f6   : > { %6787 = vmatprep.mubr.msk.bf16.mxu0 %vm1309_vm1, %v1855_v25  ;;  %6799 = vmatprep.mubr.msk.bf16.mxu1 %vm1309_vm1, %v1855_v25 }
 0x1f7   : > { %6788 = vmatmul.mubr.msk.bf16.gmra.mxu0 %vm1309_vm1, %v1856_v24  ;;  %6800 = vmatmul.mubr.msk.bf16.gmra.mxu1 %vm1309_vm1, %v1856_v24 }
 0x1f8   : > { %6838 = vmatpush3.msra.mxu1 %v2438_v30  ;;  %6810 = vmatpush3.msra.mxu0 %v2301_v9 }
 0x1f9   : > { %6839 = vmatprep.subr.mxu1 %v2437_v32  ;;  %6811 = vmatprep.subr.mxu0 %v2300_v54 }
 0x1fa   : > { %6840 = vmatpush3.msra.mxu1 %v2437_v32  ;;  %6812 = vmatpush3.msra.mxu0 %v2300_v54 }
 0x1fb   : > { %6841 = vmatprep.subr.mxu1 %v2436_v8  ;;  %6813 = vmatprep.subr.mxu0 %v2299_v34 }
 0x1fc   : > { %6842 = vmatpush3.msra.mxu1 %v2436_v8  ;;  %6814 = vmatpush3.msra.mxu0 %v2299_v34 }
 0x1fd   : > { %6843 = vmatprep.subr.mxu1 %v2435_v36  ;;  %6815 = vmatprep.subr.mxu0 %v2298_v35 }
 0x1fe   : > { %6844 = vmatpush3.msra.mxu1 %v2435_v36  ;;  %6816 = vmatpush3.msra.mxu0 %v2298_v35 }
 0x1ff   : > { %6845 = vmatprep.subr.mxu1 %v2434_v51  ;;  %6817 = vmatprep.subr.mxu0 %v2297_v37 }
 0x200   : > { %6846 = vmatpush3.msra.mxu1 %v2434_v51  ;;  %6818 = vmatpush3.msra.mxu0 %v2297_v37 }
 0x201   : > { %6859 = vmatprep.subr.mxu0 %v8038_v49 }
 0x2ae   : > { %v8042_v52 = vpop.f32.mrf.mxu0 }
 0x2af   : > { %v2054_v44 = vrot.slane %v8042_v52, 5  ;;  %v2123_v62 = vrot.slane %v8042_v52, 6  ;;  %v2184_v29 = vrot.slane %v8042_v52, 7 }
 0x2b0   : > { %v8044_v39 = vpop.f32.mrf.mxu0 }
 0x2b1   : > { %v2052_v58 = vrot.slane %v8044_v39, 5  ;;  %v2121_v22 = vrot.slane %v8044_v39, 6  ;;  %v2182_v25 = vrot.slane %v8044_v39, 7 }
 0x2b2   : > { %v6786_v14 = vpop.f32.mrf.mxu0 }
 0x2b3   : > { %v2055_v43 = vrot.slane %v6786_v14, 5  ;;  %v2124_v60 = vrot.slane %v6786_v14, 6  ;;  %v2039_v33 = vmul.f32 %v6786_v14, %v8056_v46  ;;  %v2185_v27 = vrot.slane %v6786_v14, 7 }
 0x2b4   : > { %v8047_v42 = vpop.f32.mrf.mxu0 }
 0x2b5   : > { %v2053_v45 = vrot.slane %v8047_v42, 5  ;;  %v2122_v56 = vrot.slane %v8047_v42, 6  ;;  %v2065_v61 = vsel %vm2060_vm14, %v2054_v44, %v2055_v43  ;;  %v2037_v0 = vmul.f32 %v8056_v46, %v8047_v42 }
 0x2b6   : > { %v2100_v2 = vmul.f32 %v8059_v47, %v2065_v61  ;;  %v2183_v5 = vrot.slane %v8047_v42, 7  ;;  %v2134_v28 = vsel %vm2129_vm15, %v2123_v62, %v2124_v60  ;;  %v2194_v35 = vsel %vm1163_vm7, %v2184_v29, %v2185_v27 }
 0x2b7   : > { %v2067_v63 = vsel %vm2060_vm14, %v2052_v58, %v2053_v45  ;;  %v8070_v18 = vpop.f32.mrf.mxu0  ;;  %v2136_v59 = vsel %vm2129_vm15, %v2121_v22, %v2122_v56  ;;  %v2066_v32 = vsel %vm2060_vm14, %v2053_v45, %v2054_v44  ;;  %v2169_v36 = vmul.f32 %v8086_v1, %v2134_v28 }
 0x2b8   : > { %v2098_v3 = vmul.f32 %v8059_v47, %v2067_v63  ;;  %v2167_v10 = vmul.f32 %v8086_v1, %v2136_v59  ;;  %v2108_v13 = vadd.f32 %v2100_v2, %v2039_v33  ;;  %v2196_v30 = vsel %vm1163_vm7, %v2182_v25, %v2183_v5 }
 0x2b9   : > { %v8092_v24 = vpop.f32.mrf.mxu0  ;;  %v2211_v37 = vmul.f32 %v8090_v6, %v2196_v30  ;;  %v2038_v63 = vmul.f32 %v8042_v52, %v8056_v46  ;;  %v2036_v2 = vmul.f32 %v8056_v46, %v8044_v39  ;;  %v2213_v59 = vmul.f32 %v8090_v6, %v2194_v35  ;;  %v8157_v30 = vld [vmem:[%s13891_s30] ss:$0 sm:$0xff] }
 0x2ba   : > { %v2106_v11 = vadd.f32 %v2098_v3, %v2037_v0  ;;  %v2056_v9 = vrot.slane %v8092_v24, 5  ;;  %v2125_v8 = vrot.slane %v8092_v24, 6  ;;  %v2186_v34 = vrot.slane %v8092_v24, 7 }
 0x2bb   : > { %v2177_v44 = vadd.f32 %v2169_v36, %v2108_v13  ;;  %v2040_v45 = vmul.f32 %v8056_v46, %v8092_v24  ;;  %v6790_v0 = vpop.f32.mrf.mxu0  ;;  %v2135_v52 = vsel %vm2129_vm15, %v2122_v56, %v2123_v62  ;;  %v2058_v28 = vrot.slane %v8070_v18, 5 }
 0x2bc   : > { %v2175_v54 = vadd.f32 %v2167_v10, %v2106_v11  ;;  %v2064_v51 = vsel %vm2060_vm14, %v2055_v43, %v2056_v9  ;;  %v2133_v42 = vsel %vm2129_vm15, %v2124_v60, %v2125_v8  ;;  %v2193_v48 = vsel %vm1163_vm7, %v2185_v27, %v2186_v34 }
 0x2bd   : > { %v2089_v14 = vsel %vm2048_vm2, %v2064_v51, 0.0  ;;  %v2087_v43 = vsel %vm2046_vm0, %v2066_v32, 0.0  ;;  %v2158_v60 = vsel %vm2117_vm3, %v2133_v42, 0.0  ;;  %v2202_v33 = vsel %vm1151_vm9, %v2193_v48, 0.0 }
 0x2be   : > { %v2101_v61 = vmul.f32 %v8059_v47, %v2089_v14  ;;  %v2219_v3 = vadd.f32 %v2211_v37, %v2175_v54  ;;  %v2099_v27 = vmul.f32 %v8059_v47, %v2087_v43  ;;  %v2170_v10 = vmul.f32 %v8086_v1, %v2158_v60 }
 0x2bf   : > { %v2221_v13 = vadd.f32 %v2213_v59, %v2177_v44  ;;  %v2195_v32 = vsel %vm1163_vm7, %v2183_v5, %v2184_v29  ;;  %v2059_v54 = vrot.slane %v6790_v0, 5  ;;  %v2128_v36 = vrot.slane %v6790_v0, 6 }
 0x2c0   : > { %v2109_v11 = vadd.f32 %v2101_v61, %v2040_v45  ;;  %v8162_v35 = vadd.f32 %v8157_v30, %v2219_v3  ;;  %v2127_v56 = vrot.slane %v8070_v18, 6  ;;  %v2214_v51 = vmul.f32 %v8090_v6, %v2202_v33  ;;  %v1938_v33 = vpop.f32.mrf.mxu0 }
 0x2c1   : > { %v2043_v37 = vmul.f32 %v6790_v0, %v8056_v46  ;;  %v2061_v14 = vsel %vm2060_vm14, %v2058_v28, %v2059_v54  ;;  %v2068_v5 = vsel %vm2060_vm14, %v2059_v54, %v2052_v58  ;;  %v2189_v29 = vrot.slane %v6790_v0, 7 }
 0x2c2   : > { %v2178_v62 = vadd.f32 %v2170_v10, %v2109_v11  ;;  %v2085_v42 = vsel %vm2044_vm5, %v2068_v5, 0.0  ;;  %v2104_v48 = vmul.f32 %v8059_v47, %v2061_v14  ;;  %v2130_v44 = vsel %vm2129_vm15, %v2127_v56, %v2128_v36 }
 0x2c3   : > { %v2137_v43 = vsel %vm2129_vm15, %v2128_v36, %v2121_v22  ;;  %vm2119_vm0 = vcmp.ge.s32.totalorder %v7854_v57, 2  ;;  %v2107_v45 = vadd.f32 %v2099_v27, %v2038_v63  ;;  %v2156_v58 = vsel %vm2115_vm4, %v2135_v52, 0.0  ;;  %v8605_v57 = vld [vmem:[%s7606_s8] sm:$0xff] }
 0x2c4   : > { %v2097_v61 = vmul.f32 %v8059_v47, %v2085_v42  ;;  %v2154_v3 = vsel %vm2113_vm6, %v2137_v43, 0.0  ;;  %v2200_v60 = vsel %vm1149_vm10, %v2195_v32, 0.0  ;;  %v2188_v0 = vrot.slane %v8070_v18, 7 }
 0x2c5   : > { %v2222_v59 = vadd.f32 %v2214_v51, %v2178_v62  ;;  %v2112_v11 = vadd.f32 %v2104_v48, %v2043_v37  ;;  %v8193_v22 = vadd.f32 %v8157_v30, %v2221_v13  ;;  %v2173_v27 = vmul.f32 %v8086_v1, %v2130_v44 }
 0x2c6   : > { %v2105_v63 = vadd.f32 %v2097_v61, %v2036_v2  ;;  %v2197_v52 = vsel %vm1163_vm7, %v2189_v29, %v2182_v25  ;;  %v2242_v10 = vsub.f32 0.0, %v8162_v35  ;;  %v2042_v32 = vmul.f32 %v8070_v18, %v8056_v46 }
 0x2c7   : > { %v2166_v54 = vmul.f32 %v8086_v1, %v2154_v3  ;;  %v2190_v36 = vsel %vm1163_vm7, %v2188_v0, %v2189_v29  ;;  %v2168_v13 = vmul.f32 %v8086_v1, %v2156_v58  ;;  %v2181_v2 = vadd.f32 %v2173_v27, %v2112_v11 }
 0x2c8   : > { %v2198_v62 = vsel %vm1147_vm8, %v2197_v52, 0.0  ;;  %v2057_v39 = vrot.slane %v1938_v33, 5  ;;  %v2212_v51 = vmul.f32 %v8090_v6, %v2200_v60  ;;  %v8211_v25 = vadd.f32 %v8157_v30, %v2222_v59 }
 0x2c9   : > { %v2174_v37 = vadd.f32 %v2166_v54, %v2105_v63  ;;  %v2126_v14 = vrot.slane %v1938_v33, 6  ;;  %v2244_v18 = vsub.f32 0.0, %v8193_v22  ;;  %v2176_v5 = vadd.f32 %v2168_v13, %v2107_v45 }
 0x2ca   : > { %v2217_v42 = vmul.f32 %v8090_v6, %v2190_v36  ;;  %v2062_v29 = vsel %vm2060_vm14, %v2057_v39, %v2058_v28  ;;  %v2251_v48 = vmul.f32 1.442695, %v2242_v10  ;;  %v2210_v44 = vmul.f32 %v8090_v6, %v2198_v62 }
 0x2cb   : > { %v2041_v43 = vmul.f32 %v8056_v46, %v1938_v33  ;;  %v2063_v58 = vsel %vm2060_vm14, %v2056_v9, %v2057_v39  ;;  %v2091_v3 = vsel %vm2050_vm12, %v2062_v29, 0.0  ;;  %v2131_v60 = vsel %vm2129_vm15, %v2126_v14, %v2127_v56 }
 0x2cc   : > { %v2225_v61 = vadd.f32 %v2217_v42, %v2181_v2  ;;  %v2102_v45 = vmul.f32 %v8059_v47, %v2063_v58  ;;  %v2245_v28 = vsub.f32 0.0, %v8211_v25  ;;  %v2218_v59 = vadd.f32 %v2210_v44, %v2174_v37 }
 0x2cd   : > { %v2103_v11 = vmul.f32 %v8059_v47, %v2091_v3  ;;  %v2132_v46 = vsel %vm2129_vm15, %v2125_v8, %v2126_v14  ;;  %v2220_v9 = vadd.f32 %v2212_v51, %v2176_v5  ;;  %v2160_v27 = vsel %vm2119_vm0, %v2131_v60, 0.0 }
 0x2ce   : > { %v2110_v63 = vadd.f32 %v2102_v45, %v2041_v43  ;;  %v2171_v10 = vmul.f32 %v8086_v1, %v2132_v46  ;;  %v2255_v54 = vmul.f32 1.442695, %v2244_v18  ;;  %v8238_v56 = vadd.f32 %v8157_v30, %v2225_v61 }
 0x2cf   : > { %v2111_v52 = vadd.f32 %v2103_v11, %v2042_v32  ;;  %v2172_v36 = vmul.f32 %v8086_v1, %v2160_v27  ;;  %v2187_v47 = vrot.slane %v1938_v33, 7  ;;  %7134 = vpow2.f32 %v2251_v48 }
 0x2d0   : > { %v2257_v13 = vmul.f32 1.442695, %v2245_v28  ;;  %v2179_v2 = vadd.f32 %v2171_v10, %v2110_v63  ;;  %v2233_v8 = vadd.f32 %v8157_v30, %v2218_v59  ;;  %v2235_v51 = vadd.f32 %v8157_v30, %v2220_v9 }
 0x2d1   : > { %v2180_v62 = vadd.f32 %v2172_v36, %v2111_v52  ;;  %v2191_v39 = vsel %vm1163_vm7, %v2187_v47, %v2188_v0  ;;  %v2192_v32 = vsel %vm1163_vm7, %v2186_v34, %v2187_v47  ;;  %v2248_v14 = vsub.f32 0.0, %v8238_v56 }
 0x2d2   : > { %v2204_v1 = vsel %vm1153_vm13, %v2191_v39, 0.0  ;;  %v2215_v33 = vmul.f32 %v8090_v6, %v2192_v32  ;;  %v2241_v37 = vsub.f32 0.0, %v2233_v8  ;;  %v2243_v5 = vsub.f32 0.0, %v2235_v51 }
 0x2d3   : > { %v2216_v18 = vmul.f32 %v8090_v6, %v2204_v1  ;;  %7136 = vpow2.f32 %v2255_v54  ;;  %v2263_v48 = vmul.f32 1.442695, %v2248_v14  ;;  %vm2668_vm14 = vcmask 64512  }
 0x2d4   : > { %v2223_v0 = vadd.f32 %v2215_v33, %v2179_v2  ;;  %v2249_v42 = vmul.f32 1.442695, %v2241_v37  ;;  %7138 = vpow2.f32 %v2257_v13  ;;  %v2253_v29 = vmul.f32 1.442695, %v2243_v5 }
 0x2d5   : > { %v2224_v24 = vadd.f32 %v2216_v18, %v2180_v62  ;;  %vm3130_vm5 = vcmp.lt.s32.totalorder %v7711_v19, 4  ;;  %vm3116_vm12 = vcmp.ge.s32.totalorder %v7828_v31, 4 }
 0x2d6   : > { %v8255_v34 = vadd.f32 %v8157_v30, %v2223_v0  ;;  %7140 = vpow2.f32 %v2249_v42  ;;  %v2550_v42 = vld [vmem:[%s7592_s27 + $0x18] sm:$0xff] }
 0x2d7   : > { %7142 = vpow2.f32 %v2253_v29  ;;  %v8258_v44 = vadd.f32 %v8157_v30, %v2224_v24  ;;  %v2549_v24 = vld [vmem:[%s7592_s27 + $0x10] sm:$0xff] }
 0x2d8   : > { %v2246_v43 = vsub.f32 0.0, %v8255_v34  ;;  %7144 = vpow2.f32 %v2263_v48  ;;  %v2547_v48 = vld [vmem:[%s7592_s27] sm:$0xff] }
 0x2d9   : > { %v2247_v6 = vsub.f32 0.0, %v8258_v44 }
 0x2da   : > { %v2259_v58 = vmul.f32 1.442695, %v2246_v43 }
 0x2db   : > { %v2261_v61 = vmul.f32 1.442695, %v2247_v6 }
 0x2dc   : > { %7146 = vpow2.f32 %v2259_v58  ;;  %v7135_v3 = vpop.eup %7134 }
 0x2dd   : > { %7148 = vpow2.f32 %v2261_v61  ;;  %v2266_v60 = vadd.f32 1.0, %v7135_v3 }
 0x2df   : > { %7150 = vrcp.f32 %v2266_v60 }
 0x2e0   : > { %v7137_v45 = vpop.eup %7136 }
 0x2e1   : > { %v7139_v28 = vpop.eup %7138  ;;  %v2268_v9 = vadd.f32 1.0, %v7137_v45 }
 0x2e2   : > { %v2269_v63 = vadd.f32 1.0, %v7139_v28 }
 0x2e3   : > { %v7141_v59 = vpop.eup %7140 }
 0x2e4   : > { %v7143_v11 = vpop.eup %7142  ;;  %v2265_v46 = vadd.f32 1.0, %v7141_v59 }
 0x2e5   : > { %v2267_v30 = vadd.f32 1.0, %v7143_v11  ;;  %v7145_v27 = vpop.eup %7144 }
 0x2e6   : > { %7152 = vrcp.f32 %v2265_v46  ;;  %v2272_v47 = vadd.f32 1.0, %v7145_v27 }
 0x2e7   : > { %7154 = vrcp.f32 %v2267_v30  ;;  %v13311_v30 = vmov 1  }
 0x2e8   : > { %7156 = vrcp.f32 %v2268_v9  ;;  %v13305_v9 = vmov 7  }
 0x2e9   : > { %v7147_v52 = vpop.eup %7146  ;;  %7158 = vrcp.f32 %v2269_v63 }
 0x2ea   : > { %v7149_v10 = vpop.eup %7148  ;;  %v2270_v54 = vadd.f32 1.0, %v7147_v52 }
 0x2eb   : > { %v2271_v36 = vadd.f32 1.0, %v7149_v10  ;;  %v13309_v10 = vmov 2  }
 0x2ec   : > { %7160 = vrcp.f32 %v2270_v54  ;;  %v7151_v13 = vpop.eup %7150 }
 0x2ed   : > { %7162 = vrcp.f32 %v2271_v36  ;;  %v8265_v32 = vmul.f32 %v7151_v13, %v8162_v35 }
 0x2ee   : > { %7164 = vrcp.f32 %v2272_v47  ;;  %v13307_v47 = vmov 3  }
 0x2f3   : > { %v7153_v2 = vpop.eup %7152 }
 0x2f4   : > { %v7155_v62 = vpop.eup %7154  ;;  %v8262_v39 = vmul.f32 %v7153_v2, %v2233_v8  ;;  %v2553_v8 = vld [vmem:[%s7592_s27 + $0x30] sm:$0xff]  ;;  %v13318_v2 = vmov 4  }
 0x2f5   : > { %v7157_v1 = vpop.eup %7156  ;;  %v8271_v33 = vmul.f32 %v7155_v62, %v2235_v51  ;;  %v2552_v51 = vld [vmem:[%s7592_s27 + $0x28] sm:$0xff]  ;;  %v13321_v62 = vmov 5  }
 0x2f6   : > { %6819 = vmatprep.mubr.msk.f32.mxu0 %vm1318_vm11, %v8262_v39  ;;  %6847 = vmatprep.mubr.msk.f32.mxu1 %vm1318_vm11, %v8262_v39  ;;  %v7159_v37 = vpop.eup %7158  ;;  %v8284_v35 = vmul.f32 %v7157_v1, %v8193_v22 }
 0x2f7   : > { %6820 = vmatmul.mubr.msk.f32.vlgmr.msra.gmra.mxu0 %vm1318_vm11, %v8265_v32  ;;  %6848 = vmatmul.mubr.msk.f32.vlgmr.msra.gmra.mxu1 %vm1318_vm11, %v8265_v32  ;;  %v8290_v5 = vmul.f32 %v7159_v37, %v8211_v25 }
 0x2f8   : > { %6822 = vmatprep.mubr.msk.f32.mxu0 %vm1318_vm11, %v8271_v33  ;;  %6850 = vmatprep.mubr.msk.f32.mxu1 %vm1318_vm11, %v8271_v33 }
 0x2f9   : > { %6860 = vmatpush3.msra.mxu0 %v8038_v49  ;;  %v7161_v14 = vpop.eup %7160  ;;  %v2551_v49 = vld [vmem:[%s7592_s27 + $0x20] sm:$0xff] }
 0x2fa   : > { %6861 = vmatprep.subr.mxu0 %v2553_v8  ;;  %v7163_v18 = vpop.eup %7162  ;;  %v8300_v22 = vmul.f32 %v7161_v14, %v8255_v34  ;;  %v2548_v34 = vld [vmem:[%s7592_s27 + $0x8] sm:$0xff] }
 0x2fb   : > { %6862 = vmatpush3.msra.mxu0 %v2553_v8  ;;  %6851 = vmatmul.mubr.msk.f32.gmra.mxu1 %vm1318_vm11, %v8284_v35  ;;  %v7165_v0 = vpop.eup %7164  ;;  %v8304_v25 = vmul.f32 %v7163_v18, %v8258_v44  ;;  %v8341_v44 = vpop.f32.mrf.mxu1 }
 0x2fc   : > { %6823 = vmatmul.mubr.msk.f32.gmra.mxu0 %vm1318_vm11, %v8284_v35  ;;  %6863 = vmatprep.subr.mxu0 %v2552_v51  ;;  %v8314_v29 = vmul.f32 %v7165_v0, %v8238_v56  ;;  %v2660_v56 = vld [vmem:[%s13893_s5] sm:$0xff] }
 0x2fd   : > { %6825 = vmatprep.mubr.msk.f32.mxu0 %vm1318_vm11, %v8290_v5  ;;  %6853 = vmatprep.mubr.msk.f32.mxu1 %vm1318_vm11, %v8290_v5  ;;  %13892 = vst [vmem:[#allocation19_spill] sm:$0xff] %v8304_v25  ;;  %v8343_v43 = vpop.f32.mrf.mxu1 }
 0x2fe   : > { %6864 = vmatpush3.msra.mxu0 %v2552_v51  ;;  %6887 = vmatprep.subr.mxu1 %v2660_v56 }
 0x2ff   : > { %6865 = vmatprep.subr.mxu0 %v2551_v49  ;;  %6854 = vmatmul.mubr.msk.f32.gmra.mxu1 %vm1318_vm11, %v8300_v22  ;;  %v8345_v6 = vpop.f32.mrf.mxu1 }
 0x300   : > { %6866 = vmatpush3.msra.mxu0 %v2551_v49  ;;  %6856 = vmatprep.mubr.msk.f32.mxu1 %vm1318_vm11, %v8304_v25 }
 0x301   : > { %6826 = vmatmul.mubr.msk.f32.gmra.mxu0 %vm1318_vm11, %v8300_v22  ;;  %6867 = vmatprep.subr.mxu0 %v2550_v42  ;;  %v8347_v58 = vpop.f32.mrf.mxu1 }
 0x302   : > { %6828 = vmatprep.mubr.msk.f32.mxu0 %vm1318_vm11, %v8304_v25  ;;  %6868 = vmatpush3.msra.mxu0 %v2550_v42 }
 0x303   : > { %6869 = vmatprep.subr.mxu0 %v2549_v24  ;;  %6857 = vmatmul.mubr.msk.f32.gmra.mxu1 %vm1318_vm11, %v8314_v29  ;;  %v8349_v61 = vpop.f32.mrf.mxu1 }
 0x304   : > { %6870 = vmatpush3.msra.mxu0 %v2549_v24  ;;  %6888 = vmatpush3.msra.mxu1 %v2660_v56  ;;  %13894 = vst [vmem:[#allocation20_spill] sm:$0xff] %v8349_v61 }
 0x305   : > { %6829 = vmatmul.mubr.msk.f32.gmra.mxu0 %vm1318_vm11, %v8314_v29  ;;  %6871 = vmatprep.subr.mxu0 %v2548_v34  ;;  %v8351_v3 = vpop.f32.mrf.mxu1 }
 0x306   : > { %6872 = vmatpush3.msra.mxu0 %v2548_v34  ;;  %6875 = vmatprep.mubr.msk.f32.mxu0 %vm1318_vm11, %v8262_v39 }
 0x307   : > { %6873 = vmatprep.subr.mxu0 %v2547_v48  ;;  %v8353_v45 = vpop.f32.mrf.mxu1 }
 0x308   : > { %6874 = vmatpush3.msra.mxu0 %v2547_v48  ;;  %13895 = vst [vmem:[#allocation21_spill] sm:$0xff] %v8353_v45 }
 0x309   : > { %6876 = vmatmul.mubr.msk.f32.vlgmr.msra.gmra.mxu0 %vm1318_vm11, %v8265_v32  ;;  %v8355_v60 = vpop.f32.mrf.mxu1 }
 0x30a   : > { %6878 = vmatprep.mubr.msk.f32.mxu0 %vm1318_vm11, %v8271_v33 }
 0x30d   : > { %6879 = vmatmul.mubr.msk.f32.gmra.mxu0 %vm1318_vm11, %v8284_v35 }
 0x30e   : > { %6881 = vmatprep.mubr.msk.f32.mxu0 %vm1318_vm11, %v8290_v5 }
 0x311   : > { %6882 = vmatmul.mubr.msk.f32.gmra.mxu0 %vm1318_vm11, %v8300_v22 }
 0x312   : > { %6884 = vmatprep.mubr.msk.f32.mxu0 %vm1318_vm11, %v8304_v25 }
 0x315   : > { %6885 = vmatmul.mubr.msk.f32.gmra.mxu0 %vm1318_vm11, %v8314_v29 }
 0x3b7   : > { %v6821_v28 = vpop.f32.mrf.mxu0  ;;  %v6849_v59 = vpop.f32.mrf.mxu1 }
 0x3b8   : > { %5128 = vperm.xlu0 %6983, %v6849_v59   ;;  %2929 = vperm.xlu1 %6977, %v6849_v59  }
 0x3b9   : > { %v2395_v11 = vpop.f32.mrf.mxu0  ;;  %v2508_v27 = vpop.f32.mrf.mxu1 }
 0x3ba   : > { %6889 = vmatprep.mubr.msk.f32.mxu1 %vm2668_vm14, %v2395_v11 }
 0x3bb   : > { %6890 = vmatmul.mubr.msk.f32.vlgmr.msra.gmra.mxu1 %vm2668_vm14, %v6821_v28  ;;  %v6852_v1 = vpop.f32.mrf.mxu1 }
 0x3bc   : > { %v6824_v46 = vpop.f32.mrf.mxu0  ;;  %6984 = vset.pattern.permute.xlu0 %v13305_v9  ;;  %6978 = vset.pattern.permute.xlu1 %v13311_v30 }
 0x3bd   : > { %5484 = vperm.xlu0 %6984, %v6849_v59   ;;  %3348 = vperm.xlu1 %6978, %v6849_v59   ;;  %v2518_v8 = vpop.f32.mrf.mxu1 }
 0x3be   : > { %v2405_v63 = vpop.f32.mrf.mxu0 }
 0x3bf   : > { %6892 = vmatprep.mubr.msk.f32.mxu1 %vm2668_vm14, %v2405_v63  ;;  %v6855_v37 = vpop.f32.mrf.mxu1 }
 0x3c0   : > { %6893 = vmatmul.mubr.msk.f32.gmra.mxu1 %vm2668_vm14, %v6824_v46  ;;  %v5809_v46 = vsub.f32 0.0, %v8341_v44 }
 0x3c1   : > { %v6827_v52 = vpop.f32.mrf.mxu0  ;;  %6986 = vset.pattern.permute.xlu0 %v13311_v30  ;;  %6979 = vset.pattern.permute.xlu1 %v13309_v10  ;;  %v2528_v51 = vpop.f32.mrf.mxu1 }
 0x3c2   : > { %3704 = vperm.xlu1 %6979, %v6849_v59   ;;  %3344 = vperm.xlu0 %6986, %v2508_v27  }
 0x3c3   : > { %v2415_v54 = vpop.f32.mrf.mxu0  ;;  %v8399_v14 = vpop.f32.mrf.mxu1 }
 0x3c4   : > { %6895 = vmatprep.mubr.msk.f32.mxu1 %vm2668_vm14, %v2415_v54  ;;  %v5810_v54 = vsub.f32 0.0, %v8345_v6 }
 0x3c5   : > { %v6830_v36 = vpop.f32.mrf.mxu0  ;;  %6896 = vmatmul.mubr.msk.f32.gmra.mxu1 %vm2668_vm14, %v6827_v52  ;;  %v8407_v18 = vpop.f32.mrf.mxu1 }
 0x3c6   : > { %6980 = vset.pattern.permute.xlu1 %v13307_v47  ;;  %6987 = vset.pattern.permute.xlu0 %v13309_v10 }
 0x3c7   : > { %v2425_v13 = vpop.f32.mrf.mxu0  ;;  %4060 = vperm.xlu1 %6980, %v6849_v59   ;;  %3700 = vperm.xlu0 %6987, %v2508_v27  }
 0x3c8   : > { %6898 = vmatprep.mubr.msk.f32.mxu1 %vm2668_vm14, %v2425_v13  ;;  %v5808_v13 = vsub.f32 0.0, %v8347_v58 }
 0x3c9   : > { %6899 = vmatmul.mubr.msk.f32.gmra.mxu1 %vm2668_vm14, %v6830_v36  ;;  %v8427_v49 = vpop.f32.mrf.mxu0  ;;  %v5819_v36 = vmul.f32 1.442695, %v5809_v46 }
 0x3ca   : > { %v5817_v46 = vmul.f32 1.442695, %v5808_v13  ;;  %v8520_v13 = vld [vmem:[%s13907_s9] ss:$0 sm:$0xff] }
 0x3cb   : > { %6981 = vset.pattern.permute.xlu1 %v13318_v2  ;;  %6989 = vset.pattern.permute.xlu0 %v13318_v2  ;;  %v8441_v0 = vpop.f32.mrf.mxu0  ;;  %7166 = vpow2.f32 %v5819_v36 }
 0x3cc   : > { %4416 = vperm.xlu1 %6981, %v6849_v59   ;;  %4412 = vperm.xlu0 %6989, %v2508_v27  }
 0x3cd   : > { %v8469_v28 = vpop.f32.mrf.mxu0 }
 0x3d0   : > { %6982 = vset.pattern.permute.xlu1 %v13321_v62  ;;  %6990 = vset.pattern.permute.xlu0 %v13321_v62 }
 0x3d1   : > { %4772 = vperm.xlu1 %6982, %v6849_v59   ;;  %4768 = vperm.xlu0 %6990, %v2508_v27  }
 0x3d5   : > { %6985 = vset.pattern.permute.xlu1 %v13313_v7  ;;  %6994 = vset.pattern.permute.xlu0 %v13311_v30 }
 0x3d6   : > { %2924 = vperm.xlu1 %6985, %v2508_v27   ;;  %3356 = vperm.xlu0 %6994, %v6852_v1  }
 0x3d8   : > { %v7167_v40 = vpop.eup %7166 }
 0x3d9   : > { %v5833_v4 = vadd.f32 1.0, %v7167_v40  ;;  %v5814_v40 = vsub.f32 0.0, %v8353_v45 }
 0x3da   : > { %6988 = vset.pattern.permute.xlu1 %v13307_v47  ;;  %6996 = vset.pattern.permute.xlu0 %v13307_v47 }
 0x3db   : > { %4056 = vperm.xlu1 %6988, %v2508_v27   ;;  %4068 = vperm.xlu0 %6996, %v6852_v1  }
 0x3df   : > { %6991 = vset.pattern.permute.xlu1 %v13303_v38  ;;  %6997 = vset.pattern.permute.xlu0 %v13318_v2 }
 0x3e0   : > { %5124 = vperm.xlu1 %6991, %v2508_v27   ;;  %4424 = vperm.xlu0 %6997, %v6852_v1  }
 0x3e4   : > { %6992 = vset.pattern.permute.xlu1 %v13305_v9  ;;  %6998 = vset.pattern.permute.xlu0 %v13321_v62 }
 0x3e5   : > { %5480 = vperm.xlu1 %6992, %v2508_v27   ;;  %4780 = vperm.xlu0 %6998, %v6852_v1   ;;  %v5807_v27 = vsub.f32 0.0, %v8343_v43 }
 0x3e9   : > { %6993 = vset.pattern.permute.xlu1 %v13313_v7  ;;  %7001 = vset.pattern.permute.xlu0 %v13313_v7 }
 0x3ea   : > { %2939 = vperm.xlu1 %6993, %v6852_v1   ;;  %2934 = vperm.xlu0 %7001, %v2518_v8  }
 0x3ee   : > { %6995 = vset.pattern.permute.xlu1 %v13309_v10  ;;  %7003 = vset.pattern.permute.xlu0 %v13309_v10 }
 0x3ef   : > { %3712 = vperm.xlu1 %6995, %v6852_v1   ;;  %3708 = vperm.xlu0 %7003, %v2518_v8  }
 0x3f3   : > { %6999 = vset.pattern.permute.xlu1 %v13303_v38  ;;  %7005 = vset.pattern.permute.xlu0 %v13318_v2 }
 0x3f4   : > { %5136 = vperm.xlu1 %6999, %v6852_v1   ;;  %4420 = vperm.xlu0 %7005, %v2518_v8  }
 0x3f8   : > { %7000 = vset.pattern.permute.xlu1 %v13305_v9  ;;  %7006 = vset.pattern.permute.xlu0 %v13321_v62 }
 0x3f9   : > { %5492 = vperm.xlu1 %7000, %v6852_v1   ;;  %4776 = vperm.xlu0 %7006, %v2518_v8   ;;  %v5815_v1 = vmul.f32 1.442695, %v5807_v27  ;;  %v5812_v27 = vsub.f32 0.0, %v8355_v60 }
 0x3fb   : > { %7168 = vpow2.f32 %v5815_v1  ;;  %v5813_v1 = vsub.f32 0.0, %v8349_v61 }
 0x3fd   : > { %7002 = vset.pattern.permute.xlu1 %v13311_v30  ;;  %7010 = vset.pattern.permute.xlu0 %v13311_v30 }
 0x3fe   : > { %3352 = vperm.xlu1 %7002, %v2518_v8   ;;  %3364 = vperm.xlu0 %7010, %v6855_v37  }
 0x402   : > { %7004 = vset.pattern.permute.xlu1 %v13307_v47  ;;  %7012 = vset.pattern.permute.xlu0 %v13307_v47 }
 0x403   : > { %4064 = vperm.xlu1 %7004, %v2518_v8   ;;  %4076 = vperm.xlu0 %7012, %v6855_v37  }
 0x407   : > { %7007 = vset.pattern.permute.xlu1 %v13303_v38  ;;  %7017 = vset.pattern.permute.xlu0 %v13313_v7 }
 0x408   : > { %5132 = vperm.xlu1 %7007, %v2518_v8   ;;  %2944 = vperm.xlu0 %7017, %v2528_v51  }
 0x40c   : > { %7008 = vset.pattern.permute.xlu1 %v13305_v9  ;;  %7023 = vset.pattern.permute.xlu0 %v13303_v38 }
 0x40d   : > { %5488 = vperm.xlu1 %7008, %v2518_v8   ;;  %5140 = vperm.xlu0 %7023, %v2528_v51   ;;  %v5821_v8 = vmul.f32 1.442695, %v5810_v54 }
 0x40f   : > { %7170 = vpow2.f32 %v5821_v8 }
 0x410   : > { %7172 = vpow2.f32 %v5817_v46 }
 0x411   : > { %7009 = vset.pattern.permute.xlu1 %v13313_v7  ;;  %7026 = vset.pattern.permute.xlu0 %v13311_v30 }
 0x412   : > { %2949 = vperm.xlu1 %7009, %v6855_v37   ;;  %3372 = vperm.xlu0 %7026, %v8399_v14  }
 0x416   : > { %7011 = vset.pattern.permute.xlu1 %v13309_v10  ;;  %7028 = vset.pattern.permute.xlu0 %v13307_v47 }
 0x417   : > { %3720 = vperm.xlu1 %7011, %v6855_v37   ;;  %4084 = vperm.xlu0 %7028, %v8399_v14  }
 0x41b   : > { %7013 = vset.pattern.permute.xlu1 %v13318_v2  ;;  %7033 = vset.pattern.permute.xlu0 %v13313_v7 }
 0x41c   : > { %4432 = vperm.xlu1 %7013, %v6855_v37   ;;  %2954 = vperm.xlu0 %7033, %v8407_v18  }
 0x420   : > { %7014 = vset.pattern.permute.xlu1 %v13321_v62  ;;  %7035 = vset.pattern.permute.xlu0 %v13309_v10 }
 0x421   : > { %4788 = vperm.xlu1 %7014, %v6855_v37   ;;  %3724 = vperm.xlu0 %7035, %v8407_v18  }
 0x425   : > { %7015 = vset.pattern.permute.xlu1 %v13303_v38  ;;  %7037 = vset.pattern.permute.xlu0 %v13318_v2 }
 0x426   : > { %5144 = vperm.xlu1 %7015, %v6855_v37   ;;  %4436 = vperm.xlu0 %7037, %v8407_v18  }
 0x42a   : > { %7016 = vset.pattern.permute.xlu1 %v13305_v9  ;;  %7038 = vset.pattern.permute.xlu0 %v13321_v62 }
 0x42b   : > { %5500 = vperm.xlu1 %7016, %v6855_v37   ;;  %4792 = vperm.xlu0 %7038, %v8407_v18   ;;  %v8495_v37 = vpop.f32.mrf.mxu0 }
 0x42f   : > { %7018 = vset.pattern.permute.xlu1 %v13311_v30  ;;  %7039 = vset.pattern.permute.xlu0 %v13303_v38 }
 0x430   : > { %3360 = vperm.xlu1 %7018, %v2528_v51   ;;  %5148 = vperm.xlu0 %7039, %v8407_v18  }
 0x433   : > { %v8449_v42 = vpop.permute.xlu1 %2929  ;;  %v8455_v24 = vpop.permute.xlu0 %5128 }
 0x434   : > { %7019 = vset.pattern.permute.xlu1 %v13309_v10  ;;  %7040 = vset.pattern.permute.xlu0 %v13305_v9  ;;  %13896 = vst [vmem:[#allocation22_spill] sm:$0xff] %v8449_v42 }
 0x435   : > { %3716 = vperm.xlu1 %7019, %v2528_v51   ;;  %5504 = vperm.xlu0 %7040, %v8407_v18  }
 0x438   : > { %v8459_v34 = vpop.permute.xlu1 %3348  ;;  %v8465_v48 = vpop.permute.xlu0 %5484 }
 0x439   : > { %7020 = vset.pattern.permute.xlu1 %v13307_v47  ;;  %7042 = vset.pattern.permute.xlu0 %v13311_v30  ;;  %13897 = vst [vmem:[#allocation23_spill] sm:$0xff] %v8459_v34 }
 0x43a   : > { %4072 = vperm.xlu1 %7020, %v2528_v51   ;;  %3628 = vperm.xlu0 %7042, %v8427_v49  }
 0x43d   : > { %v8467_v56 = vpop.permute.xlu1 %3704  ;;  %v8475_v59 = vpop.permute.xlu0 %3344 }
 0x43e   : > { %7021 = vset.pattern.permute.xlu1 %v13318_v2  ;;  %7044 = vset.pattern.permute.xlu0 %v13307_v47  ;;  %13898 = vst [vmem:[#allocation24_spill] sm:$0xff] %v8467_v56  ;;  %13899 = vst [vmem:[#allocation25_spill] sm:$0xff] %v8475_v59 }
 0x43f   : > { %4428 = vperm.xlu1 %7021, %v2528_v51   ;;  %4340 = vperm.xlu0 %7044, %v8427_v49  }
 0x442   : > { %v8477_v11 = vpop.permute.xlu1 %4060  ;;  %v8484_v63 = vpop.permute.xlu0 %3700 }
 0x443   : > { %7022 = vset.pattern.permute.xlu1 %v13321_v62  ;;  %7047 = vset.pattern.permute.xlu0 %v13303_v38  ;;  %13900 = vst [vmem:[#allocation26_spill] sm:$0xff] %v8477_v11  ;;  %13901 = vst [vmem:[#allocation27_spill] sm:$0xff] %v8484_v63  ;;  %v13927_v11 = vsub.s32 1, %v7711_v19 }
 0x444   : > { %4784 = vperm.xlu1 %7022, %v2528_v51   ;;  %5408 = vperm.xlu0 %7047, %v8427_v49  }
 0x447   : > { %v8487_v52 = vpop.permute.xlu1 %4416 }
 0x448   : > { %7024 = vset.pattern.permute.xlu1 %v13305_v9  ;;  %7048 = vset.pattern.permute.xlu0 %v13305_v9  ;;  %13902 = vst [vmem:[#allocation28_spill] sm:$0xff] %v8487_v52 }
 0x449   : > { %5496 = vperm.xlu1 %7024, %v2528_v51   ;;  %5764 = vperm.xlu0 %7048, %v8427_v49   ;;  %v8497_v51 = vpop.permute.xlu0 %4412 }
 0x44a   : > { %13903 = vst [vmem:[#allocation29_spill] sm:$0xff] %v8497_v51 }
 0x44c   : > { %v8502_v17 = vpop.permute.xlu1 %4772 }
 0x44d   : > { %7025 = vset.pattern.permute.xlu1 %v13313_v7  ;;  %7049 = vset.pattern.permute.xlu0 %v13313_v7  ;;  %13904 = vst [vmem:[#allocation30_spill] sm:$0xff] %v8502_v17  ;;  %v8509_v36 = vpop.permute.xlu0 %4768 }
 0x44e   : > { %2959 = vperm.xlu1 %7025, %v8399_v14   ;;  %3261 = vperm.xlu0 %7049, %v8441_v0   ;;  %13905 = vst [vmem:[#allocation31_spill] sm:$0xff] %v8509_v36 }
 0x451   : > { %v8513_v21 = vpop.permute.xlu1 %2924 }
 0x452   : > { %7027 = vset.pattern.permute.xlu1 %v13309_v10  ;;  %7051 = vset.pattern.permute.xlu0 %v13309_v10  ;;  %13906 = vst [vmem:[#allocation32_spill] sm:$0xff] %v8513_v21  ;;  %v13917_v21 = vmov 3  }
 0x453   : > { %3728 = vperm.xlu1 %7027, %v8399_v14   ;;  %3980 = vperm.xlu0 %7051, %v8441_v0  }
 0x457   : > { %7029 = vset.pattern.permute.xlu1 %v13318_v2  ;;  %7053 = vset.pattern.permute.xlu0 %v13318_v2 }
 0x458   : > { %4440 = vperm.xlu1 %7029, %v8399_v14   ;;  %4692 = vperm.xlu0 %7053, %v8441_v0  }
 0x45c   : > { %7030 = vset.pattern.permute.xlu1 %v13321_v62  ;;  %7054 = vset.pattern.permute.xlu0 %v13321_v62 }
 0x45d   : > { %4796 = vperm.xlu1 %7030, %v8399_v14   ;;  %5048 = vperm.xlu0 %7054, %v8441_v0  }
 0x461   : > { %7031 = vset.pattern.permute.xlu1 %v13303_v38  ;;  %7058 = vset.pattern.permute.xlu0 %v13311_v30 }
 0x462   : > { %5152 = vperm.xlu1 %7031, %v8399_v14   ;;  %3636 = vperm.xlu0 %7058, %v8469_v28  }
 0x466   : > { %7032 = vset.pattern.permute.xlu1 %v13305_v9  ;;  %7059 = vset.pattern.permute.xlu0 %v13309_v10 }
 0x467   : > { %5508 = vperm.xlu1 %7032, %v8399_v14   ;;  %3992 = vperm.xlu0 %7059, %v8469_v28   ;;  %v5811_v14 = vsub.f32 0.0, %v8351_v3 }
 0x469   : > { %v5823_v54 = vmul.f32 1.442695, %v5811_v14  ;;  %v8527_v14 = vpop.permute.xlu0 %3356 }
 0x46a   : > { %13908 = vst [vmem:[#allocation33_spill] sm:$0xff] %v8527_v14  ;;  %v13923_v14 = vmov 7  }
 0x46b   : > { %7034 = vset.pattern.permute.xlu1 %v13311_v30  ;;  %7061 = vset.pattern.permute.xlu0 %v13318_v2  ;;  %7174 = vpow2.f32 %v5823_v54 }
 0x46c   : > { %3368 = vperm.xlu1 %7034, %v8407_v18   ;;  %4704 = vperm.xlu0 %7061, %v8469_v28  }
 0x470   : > { %7036 = vset.pattern.permute.xlu1 %v13307_v47  ;;  %7065 = vset.pattern.permute.xlu0 %v13313_v7  ;;  %v8538_v47 = vpop.f32.mrf.mxu0 }
 0x471   : > { %4080 = vperm.xlu1 %7036, %v8407_v18   ;;  %3271 = vperm.xlu0 %7065, %v8495_v37   ;;  %v5825_v18 = vmul.f32 1.442695, %v5812_v27  ;;  %v8532_v27 = vpop.permute.xlu1 %4056 }
 0x472   : > { %13909 = vst [vmem:[#allocation34_spill] sm:$0xff] %v8532_v27  ;;  %v13931_v27 = vsub.s32 2, %v7711_v19 }
 0x473   : > { %7176 = vpow2.f32 %v5825_v18  ;;  %v5827_v18 = vmul.f32 1.442695, %v5813_v1  ;;  %v8548_v1 = vpop.permute.xlu0 %4068 }
 0x474   : > { %13910 = vst [vmem:[#allocation35_spill] sm:$0xff] %v8548_v1 }
 0x475   : > { %7041 = vset.pattern.permute.xlu1 %v13313_v7  ;;  %7071 = vset.pattern.permute.xlu0 %v13303_v38  ;;  %7178 = vpow2.f32 %v5827_v18 }
 0x476   : > { %3266 = vperm.xlu1 %7041, %v8427_v49   ;;  %5412 = vperm.xlu0 %7071, %v8495_v37  }
 0x47a   : > { %7043 = vset.pattern.permute.xlu1 %v13309_v10  ;;  %7072 = vset.pattern.permute.xlu0 %v13305_v9  ;;  %v7169_v10 = vpop.eup %7168 }
 0x47b   : > { %v6891_v8 = vpop.f32.mrf.mxu1  ;;  %3984 = vperm.xlu1 %7043, %v8427_v49   ;;  %5768 = vperm.xlu0 %7072, %v8495_v37   ;;  %v7171_v20 = vpop.eup %7170  ;;  %v5831_v53 = vadd.f32 1.0, %v7169_v10 }
 0x47c   : > { %v8530_v46 = vadd.f32 %v6891_v8, %v8520_v13  ;;  %v5834_v50 = vadd.f32 1.0, %v7171_v20 }
 0x47d   : > { %v2759_v54 = vpop.f32.mrf.mxu1 }
 0x47e   : > { %v2807_v38 = vand.u32 2147483647, %v8530_v46  ;;  %v8536_v9 = vadd.f32 %v8520_v13, %v2759_v54 }
 0x47f   : > { %7045 = vset.pattern.permute.xlu1 %v13318_v2  ;;  %7078 = vset.pattern.permute.xlu0 %v13321_v62  ;;  %v7173_v62 = vpop.eup %7172 }
 0x480   : > { %v2815_v30 = vsub.f32 0.0, %v2807_v38  ;;  %v2806_v8 = vand.u32 2147483647, %v8536_v9  ;;  %v6894_v7 = vpop.f32.mrf.mxu1  ;;  %4696 = vperm.xlu1 %7045, %v8427_v49   ;;  %5068 = vperm.xlu0 %7078, %v8538_v47   ;;  %v8550_v38 = vpop.permute.xlu1 %5124  ;;  %v5832_v20 = vadd.f32 1.0, %v7173_v62 }
 0x481   : > { %v8546_v54 = vadd.f32 %v6894_v7, %v8520_v13  ;;  %v8557_v7 = vpop.f32.mrf.mxu0 }
 0x482   : > { %v2824_v12 = vmul.f32 1.442695, %v2815_v30  ;;  %v2814_v2 = vsub.f32 0.0, %v2806_v8  ;;  %v2769_v15 = vpop.f32.mrf.mxu1  ;;  %13911 = vst [vmem:[#allocation36_spill] sm:$0xff] %v8557_v7  ;;  %v13912_v30 = vmov 5   ;;  %v13913_v8 = vmov 0  }
 0x483   : > { %v2809_v41 = vand.u32 2147483647, %v8546_v54  ;;  %v8554_v23 = vadd.f32 %v8520_v13, %v2769_v15  ;;  %v7175_v15 = vpop.eup %7174 }
 0x484   : > { %7180 = vpow2.f32 %v2824_v12  ;;  %v2822_v61 = vmul.f32 1.442695, %v2814_v2  ;;  %7046 = vset.pattern.permute.xlu1 %v13912_v30  ;;  %7080 = vset.pattern.permute.xlu0 %v13913_v8  ;;  %v7177_v51 = vpop.eup %7176  ;;  %v5835_v63 = vadd.f32 1.0, %v7175_v15  ;;  %v8573_v62 = vpop.permute.xlu1 %5480 }
 0x485   : > { %7182 = vrcp.f32 %v5833_v4  ;;  %v2817_v10 = vsub.f32 0.0, %v2809_v41  ;;  %v2808_v18 = vand.u32 2147483647, %v8554_v23  ;;  %v6897_v36 = vpop.f32.mrf.mxu1  ;;  %5052 = vperm.xlu1 %7046, %v8427_v49   ;;  %3281 = vperm.xlu0 %7080, %v8557_v7   ;;  %v5829_v41 = vmul.f32 1.442695, %v5814_v40  ;;  %v8567_v4 = vpop.permute.xlu0 %4424 }
 0x486   : > { %7184 = vpow2.f32 %v2822_v61  ;;  %v8565_v45 = vadd.f32 %v6897_v36, %v8520_v13  ;;  %13914 = vst [vmem:[#allocation37_spill] sm:$0xff] %v8567_v4 }
 0x487   : > { %7186 = vrcp.f32 %v5831_v53  ;;  %v2828_v12 = vmul.f32 1.442695, %v2817_v10  ;;  %v2816_v2 = vsub.f32 0.0, %v2808_v18  ;;  %v2779_v52 = vpop.f32.mrf.mxu1  ;;  %v13915_v53 = vmov 1  }
 0x488   : > { %7188 = vrcp.f32 %v5834_v50  ;;  %v2811_v56 = vand.u32 2147483647, %v8565_v45  ;;  %v8571_v49 = vadd.f32 %v8520_v13, %v2779_v52  ;;  %v13916_v10 = vmov 2  }
 0x489   : > { %7190 = vpow2.f32 %v2828_v12  ;;  %v2826_v61 = vmul.f32 1.442695, %v2816_v2  ;;  %v6900_v36 = vpop.f32.mrf.mxu1  ;;  %7050 = vset.pattern.permute.xlu1 %v13915_v53  ;;  %7082 = vset.pattern.permute.xlu0 %v13916_v10  ;;  %v5836_v52 = vadd.f32 1.0, %v7177_v51  ;;  %v8589_v51 = vpop.permute.xlu0 %4780 }
 0x48a   : > { %7192 = vrcp.f32 %v5832_v20  ;;  %v2819_v50 = vsub.f32 0.0, %v2811_v56  ;;  %v2810_v40 = vand.u32 2147483647, %v8571_v49  ;;  %v8579_v18 = vadd.f32 %v6900_v36, %v8520_v13  ;;  %3624 = vperm.xlu1 %7050, %v8441_v0   ;;  %3996 = vperm.xlu0 %7082, %v8557_v7   ;;  %13918 = vst [vmem:[#allocation38_spill] sm:$0xff] %v8589_v51 }
 0x48b   : > { %7194 = vpow2.f32 %v2826_v61  ;;  %v2789_v15 = vpop.f32.mrf.mxu1  ;;  %v8591_v61 = vpop.permute.xlu1 %2939  ;;  %v13920_v51 = vmov 4  }
 0x48c   : > { %7196 = vpow2.f32 %v5829_v41  ;;  %v2832_v12 = vmul.f32 1.442695, %v2819_v50  ;;  %v2818_v2 = vsub.f32 0.0, %v2810_v40  ;;  %v2813_v42 = vand.u32 2147483647, %v8579_v18 }
 0x48d   : > { %7198 = vrcp.f32 %v5835_v63  ;;  %v8585_v56 = vadd.f32 %v8520_v13, %v2789_v15  ;;  %v7179_v63 = vpop.eup %7178 }
 0x48e   : > { %7200 = vpow2.f32 %v2832_v12  ;;  %v2830_v20 = vmul.f32 1.442695, %v2818_v2  ;;  %v2821_v36 = vsub.f32 0.0, %v2813_v42  ;;  %7052 = vset.pattern.permute.xlu1 %v13917_v21  ;;  %7083 = vset.pattern.permute.xlu0 %v13917_v21  ;;  %v13919_v2 = vmov 6  }
 0x48f   : > { %7202 = vrcp.f32 %v5836_v52  ;;  %v2812_v41 = vand.u32 2147483647, %v8585_v56  ;;  %4336 = vperm.xlu1 %7052, %v8441_v0   ;;  %4352 = vperm.xlu0 %7083, %v8557_v7   ;;  %v8637_v16 = vadd.f32 1.0, %v7179_v63 }
 0x490   : > { %v2836_v13 = vmul.f32 1.442695, %v2821_v36  ;;  %7204 = vpow2.f32 %v2830_v20  ;;  %v8600_v20 = vpop.permute.xlu0 %2934 }
 0x491   : > { %v7181_v50 = vpop.eup %7180  ;;  %v2820_v42 = vsub.f32 0.0, %v2812_v41  ;;  %13921 = vst [vmem:[#allocation39_spill] sm:$0xff] %v8600_v20  ;;  %v8602_v41 = vpop.permute.xlu1 %3712  ;;  %13932 = vst [vmem:[#allocation46_spill] sm:$0xff] %v8637_v16 }
 0x492   : > { %v7183_v40 = vpop.eup %7182  ;;  %v2839_v15 = vadd.f32 1.0, %v7181_v50  ;;  %7206 = vpow2.f32 %v2836_v13  ;;  %13922 = vst [vmem:[#allocation40_spill] sm:$0xff] %v8602_v41 }
 0x493   : > { %v7185_v12 = vpop.eup %7184  ;;  %v2834_v52 = vmul.f32 1.442695, %v2820_v42  ;;  %7055 = vset.pattern.permute.xlu1 %v13919_v2  ;;  %7084 = vset.pattern.permute.xlu0 %v13920_v51 }
 0x494   : > { %v7187_v17 = vpop.eup %7186  ;;  %7208 = vlog2.f32 %v2839_v15  ;;  %v2838_v4 = vadd.f32 1.0, %v7185_v12  ;;  %5404 = vperm.xlu1 %7055, %v8441_v0   ;;  %4708 = vperm.xlu0 %7084, %v8557_v7  }
 0x495   : > { %v7189_v36 = vpop.eup %7188  ;;  %7210 = vpow2.f32 %v2834_v52 }
 0x496   : > { %v7191_v13 = vpop.eup %7190  ;;  %7212 = vlog2.f32 %v2838_v4  ;;  %v8613_v4 = vrot.slane %v8605_v57, %v7959_v55  ;;  %v8630_v55 = vmul.f32 %v7183_v40, %v8341_v44  ;;  %v8650_v44 = vpop.f32.mrf.mxu0  ;;  %v5453_v40 = vsub.s32 7, %v7711_v19 }
 0x497   : > { %v7193_v50 = vpop.eup %7192  ;;  %v2841_v42 = vadd.f32 1.0, %v7191_v13  ;;  %v13925_v13 = vsub.s32 3, %v7711_v19  ;;  %13937 = vst [vmem:[#allocation51_spill] sm:$0xff] %v8650_v44 }
 0x498   : > { %v7195_v1 = vpop.eup %7194  ;;  %7056 = vset.pattern.permute.xlu1 %v13923_v14  ;;  %7086 = vset.pattern.permute.xlu0 %v13919_v2  ;;  %13924 = vst [vmem:[#allocation41_spill] sm:$0xff] %v8613_v4  ;;  %13930 = vst [vmem:[#allocation45_spill] sm:$0xff] %v8630_v55 }
 0x499   : > { %v7197_v15 = vpop.eup %7196  ;;  %v2840_v12 = vadd.f32 1.0, %v7195_v1  ;;  %5760 = vperm.xlu1 %7056, %v8441_v0   ;;  %5420 = vperm.xlu0 %7086, %v8557_v7   ;;  %7214 = vlog2.f32 %v2841_v42  ;;  %v8618_v41 = vrot.slane %v8605_v57, %v13925_v13  ;;  %v8623_v1 = vrot.slane %v8605_v57, %v13927_v11  ;;  %v8625_v0 = vpop.permute.xlu0 %3708 }
 0x49a   : > { %v7199_v20 = vpop.eup %7198  ;;  %13929 = vst [vmem:[#allocation44_spill] sm:$0xff] %v8625_v0  ;;  %v8627_v7 = vpop.permute.xlu1 %5136  ;;  %v8635_v13 = vrot.slane %v8605_v57, %v13931_v27  ;;  %v8640_v11 = vmul.f32 %v7187_v17, %v8343_v43  ;;  %v8643_v0 = vmul.f32 %v7189_v36, %v8345_v6  ;;  %v8648_v59 = vadd.f32 1.0, %v7197_v15  ;;  %v6606_v17 = vld [vmem:[%s998_s0] ss:$0 sm:$0xff] }
 0x49b   : > { %v7201_v52 = vpop.eup %7200  ;;  %13926 = vst [vmem:[#allocation42_spill] sm:$0xff] %v8618_v41  ;;  %13928 = vst [vmem:[#allocation43_spill] sm:$0xff] %v8623_v1  ;;  %7216 = vlog2.f32 %v2840_v12  ;;  %v8646_v12 = vmul.f32 %v7193_v50, %v8347_v58  ;;  %v8660_v6 = vmul.f32 %v7199_v20, %v8351_v3  ;;  %v4385_v58 = vsub.s32 4, %v7711_v19 }
 0x49c   : > { %v7203_v42 = vpop.eup %7202  ;;  %v2843_v34 = vadd.f32 1.0, %v7201_v52  ;;  %13933 = vst [vmem:[#allocation47_spill] sm:$0xff] %v8640_v11  ;;  %13934 = vst [vmem:[#allocation48_spill] sm:$0xff] %v8643_v0  ;;  %v5097_v27 = vsub.s32 6, %v7711_v19  ;;  %v4741_v36 = vsub.s32 5, %v7711_v19  ;;  %v8672_v50 = vmul.f32 %v6606_v17, %v8262_v39 }
 0x49d   : > { %13935 = vst [vmem:[#allocation49_spill] sm:$0xff] %v8646_v12  ;;  %13936 = vst [vmem:[#allocation50_spill] sm:$0xff] %v8648_v59  ;;  %7057 = vset.pattern.permute.xlu1 %v13913_v8  ;;  %7088 = vset.pattern.permute.xlu0 %v13915_v53  ;;  %v7205_v43 = vpop.eup %7204  ;;  %v8667_v63 = vmul.f32 %v7203_v42, %v8355_v60  ;;  %v8675_v20 = vmul.f32 %v6606_v17, %v8271_v33  ;;  %v8686_v42 = vpop.permute.xlu0 %4420  ;;  %v2799_v12 = vmax.f32 %v8530_v46, 0.0 }
 0x49e   : > { %13939 = vst [vmem:[#allocation52_spill] sm:$0xff] %v8660_v6  ;;  %7218 = vlog2.f32 %v2843_v34  ;;  %3276 = vperm.xlu1 %7057, %v8469_v28   ;;  %3652 = vperm.xlu0 %7088, %v8650_v44   ;;  %13941 = vst [vmem:[#allocation54_spill] sm:$0xff] %v8672_v50  ;;  %v8678_v34 = vmul.f32 %v6606_v17, %v8265_v32  ;;  %v8681_v15 = vmul.f32 %v6606_v17, %v8290_v5  ;;  %v8688_v59 = vpop.permute.xlu1 %5492 }
 0x49f   : > { %13940 = vst [vmem:[#allocation53_spill] sm:$0xff] %v8667_v63  ;;  %v7207_v3 = vpop.eup %7206  ;;  %13942 = vst [vmem:[#allocation55_spill] sm:$0xff] %v8675_v20  ;;  %v8684_v60 = vmul.f32 %v6606_v17, %v8284_v35  ;;  %v2842_v16 = vadd.f32 1.0, %v7205_v43  ;;  %v8691_v6 = vmul.f32 %v6606_v17, %v8304_v25  ;;  %v8694_v63 = vmul.f32 %v6606_v17, %v8300_v22 }
 0x4a0   : > { %13943 = vst [vmem:[#allocation56_spill] sm:$0xff] %v8678_v34  ;;  %13944 = vst [vmem:[#allocation57_spill] sm:$0xff] %v8681_v15  ;;  %v8697_v55 = vmul.f32 %v6606_v17, %v8314_v29  ;;  %v8704_v15 = vrot.slane %v8605_v57, %v5097_v27  ;;  %v2798_v17 = vmax.f32 %v8536_v9, 0.0  ;;  %v8714_v46 = vrot.slane %v8605_v57, %v4741_v36 }
 0x4a1   : > { %13945 = vst [vmem:[#allocation58_spill] sm:$0xff] %v8684_v60  ;;  %v7209_v52 = vpop.eup %7208  ;;  %13946 = vst [vmem:[#allocation59_spill] sm:$0xff] %v8686_v42  ;;  %v8701_v60 = vrot.slane %v8605_v57, %v4385_v58  ;;  %7220 = vlog2.f32 %v2842_v16  ;;  %v8733_v36 = vpop.permute.xlu0 %4776 }
 0x4a2   : > { %13947 = vst [vmem:[#allocation60_spill] sm:$0xff] %v8691_v6  ;;  %13948 = vst [vmem:[#allocation61_spill] sm:$0xff] %v8694_v63  ;;  %v7211_v0 = vpop.eup %7210  ;;  %v2849_v11 = vmul.f32 0.6931472, %v7209_v52  ;;  %7060 = vset.pattern.permute.xlu1 %v13917_v21  ;;  %7091 = vset.pattern.permute.xlu0 %v13920_v51  ;;  %v8709_v63 = vrot.slane %v8605_v57, %v5453_v40  ;;  %v2800_v52 = vmax.f32 %v8554_v23, 0.0  ;;  %v2845_v6 = vadd.f32 1.0, %v7207_v3  ;;  %v8735_v3 = vpop.permute.xlu1 %3352 }
 0x4a3   : > { %13949 = vst [vmem:[#allocation62_spill] sm:$0xff] %v8697_v55  ;;  %13950 = vst [vmem:[#allocation63_spill] sm:$0xff] %v8704_v15  ;;  %v7213_v43 = vpop.eup %7212  ;;  %v2801_v55 = vmax.f32 %v8546_v54, 0.0  ;;  %4348 = vperm.xlu1 %7060, %v8469_v28   ;;  %4720 = vperm.xlu0 %7091, %v8650_v44   ;;  %v2844_v9 = vadd.f32 1.0, %v7211_v0  ;;  %v8746_v40 = vpop.f32.mrf.mxu0 }
 0x4a4   : > { %13951 = vst [vmem:[#allocation64_spill] sm:$0xff] %v8709_v63  ;;  %13952 = vst [vmem:[#allocation65_spill] sm:$0xff] %v8714_v46  ;;  %v8718_v58 = vadd.f32 %v2849_v11, %v2799_v12  ;;  %v2847_v27 = vmul.f32 0.6931472, %v7213_v43  ;;  %7222 = vlog2.f32 %v2845_v6 }
 0x4a5   : > { %13954 = vst [vmem:[#allocation67_spill] sm:$0xff] %v8733_v36  ;;  %13955 = vst [vmem:[#allocation68_spill] sm:$0xff] %v8735_v3  ;;  %7224 = vlog2.f32 %v2844_v9 }
 0x4a6   : > { %13953 = vst [vmem:[#allocation66_spill] sm:$0xff] %v8718_v58  ;;  %v8725_v57 = vmul.f32 %v8718_v58, %v8265_v32  ;;  %v2899_v54 = vmul.f32 %v8613_v4, %v8718_v58  ;;  %v3320_v11 = vmul.f32 %v8623_v1, %v8718_v58  ;;  %v3676_v23 = vmul.f32 %v8635_v13, %v8718_v58  ;;  %v7215_v12 = vpop.eup %7214 }
 0x4a7   : > { %v4032_v16 = vmul.f32 %v8618_v41, %v8718_v58  ;;  %v4388_v32 = vmul.f32 %v8701_v60, %v8718_v58  ;;  %v5100_v0 = vmul.f32 %v8704_v15, %v8718_v58  ;;  %v5456_v43 = vmul.f32 %v8709_v63, %v8718_v58  ;;  %7062 = vset.pattern.permute.xlu1 %v13912_v30 }
 0x4a8   : > { %v7217_v20 = vpop.eup %7216  ;;  %13956 = vst [vmem:[#allocation69_spill] sm:$0xff] %v8746_v40  ;;  %v2908_v34 = vmul.f32 1.442695, %v2899_v54  ;;  %v3329_v50 = vmul.f32 1.442695, %v3320_v11  ;;  %v8748_v36 = vadd.f32 %v2847_v27, %v2798_v17  ;;  %7093 = vset.pattern.permute.xlu0 %v13913_v8  ;;  %5060 = vperm.xlu1 %7062, %v8469_v28   ;;  %v8754_v3 = vmul.f32 %v8455_v24, %v8725_v57 }
 0x4a9   : > { %v3685_v42 = vmul.f32 1.442695, %v3676_v23  ;;  %3291 = vperm.xlu0 %7093, %v8746_v40   ;;  %v4041_v25 = vmul.f32 1.442695, %v4032_v16  ;;  %v4397_v54 = vmul.f32 1.442695, %v4388_v32  ;;  %v8767_v9 = vmul.f32 %v8465_v48, %v8725_v57  ;;  %v8770_v16 = vpop.permute.xlu0 %3364 }
 0x4aa   : > { %13957 = vst [vmem:[#allocation70_spill] sm:$0xff] %v8748_v36  ;;  %v8760_v17 = vmul.f32 %v8748_v36, %v8262_v39  ;;  %v2853_v6 = vmul.f32 0.6931472, %v7215_v12  ;;  %7226 = vpow2.f32 %v2908_v34  ;;  %v5109_v11 = vmul.f32 1.442695, %v5100_v0  ;;  %13959 = vst [vmem:[#allocation72_spill] sm:$0xff] %v8770_v16  ;;  %v8772_v39 = vpop.permute.xlu1 %4064 }
 0x4ab   : > { %v7219_v27 = vpop.eup %7218  ;;  %v5465_v23 = vmul.f32 1.442695, %v5456_v43  ;;  %v2851_v30 = vmul.f32 0.6931472, %v7217_v20  ;;  %7228 = vpow2.f32 %v3329_v50  ;;  %13960 = vst [vmem:[#allocation73_spill] sm:$0xff] %v8772_v39 }
 0x4ac   : > { %13958 = vst [vmem:[#allocation71_spill] sm:$0xff] %v8760_v17  ;;  %v8762_v24 = vadd.f32 %v2853_v6, %v2801_v55  ;;  %7063 = vset.pattern.permute.xlu1 %v13919_v2  ;;  %7230 = vpow2.f32 %v3685_v42  ;;  %v8778_v50 = vmul.f32 %v8550_v38, %v8760_v17  ;;  %v2857_v55 = vmul.f32 0.6931472, %v7219_v27 }
 0x4ad   : > { %v8774_v34 = vadd.f32 %v2851_v30, %v2800_v52  ;;  %7094 = vset.pattern.permute.xlu0 %v13919_v2  ;;  %5416 = vperm.xlu1 %7063, %v8469_v28   ;;  %7232 = vpow2.f32 %v4041_v25  ;;  %v8803_v43 = vmul.f32 %v8573_v62, %v8760_v17  ;;  %v8815_v62 = vpop.permute.xlu0 %4076 }
 0x4ae   : > { %13962 = vst [vmem:[#allocation75_spill] sm:$0xff] %v8778_v50  ;;  %v8784_v48 = vmul.f32 %v8762_v24, %v8284_v35  ;;  %v2901_v20 = vmul.f32 %v8613_v4, %v8762_v24  ;;  %v3322_v30 = vmul.f32 %v8623_v1, %v8762_v24  ;;  %5432 = vperm.xlu0 %7094, %v8650_v44   ;;  %7234 = vpow2.f32 %v5109_v11  ;;  %v7221_v27 = vpop.eup %7220 }
 0x4af   : > { %13961 = vst [vmem:[#allocation74_spill] sm:$0xff] %v8774_v34  ;;  %v3678_v38 = vmul.f32 %v8635_v13, %v8762_v24  ;;  %v4034_v42 = vmul.f32 %v8618_v41, %v8762_v24  ;;  %v4390_v25 = vmul.f32 %v8701_v60, %v8762_v24  ;;  %7236 = vpow2.f32 %v5465_v23  ;;  %13964 = vst [vmem:[#allocation77_spill] sm:$0xff] %v8803_v43 }
 0x4b0   : > { %13963 = vst [vmem:[#allocation76_spill] sm:$0xff] %v8784_v48  ;;  %v2912_v35 = vmul.f32 1.442695, %v2901_v20  ;;  %v3333_v52 = vmul.f32 1.442695, %v3322_v30  ;;  %v4746_v12 = vmul.f32 %v8714_v46, %v8762_v24  ;;  %v4033_v0 = vmul.f32 %v8618_v41, %v8774_v34  ;;  %13966 = vst [vmem:[#allocation79_spill] sm:$0xff] %v8815_v62 }
 0x4b1   : > { %v3689_v32 = vmul.f32 1.442695, %v3678_v38  ;;  %7064 = vset.pattern.permute.xlu1 %v13923_v14  ;;  %7238 = vpow2.f32 %v4397_v54  ;;  %v4045_v11 = vmul.f32 1.442695, %v4034_v42  ;;  %v4745_v23 = vmul.f32 %v8714_v46, %v8774_v34  ;;  %v5133_v38 = vpop.permute.xlu1 %5132 }
 0x4b2   : > { %v8811_v20 = vmul.f32 %v8774_v34, %v8271_v33  ;;  %7096 = vset.pattern.permute.xlu0 %v13923_v14  ;;  %5772 = vperm.xlu1 %7064, %v8469_v28   ;;  %7240 = vpow2.f32 %v2912_v35  ;;  %v4401_v30 = vmul.f32 1.442695, %v4390_v25  ;;  %v5101_v54 = vmul.f32 %v8704_v15, %v8774_v34  ;;  %v7223_v35 = vpop.eup %7222 }
 0x4b3   : > { %v5102_v42 = vmul.f32 %v8704_v15, %v8762_v24  ;;  %5780 = vperm.xlu0 %7096, %v8538_v47   ;;  %7242 = vpow2.f32 %v3333_v52  ;;  %v4757_v33 = vmul.f32 1.442695, %v4746_v12  ;;  %v8827_v28 = vmul.f32 %v8627_v7, %v8784_v48  ;;  %v8830_v62 = vpop.eup %7224 }
 0x4b4   : > { %13965 = vst [vmem:[#allocation78_spill] sm:$0xff] %v8811_v20  ;;  %v8823_v6 = vmul.f32 %v5133_v38, %v8811_v20  ;;  %7244 = vpow2.f32 %v3689_v32  ;;  %v4043_v25 = vmul.f32 1.442695, %v4033_v0  ;;  %v4755_v58 = vmul.f32 1.442695, %v4745_v23 }
 0x4b5   : > { %v13345_v40 = vrot.slane %v8778_v50, 7  ;;  %7246 = vpow2.f32 %v4045_v11  ;;  %v5111_v14 = vmul.f32 1.442695, %v5101_v54  ;;  %v13341_v12 = vrot.slane %v8827_v28, 7  ;;  %v5489_v50 = vpop.permute.xlu1 %5488 }
 0x4b6   : > { %v5189_v52 = vrot.slane %v8823_v6, 7  ;;  %7066 = vset.pattern.permute.xlu1 %v13915_v53  ;;  %7248 = vpow2.f32 %v4401_v30  ;;  %v5113_v38 = vmul.f32 1.442695, %v5102_v42  ;;  %v13967_v7 = vmax.f32 %v8565_v45, 0.0  ;;  %v2945_v42 = vpop.permute.xlu0 %2944 }
 0x4b7   : > { %v2855_v32 = vmul.f32 0.6931472, %v7221_v27  ;;  %3632 = vperm.xlu1 %7066, %v8495_v37   ;;  %7105 = vset.pattern.permute.xlu0 %v13913_v8  ;;  %v8841_v0 = vpop.eup %7226  ;;  %7250 = vpow2.f32 %v4757_v33  ;;  %v13969_v23 = vrot.slane %v8754_v3, 7  ;;  %v13972_v33 = vmax.f32 %v8571_v49, 0.0 }
 0x4b8   : > { %v8837_v39 = vadd.f32 %v2857_v55, %v13967_v7  ;;  %13968 = vst [vmem:[#allocation80_spill] sm:$0xff] %v8841_v0  ;;  %v8847_v11 = vsel %vm1163_vm7, %v5189_v52, %v13341_v12  ;;  %v5457_v55 = vmul.f32 %v8709_v63, %v8774_v34  ;;  %v8857_v27 = vpop.eup %7228  ;;  %7252 = vpow2.f32 %v4043_v25 }
 0x4b9   : > { %v5201_v45 = vsel %vm1163_vm7, %v13345_v40, %v13969_v23  ;;  %13970 = vst [vmem:[#allocation81_spill] sm:$0xff] %v8857_v27  ;;  %v13971_v30 = vmov %v13969_v23  ;;  %v8865_v7 = vadd.f32 %v2855_v32, %v13972_v33  ;;  %v2861_v12 = vmul.f32 0.6931472, %v7223_v35  ;;  %v8867_v0 = vpop.eup %7230 }
 0x4ba   : > { %v5200_v54 = vsel %vm1163_vm7, %v13971_v30, %v5189_v52  ;;  %13973 = vst [vmem:[#allocation82_spill] sm:$0xff] %v8867_v0  ;;  %7254 = vpow2.f32 %v5111_v14  ;;  %v5458_v23 = vmul.f32 %v8709_v63, %v8762_v24  ;;  %v5467_v40 = vmul.f32 1.442695, %v5457_v55  ;;  %v8874_v34 = vpop.eup %7232 }
 0x4bb   : > { %v8872_v25 = vmul.f32 %v5489_v50, %v8811_v20  ;;  %13974 = vst [vmem:[#allocation83_spill] sm:$0xff] %v8874_v34  ;;  %7256 = vpow2.f32 %v5113_v38  ;;  %v2902_v49 = vmul.f32 %v8613_v4, %v8865_v7  ;;  %v8880_v35 = vmul.f32 %v8688_v59, %v8784_v48  ;;  %7067 = vset.pattern.permute.xlu1 %v13916_v10  ;;  %v8884_v14 = vpop.eup %7234 }
 0x4bc   : > { %13976 = vst [vmem:[#allocation85_spill] sm:$0xff] %v8884_v14  ;;  %7258 = vpow2.f32 %v5467_v40  ;;  %v5469_v24 = vmul.f32 1.442695, %v5458_v23  ;;  %v8889_v38 = vmul.f32 %v8865_v7, %v8290_v5  ;;  %3988 = vperm.xlu1 %7067, %v8495_v37   ;;  %v8892_v32 = vpop.eup %7236  ;;  %v5212_v59 = vmul.f32 %v8884_v14, %v5201_v45 }
 0x4bd   : > { %13975 = vst [vmem:[#allocation84_spill] sm:$0xff] %v8880_v35  ;;  %v5545_v50 = vrot.slane %v8872_v25, 7  ;;  %13978 = vst [vmem:[#allocation87_spill] sm:$0xff] %v8892_v32  ;;  %7260 = vpow2.f32 %v4755_v58  ;;  %v2914_v55 = vmul.f32 1.442695, %v2902_v49  ;;  %v13349_v30 = vrot.slane %v8880_v35, 7 }
 0x4be   : > { %13977 = vst [vmem:[#allocation86_spill] sm:$0xff] %v8889_v38  ;;  %v5205_v40 = vsel %vm1149_vm10, %v5200_v54, 0.0  ;;  %v13979_v33 = vmax.f32 %v8579_v18, 0.0  ;;  %7262 = vpow2.f32 %v5469_v24  ;;  %v2804_v5 = vmax.f32 %v8585_v56, 0.0  ;;  %v8903_v52 = vpop.eup %7238  ;;  %v5141_v54 = vpop.permute.xlu0 %5140 }
 0x4bf   : > { %13981 = vst [vmem:[#allocation89_spill] sm:$0xff] %v8903_v52  ;;  %7264 = vpow2.f32 %v2914_v55  ;;  %v8910_v58 = vsel %vm1163_vm7, %v5545_v50, %v13349_v30  ;;  %v13982_v45 = vrot.slane %v8767_v9, 7  ;;  %v13983_v18 = vrot.slane %v8803_v43, 7  ;;  %v8918_v56 = vpop.eup %7240  ;;  %v13999_v52 = vld [vmem:[#allocation25_spill] sm:$0xff] }
 0x4c0   : > { %v8900_v23 = vadd.f32 %v2861_v12, %v13979_v33  ;;  %13984 = vst [vmem:[#allocation90_spill] sm:$0xff] %v8918_v56  ;;  %v5103_v33 = vmul.f32 %v8704_v15, %v8865_v7  ;;  %v8928_v30 = vmul.f32 %v5141_v54, %v8889_v38  ;;  %7068 = vset.pattern.permute.xlu1 %v13917_v21  ;;  %v8931_v0 = vpop.eup %7242  ;;  %v2950_v56 = vpop.permute.xlu1 %2949 }
 0x4c1   : > { %v5557_v12 = vsel %vm1163_vm7, %v13983_v18, %v13982_v45  ;;  %v13985_v49 = vmov %v13982_v45  ;;  %13986 = vst [vmem:[#allocation91_spill] sm:$0xff] %v8931_v0  ;;  %v8934_v45 = vadd.f32 %v5212_v59, %v8754_v3  ;;  %v8938_v18 = vmul.f32 %v8837_v39, %v8300_v22  ;;  %4344 = vperm.xlu1 %7068, %v8495_v37   ;;  %v8947_v54 = vpop.eup %7244  ;;  %v14000_v0 = vld [vmem:[#allocation23_spill] sm:$0xff] }
 0x4c2   : > { %13980 = vst [vmem:[#allocation88_spill] sm:$0xff] %v8900_v23  ;;  %v5556_v24 = vsel %vm1163_vm7, %v13985_v49, %v5545_v50  ;;  %v5568_v55 = vmul.f32 %v8892_v32, %v5557_v12  ;;  %v2903_v50 = vmul.f32 %v8613_v4, %v8837_v39  ;;  %v8944_v12 = vmul.f32 %v8591_v61, %v8784_v48  ;;  %v8954_v43 = vpop.eup %7246 }
 0x4c3   : > { %13987 = vst [vmem:[#allocation92_spill] sm:$0xff] %v8934_v45  ;;  %13989 = vst [vmem:[#allocation94_spill] sm:$0xff] %v8947_v54  ;;  %v5115_v3 = vmul.f32 1.442695, %v5103_v33  ;;  %v13359_v59 = vrot.slane %v8928_v30, 7  ;;  %v8958_v61 = vmul.f32 %v2945_v42, %v8889_v38  ;;  %v8961_v44 = vmul.f32 %v2950_v56, %v8938_v18  ;;  %v8963_v54 = vpop.eup %7248 }
 0x4c4   : > { %13988 = vst [vmem:[#allocation93_spill] sm:$0xff] %v8944_v12  ;;  %v8950_v49 = vadd.f32 %v5568_v55, %v8767_v9  ;;  %v2859_v22 = vmul.f32 0.6931472, %v8830_v62  ;;  %13991 = vst [vmem:[#allocation96_spill] sm:$0xff] %v8954_v43  ;;  %v2916_v63 = vmul.f32 1.442695, %v2903_v50  ;;  %v8974_v42 = vpop.eup %7250  ;;  %v9014_v16 = vmul.f32 %v14000_v0, %v8725_v57 }
 0x4c5   : > { %13992 = vst [vmem:[#allocation97_spill] sm:$0xff] %v8963_v54  ;;  %v5561_v9 = vsel %vm1149_vm10, %v5556_v24, 0.0  ;;  %7266 = vpow2.f32 %v5115_v3  ;;  %v13993_v62 = vrot.slane %v8827_v28, 7  ;;  %13994 = vst [vmem:[#allocation98_spill] sm:$0xff] %v8974_v42  ;;  %v2998_v56 = vrot.slane %v8958_v61, 7  ;;  %7069 = vset.pattern.permute.xlu1 %v13920_v51  ;;  %v8983_v3 = vpop.eup %7252 }
 0x4c6   : > { %13990 = vst [vmem:[#allocation95_spill] sm:$0xff] %v8950_v49  ;;  %7268 = vpow2.f32 %v2916_v63  ;;  %v13367_v50 = vrot.slane %v8961_v44, 7  ;;  %v8980_v24 = vmul.f32 %v8900_v23, %v8314_v29  ;;  %13996 = vst [vmem:[#allocation100_spill] sm:$0xff] %v8983_v3  ;;  %v3319_v63 = vmul.f32 %v8623_v1, %v8748_v36  ;;  %4700 = vperm.xlu1 %7069, %v8495_v37  }
 0x4c7   : > { %v5198_v55 = vsel %vm1163_vm7, %v13993_v62, %v13359_v59  ;;  %v8987_v59 = vadd.f32 %v2859_v22, %v2804_v5  ;;  %v7255_v33 = vpop.eup %7254  ;;  %v13998_v62 = vrot.slane %v8944_v12, 7  ;;  %v3373_v22 = vpop.permute.xlu0 %3372  ;;  %v9008_v23 = vmul.f32 %v13999_v52, %v8760_v17  ;;  %14001 = vst [vmem:[#allocation25_spill] sm:$0xff] %v9014_v16 }
 0x4c8   : > { %13995 = vst [vmem:[#allocation99_spill] sm:$0xff] %v8980_v24  ;;  %v8994_v29 = vsel %vm1151_vm9, %v5198_v55, 0.0  ;;  %v9000_v3 = vsel %vm1163_vm7, %v2998_v56, %v13367_v50  ;;  %v9010_v42 = vpop.eup %7256  ;;  %v5165_v55 = vrot.slane %v7255_v33, 7  ;;  %v5213_v54 = vmul.f32 %v7255_v33, %v5205_v40  ;;  %v3721_v50 = vpop.permute.xlu1 %3720 }
 0x4c9   : > { %13997 = vst [vmem:[#allocation101_spill] sm:$0xff] %v8987_v59  ;;  %v3005_v5 = vsel %vm1163_vm7, %v13998_v62, %v2998_v56  ;;  %v3327_v43 = vmul.f32 1.442695, %v3319_v63  ;;  %v9016_v38 = vpop.eup %7258  ;;  %v5166_v12 = vrot.slane %v9010_v42, 7  ;;  %v5214_v56 = vmul.f32 %v9010_v42, %v8847_v11 }
 0x4ca   : > { %14002 = vst [vmem:[#allocation23_spill] sm:$0xff] %v9016_v38  ;;  %v9022_v52 = vmul.f32 %v3373_v22, %v8980_v24  ;;  %v9025_v62 = vmul.f32 %v3721_v50, %v8938_v18  ;;  %v9027_v40 = vpop.eup %7260  ;;  %v14006_v63 = vrot.slane %v8884_v14, 7  ;;  %v5221_v2 = vadd.f32 %v5213_v54, %v8823_v6 }
 0x4cb   : > { %14005 = vst [vmem:[#allocation104_spill] sm:$0xff] %v9027_v40  ;;  %v13382_v48 = vrot.slane %v9016_v38, 7  ;;  %v5569_v20 = vmul.f32 %v9016_v38, %v5561_v9  ;;  %v14007_v11 = vmov 5   ;;  %v9037_v22 = vpop.eup %7262  ;;  %v5175_v50 = vsel %vm1163_vm7, %v5165_v55, %v5166_v12 }
 0x4cc   : > { %14003 = vst [vmem:[#allocation102_spill] sm:$0xff] %v9022_v52  ;;  %14004 = vst [vmem:[#allocation103_spill] sm:$0xff] %v9025_v62  ;;  %v5176_v0 = vsel %vm1163_vm7, %v14006_v63, %v5165_v55  ;;  %7070 = vset.pattern.permute.xlu1 %v14007_v11  ;;  %v9044_v14 = vadd.f32 %v5214_v56, %v8827_v28  ;;  %7270 = vpow2.f32 %v3327_v43  ;;  %v9047_v6 = vpop.eup %7264  ;;  %v5261_v9 = vrot.slane %v5221_v2, 6 }
 0x4cd   : > { %14008 = vst [vmem:[#allocation105_spill] sm:$0xff] %v9037_v22  ;;  %v5181_v40 = vsel %vm1149_vm10, %v5176_v0, 1.0  ;;  %5056 = vperm.xlu1 %7070, %v8495_v37   ;;  %14009 = vst [vmem:[#allocation106_spill] sm:$0xff] %v9047_v6  ;;  %v9050_v54 = vmul.f32 %v9010_v42, %v5175_v50  ;;  %v14011_v63 = vrot.slane %v8892_v32, 7  ;;  %v4031_v28 = vmul.f32 %v8618_v41, %v8748_v36  ;;  %v4085_v0 = vpop.permute.xlu0 %4084 }
 0x4ce   : > { %v5262_v43 = vrot.slane %v9044_v14, 6  ;;  %v5570_v37 = vmul.f32 %v9037_v22, %v8910_v58  ;;  %v9064_v56 = vadd.f32 %v5569_v20, %v8872_v25  ;;  %v3014_v42 = vsel %vm1151_vm9, %v3005_v5, 0.0 }
 0x4cf   : > { %14010 = vst [vmem:[#allocation107_spill] sm:$0xff] %v9050_v54  ;;  %v5532_v55 = vsel %vm1163_vm7, %v14011_v63, %v13382_v48  ;;  %v9068_v50 = vmul.f32 %v7255_v33, %v5181_v40  ;;  %v14014_v32 = vrot.slane %v8934_v45, 6  ;;  %v3022_v36 = vmul.f32 %v9047_v6, %v3014_v42 }
 0x4d0   : > { %14012 = vst [vmem:[#allocation108_spill] sm:$0xff] %v9064_v56  ;;  %v5537_v48 = vsel %vm1149_vm10, %v5532_v55, 1.0  ;;  %v5271_v20 = vsel %vm2129_vm15, %v5261_v9, %v5262_v43  ;;  %v9082_v58 = vadd.f32 %v5570_v37, %v8880_v35  ;;  %v13391_v33 = vrot.slane %v9064_v56, 6 }
 0x4d1   : > { %14013 = vst [vmem:[#allocation109_spill] sm:$0xff] %v9068_v50  ;;  %v5272_v63 = vsel %vm2129_vm15, %v14014_v32, %v5261_v9  ;;  %7073 = vset.pattern.permute.xlu1 %v13913_v8  ;;  %v5286_v5 = vmul.f32 %v5271_v20, %v9050_v54  ;;  %v9089_v40 = vadd.f32 %v3022_v36, %v8958_v61  ;;  %v9092_v9 = vpop.permute.xlu1 %4432  ;;  %v14017_v37 = vrot.slane %v8950_v49, 6 }
 0x4d2   : > { %v5277_v25 = vsel %vm2115_vm4, %v5272_v63, 0.0  ;;  %14015 = vst [vmem:[#allocation110_spill] sm:$0xff] %v9082_v58  ;;  %3286 = vperm.xlu1 %7073, %v8538_v47   ;;  %v9095_v42 = vpop.eup %7266  ;;  %v3407_v36 = vrot.slane %v9008_v23, 7  ;;  %v9112_v54 = vmul.f32 %v9016_v38, %v5537_v48  ;;  %v5105_v35 = vmul.f32 %v8704_v15, %v8987_v59 }
 0x4d3   : > { %v5285_v32 = vmul.f32 %v5277_v25, %v9068_v50  ;;  %14016 = vst [vmem:[#allocation111_spill] sm:$0xff] %v9089_v40  ;;  %v5628_v63 = vsel %vm2129_vm15, %v14017_v37, %v13391_v33  ;;  %v9106_v25 = vpop.eup %7268  ;;  %v9109_v55 = vadd.f32 %v5286_v5, %v9044_v14  ;;  %v13392_v45 = vrot.slane %v9095_v42, 7  ;;  %v2955_v14 = vpop.permute.xlu0 %2954 }
 0x4d4   : > { %14019 = vst [vmem:[#allocation113_spill] sm:$0xff] %v9112_v54  ;;  %v5633_v49 = vsel %vm2115_vm4, %v5628_v63, 0.0  ;;  %v5215_v33 = vmul.f32 %v9095_v42, %v8994_v29  ;;  %v13397_v61 = vrot.slane %v9106_v25, 7  ;;  %v3023_v20 = vmul.f32 %v9106_v25, %v9000_v3 }
 0x4d5   : > { %14018 = vst [vmem:[#allocation112_spill] sm:$0xff] %v9109_v55  ;;  %v9123_v5 = vadd.f32 %v5285_v32, %v5221_v2  ;;  %v5641_v48 = vmul.f32 %v5633_v49, %v9112_v54  ;;  %v5174_v63 = vsel %vm1163_vm7, %v5166_v12, %v13392_v45  ;;  %v14021_v37 = vrot.slane %v9022_v52, 7  ;;  %v4789_v55 = vpop.permute.xlu1 %4788 }
 0x4d6   : > { %7074 = vset.pattern.permute.xlu1 %v13915_v53  ;;  %v5183_v3 = vsel %vm1151_vm9, %v5174_v63, 1.0  ;;  %v9138_v2 = vadd.f32 %v5215_v33, %v8928_v30  ;;  %v14022_v49 = vrot.slane %v9047_v6, 7  ;;  %v9152_v45 = vadd.f32 %v3023_v20, %v8961_v44  ;;  %v14030_v6 = vld [vmem:[#allocation26_spill] sm:$0xff] }
 0x4d7   : > { %14020 = vst [vmem:[#allocation114_spill] sm:$0xff] %v9123_v5  ;;  %v3422_v29 = vsel %vm1163_vm7, %v14021_v37, %v3407_v36  ;;  %3644 = vperm.xlu1 %7074, %v8538_v47   ;;  %v9149_v37 = vmul.f32 %v9095_v42, %v5183_v3  ;;  %v4039_v32 = vmul.f32 1.442695, %v4031_v28  ;;  %v9168_v20 = vadd.f32 %v5641_v48, %v9064_v56  ;;  %v3725_v3 = vpop.permute.xlu0 %3724  ;;  %v14036_v5 = vld [vmem:[#allocation19_spill] sm:$0xff] }
 0x4d8   : > { %v2980_v12 = vsel %vm1163_vm7, %v14022_v49, %v13397_v61  ;;  %v3423_v38 = vsel %vm1147_vm8, %v3422_v29, 0.0  ;;  %v14026_v49 = vrot.slane %v9014_v16, 7  ;;  %v14029_v29 = vld [vmem:[#allocation34_spill] sm:$0xff]  ;;  %v9177_v52 = vmul.f32 %v14030_v6, %v8725_v57 }
 0x4d9   : > { %14023 = vst [vmem:[#allocation115_spill] sm:$0xff] %v9149_v37  ;;  %v9155_v33 = vmul.f32 %v9106_v25, %v2980_v12  ;;  %v9165_v54 = vpop.eup %7270  ;;  %14028 = vst [vmem:[#allocation118_spill] sm:$0xff] %v9168_v20  ;;  %v13409_v12 = vrot.slane %v9152_v45, 6  ;;  %v9173_v50 = vmul.f32 %v14029_v29, %v8760_v17  ;;  %7272 = vpow2.f32 %v4039_v32  ;;  %v5145_v16 = vpop.permute.xlu1 %5144 }
 0x4da   : > { %v3421_v61 = vsel %vm1163_vm7, %v3407_v36, %v14026_v49  ;;  %14027 = vst [vmem:[#allocation117_spill] sm:$0xff] %v9165_v54  ;;  %14031 = vst [vmem:[#allocation34_spill] sm:$0xff] %v9177_v52  ;;  %v14032_v36 = vrot.slane %v9138_v2, 6  ;;  %v3431_v49 = vmul.f32 %v9165_v54, %v3423_v38  ;;  %v9185_v48 = vmul.f32 %v4085_v0, %v8980_v24  ;;  %v14060_v24 = vld [vmem:[#allocation86_spill] sm:$0xff] }
 0x4db   : > { %14024 = vst [vmem:[#allocation116_spill] sm:$0xff] %v9155_v33  ;;  %7075 = vset.pattern.permute.xlu1 %v13916_v10  ;;  %v14034_v56 = vrot.slane %v9089_v40, 6  ;;  %v4119_v38 = vrot.slane %v9173_v50, 7  ;;  %v13417_v40 = vrot.slane %v9177_v52, 7  ;;  %v14058_v54 = vmov 6  }
 0x4dc   : > { %v5270_v28 = vsel %vm2129_vm15, %v5262_v43, %v14032_v36  ;;  %14033 = vst [vmem:[#allocation26_spill] sm:$0xff] %v9185_v48  ;;  %4000 = vperm.xlu1 %7075, %v8538_v47   ;;  %v9202_v36 = vadd.f32 %v3431_v49, %v9008_v23  ;;  %v9220_v49 = vmul.f32 %v8857_v27, %v3421_v61  ;;  %v5119_v17 = vmul.f32 1.442695, %v5105_v35 }
 0x4dd   : > { %v5279_v6 = vsel %vm2117_vm3, %v5270_v28, 0.0  ;;  %v3076_v43 = vsel %vm2129_vm15, %v14034_v56, %v13409_v12  ;;  %v13414_v28 = vrot.slane %v9185_v48, 7  ;;  %v9209_v56 = vmul.f32 %v8987_v59, %v14036_v5  ;;  %v5501_v48 = vpop.permute.xlu1 %5500 }
 0x4de   : > { %v5287_v0 = vmul.f32 %v5279_v6, %v9149_v37  ;;  %v3095_v32 = vmul.f32 %v3076_v43, %v9155_v33  ;;  %14035 = vst [vmem:[#allocation119_spill] sm:$0xff] %v9202_v36  ;;  %v2904_v12 = vmul.f32 %v8613_v4, %v8987_v59  ;;  %14040 = vst [vmem:[#allocation122_spill] sm:$0xff] %v9220_v49  ;;  %v4437_v37 = vpop.permute.xlu0 %4436  ;;  %v14046_v36 = vrot.slane %v8961_v44, 7  ;;  %v14057_v49 = vld [vmem:[#allocation33_spill] sm:$0xff] }
 0x4df   : > { %14037 = vst [vmem:[#allocation19_spill] sm:$0xff] %v9209_v56  ;;  %v4134_v43 = vsel %vm1163_vm7, %v13414_v28, %v4119_v38  ;;  %v4133_v29 = vsel %vm1163_vm7, %v4119_v38, %v13417_v40  ;;  %v9240_v28 = vmul.f32 %v2955_v14, %v9209_v56  ;;  %v9243_v5 = vmul.f32 %v4789_v55, %v8938_v18 }
 0x4e0   : > { %v9214_v6 = vadd.f32 %v5287_v0, %v9138_v2  ;;  %v9217_v23 = vadd.f32 %v3095_v32, %v9152_v45  ;;  %v9233_v0 = vmul.f32 %v9092_v9, %v8938_v18  ;;  %v2918_v32 = vmul.f32 1.442695, %v2904_v12  ;;  %7076 = vset.pattern.permute.xlu1 %v13917_v21 }
 0x4e1   : > { %v4135_v33 = vsel %vm1147_vm8, %v4134_v43, 0.0  ;;  %14041 = vst [vmem:[#allocation123_spill] sm:$0xff] %v9243_v5  ;;  %4356 = vperm.xlu1 %7076, %v8538_v47   ;;  %v3681_v9 = vmul.f32 %v8635_v13, %v8987_v59  ;;  %v9249_v12 = vmul.f32 %v3725_v3, %v9209_v56  ;;  %v5104_v38 = vmul.f32 %v8704_v15, %v8837_v39 }
 0x4e2   : > { %14038 = vst [vmem:[#allocation120_spill] sm:$0xff] %v9214_v6  ;;  %14039 = vst [vmem:[#allocation121_spill] sm:$0xff] %v9217_v23  ;;  %7274 = vpow2.f32 %v2918_v32  ;;  %v9254_v43 = vmul.f32 %v8874_v34, %v4133_v29  ;;  %v9258_v55 = vmul.f32 %v5145_v16, %v8938_v18  ;;  %v4393_v32 = vmul.f32 %v8701_v60, %v8987_v59  ;;  %v14053_v6 = vld [vmem:[#allocation78_spill] sm:$0xff]  ;;  %v14054_v34 = vld [vmem:[#allocation68_spill] sm:$0xff] }
 0x4e3   : > { %14042 = vst [vmem:[#allocation124_spill] sm:$0xff] %v9249_v12  ;;  %v3695_v61 = vmul.f32 1.442695, %v3681_v9  ;;  %v13427_v40 = vrot.slane %v9249_v12, 7  ;;  %v5117_v20 = vmul.f32 1.442695, %v5104_v38  ;;  %v9264_v3 = vmul.f32 %v4437_v37, %v9209_v56  ;;  %v4793_v9 = vpop.permute.xlu0 %4792 }
 0x4e4   : > { %14043 = vst [vmem:[#allocation125_spill] sm:$0xff] %v9254_v43  ;;  %v13424_v14 = vrot.slane %v9258_v55, 7  ;;  %v4407_v43 = vmul.f32 1.442695, %v4393_v32  ;;  %v14045_v37 = vrot.slane %v9240_v28, 7  ;;  %v14047_v32 = vrot.slane %v8928_v30, 7 }
 0x4e5   : > { %14044 = vst [vmem:[#allocation126_spill] sm:$0xff] %v9264_v3  ;;  %7077 = vset.pattern.permute.xlu1 %v13920_v51  ;;  %7276 = vpow2.f32 %v3695_v61  ;;  %v9289_v61 = vmul.f32 %v5501_v48, %v8938_v18  ;;  %v14050_v44 = vrot.slane %v9025_v62, 7  ;;  %v4749_v30 = vmul.f32 %v8714_v46, %v8987_v59 }
 0x4e6   : > { %4712 = vperm.xlu1 %7077, %v8538_v47   ;;  %v3003_v29 = vsel %vm1163_vm7, %v14046_v36, %v14045_v37  ;;  %7278 = vpow2.f32 %v5117_v20  ;;  %v9286_v16 = vsel %vm1163_vm7, %v14047_v32, %v13424_v14  ;;  %v9291_v38 = vpop.eup %7272  ;;  %v9302_v36 = vmul.f32 %v4793_v9, %v9209_v56  ;;  %v3361_v9 = vpop.permute.xlu1 %3360 }
 0x4e7   : > { %14048 = vst [vmem:[#allocation127_spill] sm:$0xff] %v9289_v61  ;;  %14049 = vst [vmem:[#allocation128_spill] sm:$0xff] %v9291_v38  ;;  %v3772_v20 = vsel %vm1163_vm7, %v14050_v44, %v13427_v40  ;;  %7280 = vpow2.f32 %v4407_v43  ;;  %v4143_v48 = vmul.f32 %v9291_v38, %v4135_v33  ;;  %v14051_v37 = vrot.slane %v9264_v3, 7  ;;  %v14056_v38 = vld [vmem:[#allocation76_spill] sm:$0xff] }
 0x4e8   : > { %v14052_v32 = vrot.slane %v9233_v0, 7  ;;  %v3323_v23 = vmul.f32 %v8623_v1, %v8865_v7  ;;  %v3324_v43 = vmul.f32 %v8623_v1, %v8837_v39  ;;  %v4763_v44 = vmul.f32 1.442695, %v4749_v30 }
 0x4e9   : > { %v9318_v33 = vmul.f32 %v14054_v34, %v14053_v6  ;;  %v3378_v27 = vmul.f32 %v14057_v49, %v14056_v38  ;;  %v9326_v1 = vmul.f32 %v3361_v9, %v14060_v24  ;;  %v9330_v30 = vadd.f32 %v4143_v48, %v9173_v50  ;;  %v14064_v50 = vld [vmem:[#allocation72_spill] sm:$0xff]  ;;  %v5149_v9 = vpop.permute.xlu0 %5148  ;;  %v14067_v49 = vld [vmem:[#allocation91_spill] sm:$0xff] }
 0x4ea   : > { %v4484_v14 = vsel %vm1163_vm7, %v14052_v32, %v14051_v37  ;;  %7079 = vset.pattern.permute.xlu1 %v14058_v54  ;;  %v3016_v32 = vsel %vm1153_vm13, %v3003_v29, 0.0  ;;  %v3335_v58 = vmul.f32 1.442695, %v3323_v23  ;;  %v3337_v63 = vmul.f32 1.442695, %v3324_v43 }
 0x4eb   : > { %14055 = vst [vmem:[#allocation68_spill] sm:$0xff] %v9318_v33  ;;  %5424 = vperm.xlu1 %7079, %v8538_v47   ;;  %14061 = vst [vmem:[#allocation76_spill] sm:$0xff] %v9330_v30  ;;  %v3785_v34 = vsel %vm1153_vm13, %v3772_v20, 0.0  ;;  %7282 = vpow2.f32 %v4763_v44  ;;  %v4497_v40 = vsel %vm1153_vm13, %v4484_v14, 0.0  ;;  %v14062_v23 = vrot.slane %v9302_v36, 7  ;;  %v14068_v47 = vld [vmem:[#allocation36_spill] sm:$0xff] }
 0x4ec   : > { %v14063_v29 = vrot.slane %v9243_v5, 7  ;;  %7284 = vpow2.f32 %v3335_v58  ;;  %v9346_v20 = vmul.f32 %v14064_v50, %v8938_v18  ;;  %v3410_v48 = vrot.slane %v3378_v27, 7 }
 0x4ed   : > { %7286 = vpow2.f32 %v3337_v63  ;;  %v3411_v44 = vrot.slane %v9326_v1, 7  ;;  %v9355_v58 = vmul.f32 %v5149_v9, %v9209_v56  ;;  %v3679_v63 = vmul.f32 %v8635_v13, %v8865_v7 }
 0x4ee   : > { %v4840_v43 = vsel %vm1163_vm7, %v14063_v29, %v14062_v23  ;;  %14065 = vst [vmem:[#allocation33_spill] sm:$0xff] %v9346_v20  ;;  %v14069_v15 = vrot.slane %v9318_v33, 7  ;;  %v3680_v23 = vmul.f32 %v8635_v13, %v8837_v39  ;;  %7288 = vpow2.f32 %v5119_v17 }
 0x4ef   : > { %v9349_v14 = vpop.eup %7274  ;;  %7081 = vset.pattern.permute.xlu1 %v13915_v53  ;;  %v3418_v22 = vsel %vm1163_vm7, %v3410_v48, %v3411_v44  ;;  %v3691_v51 = vmul.f32 1.442695, %v3679_v63  ;;  %v14073_v63 = vrot.slane %v9355_v58, 7 }
 0x4f0   : > { %14066 = vst [vmem:[#allocation86_spill] sm:$0xff] %v9349_v14  ;;  %v13459_v29 = vrot.slane %v9349_v14, 7  ;;  %v3024_v50 = vmul.f32 %v9349_v14, %v3016_v32  ;;  %3640 = vperm.xlu1 %7081, %v14068_v47   ;;  %v3419_v9 = vsel %vm1163_vm7, %v14069_v15, %v3410_v48  ;;  %v14070_v32 = vrot.slane %v9106_v25, 7 }
 0x4f1   : > { %v3434_v33 = vmul.f32 %v14067_v49, %v3419_v9  ;;  %v4853_v48 = vsel %vm1153_vm13, %v4840_v43, 0.0  ;;  %v14074_v9 = vrot.slane %v9258_v55, 7  ;;  %7290 = vpow2.f32 %v3691_v51 }
 0x4f2   : > { %v2979_v30 = vsel %vm1163_vm7, %v14070_v32, %v13459_v29  ;;  %v9380_v54 = vadd.f32 %v3024_v50, %v9240_v28  ;;  %v9383_v15 = vpop.eup %7276 }
 0x4f3   : > { %v2992_v35 = vsel %vm1153_vm13, %v2979_v30, 1.0  ;;  %v9390_v25 = vpop.eup %7278  ;;  %v3793_v50 = vmul.f32 %v9383_v15, %v3785_v34  ;;  %v9394_v29 = vadd.f32 %v3434_v33, %v3378_v27  ;;  %v5196_v30 = vsel %vm1163_vm7, %v14074_v9, %v14073_v63 }
 0x4f4   : > { %14071 = vst [vmem:[#allocation72_spill] sm:$0xff] %v9380_v54  ;;  %v13461_v32 = vrot.slane %v9380_v54, 6  ;;  %7085 = vset.pattern.permute.xlu1 %v14007_v11  ;;  %v9403_v43 = vpop.eup %7280  ;;  %v9406_v17 = vmul.f32 %v9349_v14, %v2992_v35  ;;  %v5216_v27 = vmul.f32 %v9390_v25, %v9286_v16  ;;  %v14077_v33 = vrot.slane %v9152_v45, 6 }
 0x4f5   : > { %14072 = vst [vmem:[#allocation36_spill] sm:$0xff] %v9394_v29  ;;  %14075 = vst [vmem:[#allocation129_spill] sm:$0xff] %v9403_v43  ;;  %5064 = vperm.xlu1 %7085, %v14068_v47   ;;  %v9419_v63 = vadd.f32 %v3793_v50, %v9249_v12  ;;  %v4505_v35 = vmul.f32 %v9403_v43, %v4497_v40  ;;  %v3693_v9 = vmul.f32 1.442695, %v3680_v23  ;;  %v14079_v51 = vrot.slane %v9390_v25, 7 }
 0x4f6   : > { %14076 = vst [vmem:[#allocation130_spill] sm:$0xff] %v9406_v17  ;;  %v3075_v34 = vsel %vm2129_vm15, %v14077_v33, %v13461_v32  ;;  %v14080_v16 = vrot.slane %v9095_v42, 7  ;;  %v9431_v45 = vadd.f32 %v5216_v27, %v9258_v55  ;;  %v14081_v33 = vrot.slane %v9346_v20, 7  ;;  %v14087_v27 = vld [vmem:[#allocation51_spill] sm:$0xff] }
 0x4f7   : > { %14078 = vst [vmem:[#allocation131_spill] sm:$0xff] %v9419_v63  ;;  %v3088_v4 = vsel %vm2119_vm0, %v3075_v34, 0.0  ;;  %v3427_v34 = vsel %vm1151_vm9, %v3418_v22, 0.0  ;;  %v5209_v42 = vsel %vm1153_vm13, %v5196_v30, 0.0  ;;  %v9456_v22 = vadd.f32 %v4505_v35, %v9264_v3  ;;  %v14085_v30 = vld [vmem:[#allocation44_spill] sm:$0xff] }
 0x4f8   : > { %v5173_v14 = vsel %vm1163_vm7, %v14080_v16, %v14079_v51  ;;  %v3417_v50 = vsel %vm1163_vm7, %v3411_v44, %v14081_v33  ;;  %v3096_v40 = vmul.f32 %v3088_v4, %v9406_v17  ;;  %v9445_v51 = vpop.eup %7282  ;;  %v13471_v16 = vrot.slane %v9431_v45, 6  ;;  %v3717_v4 = vpop.permute.xlu1 %3716  ;;  %v14090_v35 = vld [vmem:[#allocation40_spill] sm:$0xff] }
 0x4f9   : > { %v9439_v23 = vmul.f32 %v9390_v25, %v5173_v14  ;;  %7087 = vset.pattern.permute.xlu1 %v13913_v8  ;;  %v7285_v14 = vpop.eup %7284  ;;  %14084 = vst [vmem:[#allocation134_spill] sm:$0xff] %v9456_v22  ;;  %7292 = vpow2.f32 %v3693_v9  ;;  %v9460_v55 = vmul.f32 %v14085_v30, %v14053_v6  ;;  %v14089_v44 = vrot.slane %v9138_v2, 6 }
 0x4fa   : > { %v9453_v33 = vadd.f32 %v3096_v40, %v9380_v54  ;;  %3296 = vperm.xlu1 %7087, %v14087_v27   ;;  %v9463_v32 = vpop.eup %7286  ;;  %v3387_v63 = vrot.slane %v7285_v14, 7  ;;  %v3435_v17 = vmul.f32 %v7285_v14, %v3427_v34  ;;  %v3734_v9 = vmul.f32 %v14090_v35, %v14056_v38 }
 0x4fb   : > { %14082 = vst [vmem:[#allocation132_spill] sm:$0xff] %v9439_v23  ;;  %14086 = vst [vmem:[#allocation44_spill] sm:$0xff] %v9460_v55  ;;  %v5269_v40 = vsel %vm2129_vm15, %v14089_v44, %v13471_v16  ;;  %v4861_v30 = vmul.f32 %v9445_v51, %v4853_v48  ;;  %v13472_v54 = vrot.slane %v9463_v32, 7  ;;  %v3735_v43 = vmul.f32 %v3717_v4, %v14060_v24 }
 0x4fc   : > { %14083 = vst [vmem:[#allocation133_spill] sm:$0xff] %v9453_v33  ;;  %14088 = vst [vmem:[#allocation51_spill] sm:$0xff] %v9463_v32  ;;  %v5288_v3 = vmul.f32 %v5269_v40, %v9439_v23  ;;  %v14091_v2 = vrot.slane %v14067_v49, 7  ;;  %v3436_v34 = vmul.f32 %v9463_v32, %v3417_v50  ;;  %v3443_v16 = vadd.f32 %v3435_v17, %v9326_v1  ;;  %v9504_v17 = vpop.eup %7288 }
 0x4fd   : > { %v3393_v4 = vsel %vm1163_vm7, %v3387_v63, %v13472_v54  ;;  %v3766_v12 = vrot.slane %v3734_v9, 7  ;;  %v3767_v54 = vrot.slane %v3735_v43, 7  ;;  %v5217_v48 = vmul.f32 %v9504_v17, %v5209_v42 }
 0x4fe   : > { %v3394_v44 = vsel %vm1163_vm7, %v14091_v2, %v3387_v63  ;;  %v9485_v35 = vadd.f32 %v5288_v3, %v9431_v45  ;;  %7089 = vset.pattern.permute.xlu1 %v13916_v10  ;;  %v9496_v2 = vadd.f32 %v3436_v34, %v9346_v20  ;;  %v9501_v1 = vmul.f32 %v9463_v32, %v3393_v4  ;;  %v9517_v23 = vpop.eup %7290 }
 0x4ff   : > { %v3403_v40 = vsel %vm1151_vm9, %v3394_v44, 1.0  ;;  %v3483_v3 = vrot.slane %v3443_v16, 6  ;;  %4008 = vperm.xlu1 %7089, %v14087_v27   ;;  %v9507_v63 = vadd.f32 %v4861_v30, %v9302_v36  ;;  %14098 = vst [vmem:[#allocation139_spill] sm:$0xff] %v9517_v23  ;;  %v14099_v44 = vrot.slane %v9025_v62, 7 }
 0x500   : > { %14092 = vst [vmem:[#allocation40_spill] sm:$0xff] %v9485_v35  ;;  %14093 = vst [vmem:[#allocation135_spill] sm:$0xff] %v9496_v2  ;;  %v9498_v50 = vmul.f32 %v7285_v14, %v3403_v40  ;;  %v14097_v14 = vrot.slane %v9394_v29, 6  ;;  %v3774_v34 = vsel %vm1163_vm7, %v3766_v12, %v3767_v54  ;;  %v14101_v42 = vrot.slane %v9496_v2, 6 }
 0x501   : > { %14095 = vst [vmem:[#allocation137_spill] sm:$0xff] %v9501_v1  ;;  %14096 = vst [vmem:[#allocation138_spill] sm:$0xff] %v9507_v63  ;;  %v9525_v32 = vsel %vm1163_vm7, %v3767_v54, %v14099_v44  ;;  %v14102_v62 = vrot.slane %v9504_v17, 7  ;;  %v14103_v44 = vrot.slane %v9390_v25, 7  ;;  %v9545_v54 = vadd.f32 %v5217_v48, %v9355_v58 }
 0x502   : > { %14094 = vst [vmem:[#allocation136_spill] sm:$0xff] %v9498_v50  ;;  %v3490_v4 = vsel %vm2129_vm15, %v14097_v14, %v3483_v3  ;;  %v14100_v14 = vrot.slane %v9460_v55, 7  ;;  %v3489_v20 = vsel %vm2129_vm15, %v3483_v3, %v14101_v42  ;;  %v14104_v3 = vld [vmem:[#allocation94_spill] sm:$0xff]  ;;  %v3783_v48 = vsel %vm1151_vm9, %v3774_v34, 0.0 }
 0x503   : > { %v3499_v30 = vsel %vm2117_vm3, %v3490_v4, 0.0  ;;  %v5172_v29 = vsel %vm1163_vm7, %v14103_v44, %v14102_v62  ;;  %7090 = vset.pattern.permute.xlu1 %v13917_v21  ;;  %v13486_v42 = vrot.slane %v14104_v3, 7 }
 0x504   : > { %v3775_v40 = vsel %vm1163_vm7, %v14100_v14, %v3766_v12  ;;  %v3507_v4 = vmul.f32 %v3499_v30, %v9498_v50  ;;  %v3508_v12 = vmul.f32 %v3489_v20, %v9501_v1  ;;  %v5185_v14 = vsel %vm1153_vm13, %v5172_v29, 1.0  ;;  %4364 = vperm.xlu1 %7090, %v14087_v27  }
 0x505   : > { %v13485_v30 = vrot.slane %v9517_v23, 7  ;;  %v3790_v44 = vmul.f32 %v14104_v3, %v3775_v40  ;;  %v9576_v40 = vmul.f32 %v9504_v17, %v5185_v14  ;;  %v5505_v14 = vpop.permute.xlu0 %5504  ;;  %v14118_v3 = vld [vmem:[#allocation35_spill] sm:$0xff] }
 0x506   : > { %v9554_v25 = vadd.f32 %v3507_v4, %v3443_v16  ;;  %v9561_v20 = vadd.f32 %v3508_v12, %v9496_v2  ;;  %v3791_v16 = vmul.f32 %v9517_v23, %v3783_v48  ;;  %v14107_v4 = vld [vmem:[#allocation64_spill] sm:$0xff]  ;;  %v9572_v50 = vpop.eup %7292  ;;  %v14110_v12 = vrot.slane %v9545_v54, 6 }
 0x507   : > { %v3750_v29 = vsel %vm1163_vm7, %v13486_v42, %v13485_v30  ;;  %v5461_v62 = vmul.f32 %v14107_v4, %v8987_v59  ;;  %14108 = vst [vmem:[#allocation64_spill] sm:$0xff] %v9572_v50  ;;  %14109 = vst [vmem:[#allocation142_spill] sm:$0xff] %v9576_v40  ;;  %v9589_v2 = vadd.f32 %v3790_v44, %v3734_v9  ;;  %v14143_v59 = vld [vmem:[#allocation104_spill] sm:$0xff] }
 0x508   : > { %14105 = vst [vmem:[#allocation140_spill] sm:$0xff] %v9554_v25  ;;  %14106 = vst [vmem:[#allocation141_spill] sm:$0xff] %v9561_v20  ;;  %v14111_v20 = vrot.slane %v9431_v45, 6  ;;  %v3759_v48 = vsel %vm1151_vm9, %v3750_v29, 1.0  ;;  %v9591_v34 = vadd.f32 %v3791_v16, %v3735_v43  ;;  %7092 = vset.pattern.permute.xlu1 %v14007_v11  ;;  %v9599_v29 = vmul.f32 %v5505_v14, %v9209_v56  ;;  %v4073_v43 = vpop.permute.xlu1 %4072 }
 0x509   : > { %14112 = vst [vmem:[#allocation143_spill] sm:$0xff] %v9589_v2  ;;  %v9596_v33 = vmul.f32 %v9517_v23, %v3759_v48  ;;  %5076 = vperm.xlu1 %7092, %v14087_v27   ;;  %v4035_v44 = vmul.f32 %v8618_v41, %v8865_v7  ;;  %v14119_v56 = vmov 7   ;;  %v14129_v25 = vrot.slane %v9177_v52, 7 }
 0x50a   : > { %v5268_v1 = vsel %vm2129_vm15, %v14111_v20, %v14110_v12  ;;  %14113 = vst [vmem:[#allocation144_spill] sm:$0xff] %v9591_v34  ;;  %v5475_v20 = vmul.f32 1.442695, %v5461_v62  ;;  %v13498_v9 = vrot.slane %v9591_v34, 6  ;;  %v14116_v12 = vld [vmem:[#allocation73_spill] sm:$0xff] }
 0x50b   : > { %v5281_v42 = vsel %vm2119_vm0, %v5268_v1, 0.0  ;;  %14114 = vst [vmem:[#allocation145_spill] sm:$0xff] %v9596_v33  ;;  %v13499_v1 = vrot.slane %v9589_v2, 6  ;;  %v9614_v48 = vmul.f32 %v14116_v12, %v14053_v6  ;;  %v4047_v30 = vmul.f32 1.442695, %v4035_v44  ;;  %v14128_v2 = vld [vmem:[#allocation96_spill] sm:$0xff] }
 0x50c   : > { %v5289_v45 = vmul.f32 %v5281_v42, %v9576_v40  ;;  %v4036_v42 = vmul.f32 %v8618_v41, %v8837_v39  ;;  %7294 = vpow2.f32 %v5475_v20  ;;  %v9629_v41 = vmul.f32 %v4073_v43, %v14060_v24 }
 0x50d   : > { %14117 = vst [vmem:[#allocation73_spill] sm:$0xff] %v9614_v48  ;;  %v3846_v14 = vsel %vm2129_vm15, %v13499_v1, %v13498_v9  ;;  %7095 = vset.pattern.permute.xlu1 %v14119_v56  ;;  %7296 = vpow2.f32 %v4047_v30  ;;  %v14122_v9 = vrot.slane %v9599_v29, 7  ;;  %v4121_v62 = vrot.slane %v9614_v48, 7 }
 0x50e   : > { %v9609_v16 = vadd.f32 %v5289_v45, %v9545_v54  ;;  %v4049_v23 = vmul.f32 1.442695, %v4036_v42  ;;  %v4090_v45 = vmul.f32 %v14118_v3, %v14056_v38  ;;  %v3855_v12 = vsel %vm2117_vm3, %v3846_v14, 0.0  ;;  %v14120_v42 = vld [vmem:[#allocation79_spill] sm:$0xff]  ;;  %5776 = vperm.xlu1 %7095, %v14068_v47  }
 0x50f   : > { %v3863_v44 = vmul.f32 %v3855_v12, %v9596_v33  ;;  %v9636_v3 = vmul.f32 %v14120_v42, %v8938_v18  ;;  %v14123_v14 = vrot.slane %v9289_v61, 7  ;;  %v9648_v30 = vmul.f32 %v9572_v50, %v9525_v32  ;;  %v14126_v32 = vld [vmem:[#allocation59_spill] sm:$0xff]  ;;  %v14130_v33 = vld [vmem:[#allocation69_spill] sm:$0xff] }
 0x510   : > { %14115 = vst [vmem:[#allocation146_spill] sm:$0xff] %v9609_v16  ;;  %7298 = vpow2.f32 %v4049_v23  ;;  %v4122_v20 = vrot.slane %v4090_v45, 7  ;;  %v4123_v47 = vrot.slane %v9629_v41, 7  ;;  %v4391_v12 = vmul.f32 %v8701_v60, %v8865_v7 }
 0x511   : > { %14121 = vst [vmem:[#allocation35_spill] sm:$0xff] %v9636_v3  ;;  %v5552_v43 = vsel %vm1163_vm7, %v14123_v14, %v14122_v9  ;;  %14124 = vst [vmem:[#allocation79_spill] sm:$0xff] %v9648_v30  ;;  %v9651_v18 = vadd.f32 %v3863_v44, %v9591_v34  ;;  %v4429_v9 = vpop.permute.xlu1 %4428  ;;  %v4392_v14 = vmul.f32 %v8701_v60, %v8837_v39  ;;  %v14131_v34 = vld [vmem:[#allocation37_spill] sm:$0xff]  ;;  %v14132_v52 = vrot.slane %v9636_v3, 7 }
 0x512   : > { %v4131_v23 = vsel %vm1163_vm7, %v4121_v62, %v4122_v20  ;;  %v9663_v1 = vmul.f32 %v14126_v32, %v14053_v6  ;;  %v5565_v44 = vsel %vm1153_vm13, %v5552_v43, 0.0  ;;  %v4130_v42 = vsel %vm1163_vm7, %v4122_v20, %v4123_v47  ;;  %7097 = vset.pattern.permute.xlu1 %v13915_v53 }
 0x513   : > { %14125 = vst [vmem:[#allocation147_spill] sm:$0xff] %v9651_v18  ;;  %v4132_v35 = vsel %vm1163_vm7, %v14129_v25, %v4121_v62  ;;  %v4146_v32 = vmul.f32 %v14128_v2, %v4131_v23  ;;  %v4403_v16 = vmul.f32 1.442695, %v4391_v12  ;;  %v4405_v48 = vmul.f32 1.442695, %v4392_v14  ;;  %3648 = vperm.xlu1 %7097, %v14130_v33   ;;  %v14142_v18 = vld [vmem:[#allocation97_spill] sm:$0xff] }
 0x514   : > { %14127 = vst [vmem:[#allocation59_spill] sm:$0xff] %v9663_v1  ;;  %v4446_v30 = vmul.f32 %v14131_v34, %v14056_v38  ;;  %v9682_v20 = vmul.f32 %v4429_v9, %v14060_v24  ;;  %v4129_v25 = vsel %vm1163_vm7, %v4123_v47, %v14132_v52  ;;  %v4747_v12 = vmul.f32 %v8714_v46, %v8865_v7  ;;  %v14135_v52 = vld [vmem:[#allocation30_spill] sm:$0xff] }
 0x515   : > { %v9689_v62 = vadd.f32 %v4146_v32, %v4090_v45  ;;  %7300 = vpow2.f32 %v4403_v16  ;;  %v9695_v23 = vsel %vm1149_vm10, %v4132_v35, 0.0  ;;  %v4139_v14 = vsel %vm1151_vm9, %v4130_v42, 0.0  ;;  %v4785_v43 = vpop.permute.xlu1 %4784  ;;  %v14137_v16 = vld [vmem:[#allocation67_spill] sm:$0xff] }
 0x516   : > { %14134 = vst [vmem:[#allocation37_spill] sm:$0xff] %v9695_v23  ;;  %7302 = vpow2.f32 %v4405_v48  ;;  %v4478_v34 = vrot.slane %v4446_v30, 7  ;;  %v4479_v9 = vrot.slane %v9682_v20, 7  ;;  %v4759_v53 = vmul.f32 1.442695, %v4747_v12  ;;  %v14141_v23 = vld [vmem:[#allocation38_spill] sm:$0xff] }
 0x517   : > { %14133 = vst [vmem:[#allocation69_spill] sm:$0xff] %v9689_v62  ;;  %v9702_v45 = vmul.f32 %v14135_v52, %v8725_v57  ;;  %v4801_v47 = vmul.f32 %v14137_v16, %v14053_v6  ;;  %7098 = vset.pattern.permute.xlu1 %v13916_v10  ;;  %v14139_v48 = vrot.slane %v9233_v0, 7  ;;  %v14140_v12 = vrot.slane %v9663_v1, 7 }
 0x518   : > { %v4486_v42 = vsel %vm1163_vm7, %v4478_v34, %v4479_v9  ;;  %v4802_v16 = vmul.f32 %v14141_v23, %v14056_v38  ;;  %4004 = vperm.xlu1 %7098, %v14130_v33   ;;  %7304 = vpow2.f32 %v4759_v53  ;;  %v9728_v1 = vmul.f32 %v4785_v43, %v14060_v24 }
 0x519   : > { %14136 = vst [vmem:[#allocation30_spill] sm:$0xff] %v9702_v45  ;;  %v9707_v35 = vpop.eup %7294  ;;  %v4485_v32 = vsel %vm1163_vm7, %v4479_v9, %v14139_v48  ;;  %v4487_v52 = vsel %vm1163_vm7, %v14140_v12, %v4478_v34  ;;  %v4748_v48 = vmul.f32 %v8714_v46, %v8837_v39  ;;  %v13525_v34 = vrot.slane %v14143_v59, 7  ;;  %v14144_v12 = vld [vmem:[#allocation98_spill] sm:$0xff] }
 0x51a   : > { %14138 = vst [vmem:[#allocation67_spill] sm:$0xff] %v9707_v35  ;;  %v5573_v10 = vmul.f32 %v9707_v35, %v5565_v44  ;;  %v4502_v6 = vmul.f32 %v14142_v18, %v4487_v52  ;;  %v13526_v55 = vrot.slane %v14144_v12, 7  ;;  %v9732_v38 = vpop.eup %7296  ;;  %v4833_v35 = vrot.slane %v4801_v47, 7 }
 0x51b   : > { %14145 = vst [vmem:[#allocation38_spill] sm:$0xff] %v9732_v38  ;;  %v4147_v43 = vmul.f32 %v9732_v38, %v4139_v14  ;;  %v4834_v23 = vrot.slane %v4802_v16, 7  ;;  %v4761_v52 = vmul.f32 1.442695, %v4748_v48  ;;  %v4835_v53 = vrot.slane %v9728_v1, 7 }
 0x51c   : > { %v9735_v44 = vadd.f32 %v4502_v6, %v4446_v30  ;;  %v9748_v9 = vsel %vm1163_vm7, %v13525_v34, %v13526_v55  ;;  %7099 = vset.pattern.permute.xlu1 %v13917_v21  ;;  %v9752_v6 = vadd.f32 %v5573_v10, %v9599_v29  ;;  %v14150_v14 = vrot.slane %v9732_v38, 7 }
 0x51d   : > { %v9738_v49 = vpop.eup %7298  ;;  %14148 = vst [vmem:[#allocation150_spill] sm:$0xff] %v9748_v9  ;;  %4360 = vperm.xlu1 %7099, %v14130_v33   ;;  %v14151_v40 = vrot.slane %v14128_v2, 7  ;;  %v9764_v55 = vadd.f32 %v4147_v43, %v9629_v41  ;;  %v4843_v21 = vsel %vm1163_vm7, %v4833_v35, %v4834_v23  ;;  %v14155_v2 = vrot.slane %v9243_v5, 7  ;;  %v14211_v5 = vld [vmem:[#allocation29_spill] sm:$0xff] }
 0x51e   : > { %14146 = vst [vmem:[#allocation148_spill] sm:$0xff] %v9735_v44  ;;  %14147 = vst [vmem:[#allocation149_spill] sm:$0xff] %v9738_v49  ;;  %v4148_v30 = vmul.f32 %v9738_v49, %v4129_v25  ;;  %v14153_v25 = vrot.slane %v9702_v45, 7  ;;  %7306 = vpow2.f32 %v4761_v52 }
 0x51f   : > { %14149 = vst [vmem:[#allocation151_spill] sm:$0xff] %v9752_v6  ;;  %v4106_v34 = vsel %vm1163_vm7, %v14151_v40, %v14150_v14  ;;  %14152 = vst [vmem:[#allocation152_spill] sm:$0xff] %v9764_v55  ;;  %v9781_v41 = vsel %vm1163_vm7, %v4835_v53, %v14155_v2  ;;  %v4842_v40 = vsel %vm1163_vm7, %v4834_v23, %v4835_v53  ;;  %v14157_v23 = vmov 4  }
 0x520   : > { %v4844_v10 = vsel %vm1163_vm7, %v14153_v25, %v4833_v35  ;;  %v4115_v48 = vsel %vm1151_vm9, %v4106_v34, 1.0  ;;  %v9775_v9 = vadd.f32 %v4148_v30, %v9636_v3  ;;  %v13530_v35 = vrot.slane %v9764_v55, 6 }
 0x521   : > { %v9786_v43 = vmul.f32 %v9732_v38, %v4115_v48  ;;  %v4495_v34 = vsel %vm1151_vm9, %v4486_v42, 0.0  ;;  %v4849_v30 = vsel %vm1149_vm10, %v4844_v10, 0.0  ;;  %v4858_v2 = vmul.f32 %v14144_v12, %v4843_v21  ;;  %7100 = vset.pattern.permute.xlu1 %v14157_v23 }
 0x522   : > { %14154 = vst [vmem:[#allocation153_spill] sm:$0xff] %v9775_v9  ;;  %v4857_v14 = vmul.f32 %v14143_v59, %v4849_v30  ;;  %v5459_v25 = vmul.f32 %v14107_v4, %v8865_v7  ;;  %v7301_v53 = vpop.eup %7300  ;;  %v14158_v42 = vrot.slane %v9689_v62, 6  ;;  %v4851_v21 = vsel %vm1151_vm9, %v4842_v40, 0.0  ;;  %4716 = vperm.xlu1 %7100, %v14130_v33  }
 0x523   : > { %14156 = vst [vmem:[#allocation154_spill] sm:$0xff] %v9786_v43  ;;  %v9809_v7 = vpop.eup %7302  ;;  %v4455_v23 = vrot.slane %v7301_v53, 7  ;;  %v4503_v48 = vmul.f32 %v7301_v53, %v4495_v34  ;;  %v9818_v52 = vadd.f32 %v4858_v2, %v4802_v16  ;;  %v14161_v40 = vrot.slane %v14142_v18, 7  ;;  %v5497_v34 = vpop.permute.xlu1 %5496 }
 0x524   : > { %v4202_v10 = vsel %vm2129_vm15, %v14158_v42, %v13530_v35  ;;  %v9813_v38 = vadd.f32 %v4857_v14, %v4801_v47  ;;  %v13537_v42 = vrot.slane %v9809_v7, 7  ;;  %v4504_v35 = vmul.f32 %v9809_v7, %v4485_v32 }
 0x525   : > { %v4211_v30 = vsel %vm2117_vm3, %v4202_v10, 0.0  ;;  %14160 = vst [vmem:[#allocation156_spill] sm:$0xff] %v9818_v52  ;;  %v4462_v62 = vsel %vm1163_vm7, %v14161_v40, %v4455_v23  ;;  %v4511_v45 = vadd.f32 %v4503_v48, %v9682_v20  ;;  %v5471_v47 = vmul.f32 1.442695, %v5459_v25  ;;  %v9826_v14 = vpop.eup %7304 }
 0x526   : > { %14159 = vst [vmem:[#allocation155_spill] sm:$0xff] %v9813_v38  ;;  %v4219_v59 = vmul.f32 %v4211_v30, %v9786_v43  ;;  %v13538_v10 = vrot.slane %v9813_v38, 6  ;;  %14162 = vst [vmem:[#allocation157_spill] sm:$0xff] %v9826_v14  ;;  %v4461_v32 = vsel %vm1163_vm7, %v4455_v23, %v13537_v42  ;;  %v4471_v16 = vsel %vm1151_vm9, %v4462_v62, 1.0  ;;  %7101 = vset.pattern.permute.xlu1 %v14007_v11  ;;  %v14179_v38 = vld [vmem:[#allocation32_spill] sm:$0xff] }
 0x527   : > { %v9838_v2 = vadd.f32 %v4504_v35, %v9233_v0  ;;  %v9841_v20 = vmul.f32 %v7301_v53, %v4471_v16  ;;  %v9844_v25 = vmul.f32 %v9809_v7, %v4461_v32  ;;  %v13536_v48 = vrot.slane %v9826_v14, 7  ;;  %5072 = vperm.xlu1 %7101, %v14130_v33   ;;  %v2960_v42 = vpop.permute.xlu1 %2959 }
 0x528   : > { %v9829_v30 = vadd.f32 %v4219_v59, %v9764_v55  ;;  %v4551_v59 = vrot.slane %v4511_v45, 6  ;;  %v4859_v40 = vmul.f32 %v9826_v14, %v4851_v21  ;;  %v5460_v0 = vmul.f32 %v14107_v4, %v8837_v39 }
 0x529   : > { %14164 = vst [vmem:[#allocation159_spill] sm:$0xff] %v9838_v2  ;;  %14165 = vst [vmem:[#allocation160_spill] sm:$0xff] %v9841_v20  ;;  %v13535_v23 = vrot.slane %v9838_v2, 6  ;;  %v9853_v62 = vmul.f32 %v5497_v34, %v14060_v24  ;;  %v14167_v11 = vrot.slane %v9735_v44, 6  ;;  %v14168_v53 = vrot.slane %v14144_v12, 7  ;;  %v14215_v44 = vld [vmem:[#allocation86_spill] sm:$0xff] }
 0x52a   : > { %14163 = vst [vmem:[#allocation158_spill] sm:$0xff] %v9829_v30  ;;  %14166 = vst [vmem:[#allocation161_spill] sm:$0xff] %v9844_v25  ;;  %v4906_v21 = vrot.slane %v9818_v52, 6  ;;  %7308 = vpow2.f32 %v5471_v47  ;;  %v9875_v16 = vadd.f32 %v4859_v40, %v9728_v1  ;;  %v14173_v40 = vld [vmem:[#allocation70_spill] sm:$0xff]  ;;  %v14185_v52 = vld [vmem:[#allocation105_spill] sm:$0xff] }
 0x52b   : > { %v4558_v35 = vsel %vm2129_vm15, %v14167_v11, %v4551_v59  ;;  %v4818_v32 = vsel %vm1163_vm7, %v14168_v53, %v13536_v48  ;;  %v4557_v39 = vsel %vm2129_vm15, %v4551_v59, %v13535_v23  ;;  %v5473_v23 = vmul.f32 1.442695, %v5460_v0  ;;  %v9905_v0 = vpop.eup %7306 }
 0x52c   : > { %v4567_v24 = vsel %vm2117_vm3, %v4558_v35, 0.0  ;;  %v4827_v34 = vsel %vm1151_vm9, %v4818_v32, 1.0  ;;  %14169 = vst [vmem:[#allocation162_spill] sm:$0xff] %v9875_v16  ;;  %v4576_v53 = vmul.f32 %v4557_v39, %v9844_v25  ;;  %v9886_v59 = vsel %vm2129_vm15, %v13538_v10, %v4906_v21  ;;  %v14177_v10 = vld [vmem:[#allocation88_spill] sm:$0xff] }
 0x52d   : > { %v4575_v11 = vmul.f32 %v4567_v24, %v9841_v20  ;;  %v9880_v47 = vmul.f32 %v9826_v14, %v4827_v34  ;;  %14171 = vst [vmem:[#allocation164_spill] sm:$0xff] %v9886_v59  ;;  %v14172_v35 = vmov 6   ;;  %v5547_v1 = vrot.slane %v9853_v62, 7  ;;  %v14174_v24 = vld [vmem:[#allocation41_spill] sm:$0xff]  ;;  %14180 = vst [vmem:[#allocation88_spill] sm:$0xff] %v9905_v0 }
 0x52e   : > { %7102 = vset.pattern.permute.xlu1 %v14172_v35  ;;  %v2898_v48 = vmul.f32 %v14174_v24, %v14173_v40  ;;  %v9897_v34 = vadd.f32 %v4576_v53, %v9838_v2  ;;  %v2905_v55 = vmul.f32 %v14174_v24, %v14177_v10  ;;  %v14178_v35 = vld [vmem:[#allocation71_spill] sm:$0xff]  ;;  %v14181_v25 = vrot.slane %v9875_v16, 6  ;;  %v14183_v53 = vld [vmem:[#allocation84_spill] sm:$0xff] }
 0x52f   : > { %14170 = vst [vmem:[#allocation163_spill] sm:$0xff] %v9880_v47  ;;  %5428 = vperm.xlu1 %7102, %v14130_v33   ;;  %v9894_v39 = vadd.f32 %v4575_v11, %v4511_v45  ;;  %v9903_v32 = vmul.f32 %v14179_v38, %v14178_v35  ;;  %7310 = vpow2.f32 %v5473_v23  ;;  %v14182_v45 = vrot.slane %v9289_v61, 7 }
 0x530   : > { %14176 = vst [vmem:[#allocation165_spill] sm:$0xff] %v9897_v34  ;;  %v4914_v20 = vsel %vm2129_vm15, %v4906_v21, %v14181_v25  ;;  %v14184_v34 = vrot.slane %v14183_v53, 7  ;;  %v2906_v12 = vmul.f32 1.442695, %v2898_v48  ;;  %v2920_v23 = vmul.f32 1.442695, %v2905_v55 }
 0x531   : > { %14175 = vst [vmem:[#allocation70_spill] sm:$0xff] %v9894_v39  ;;  %v5553_v11 = vsel %vm1163_vm7, %v5547_v1, %v14182_v45  ;;  %v4923_v43 = vsel %vm2117_vm3, %v4914_v20, 0.0  ;;  %v14186_v21 = vld [vmem:[#allocation22_spill] sm:$0xff]  ;;  %v14188_v45 = vld [vmem:[#allocation99_spill] sm:$0xff]  ;;  %v9935_v20 = vmul.f32 %v9905_v0, %v9781_v41  ;;  %v2994_v48 = vrot.slane %v9903_v32, 7  ;;  %v3729_v41 = vpop.permute.xlu1 %3728 }
 0x532   : > { %v5554_v2 = vsel %vm1163_vm7, %v14184_v34, %v5547_v1  ;;  %v4931_v25 = vmul.f32 %v4923_v43, %v9880_v47  ;;  %v9926_v61 = vmul.f32 %v14186_v21, %v8725_v57  ;;  %v9929_v53 = vmul.f32 %v2960_v42, %v14188_v45  ;;  %v14191_v21 = vld [vmem:[#allocation80_spill] sm:$0xff]  ;;  %v10031_v47 = vpop.permute.xlu0 %3628 }
 0x533   : > { %7103 = vset.pattern.permute.xlu1 %v14119_v56  ;;  %14189 = vst [vmem:[#allocation32_spill] sm:$0xff] %v9935_v20  ;;  %7312 = vpow2.f32 %v2906_v12  ;;  %v5563_v34 = vsel %vm1151_vm9, %v5554_v2, 0.0  ;;  %v3675_v12 = vmul.f32 %v8635_v13, %v14173_v40  ;;  %v14192_v56 = vld [vmem:[#allocation27_spill] sm:$0xff]  ;;  %v9972_v1 = vmul.f32 %v3729_v41, %v14188_v45 }
 0x534   : > { %14187 = vst [vmem:[#allocation71_spill] sm:$0xff] %v9926_v61  ;;  %5784 = vperm.xlu1 %7103, %v14130_v33   ;;  %v9940_v55 = vadd.f32 %v4931_v25, %v9875_v16  ;;  %7314 = vpow2.f32 %v2920_v23  ;;  %v13559_v43 = vrot.slane %v9926_v61, 7  ;;  %v3001_v42 = vrot.slane %v9929_v53, 7 }
 0x535   : > { %v3682_v33 = vmul.f32 %v8635_v13, %v14177_v10  ;;  %v9959_v38 = vmul.f32 %v14192_v56, %v14178_v35  ;;  %v3683_v30 = vmul.f32 1.442695, %v3675_v12  ;;  %v13561_v56 = vrot.slane %v9572_v50, 7 }
 0x536   : > { %14190 = vst [vmem:[#allocation84_spill] sm:$0xff] %v9940_v55  ;;  %v3008_v23 = vsel %vm1163_vm7, %v2994_v48, %v13559_v43  ;;  %v3009_v2 = vsel %vm1163_vm7, %v3001_v42, %v2994_v48  ;;  %v14194_v55 = vld [vmem:[#allocation24_spill] sm:$0xff]  ;;  %v13562_v16 = vrot.slane %v9383_v15, 7  ;;  %v3770_v41 = vrot.slane %v9972_v1, 7 }
 0x537   : > { %v3019_v59 = vmul.f32 %v14191_v21, %v3008_v23  ;;  %v3697_v39 = vmul.f32 1.442695, %v3682_v33  ;;  %v9965_v25 = vpop.eup %7308  ;;  %v9969_v43 = vmul.f32 %v14194_v55, %v8725_v57  ;;  %7316 = vpow2.f32 %v3683_v30 }
 0x538   : > { %5788 = vperm.xlu1 %7103, %v14087_v27   ;;  %14193 = vst [vmem:[#allocation22_spill] sm:$0xff] %v9965_v25  ;;  %v13563_v48 = vrot.slane %v9965_v25, 7  ;;  %v5571_v12 = vmul.f32 %v9965_v25, %v5563_v34  ;;  %v3748_v27 = vsel %vm1163_vm7, %v13561_v56, %v13562_v16  ;;  %v3763_v55 = vrot.slane %v9959_v38, 7 }
 0x539   : > { %v9979_v33 = vadd.f32 %v3019_v59, %v9926_v61  ;;  %7318 = vpow2.f32 %v3697_v39  ;;  %v14196_v34 = vrot.slane %v14185_v52, 7  ;;  %v14198_v39 = vrot.slane %v9240_v28, 7  ;;  %v4441_v61 = vpop.permute.xlu1 %4440 }
 0x53a   : > { %v9996_v30 = vadd.f32 %v5571_v12, %v9853_v62  ;;  %v3761_v56 = vsel %vm1153_vm13, %v3748_v27, 1.0  ;;  %v14203_v27 = vld [vmem:[#allocation8_spill] sm:$0xff]  ;;  %v10058_v14 = vmul.f32 %v14211_v5, %v14178_v35 }
 0x53b   : > { %14195 = vst [vmem:[#allocation99_spill] sm:$0xff] %v9979_v33  ;;  %v5530_v59 = vsel %vm1163_vm7, %v14196_v34, %v13563_v48  ;;  %v3002_v23 = vsel %vm1163_vm7, %v14198_v39, %v3001_v42  ;;  %v14199_v34 = vrot.slane %v9969_v43, 7  ;;  %v10013_v28 = vmul.f32 %v9383_v15, %v3761_v56  ;;  %v14204_v39 = vld [vmem:[#allocation82_spill] sm:$0xff] }
 0x53c   : > { %14197 = vst [vmem:[#allocation27_spill] sm:$0xff] %v9996_v30  ;;  %7104 = vset.pattern.permute.xlu1 %v13913_v8  ;;  %v5539_v16 = vsel %vm1151_vm9, %v5530_v59, 1.0  ;;  %v10015_v12 = vpop.eup %7310  ;;  %v13570_v8 = vrot.slane %v9996_v30, 6  ;;  %v3010_v59 = vsel %vm1147_vm8, %v3009_v2, 0.0  ;;  %v3778_v56 = vsel %vm1163_vm7, %v3770_v41, %v3763_v55  ;;  %14206 = vst [vmem:[#allocation82_spill] sm:$0xff] %v10031_v47 }
 0x53d   : > { %v3777_v62 = vsel %vm1163_vm7, %v3763_v55, %v14199_v34  ;;  %14200 = vst [vmem:[#allocation24_spill] sm:$0xff] %v10013_v28  ;;  %14201 = vst [vmem:[#allocation166_spill] sm:$0xff] %v10015_v12  ;;  %v10018_v42 = vmul.f32 %v9965_v25, %v5539_v16  ;;  %v10025_v50 = vmul.f32 %v10015_v12, %v5553_v11  ;;  %v14207_v16 = vld [vmem:[#allocation110_spill] sm:$0xff]  ;;  %vm3114_vm2 = vcmp.ge.s32.totalorder %v14203_v27, 4 }
 0x53e   : > { %v3788_v48 = vmul.f32 %v14204_v39, %v3777_v62  ;;  %v14208_v25 = vrot.slane %v14207_v16, 6  ;;  %v14209_v62 = vld [vmem:[#allocation124_spill] sm:$0xff]  ;;  %v4387_v55 = vmul.f32 %v8701_v60, %v14173_v40  ;;  %v3779_v16 = vsel %vm1147_vm8, %v3778_v56, 0.0 }
 0x53f   : > { %14202 = vst [vmem:[#allocation167_spill] sm:$0xff] %v10018_v42  ;;  %14205 = vst [vmem:[#allocation8_spill] sm:$0xff] %v10025_v50  ;;  %v14210_v20 = vrot.slane %v14209_v62, 7  ;;  %v4394_v62 = vmul.f32 %v8701_v60, %v14177_v10  ;;  %v14212_v56 = vld [vmem:[#allocation28_spill] sm:$0xff] }
 0x540   : > { %v5626_v2 = vsel %vm2129_vm15, %v14208_v25, %v13570_v8  ;;  %v10044_v34 = vadd.f32 %v3788_v48, %v9969_v43  ;;  %v7313_v52 = vpop.eup %7312  ;;  %v10063_v25 = vmul.f32 %v14212_v56, %v8725_v57  ;;  %v10080_v56 = vpop.permute.xlu0 %4340 }
 0x541   : > { %v3771_v11 = vsel %vm1163_vm7, %v14210_v20, %v3770_v41  ;;  %v5635_v50 = vsel %vm2117_vm3, %v5626_v2, 0.0  ;;  %v7315_v8 = vpop.eup %7314  ;;  %v3018_v48 = vmul.f32 %v7313_v52, %v3010_v59  ;;  %v2970_v41 = vrot.slane %v7313_v52, 7  ;;  %14217 = vst [vmem:[#allocation29_spill] sm:$0xff] %v10080_v56  ;;  %v14222_v56 = vld [vmem:[#allocation130_spill] sm:$0xff] }
 0x542   : > { %v5643_v20 = vmul.f32 %v5635_v50, %v10018_v42  ;;  %v2977_v47 = vrot.slane %v7315_v8, 7  ;;  %v3025_v26 = vmul.f32 %v7315_v8, %v3002_v23  ;;  %v14214_v50 = vrot.slane %v14191_v21, 7 }
 0x543   : > { %v3026_v5 = vadd.f32 %v3018_v48, %v9903_v32  ;;  %v4395_v42 = vmul.f32 1.442695, %v4387_v55  ;;  %v14216_v23 = vrot.slane %v14215_v44, 7  ;;  %v10085_v32 = vmul.f32 %v4441_v61, %v14188_v45  ;;  %v14219_v61 = vld [vmem:[#allocation129_spill] sm:$0xff] }
 0x544   : > { %v10066_v9 = vadd.f32 %v5643_v20, %v9996_v30  ;;  %v2984_v59 = vsel %vm1163_vm7, %v2970_v41, %v14214_v50  ;;  %v3033_v18 = vadd.f32 %v3025_v26, %v9929_v53  ;;  %v2985_v57 = vsel %vm1163_vm7, %v2977_v47, %v2970_v41  ;;  %v7317_v44 = vpop.eup %7316 }
 0x545   : > { %v2978_v2 = vsel %vm1163_vm7, %v14216_v23, %v2977_v47  ;;  %v4409_v20 = vmul.f32 1.442695, %v4394_v62  ;;  %v2986_v50 = vsel %vm1147_vm8, %v2985_v57, 1.0  ;;  %v3066_v3 = vrot.slane %v3026_v5, 6 }
 0x546   : > { %14213 = vst [vmem:[#allocation124_spill] sm:$0xff] %v10066_v9  ;;  %v3041_v30 = vmul.f32 %v7315_v8, %v2978_v2  ;;  %v3073_v48 = vrot.slane %v3033_v18, 6  ;;  %v10088_v23 = vmul.f32 %v7313_v52, %v2986_v50  ;;  %v10091_v26 = vmul.f32 %v14191_v21, %v2984_v59  ;;  %v7319_v47 = vpop.eup %7318  ;;  %v14220_v2 = vld [vmem:[#allocation72_spill] sm:$0xff] }
 0x547   : > { %v14218_v8 = vrot.slane %v9979_v33, 6  ;;  %7320 = vpow2.f32 %v4395_v42  ;;  %v14221_v52 = vrot.slane %v14220_v2, 6  ;;  %v3787_v55 = vmul.f32 %v7317_v44, %v3779_v16  ;;  %v10120_v16 = vpop.permute.xlu0 %5408 }
 0x548   : > { %v3049_v53 = vrot.slane %v3041_v30, 6  ;;  %v13595_v57 = vrot.slane %v10088_v23, 6  ;;  %v3081_v50 = vsel %vm2129_vm15, %v3073_v48, %v3066_v3  ;;  %v14223_v33 = vrot.slane %v14222_v56, 6  ;;  %14225 = vst [vmem:[#allocation86_spill] sm:$0xff] %v10120_v16 }
 0x549   : > { %v3080_v62 = vsel %vm2129_vm15, %v3066_v3, %v14218_v8  ;;  %v3074_v59 = vsel %vm2129_vm15, %v14221_v52, %v3073_v48  ;;  %v3082_v42 = vsel %vm2113_vm6, %v3081_v50, 0.0  ;;  %v3746_v41 = vrot.slane %v7319_v47, 7 }
 0x54a   : > { %v3097_v9 = vmul.f32 %v3074_v59, %v3041_v30  ;;  %v3050_v8 = vsel %vm2129_vm15, %v14223_v33, %v3049_v53  ;;  %v3057_v2 = vsel %vm2129_vm15, %v3049_v53, %v13595_v57  ;;  %v3090_v52 = vmul.f32 %v3082_v42, %v10088_v23 }
 0x54b   : > { %v10118_v21 = vmul.f32 %v3050_v8, %v3041_v30  ;;  %v3794_v3 = vmul.f32 %v7319_v47, %v3771_v11  ;;  %v3058_v33 = vsel %vm2113_vm6, %v3057_v2, 1.0  ;;  %v14227_v59 = vrot.slane %v9383_v15, 7 }
 0x54c   : > { %v10122_v48 = vadd.f32 %v3097_v9, %v3033_v18  ;;  %v3739_v56 = vrot.slane %v7317_v44, 7  ;;  %v10130_v24 = vadd.f32 %v3090_v52, %v3026_v5  ;;  %v10133_v53 = vmul.f32 %v3058_v33, %v10088_v23 }
 0x54d   : > { %14224 = vst [vmem:[#allocation28_spill] sm:$0xff] %v10118_v21  ;;  %v3747_v50 = vsel %vm1163_vm7, %v14227_v59, %v3746_v41  ;;  %v13591_v30 = vrot.slane %v10118_v21, 4  ;;  %v3802_v11 = vadd.f32 %v3794_v3, %v9972_v1  ;;  %v3795_v15 = vadd.f32 %v3787_v55, %v9959_v38  ;;  %v14247_v21 = vld [vmem:[#allocation54_spill] sm:$0xff] }
 0x54e   : > { %14226 = vst [vmem:[#allocation129_spill] sm:$0xff] %v10122_v48  ;;  %v13593_v18 = vrot.slane %v10122_v48, 4  ;;  %v3810_v9 = vmul.f32 %v7319_v47, %v3747_v50  ;;  %v3754_v8 = vsel %vm1163_vm7, %v3746_v41, %v3739_v56  ;;  %v13592_v42 = vrot.slane %v10133_v53, 4  ;;  %v14230_v41 = vld [vmem:[#allocation131_spill] sm:$0xff]  ;;  %v10167_v50 = vpop.permute.xlu0 %5764 }
 0x54f   : > { %v13594_v5 = vrot.slane %v10130_v24, 4  ;;  %v3842_v2 = vrot.slane %v3802_v11, 6  ;;  %v3755_v52 = vsel %vm1147_vm8, %v3754_v8, 1.0  ;;  %v14228_v33 = vrot.slane %v14204_v39, 7  ;;  %14232 = vst [vmem:[#allocation168_spill] sm:$0xff] %v10167_v50 }
 0x550   : > { %v10149_v3 = vmul.f32 %v7317_v44, %v3755_v52  ;;  %v3818_v47 = vrot.slane %v3810_v9, 6  ;;  %v3835_v59 = vrot.slane %v3795_v15, 6  ;;  %v3138_v38 = vsel %vm3130_vm5, %v13591_v30, %v13592_v42 }
 0x551   : > { %v3753_v1 = vsel %vm1163_vm7, %v3739_v56, %v14228_v33  ;;  %v3178_v55 = vsel %vm3130_vm5, %v13593_v18, %v13594_v5  ;;  %v14231_v56 = vrot.slane %v14230_v41, 6  ;;  %7322 = vpow2.f32 %v4409_v20 }
 0x552   : > { %14229 = vst [vmem:[#allocation72_spill] sm:$0xff] %v10149_v3  ;;  %v3155_v8 = vsel %vm3114_vm2, %v3138_v38, 1.0  ;;  %v3179_v52 = vsel %vm3114_vm2, %v3178_v55, 0.0  ;;  %v13596_v30 = vrot.slane %v10149_v3, 6  ;;  %v10175_v42 = vmul.f32 %v3080_v62, %v10091_v26 }
 0x553   : > { %v3843_v44 = vsel %vm2129_vm15, %v14231_v56, %v3842_v2  ;;  %v3187_v18 = vmul.f32 %v3179_v52, %v10133_v53  ;;  %v3203_v5 = vmul.f32 %v3155_v8, %v10133_v53  ;;  %v14233_v20 = vrot.slane %v10013_v28, 6 }
 0x554   : > { %v3866_v33 = vmul.f32 %v3843_v44, %v3810_v9  ;;  %v10186_v38 = vmul.f32 %v14204_v39, %v3753_v1  ;;  %v3826_v62 = vsel %vm2129_vm15, %v3818_v47, %v13596_v30  ;;  %v3850_v55 = vsel %vm2129_vm15, %v3842_v2, %v3835_v59  ;;  %v7321_v44 = vpop.eup %7320 }
 0x555   : > { %v3819_v56 = vsel %vm2129_vm15, %v14233_v20, %v3818_v47  ;;  %v10195_v8 = vadd.f32 %v3187_v18, %v10130_v24  ;;  %v3243_v52 = vmul.f32 0.0, %v3203_v5  ;;  %v3851_v1 = vsel %vm2113_vm6, %v3850_v55, 0.0 }
 0x556   : > { %v10183_v57 = vadd.f32 %v3866_v33, %v3802_v11  ;;  %v3827_v11 = vsel %vm2113_vm6, %v3826_v62, 1.0  ;;  %v14236_v33 = vrot.slane %v10044_v34, 6  ;;  %v3859_v47 = vmul.f32 %v3851_v1, %v10149_v3 }
 0x557   : > { %14235 = vst [vmem:[#allocation170_spill] sm:$0xff] %v10195_v8  ;;  %v10207_v2 = vmul.f32 %v3827_v11, %v10149_v3  ;;  %v10209_v30 = vmul.f32 %v3819_v56, %v3810_v9  ;;  %v3251_v18 = vadd.f32 %v3243_v52, %v10195_v8  ;;  %v14239_v5 = vrot.slane %v14219_v61, 7  ;;  %v14279_v3 = vld [vmem:[#allocation25_spill] sm:$0xff] }
 0x558   : > { %14234 = vst [vmem:[#allocation169_spill] sm:$0xff] %v10183_v57  ;;  %v3849_v20 = vsel %vm2129_vm15, %v3835_v59, %v14236_v33  ;;  %v14240_v62 = vrot.slane %v9809_v7, 7  ;;  %v4475_v41 = vrot.slane %v10058_v14, 7  ;;  %v13599_v59 = vrot.slane %v10063_v25, 7  ;;  %v3262_v33 = vpop.permute.xlu0 %3261 }
 0x559   : > { %14237 = vst [vmem:[#allocation171_spill] sm:$0xff] %v10207_v2  ;;  %14238 = vst [vmem:[#allocation172_spill] sm:$0xff] %v10209_v30  ;;  %v10220_v1 = vadd.f32 %v3859_v47, %v3795_v15  ;;  %v13603_v11 = vrot.slane %v10207_v2, 4  ;;  %v13602_v9 = vrot.slane %v10209_v30, 4  ;;  %v3299_v52 = vmul.f32 %v3262_v33, %v3251_v18 }
 0x55a   : > { %v4460_v55 = vsel %vm1163_vm7, %v14240_v62, %v14239_v5  ;;  %v4482_v28 = vrot.slane %v10085_v32, 7  ;;  %v4489_v5 = vsel %vm1163_vm7, %v4475_v41, %v13599_v59  ;;  %v14242_v62 = vld [vmem:[#allocation89_spill] sm:$0xff]  ;;  %v10244_v33 = vmul.f32 %v3849_v20, %v10186_v38 }
 0x55b   : > { %14241 = vst [vmem:[#allocation173_spill] sm:$0xff] %v10220_v1  ;;  %v4473_v56 = vsel %vm1153_vm13, %v4460_v55, 1.0  ;;  %v3898_v15 = vsel %vm3130_vm5, %v13602_v9, %v13603_v11  ;;  %v13610_v47 = vrot.slane %v10220_v1, 4  ;;  %v4500_v18 = vmul.f32 %v14242_v62, %v4489_v5  ;;  %v14245_v11 = vld [vmem:[#allocation126_spill] sm:$0xff] }
 0x55c   : > { %v10241_v55 = vmul.f32 %v14219_v61, %v4473_v56  ;;  %v3899_v59 = vsel %vm3114_vm2, %v3898_v15, 1.0  ;;  %v4490_v7 = vsel %vm1163_vm7, %v4482_v28, %v4475_v41  ;;  %v4451_v30 = vrot.slane %v7321_v44, 7 }
 0x55d   : > { %v14244_v9 = vrot.slane %v10183_v57, 4  ;;  %v3947_v56 = vmul.f32 %v3899_v59, %v10207_v2  ;;  %v14246_v48 = vrot.slane %v14245_v11, 7  ;;  %v4491_v15 = vsel %vm1147_vm8, %v4490_v7, 0.0 }
 0x55e   : > { %14243 = vst [vmem:[#allocation89_spill] sm:$0xff] %v10241_v55  ;;  %v10264_v41 = vadd.f32 %v3299_v52, %v14247_v21  ;;  %v4499_v57 = vmul.f32 %v7321_v44, %v4491_v15  ;;  %v10269_v16 = vadd.f32 %v4500_v18, %v10063_v25  ;;  %v13611_v11 = vrot.slane %v14242_v62, 7 }
 0x55f   : > { %v3922_v5 = vsel %vm3130_vm5, %v14244_v9, %v13610_v47  ;;  %v4483_v20 = vsel %vm1163_vm7, %v14246_v48, %v4482_v28  ;;  %v7323_v9 = vpop.eup %7322  ;;  %v4743_v48 = vmul.f32 %v8714_v46, %v14173_v40  ;;  %v3963_v7 = vmul.f32 0.0, %v3947_v56 }
 0x560   : > { %14248 = vst [vmem:[#allocation126_spill] sm:$0xff] %v10264_v41  ;;  %v3923_v50 = vsel %vm3114_vm2, %v3922_v5, 0.0  ;;  %v4458_v21 = vrot.slane %v7323_v9, 7  ;;  %v4506_v52 = vmul.f32 %v7323_v9, %v4483_v20  ;;  %v4507_v47 = vadd.f32 %v4499_v57, %v10058_v14 }
 0x561   : > { %v3931_v59 = vmul.f32 %v3923_v50, %v10207_v2  ;;  %v4465_v50 = vsel %vm1163_vm7, %v4451_v30, %v13611_v11  ;;  %v4750_v18 = vmul.f32 %v8714_v46, %v14177_v10  ;;  %v4751_v15 = vmul.f32 1.442695, %v4743_v48 }
 0x562   : > { %v14250_v28 = vrot.slane %v14219_v61, 7  ;;  %v4514_v20 = vadd.f32 %v4506_v52, %v10085_v32  ;;  %v4466_v14 = vsel %vm1163_vm7, %v4458_v21, %v4451_v30  ;;  %v4547_v57 = vrot.slane %v4507_v47, 6 }
 0x563   : > { %v10278_v5 = vadd.f32 %v3931_v59, %v10220_v1  ;;  %v4467_v41 = vsel %vm1147_vm8, %v4466_v14, 1.0  ;;  %v13614_v11 = vrot.slane %v10269_v16, 6  ;;  %7324 = vpow2.f32 %v4751_v15 }
 0x564   : > { %v4459_v56 = vsel %vm1163_vm7, %v14250_v28, %v4458_v21  ;;  %v4554_v46 = vrot.slane %v4514_v20, 6  ;;  %v10296_v48 = vmul.f32 %v7321_v44, %v4467_v41  ;;  %v10299_v61 = vmul.f32 %v14242_v62, %v4465_v50  ;;  %v4797_v28 = vpop.permute.xlu1 %4796 }
 0x565   : > { %14249 = vst [vmem:[#allocation54_spill] sm:$0xff] %v10278_v5  ;;  %v4522_v59 = vmul.f32 %v7323_v9, %v4459_v56  ;;  %v4765_v2 = vmul.f32 1.442695, %v4750_v18  ;;  %v3971_v32 = vadd.f32 %v3963_v7, %v10278_v5  ;;  %v4561_v30 = vsel %vm2129_vm15, %v4547_v57, %v13614_v11  ;;  %v14252_v9 = vld [vmem:[#allocation31_spill] sm:$0xff] }
 0x566   : > { %14251 = vst [vmem:[#allocation174_spill] sm:$0xff] %v10296_v48  ;;  %v10308_v21 = vmul.f32 %v14252_v9, %v14178_v35  ;;  %v14254_v44 = vrot.slane %v9456_v22, 6  ;;  %v13615_v50 = vrot.slane %v10296_v48, 6  ;;  %v4562_v7 = vsel %vm2129_vm15, %v4554_v46, %v4547_v57 }
 0x567   : > { %v4530_v52 = vrot.slane %v4522_v59, 6  ;;  %7326 = vpow2.f32 %v4765_v2  ;;  %v14255_v15 = vrot.slane %v10241_v55, 6  ;;  %v4563_v35 = vsel %vm2113_vm6, %v4562_v7, 0.0 }
 0x568   : > { %14253 = vst [vmem:[#allocation31_spill] sm:$0xff] %v10308_v21  ;;  %v4555_v41 = vsel %vm2129_vm15, %v14254_v44, %v4554_v46  ;;  %v10324_v14 = vmul.f32 %v4797_v28, %v14188_v45  ;;  %v4571_v46 = vmul.f32 %v4563_v35, %v10296_v48  ;;  %v4813_v57 = vrot.slane %v9445_v51, 7  ;;  %v5153_v35 = vpop.permute.xlu1 %5152 }
 0x569   : > { %v4578_v18 = vmul.f32 %v4555_v41, %v4522_v59  ;;  %v4531_v56 = vsel %vm2129_vm15, %v14255_v15, %v4530_v52  ;;  %v4538_v9 = vsel %vm2129_vm15, %v4530_v52, %v13615_v50  ;;  %v13616_v7 = vrot.slane %v10308_v21, 7  ;;  %v3981_v15 = vpop.permute.xlu0 %3980 }
 0x56a   : > { %v10331_v2 = vmul.f32 %v4531_v56, %v4522_v59  ;;  %v4539_v41 = vsel %vm2113_vm6, %v4538_v9, 1.0  ;;  %v4838_v28 = vrot.slane %v10324_v14, 7  ;;  %v10340_v11 = vadd.f32 %v4571_v46, %v4507_v47  ;;  %v14261_v47 = vld [vmem:[#allocation63_spill] sm:$0xff] }
 0x56b   : > { %v10334_v44 = vadd.f32 %v4578_v18, %v4514_v20  ;;  %v10343_v52 = vmul.f32 %v4539_v41, %v10296_v48  ;;  %v13621_v56 = vrot.slane %v9905_v0, 7  ;;  %v10347_v20 = vmul.f32 %v3981_v15, %v3971_v32 }
 0x56c   : > { %14256 = vst [vmem:[#allocation175_spill] sm:$0xff] %v10331_v2  ;;  %14258 = vst [vmem:[#allocation177_spill] sm:$0xff] %v10340_v11  ;;  %v10350_v18 = vmul.f32 %v4561_v30, %v10299_v61  ;;  %v4846_v9 = vsel %vm1163_vm7, %v4838_v28, %v13616_v7  ;;  %v5099_v46 = vmul.f32 %v14261_v47, %v14173_v40  ;;  %v14262_v41 = vrot.slane %v10331_v2, 4 }
 0x56d   : > { %14257 = vst [vmem:[#allocation176_spill] sm:$0xff] %v10334_v44  ;;  %14259 = vst [vmem:[#allocation178_spill] sm:$0xff] %v10343_v52  ;;  %v13624_v50 = vrot.slane %v10343_v52, 4  ;;  %v4816_v32 = vsel %vm1163_vm7, %v13621_v56, %v4813_v57  ;;  %v5106_v15 = vmul.f32 %v14261_v47, %v14177_v10  ;;  %v10370_v55 = vmul.f32 %v5153_v35, %v14188_v45 }
 0x56e   : > { %14260 = vst [vmem:[#allocation179_spill] sm:$0xff] %v10347_v20  ;;  %v4829_v30 = vsel %vm1153_vm13, %v4816_v32, 1.0  ;;  %v5107_v7 = vmul.f32 1.442695, %v5099_v46  ;;  %v14263_v22 = vrot.slane %v10340_v11, 4  ;;  %v14264_v56 = vrot.slane %v10334_v44, 4 }
 0x56f   : > { %v4610_v59 = vsel %vm3130_vm5, %v14262_v41, %v13624_v50  ;;  %v4847_v47 = vsel %vm1147_vm8, %v4846_v9, 0.0  ;;  %v10387_v35 = vmul.f32 %v9445_v51, %v4829_v30  ;;  %v5121_v41 = vmul.f32 1.442695, %v5106_v15  ;;  %v14269_v15 = vld [vmem:[#allocation43_spill] sm:$0xff] }
 0x570   : > { %v4634_v32 = vsel %vm3130_vm5, %v14264_v56, %v14263_v22  ;;  %v4611_v46 = vsel %vm3114_vm2, %v4610_v59, 1.0  ;;  %7328 = vpow2.f32 %v5107_v7  ;;  %v10393_v50 = vpop.eup %7324  ;;  %v14267_v56 = vrot.slane %v9302_v36, 7  ;;  %v14268_v7 = vld [vmem:[#allocation74_spill] sm:$0xff]  ;;  %v14271_v36 = vld [vmem:[#allocation75_spill] sm:$0xff] }
 0x571   : > { %14265 = vst [vmem:[#allocation63_spill] sm:$0xff] %v10387_v35  ;;  %v4635_v2 = vsel %vm3114_vm2, %v4634_v32, 0.0  ;;  %14266 = vst [vmem:[#allocation180_spill] sm:$0xff] %v10393_v50  ;;  %v4659_v22 = vmul.f32 %v4611_v46, %v10343_v52  ;;  %v5194_v9 = vrot.slane %v10370_v55, 7  ;;  %v4855_v59 = vmul.f32 %v10393_v50, %v4847_v47 }
 0x572   : > { %v4643_v44 = vmul.f32 %v4635_v2, %v10343_v52  ;;  %v4839_v51 = vsel %vm1163_vm7, %v14267_v56, %v4838_v28  ;;  %7330 = vpow2.f32 %v5121_v41  ;;  %v3321_v32 = vmul.f32 %v14269_v15, %v14268_v7 }
 0x573   : > { %v4675_v2 = vmul.f32 0.0, %v4659_v22  ;;  %v14272_v52 = vrot.slane %v14271_v36, 7  ;;  %v10415_v47 = vadd.f32 %v4855_v59, %v10308_v21  ;;  %v14274_v41 = vrot.slane %v9355_v58, 7  ;;  %v14277_v59 = vld [vmem:[#allocation68_spill] sm:$0xff] }
 0x574   : > { %v10407_v20 = vadd.f32 %v4643_v44, %v10340_v11  ;;  %v7327_v56 = vpop.eup %7326  ;;  %v3331_v0 = vmul.f32 1.442695, %v3321_v32  ;;  %v14275_v44 = vld [vmem:[#allocation117_spill] sm:$0xff]  ;;  %v14278_v21 = vrot.slane %v14277_v59, 7  ;;  %v14280_v58 = vrot.slane %v14279_v3, 7  ;;  %v14281_v32 = vld [vmem:[#allocation122_spill] sm:$0xff] }
 0x575   : > { %v5202_v28 = vsel %vm1163_vm7, %v5194_v9, %v14272_v52  ;;  %14273 = vst [vmem:[#allocation43_spill] sm:$0xff] %v10415_v47  ;;  %v5195_v30 = vsel %vm1163_vm7, %v14274_v41, %v5194_v9  ;;  %v4814_v46 = vrot.slane %v7327_v56, 7  ;;  %v4862_v48 = vmul.f32 %v7327_v56, %v4839_v51  ;;  %v14276_v52 = vld [vmem:[#allocation81_spill] sm:$0xff] }
 0x576   : > { %14270 = vst [vmem:[#allocation74_spill] sm:$0xff] %v10407_v20  ;;  %v4683_v22 = vadd.f32 %v4675_v2, %v10407_v20  ;;  %v5203_v5 = vsel %vm1147_vm8, %v5202_v28, 0.0  ;;  %7332 = vpow2.f32 %v3331_v0  ;;  %v3420_v9 = vsel %vm1163_vm7, %v14280_v58, %v14278_v21  ;;  %v4693_v2 = vpop.permute.xlu0 %4692 }
 0x577   : > { %v10434_v41 = vadd.f32 %v14281_v32, %v14279_v3  ;;  %v4815_v51 = vsel %vm1163_vm7, %v4813_v57, %v4814_v46  ;;  %v4870_v28 = vadd.f32 %v4862_v48, %v10324_v14  ;;  %v14282_v0 = vrot.slane %v10393_v50, 7  ;;  %v5509_v14 = vpop.permute.xlu1 %5508 }
 0x578   : > { %v13640_v1 = vrot.slane %v10415_v47, 6  ;;  %v10444_v20 = vmul.f32 %v4693_v2, %v4683_v22  ;;  %v4878_v21 = vmul.f32 %v7327_v56, %v4815_v51  ;;  %v14284_v58 = vrot.slane %v14276_v52, 7 }
 0x579   : > { %v4822_v11 = vsel %vm1163_vm7, %v4814_v46, %v14282_v0  ;;  %v14285_v32 = vrot.slane %v14275_v44, 7  ;;  %v4910_v57 = vrot.slane %v4870_v28, 6  ;;  %v3425_v46 = vsel %vm1149_vm10, %v3420_v9, 0.0  ;;  %v14290_v9 = vld [vmem:[#allocation119_spill] sm:$0xff] }
 0x57a   : > { %14283 = vst [vmem:[#allocation75_spill] sm:$0xff] %v10444_v20  ;;  %v4823_v3 = vsel %vm1147_vm8, %v4822_v11, 1.0  ;;  %v4886_v22 = vrot.slane %v4878_v21, 6  ;;  %v5455_v2 = vmul.f32 %v14107_v4, %v14173_v40  ;;  %v10467_v51 = vmul.f32 %v14107_v4, %v14177_v10 }
 0x57b   : > { %v3397_v48 = vsel %vm1163_vm7, %v14285_v32, %v14284_v58  ;;  %v10455_v8 = vmul.f32 %v10393_v50, %v4823_v3  ;;  %v14287_v0 = vrot.slane %v9507_v63, 6  ;;  %v4918_v58 = vsel %vm2129_vm15, %v4910_v57, %v13640_v1 }
 0x57c   : > { %v10460_v56 = vmul.f32 %v14276_v52, %v3397_v48  ;;  %v10479_v32 = vmul.f32 %v5509_v14, %v14188_v45  ;;  %v14288_v48 = vrot.slane %v10387_v35, 6  ;;  %v4919_v11 = vsel %vm2113_vm6, %v4918_v58, 0.0 }
 0x57d   : > { %14286 = vst [vmem:[#allocation81_spill] sm:$0xff] %v10455_v8  ;;  %v4911_v3 = vsel %vm2129_vm15, %v14287_v0, %v4910_v57  ;;  %v14289_v0 = vrot.slane %v10434_v41, 6  ;;  %v14291_v63 = vrot.slane %v14290_v9, 6  ;;  %v10493_v57 = vpop.eup %7328  ;;  %v14292_v45 = vrot.slane %v10455_v8, 6 }
 0x57e   : > { %v4934_v40 = vmul.f32 %v4911_v3, %v4878_v21  ;;  %v4887_v4 = vsel %vm2129_vm15, %v14288_v48, %v4886_v22  ;;  %v4927_v3 = vmul.f32 %v4919_v11, %v10455_v8 }
 0x57f   : > { %v3493_v20 = vsel %vm2129_vm15, %v14291_v63, %v14289_v0  ;;  %v4894_v14 = vsel %vm2129_vm15, %v4886_v22, %v14292_v45  ;;  %v10500_v48 = vmul.f32 %v4887_v4, %v4878_v21  ;;  %v5211_v63 = vmul.f32 %v10493_v57, %v5203_v5  ;;  %v7331_v50 = vpop.eup %7330 }
 0x580   : > { %v3504_v58 = vmul.f32 %v3493_v20, %v10460_v56  ;;  %v10503_v1 = vadd.f32 %v4934_v40, %v4870_v28  ;;  %v4895_v35 = vsel %vm2113_vm6, %v4894_v14, 1.0  ;;  %v10510_v44 = vadd.f32 %v4927_v3, %v10415_v47 }
 0x581   : > { %14293 = vst [vmem:[#allocation68_spill] sm:$0xff] %v10500_v48  ;;  %v10513_v22 = vmul.f32 %v4895_v35, %v10455_v8  ;;  %v13646_v21 = vrot.slane %v10500_v48, 4  ;;  %v13645_v28 = vrot.slane %v10493_v57, 7  ;;  %v5170_v11 = vrot.slane %v7331_v50, 7 }
 0x582   : > { %14294 = vst [vmem:[#allocation25_spill] sm:$0xff] %v10503_v1  ;;  %14295 = vst [vmem:[#allocation122_spill] sm:$0xff] %v10510_v44  ;;  %v10517_v20 = vadd.f32 %v3504_v58, %v10434_v41  ;;  %v5218_v40 = vmul.f32 %v7331_v50, %v5195_v30  ;;  %v10521_v5 = vadd.f32 %v5211_v63, %v14271_v36  ;;  %v13650_v4 = vrot.slane %v10503_v1, 4 }
 0x583   : > { %14296 = vst [vmem:[#allocation119_spill] sm:$0xff] %v10513_v22  ;;  %v13647_v45 = vrot.slane %v10513_v22, 4  ;;  %v13651_v14 = vrot.slane %v10510_v44, 4  ;;  %v14297_v3 = vrot.slane %v9504_v17, 7  ;;  %v5178_v30 = vsel %vm1163_vm7, %v5170_v11, %v13645_v28  ;;  %v7333_v0 = vpop.eup %7332 }
 0x584   : > { %v5226_v36 = vadd.f32 %v5218_v40, %v10370_v55  ;;  %v5179_v55 = vsel %vm1147_vm8, %v5178_v30, 1.0  ;;  %v14299_v30 = vrot.slane %v10521_v5, 6 }
 0x585   : > { %v5171_v58 = vsel %vm1163_vm7, %v14297_v3, %v5170_v11  ;;  %v4966_v17 = vsel %vm3130_vm5, %v13646_v21, %v13647_v45  ;;  %v4990_v3 = vsel %vm3130_vm5, %v13650_v4, %v13651_v14  ;;  %v10556_v35 = vmul.f32 %v10493_v57, %v5179_v55 }
 0x586   : > { %v5234_v11 = vmul.f32 %v7331_v50, %v5171_v58  ;;  %v4967_v40 = vsel %vm3114_vm2, %v4966_v17, 1.0  ;;  %v4991_v28 = vsel %vm3114_vm2, %v4990_v3, 0.0  ;;  %v5266_v21 = vrot.slane %v5226_v36, 6 }
 0x587   : > { %v4999_v45 = vmul.f32 %v4991_v28, %v10513_v22  ;;  %v5015_v63 = vmul.f32 %v4967_v40, %v10513_v22  ;;  %v3385_v4 = vrot.slane %v7333_v0, 7  ;;  %v14298_v50 = vrot.slane %v9545_v54, 6  ;;  %v14301_v28 = vld [vmem:[#allocation142_spill] sm:$0xff] }
 0x588   : > { %v5242_v1 = vrot.slane %v5234_v11, 6  ;;  %v5274_v17 = vsel %vm2129_vm15, %v5266_v21, %v14299_v30  ;;  %v5463_v3 = vmul.f32 1.442695, %v5455_v2  ;;  %v14302_v40 = vrot.slane %v14301_v28, 6  ;;  %v14305_v28 = vld [vmem:[#allocation91_spill] sm:$0xff] }
 0x589   : > { %v5267_v58 = vsel %vm2129_vm15, %v14298_v50, %v5266_v21  ;;  %v10570_v55 = vadd.f32 %v4999_v45, %v10510_v44  ;;  %v5275_v54 = vsel %vm2113_vm6, %v5274_v17, 0.0  ;;  %v3433_v14 = vmul.f32 %v7333_v0, %v3425_v46 }
 0x58a   : > { %v5243_v48 = vsel %vm2129_vm15, %v14302_v40, %v5242_v1  ;;  %v5031_v22 = vmul.f32 0.0, %v5015_v63  ;;  %v14303_v50 = vrot.slane %v10556_v35, 6  ;;  %v5283_v2 = vmul.f32 %v5275_v54, %v10556_v35 }
 0x58b   : > { %14300 = vst [vmem:[#allocation181_spill] sm:$0xff] %v10570_v55  ;;  %v5290_v21 = vmul.f32 %v5267_v58, %v5234_v11  ;;  %v10585_v30 = vmul.f32 %v5243_v48, %v5234_v11  ;;  %v14306_v40 = vrot.slane %v14305_v28, 7  ;;  %v14307_v46 = vrot.slane %v14276_v52, 7 }
 0x58c   : > { %v5250_v8 = vsel %vm2129_vm15, %v5242_v1, %v14303_v50  ;;  %v5039_v1 = vadd.f32 %v5031_v22, %v10570_v55  ;;  %v10597_v54 = vadd.f32 %v5283_v2, %v10521_v5  ;;  %v3441_v11 = vadd.f32 %v3433_v14, %v14277_v59 }
 0x58d   : > { %v5251_v45 = vsel %vm2113_vm6, %v5250_v8, 1.0  ;;  %14304 = vst [vmem:[#allocation182_spill] sm:$0xff] %v10585_v30  ;;  %v3395_v17 = vsel %vm1163_vm7, %v3385_v4, %v14306_v40  ;;  %v3396_v63 = vsel %vm1163_vm7, %v14307_v46, %v3385_v4  ;;  %v10599_v58 = vadd.f32 %v5290_v21, %v5226_v36 }
 0x58e   : > { %14308 = vst [vmem:[#allocation91_spill] sm:$0xff] %v10597_v54  ;;  %v3401_v8 = vsel %vm1149_vm10, %v3396_v63, 1.0  ;;  %v10604_v48 = vmul.f32 %v5251_v45, %v10556_v35  ;;  %v10608_v52 = vmul.f32 %v14305_v28, %v3395_v17  ;;  %v13657_v4 = vrot.slane %v10597_v54, 4 }
 0x58f   : > { %14309 = vst [vmem:[#allocation183_spill] sm:$0xff] %v10599_v58  ;;  %v3449_v50 = vmul.f32 %v7333_v0, %v3401_v8  ;;  %v13656_v22 = vrot.slane %v10599_v58, 4  ;;  %7334 = vpow2.f32 %v5463_v3  ;;  %v5477_v36 = vmul.f32 1.442695, %v10467_v51  ;;  %v14311_v0 = vld [vmem:[#allocation67_spill] sm:$0xff]  ;;  %v5049_v3 = vpop.permute.xlu0 %5048  ;;  %v14313_v8 = vld [vmem:[#allocation36_spill] sm:$0xff] }
 0x590   : > { %14310 = vst [vmem:[#allocation184_spill] sm:$0xff] %v10608_v52  ;;  %v13658_v21 = vrot.slane %v10608_v52, 6  ;;  %v3481_v40 = vrot.slane %v3441_v11, 6  ;;  %v5550_v51 = vrot.slane %v10479_v32, 7  ;;  %v14312_v46 = vrot.slane %v10460_v56, 6 }
 0x591   : > { %v3457_v2 = vrot.slane %v3449_v50, 6  ;;  %v5346_v59 = vsel %vm3130_vm5, %v13656_v22, %v13657_v4  ;;  %7336 = vpow2.f32 %v5477_v36  ;;  %v14314_v36 = vrot.slane %v14313_v8, 6 }
 0x592   : > { %v5347_v28 = vsel %vm3114_vm2, %v5346_v59, 0.0  ;;  %v10638_v4 = vmul.f32 %v5049_v3, %v5039_v1  ;;  %v14316_v45 = vrot.slane %v10434_v41, 6  ;;  %v14319_v1 = vrot.slane %v14311_v0, 7 }
 0x593   : > { %v3467_v17 = vsel %vm2129_vm15, %v3457_v2, %v13658_v21  ;;  %v3468_v63 = vsel %vm2129_vm15, %v14312_v46, %v3457_v2  ;;  %v3491_v22 = vsel %vm2129_vm15, %v3481_v40, %v14314_v36  ;;  %v14320_v3 = vrot.slane %v10015_v12, 7  ;;  %v14323_v36 = vld [vmem:[#allocation77_spill] sm:$0xff] }
 0x594   : > { %14315 = vst [vmem:[#allocation67_spill] sm:$0xff] %v10638_v4  ;;  %v3473_v59 = vsel %vm2115_vm4, %v3468_v63, 1.0  ;;  %v3492_v21 = vsel %vm2129_vm15, %v14316_v45, %v3481_v40  ;;  %v3506_v14 = vmul.f32 %v3491_v22, %v10608_v52  ;;  %v10652_v58 = vmul.f32 %v3467_v17, %v10608_v52 }
 0x595   : > { %v3497_v2 = vsel %vm2115_vm4, %v3492_v21, 0.0  ;;  %v10649_v46 = vmul.f32 %v3473_v59, %v3449_v50  ;;  %v5528_v41 = vsel %vm1163_vm7, %v14320_v3, %v14319_v1  ;;  %v10661_v63 = vmul.f32 %v5347_v28, %v10604_v48  ;;  %v3369_v3 = vpop.permute.xlu1 %3368 }
 0x596   : > { %14318 = vst [vmem:[#allocation185_spill] sm:$0xff] %v10652_v58  ;;  %v3505_v40 = vmul.f32 %v3497_v2, %v3449_v50  ;;  %v10664_v22 = vadd.f32 %v3506_v14, %v14313_v8  ;;  %v5541_v21 = vsel %vm1153_vm13, %v5528_v41, 1.0  ;;  %v13664_v17 = vrot.slane %v10652_v58, 4 }
 0x597   : > { %14317 = vst [vmem:[#allocation36_spill] sm:$0xff] %v10649_v46  ;;  %14321 = vst [vmem:[#allocation186_spill] sm:$0xff] %v10661_v63  ;;  %v13665_v45 = vrot.slane %v10649_v46, 4  ;;  %v14324_v59 = vrot.slane %v14323_v36, 7  ;;  %v10675_v1 = vmul.f32 %v14311_v0, %v5541_v21  ;;  %v14326_v14 = vrot.slane %v9599_v29, 7  ;;  %v14327_v29 = vld [vmem:[#allocation44_spill] sm:$0xff] }
 0x598   : > { %14322 = vst [vmem:[#allocation187_spill] sm:$0xff] %v10664_v22  ;;  %v3513_v28 = vadd.f32 %v3505_v40, %v3441_v11  ;;  %v3677_v2 = vmul.f32 %v8635_v13, %v14268_v7  ;;  %v14328_v21 = vrot.slane %v14327_v29, 7  ;;  %v3326_v40 = vmul.f32 %v14269_v15, %v14177_v10 }
 0x599   : > { %v5558_v52 = vsel %vm1163_vm7, %v5550_v51, %v14324_v59  ;;  %14325 = vst [vmem:[#allocation77_spill] sm:$0xff] %v10675_v1  ;;  %v5551_v8 = vsel %vm1163_vm7, %v14326_v14, %v5550_v51  ;;  %v3539_v41 = vsel %vm3130_vm5, %v13665_v45, %v13664_v17  ;;  %v14329_v51 = vrot.slane %v9969_v43, 7  ;;  %v14331_v43 = vld [vmem:[#allocation19_spill] sm:$0xff] }
 0x59a   : > { %v5559_v11 = vsel %vm1147_vm8, %v5558_v52, 0.0  ;;  %v3553_v59 = vrot.slane %v3513_v28, 4  ;;  %v3594_v14 = vmul.f32 %v3539_v41, %v10652_v58  ;;  %v3687_v50 = vmul.f32 1.442695, %v3677_v2  ;;  %v14330_v52 = vld [vmem:[#allocation101_spill] sm:$0xff] }
 0x59b   : > { %v3776_v13 = vsel %vm1163_vm7, %v14329_v51, %v14328_v21  ;;  %v10703_v17 = vadd.f32 %v10244_v33, %v10044_v34  ;;  %v3325_v45 = vmul.f32 %v14269_v15, %v14330_v52  ;;  %v10710_v4 = vmul.f32 %v3369_v3, %v14331_v43 }
 0x59c   : > { %v14332_v21 = vrot.slane %v10664_v22, 4  ;;  %v14333_v41 = vrot.slane %v10517_v20, 4  ;;  %7338 = vpow2.f32 %v3687_v50  ;;  %v3781_v51 = vsel %vm1149_vm10, %v3776_v13, 0.0  ;;  %v10722_v12 = vpop.eup %7334 }
 0x59d   : > { %v3339_v30 = vmul.f32 1.442695, %v3325_v45  ;;  %v5567_v44 = vmul.f32 %v10722_v12, %v5559_v11  ;;  %v13672_v47 = vrot.slane %v10722_v12, 7  ;;  %v14335_v11 = vld [vmem:[#allocation33_spill] sm:$0xff] }
 0x59e   : > { %v3563_v2 = vsel %vm3130_vm5, %v3553_v59, %v14332_v21  ;;  %v3564_v33 = vsel %vm3130_vm5, %v14333_v41, %v3553_v59  ;;  %v4389_v21 = vmul.f32 %v8701_v60, %v14268_v7  ;;  %v3341_v59 = vmul.f32 1.442695, %v3326_v40  ;;  %v7337_v41 = vpop.eup %7336 }
 0x59f   : > { %v3569_v15 = vsel %vm3116_vm12, %v3564_v33, 0.0  ;;  %v3578_v3 = vmul.f32 %v3563_v2, %v10652_v58  ;;  %7340 = vpow2.f32 %v3339_v30  ;;  %v3413_v33 = vrot.slane %v10710_v4, 7 }
 0x5a0   : > { %v3577_v55 = vmul.f32 %v3569_v15, %v10649_v46  ;;  %v5526_v45 = vrot.slane %v7337_v41, 7  ;;  %v5574_v58 = vmul.f32 %v7337_v41, %v5551_v8  ;;  %v10738_v60 = vadd.f32 %v5567_v44, %v14323_v36 }
 0x5a1   : > { %v3586_v13 = vadd.f32 %v3578_v3, %v10664_v22  ;;  %7342 = vpow2.f32 %v3341_v59  ;;  %v14336_v15 = vrot.slane %v14335_v11, 7  ;;  %v4399_v50 = vmul.f32 1.442695, %v4389_v21  ;;  %v14337_v3 = vld [vmem:[#allocation59_spill] sm:$0xff]  ;;  %v3637_v59 = vpop.permute.xlu0 %3636 }
 0x5a2   : > { %v10735_v2 = vadd.f32 %v3577_v55, %v3513_v28  ;;  %v14338_v22 = vrot.slane %v14337_v3, 7  ;;  %v14339_v30 = vrot.slane %v10063_v25, 7  ;;  %v14340_v8 = vrot.slane %v14311_v0, 7 }
 0x5a3   : > { %v3416_v40 = vsel %vm1163_vm7, %v14336_v15, %v3413_v33  ;;  %v5534_v36 = vsel %vm1163_vm7, %v5526_v45, %v13672_v47  ;;  %v5582_v21 = vadd.f32 %v5574_v58, %v10479_v32  ;;  %7344 = vpow2.f32 %v4399_v50  ;;  %v14346_v50 = vld [vmem:[#allocation42_spill] sm:$0xff] }
 0x5a4   : > { %14334 = vst [vmem:[#allocation44_spill] sm:$0xff] %v10735_v2  ;;  %v4488_v55 = vsel %vm1163_vm7, %v14339_v30, %v14338_v22  ;;  %v3610_v28 = vmul.f32 %v3594_v14, %v10735_v2  ;;  %v5527_v44 = vsel %vm1163_vm7, %v14340_v8, %v5526_v45  ;;  %v5535_v25 = vsel %vm1147_vm8, %v5534_v36, 1.0  ;;  %v14342_v14 = vld [vmem:[#allocation102_spill] sm:$0xff] }
 0x5a5   : > { %v10762_v11 = vmul.f32 %v7337_v41, %v5527_v44  ;;  %v13676_v22 = vrot.slane %v10738_v60, 6  ;;  %v14343_v0 = vrot.slane %v14342_v14, 7  ;;  %v10770_v8 = vmul.f32 %v10722_v12, %v5535_v25 }
 0x5a6   : > { %v3618_v30 = vadd.f32 %v3610_v28, %v3586_v13  ;;  %v5622_v45 = vrot.slane %v5582_v21, 6  ;;  %v3429_v32 = vsel %vm1153_vm13, %v3416_v40, 0.0  ;;  %v10777_v41 = vsel %vm1149_vm10, %v4488_v55, 0.0 }
 0x5a7   : > { %14341 = vst [vmem:[#allocation101_spill] sm:$0xff] %v10762_v11  ;;  %v3415_v15 = vsel %vm1163_vm7, %v3413_v33, %v14343_v0  ;;  %v13673_v58 = vrot.slane %v10762_v11, 6  ;;  %v10781_v44 = vadd.f32 %v10350_v18, %v10269_v16  ;;  %v4081_v33 = vpop.permute.xlu1 %4080  ;;  %v14345_v28 = vrot.slane %v9752_v6, 6 }
 0x5a8   : > { %v10783_v13 = vmul.f32 %v3637_v59, %v3618_v30  ;;  %v4037_v25 = vmul.f32 %v14346_v50, %v14330_v52  ;;  %v14347_v55 = vrot.slane %v10675_v1, 6  ;;  %v10802_v59 = vsel %vm2129_vm15, %v5622_v45, %v13676_v22 }
 0x5a9   : > { %v5623_v36 = vsel %vm2129_vm15, %v14345_v28, %v5622_v45  ;;  %14348 = vst [vmem:[#allocation33_spill] sm:$0xff] %v10802_v59  ;;  %v4038_v30 = vmul.f32 %v14346_v50, %v14177_v10  ;;  %v10812_v40 = vmul.f32 %v4081_v33, %v14331_v43  ;;  %v14352_v43 = vld [vmem:[#allocation78_spill] sm:$0xff]  ;;  %v14353_v33 = vld [vmem:[#allocation39_spill] sm:$0xff] }
 0x5aa   : > { %14344 = vst [vmem:[#allocation19_spill] sm:$0xff] %v10783_v13  ;;  %v5599_v18 = vsel %vm2129_vm15, %v14347_v55, %v13673_v58  ;;  %v5646_v0 = vmul.f32 %v5623_v36, %v10762_v11  ;;  %v4051_v47 = vmul.f32 1.442695, %v4037_v25  ;;  %v7339_v55 = vpop.eup %7338  ;;  %v14351_v36 = vld [vmem:[#allocation41_spill] sm:$0xff]  ;;  %v10823_v28 = vmul.f32 %v14353_v33, %v14352_v43 }
 0x5ab   : > { %v10808_v52 = vmul.f32 %v5599_v18, %v10762_v11  ;;  %v4053_v6 = vmul.f32 1.442695, %v4038_v30  ;;  %v2900_v22 = vmul.f32 %v14351_v36, %v14268_v7  ;;  %v3741_v1 = vrot.slane %v7339_v55, 7  ;;  %v14357_v36 = vld [vmem:[#allocation90_spill] sm:$0xff] }
 0x5ac   : > { %v10814_v58 = vadd.f32 %v5646_v0, %v5582_v21  ;;  %v3789_v10 = vmul.f32 %v7339_v55, %v3781_v51  ;;  %7346 = vpow2.f32 %v4051_v47  ;;  %v4125_v50 = vrot.slane %v10812_v40, 7  ;;  %v7341_v21 = vpop.eup %7340  ;;  %v14354_v0 = vld [vmem:[#allocation94_spill] sm:$0xff] }
 0x5ad   : > { %14349 = vst [vmem:[#allocation59_spill] sm:$0xff] %v10808_v52  ;;  %7348 = vpow2.f32 %v4053_v6  ;;  %v2910_v25 = vmul.f32 1.442695, %v2900_v22  ;;  %v14355_v30 = vrot.slane %v14354_v0, 7  ;;  %v14356_v7 = vrot.slane %v14204_v39, 7  ;;  %v14359_v39 = vld [vmem:[#allocation26_spill] sm:$0xff] }
 0x5ae   : > { %14350 = vst [vmem:[#allocation102_spill] sm:$0xff] %v10814_v58  ;;  %v3797_v51 = vadd.f32 %v3789_v10, %v14327_v29  ;;  %v3389_v33 = vrot.slane %v7341_v21, 7  ;;  %v3437_v18 = vmul.f32 %v7341_v21, %v3429_v32  ;;  %v10840_v2 = vpop.eup %7342  ;;  %v14360_v13 = vrot.slane %v14359_v39, 7  ;;  %v14361_v29 = vld [vmem:[#allocation35_spill] sm:$0xff] }
 0x5af   : > { %v3751_v45 = vsel %vm1163_vm7, %v3741_v1, %v14355_v30  ;;  %v3752_v47 = vsel %vm1163_vm7, %v14356_v7, %v3741_v1  ;;  %v14362_v10 = vrot.slane %v14361_v29, 7  ;;  %v13685_v32 = vrot.slane %v10840_v2, 7 }
 0x5b0   : > { %v3757_v22 = vsel %vm1149_vm10, %v3752_v47, 1.0  ;;  %v10838_v43 = vmul.f32 %v14354_v0, %v3751_v45  ;;  %v3837_v46 = vrot.slane %v3797_v51, 6  ;;  %v10846_v1 = vsel %vm1163_vm7, %v4125_v50, %v14360_v13  ;;  %v14363_v0 = vld [vmem:[#allocation51_spill] sm:$0xff]  ;;  %v7345_v52 = vpop.eup %7344 }
 0x5b1   : > { %v3805_v30 = vmul.f32 %v7339_v55, %v3757_v22  ;;  %v10852_v7 = vsel %vm1163_vm7, %v14362_v10, %v4125_v50  ;;  %v14364_v47 = vrot.slane %v14363_v0, 7  ;;  %v3438_v22 = vmul.f32 %v10840_v2, %v3415_v15  ;;  %v14365_v13 = vld [vmem:[#allocation143_spill] sm:$0xff] }
 0x5b2   : > { %14358 = vst [vmem:[#allocation42_spill] sm:$0xff] %v10838_v43  ;;  %v14366_v58 = vrot.slane %v14365_v13, 6  ;;  %v14367_v50 = vrot.slane %v10044_v34, 6  ;;  %v3391_v15 = vsel %vm1163_vm7, %v3389_v33, %v13685_v32  ;;  %v14368_v34 = vrot.slane %v10838_v43, 6 }
 0x5b3   : > { %v3392_v55 = vsel %vm1163_vm7, %v14364_v47, %v3389_v33  ;;  %v3813_v6 = vrot.slane %v3805_v30, 6  ;;  %v10901_v11 = vmul.f32 %v10840_v2, %v3391_v15  ;;  %7350 = vpow2.f32 %v2910_v25 }
 0x5b4   : > { %v3847_v29 = vsel %vm2129_vm15, %v3837_v46, %v14366_v58  ;;  %v3848_v10 = vsel %vm2129_vm15, %v14367_v50, %v3837_v46  ;;  %v3405_v45 = vsel %vm1153_vm13, %v3392_v55, 1.0  ;;  %v3445_v58 = vadd.f32 %v3437_v18, %v10710_v4 }
 0x5b5   : > { %v3853_v0 = vsel %vm2115_vm4, %v3848_v10, 0.0  ;;  %v3862_v47 = vmul.f32 %v3847_v29, %v10838_v43  ;;  %v3823_v46 = vsel %vm2129_vm15, %v3813_v6, %v14368_v34  ;;  %v14369_v55 = vrot.slane %v10186_v38, 6 }
 0x5b6   : > { %v3861_v10 = vmul.f32 %v3853_v0, %v3805_v30  ;;  %v3446_v29 = vadd.f32 %v3438_v22, %v14342_v14  ;;  %v10894_v4 = vmul.f32 %v3823_v46, %v10838_v43  ;;  %v10896_v18 = vmul.f32 %v7341_v21, %v3405_v45  ;;  %v14371_v21 = vld [vmem:[#allocation135_spill] sm:$0xff] }
 0x5b7   : > { %v3824_v50 = vsel %vm2129_vm15, %v14369_v55, %v3813_v6  ;;  %v10891_v33 = vadd.f32 %v3862_v47, %v14365_v13  ;;  %v3485_v6 = vrot.slane %v3445_v58, 6  ;;  %v14372_v45 = vrot.slane %v14371_v21, 6 }
 0x5b8   : > { %v3829_v59 = vsel %vm2115_vm4, %v3824_v50, 1.0  ;;  %v3869_v34 = vadd.f32 %v3861_v10, %v3797_v51  ;;  %v13689_v14 = vrot.slane %v10894_v4, 4  ;;  %v3486_v0 = vrot.slane %v3446_v29, 6 }
 0x5b9   : > { %v10898_v32 = vmul.f32 %v3829_v59, %v3805_v30  ;;  %v13690_v22 = vrot.slane %v10891_v33, 4  ;;  %v3488_v59 = vsel %vm2129_vm15, %v14372_v45, %v3485_v6  ;;  %v7347_v51 = vpop.eup %7346  ;;  %v4453_v25 = vrot.slane %v7345_v52, 7 }
 0x5ba   : > { %v3909_v47 = vrot.slane %v3869_v34, 4  ;;  %v3487_v15 = vsel %vm2129_vm15, %v3485_v6, %v3486_v0  ;;  %v3501_v55 = vsel %vm2119_vm0, %v3488_v59, 0.0  ;;  %v10916_v50 = vpop.eup %7348  ;;  %v14373_v6 = vrot.slane %v10703_v17, 4 }
 0x5bb   : > { %14370 = vst [vmem:[#allocation41_spill] sm:$0xff] %v10898_v32  ;;  %v13688_v13 = vrot.slane %v10898_v32, 4  ;;  %v3509_v59 = vmul.f32 %v3501_v55, %v10896_v18  ;;  %v14377_v55 = vrot.slane %v14242_v62, 7 }
 0x5bc   : > { %v3919_v21 = vsel %vm3130_vm5, %v3909_v47, %v13690_v22  ;;  %v3920_v45 = vsel %vm3130_vm5, %v14373_v6, %v3909_v47  ;;  %v14375_v22 = vld [vmem:[#allocation97_spill] sm:$0xff] }
 0x5bd   : > { %v3895_v10 = vsel %vm3130_vm5, %v13688_v13, %v13689_v14  ;;  %v3925_v46 = vsel %vm3116_vm12, %v3920_v45, 0.0  ;;  %v3934_v30 = vmul.f32 %v3919_v21, %v10894_v4  ;;  %v3510_v13 = vmul.f32 %v3487_v15, %v10901_v11 }
 0x5be   : > { %v3950_v43 = vmul.f32 %v3895_v10, %v10894_v4  ;;  %v3933_v14 = vmul.f32 %v3925_v46, %v10898_v32  ;;  %v10939_v63 = vadd.f32 %v3509_v59, %v3445_v58  ;;  %v14376_v54 = vrot.slane %v14375_v22, 7 }
 0x5bf   : > { %v4464_v6 = vsel %vm1163_vm7, %v14377_v55, %v4453_v25  ;;  %v3942_v21 = vadd.f32 %v3934_v30, %v10891_v33  ;;  %v14378_v10 = vrot.slane %v14290_v9, 6  ;;  %v4501_v46 = vmul.f32 %v7345_v52, %v10777_v41  ;;  %v14383_v30 = vld [vmem:[#allocation148_spill] sm:$0xff] }
 0x5c0   : > { %14374 = vst [vmem:[#allocation78_spill] sm:$0xff] %v10939_v63  ;;  %v4463_v47 = vsel %vm1163_vm7, %v4453_v25, %v14376_v54  ;;  %v4469_v58 = vsel %vm1149_vm10, %v4464_v6, 1.0  ;;  %v10959_v45 = vadd.f32 %v3933_v14, %v3869_v34  ;;  %v10961_v54 = vadd.f32 %v3510_v13, %v3446_v29 }
 0x5c1   : > { %v10954_v15 = vsel %vm2129_vm15, %v3486_v0, %v14378_v10  ;;  %v4517_v62 = vmul.f32 %v7345_v52, %v4469_v58  ;;  %v10964_v25 = vmul.f32 %v14375_v22, %v4463_v47  ;;  %v4509_v59 = vadd.f32 %v4501_v46, %v14337_v3 }
 0x5c2   : > { %14379 = vst [vmem:[#allocation39_spill] sm:$0xff] %v10959_v45  ;;  %14380 = vst [vmem:[#allocation94_spill] sm:$0xff] %v10961_v54  ;;  %v4101_v55 = vrot.slane %v7347_v51, 7  ;;  %v13694_v0 = vrot.slane %v10916_v50, 7  ;;  %v3966_v10 = vmul.f32 %v3950_v43, %v10959_v45  ;;  %v4141_v29 = vsel %vm1153_vm13, %v10852_v7, 0.0 }
 0x5c3   : > { %v4525_v6 = vrot.slane %v4517_v62, 6  ;;  %v13693_v41 = vrot.slane %v10964_v25, 6  ;;  %v4549_v52 = vrot.slane %v4509_v59, 6  ;;  %v14381_v3 = vrot.slane %v9738_v49, 7 }
 0x5c4   : > { %v4103_v34 = vsel %vm1163_vm7, %v4101_v55, %v13694_v0  ;;  %v4149_v22 = vmul.f32 %v7347_v51, %v4141_v29  ;;  %v3974_v43 = vadd.f32 %v3966_v10, %v3942_v21  ;;  %v14382_v7 = vrot.slane %v10299_v61, 6 }
 0x5c5   : > { %v4104_v14 = vsel %vm1163_vm7, %v14381_v3, %v4101_v55  ;;  %v4535_v13 = vsel %vm2129_vm15, %v4525_v6, %v13693_v41  ;;  %v14384_v55 = vrot.slane %v14383_v30, 6  ;;  %v14385_v10 = vrot.slane %v10269_v16, 6 }
 0x5c6   : > { %v4536_v47 = vsel %vm2129_vm15, %v14382_v7, %v4525_v6  ;;  %v4117_v58 = vsel %vm1153_vm13, %v4104_v14, 1.0  ;;  %v11003_v3 = vmul.f32 %v4535_v13, %v10964_v25  ;;  %v7351_v6 = vpop.eup %7350  ;;  %v4150_v16 = vmul.f32 %v10916_v50, %v10846_v1 }
 0x5c7   : > { %v4541_v46 = vsel %vm2115_vm4, %v4536_v47, 1.0  ;;  %v4559_v21 = vsel %vm2129_vm15, %v4549_v52, %v14384_v55  ;;  %v4560_v29 = vsel %vm2129_vm15, %v14385_v10, %v4549_v52  ;;  %v4157_v52 = vadd.f32 %v4149_v22, %v10812_v40 }
 0x5c8   : > { %v4565_v14 = vsel %vm2115_vm4, %v4560_v29, 0.0  ;;  %v4574_v47 = vmul.f32 %v4559_v21, %v10964_v25  ;;  %v11009_v41 = vmul.f32 %v4541_v46, %v4517_v62  ;;  %v11019_v7 = vmul.f32 %v7347_v51, %v4117_v58  ;;  %v3993_v46 = vpop.permute.xlu0 %3992 }
 0x5c9   : > { %v4573_v0 = vmul.f32 %v4565_v14, %v4517_v62  ;;  %v11022_v29 = vmul.f32 %v10916_v50, %v4103_v34  ;;  %v4158_v62 = vadd.f32 %v4150_v16, %v14359_v39  ;;  %v4197_v14 = vrot.slane %v4157_v52, 6  ;;  %v14390_v39 = vld [vmem:[#allocation153_spill] sm:$0xff] }
 0x5ca   : > { %14386 = vst [vmem:[#allocation90_spill] sm:$0xff] %v11009_v41  ;;  %v11016_v13 = vadd.f32 %v4574_v47, %v14383_v30  ;;  %v13697_v10 = vrot.slane %v11009_v41, 4  ;;  %14387 = vst [vmem:[#allocation26_spill] sm:$0xff] %v11019_v7  ;;  %v2972_v55 = vrot.slane %v7351_v6, 7  ;;  %v11025_v49 = vmul.f32 %v3993_v46, %v3974_v43  ;;  %v14393_v46 = vld [vmem:[#allocation80_spill] sm:$0xff] }
 0x5cb   : > { %v4581_v21 = vadd.f32 %v4573_v0, %v4509_v59  ;;  %v14389_v40 = vrot.slane %v11003_v3, 4  ;;  %v4198_v0 = vrot.slane %v4158_v62, 6  ;;  %v14391_v22 = vrot.slane %v14390_v39, 6 }
 0x5cc   : > { %14388 = vst [vmem:[#allocation35_spill] sm:$0xff] %v11025_v49  ;;  %v13699_v51 = vrot.slane %v11016_v13, 4  ;;  %v14392_v47 = vrot.slane %v14357_v36, 7  ;;  %v14395_v30 = vrot.slane %v10781_v44, 4 }
 0x5cd   : > { %v4607_v1 = vsel %vm3130_vm5, %v13697_v10, %v14389_v40  ;;  %v4621_v34 = vrot.slane %v4581_v21, 4  ;;  %v4200_v43 = vsel %vm2129_vm15, %v14391_v22, %v4197_v14  ;;  %v14394_v40 = vrot.slane %v14393_v46, 7 }
 0x5ce   : > { %v4662_v59 = vmul.f32 %v4607_v1, %v11003_v3  ;;  %v4213_v58 = vsel %vm2119_vm0, %v4200_v43, 0.0  ;;  %v2982_v16 = vsel %vm1163_vm7, %v2972_v55, %v14392_v47  ;;  %v2996_v1 = vrot.slane %v10823_v28, 7 }
 0x5cf   : > { %v2983_v10 = vsel %vm1163_vm7, %v14394_v40, %v2972_v55  ;;  %v4631_v22 = vsel %vm3130_vm5, %v4621_v34, %v13699_v51  ;;  %v4632_v43 = vsel %vm3130_vm5, %v14395_v30, %v4621_v34  ;;  %v4199_v47 = vsel %vm2129_vm15, %v4197_v14, %v4198_v0  ;;  %v14396_v30 = vld [vmem:[#allocation93_spill] sm:$0xff]  ;;  %v14398_v14 = vld [vmem:[#allocation71_spill] sm:$0xff] }
 0x5d0   : > { %v4637_v55 = vsel %vm3116_vm12, %v4632_v43, 0.0  ;;  %v4646_v46 = vmul.f32 %v4631_v22, %v11003_v3  ;;  %v4221_v40 = vmul.f32 %v4213_v58, %v11019_v7  ;;  %v4222_v45 = vmul.f32 %v4199_v47, %v11022_v29 }
 0x5d1   : > { %v4645_v51 = vmul.f32 %v4637_v55, %v11009_v41  ;;  %v2988_v32 = vsel %vm1149_vm10, %v2983_v10, 1.0  ;;  %v14397_v34 = vrot.slane %v14396_v30, 7  ;;  %v14399_v49 = vrot.slane %v14398_v14, 7  ;;  %v14403_v14 = vld [vmem:[#allocation76_spill] sm:$0xff] }
 0x5d2   : > { %v4654_v22 = vadd.f32 %v4646_v46, %v11016_v13  ;;  %v11079_v58 = vadd.f32 %v4221_v40, %v4157_v52  ;;  %v11081_v47 = vadd.f32 %v4222_v45, %v4158_v62  ;;  %v14404_v37 = vrot.slane %v14403_v14, 6  ;;  %v14407_v46 = vld [vmem:[#allocation85_spill] sm:$0xff] }
 0x5d3   : > { %v3006_v39 = vsel %vm1163_vm7, %v2996_v1, %v14397_v34  ;;  %v3007_v43 = vsel %vm1163_vm7, %v14399_v49, %v2996_v1  ;;  %v11085_v10 = vadd.f32 %v4645_v51, %v4581_v21  ;;  %v11088_v34 = vmul.f32 %v7351_v6, %v2988_v32 }
 0x5d4   : > { %14400 = vst [vmem:[#allocation51_spill] sm:$0xff] %v11079_v58  ;;  %14401 = vst [vmem:[#allocation143_spill] sm:$0xff] %v11081_v47  ;;  %v3012_v55 = vsel %vm1149_vm10, %v3007_v43, 0.0  ;;  %v3021_v63 = vmul.f32 %v14357_v36, %v3006_v39  ;;  %v11094_v49 = vsel %vm2129_vm15, %v4198_v0, %v14404_v37  ;;  %v11098_v45 = vmul.f32 %v14357_v36, %v2982_v16  ;;  %v14406_v16 = vld [vmem:[#allocation99_spill] sm:$0xff]  ;;  %v14417_v39 = vld [vmem:[#allocation117_spill] sm:$0xff] }
 0x5d5   : > { %14402 = vst [vmem:[#allocation135_spill] sm:$0xff] %v11085_v10  ;;  %v3020_v41 = vmul.f32 %v7351_v6, %v3012_v55  ;;  %v3043_v62 = vrot.slane %v10091_v26, 6  ;;  %v4678_v21 = vmul.f32 %v4662_v59, %v11085_v10  ;;  %v13707_v6 = vrot.slane %v11088_v34, 6 }
 0x5d6   : > { %v11104_v32 = vadd.f32 %v3021_v63, %v14396_v30  ;;  %v14405_v37 = vrot.slane %v10088_v23, 6  ;;  %v3099_v1 = vadd.f32 %v10175_v42, %v14406_v16  ;;  %v14408_v40 = vrot.slane %v14407_v46, 7 }
 0x5d7   : > { %v3028_v51 = vadd.f32 %v3020_v41, %v10823_v28  ;;  %v14409_v59 = vrot.slane %v10493_v57, 7  ;;  %v4686_v28 = vadd.f32 %v4678_v21, %v4654_v22  ;;  %v3055_v41 = vsel %vm2129_vm15, %v3043_v62, %v13707_v6  ;;  %v14414_v6 = vld [vmem:[#allocation92_spill] sm:$0xff] }
 0x5d8   : > { %v3056_v0 = vsel %vm2129_vm15, %v14405_v37, %v3043_v62  ;;  %v13708_v30 = vrot.slane %v11104_v32, 6  ;;  %v3060_v43 = vsel %vm2115_vm4, %v3055_v41, 1.0  ;;  %v3164_v55 = vrot.slane %v3099_v1, 4 }
 0x5d9   : > { %v5177_v63 = vsel %vm1163_vm7, %v14409_v59, %v14408_v40  ;;  %v3068_v23 = vrot.slane %v3028_v51, 6  ;;  %v3107_v42 = vmul.f32 %v3056_v0, %v10091_v26  ;;  %v14410_v21 = vrot.slane %v14406_v16, 6  ;;  %v14411_v40 = vld [vmem:[#allocation109_spill] sm:$0xff] }
 0x5da   : > { %v5228_v57 = vmul.f32 %v14407_v46, %v5177_v63  ;;  %v11138_v37 = vmul.f32 %v3060_v43, %v11088_v34  ;;  %v14412_v63 = vrot.slane %v10130_v24, 4  ;;  %v14413_v52 = vrot.slane %v10133_v53, 4 }
 0x5db   : > { %v3078_v22 = vsel %vm2129_vm15, %v3068_v23, %v13708_v30  ;;  %v3079_v62 = vsel %vm2129_vm15, %v14410_v21, %v3068_v23  ;;  %v3123_v46 = vrot.slane %v3107_v42, 4  ;;  %v14416_v30 = vrot.slane %v10521_v5, 6 }
 0x5dc   : > { %v3084_v26 = vsel %vm2115_vm4, %v3079_v62, 0.0  ;;  %v11144_v0 = vmul.f32 %v3078_v22, %v11098_v45  ;;  %v3177_v16 = vsel %vm3130_vm5, %v14412_v63, %v3164_v55  ;;  %v13709_v23 = vrot.slane %v11138_v37, 4 }
 0x5dd   : > { %v3092_v41 = vmul.f32 %v3084_v26, %v11088_v34  ;;  %v3188_v43 = vmul.f32 %v3177_v16, %v3107_v42  ;;  %v5236_v21 = vrot.slane %v5228_v57, 6  ;;  %v3137_v62 = vsel %vm3130_vm5, %v14413_v52, %v3123_v46 }
 0x5de   : > { %v14415_v22 = vrot.slane %v14414_v6, 6  ;;  %v14418_v63 = vrot.slane %v14417_v39, 7  ;;  %v14419_v26 = vrot.slane %v10840_v2, 7  ;;  %v3495_v53 = vsel %vm2113_vm6, %v10954_v15, 0.0 }
 0x5df   : > { %v11171_v59 = vadd.f32 %v3092_v41, %v3028_v51  ;;  %v3136_v5 = vsel %vm3130_vm5, %v3123_v46, %v13709_v23  ;;  %v3196_v52 = vadd.f32 %v3188_v43, %v3099_v1  ;;  %v14420_v2 = vrot.slane %v14411_v40, 6  ;;  %v14422_v1 = vld [vmem:[#allocation170_spill] sm:$0xff]  ;;  %v3267_v43 = vpop.permute.xlu1 %3266 }
 0x5e0   : > { %v5273_v24 = vsel %vm2129_vm15, %v14416_v30, %v14415_v22  ;;  %v3398_v16 = vsel %vm1163_vm7, %v14419_v26, %v14418_v63  ;;  %v3204_v30 = vmul.f32 %v3137_v62, %v3107_v42  ;;  %v3157_v22 = vsel %vm3116_vm12, %v3136_v5, 1.0  ;;  %v4705_v5 = vpop.permute.xlu0 %4704 }
 0x5e1   : > { %v5248_v63 = vsel %vm2129_vm15, %v5236_v21, %v14420_v2  ;;  %v14421_v26 = vrot.slane %v10556_v35, 6  ;;  %v5284_v51 = vmul.f32 %v5273_v24, %v5228_v57  ;;  %v13711_v41 = vrot.slane %v11171_v59, 4 }
 0x5e2   : > { %v3205_v46 = vmul.f32 %v3157_v22, %v11138_v37  ;;  %v3244_v42 = vmul.f32 %v3204_v30, %v14422_v1  ;;  %v5253_v62 = vsel %vm2115_vm4, %v5248_v63, 1.0  ;;  %v11202_v24 = vmul.f32 %v4705_v5, %v4686_v28 }
 0x5e3   : > { %v5249_v15 = vsel %vm2129_vm15, %v14421_v26, %v5236_v21  ;;  %v11193_v23 = vadd.f32 %v5284_v51, %v14414_v6  ;;  %v11198_v35 = vmul.f32 %v5253_v62, %v14411_v40  ;;  %v3399_v21 = vsel %vm1147_vm8, %v3398_v16, 1.0 }
 0x5e4   : > { %v11195_v2 = vmul.f32 %v5249_v15, %v5228_v57  ;;  %14424 = vst [vmem:[#allocation148_spill] sm:$0xff] %v11202_v24  ;;  %v3176_v30 = vsel %vm3130_vm5, %v3164_v55, %v13711_v41  ;;  %v3252_v22 = vadd.f32 %v3244_v42, %v3196_v52  ;;  %v3447_v63 = vmul.f32 %v14417_v39, %v3399_v21  ;;  %v14425_v55 = vld [vmem:[#allocation114_spill] sm:$0xff] }
 0x5e5   : > { %14423 = vst [vmem:[#allocation97_spill] sm:$0xff] %v11198_v35  ;;  %v3181_v6 = vsel %vm3116_vm12, %v3176_v30, 0.0  ;;  %v13710_v26 = vrot.slane %v11198_v35, 4  ;;  %v13713_v15 = vrot.slane %v11193_v23, 4  ;;  %v3245_v16 = vmul.f32 0.0, %v3205_v46  ;;  %v14428_v46 = vld [vmem:[#allocation72_spill] sm:$0xff] }
 0x5e6   : > { %v13712_v57 = vrot.slane %v11195_v2, 4  ;;  %v3189_v28 = vmul.f32 %v3181_v6, %v11138_v37  ;;  %v3455_v51 = vrot.slane %v3447_v63, 6  ;;  %v3503_v1 = vmul.f32 %v3495_v53, %v3447_v63 }
 0x5e7   : > { %v3300_v62 = vmul.f32 %v3267_v43, %v3252_v22  ;;  %v14426_v52 = vrot.slane %v14425_v55, 4  ;;  %v14427_v5 = vrot.slane %v10186_v38, 6  ;;  %v14429_v21 = vrot.slane %v14428_v46, 6  ;;  %v11246_v46 = vpop.permute.xlu1 %3984 }
 0x5e8   : > { %v5320_v39 = vsel %vm3130_vm5, %v13712_v57, %v13710_v26  ;;  %v11234_v43 = vadd.f32 %v3189_v28, %v11171_v59  ;;  %v14431_v6 = vrot.slane %v10703_v17, 4  ;;  %v14432_v26 = vld [vmem:[#allocation173_spill] sm:$0xff]  ;;  %v3272_v57 = vpop.permute.xlu0 %3271 }
 0x5e9   : > { %v5344_v42 = vsel %vm3130_vm5, %v13713_v15, %v14426_v52  ;;  %v3825_v53 = vsel %vm2129_vm15, %v14429_v21, %v14427_v5  ;;  %v5325_v30 = vsel %vm3116_vm12, %v5320_v39, 1.0  ;;  %v14433_v52 = vrot.slane %v14432_v26, 4 }
 0x5ea   : > { %14430 = vst [vmem:[#allocation80_spill] sm:$0xff] %v11234_v43  ;;  %v5349_v22 = vsel %vm3116_vm12, %v5344_v42, 0.0  ;;  %v5373_v28 = vmul.f32 %v5325_v30, %v11198_v35  ;;  %v14434_v21 = vrot.slane %v10460_v56, 6  ;;  %v14435_v42 = vrot.slane %v10901_v11, 6 }
 0x5eb   : > { %v3921_v41 = vsel %vm3130_vm5, %v14433_v52, %v14431_v6  ;;  %v5357_v5 = vmul.f32 %v5349_v22, %v11198_v35  ;;  %v3253_v15 = vadd.f32 %v3245_v16, %v11234_v43  ;;  %v3511_v52 = vadd.f32 %v3503_v1, %v14290_v9 }
 0x5ec   : > { %v3469_v39 = vsel %vm2129_vm15, %v3455_v51, %v14434_v21  ;;  %v3470_v26 = vsel %vm2129_vm15, %v14435_v42, %v3455_v51  ;;  %v5389_v58 = vmul.f32 0.0, %v5373_v28  ;;  %v11271_v10 = vmul.f32 %v3825_v53, %v10186_v38  ;;  %v14439_v42 = vld [vmem:[#allocation56_spill] sm:$0xff]  ;;  %v11296_v53 = vpop.permute.xlu1 %4696  ;;  %v14445_v28 = vld [vmem:[#allocation55_spill] sm:$0xff] }
 0x5ed   : > { %v3471_v6 = vsel %vm2113_vm6, %v3470_v26, 1.0  ;;  %v11263_v22 = vmul.f32 %v3469_v39, %v10460_v56  ;;  %v11266_v30 = vadd.f32 %v5357_v5, %v14425_v55  ;;  %v3301_v51 = vmul.f32 %v3272_v57, %v3253_v15  ;;  %v14440_v26 = vld [vmem:[#allocation87_spill] sm:$0xff]  ;;  %v14492_v55 = vld [vmem:[#allocation178_spill] sm:$0xff] }
 0x5ee   : > { %v11268_v21 = vmul.f32 %v3471_v6, %v3447_v63  ;;  %14438 = vst [vmem:[#allocation76_spill] sm:$0xff] %v11271_v10  ;;  %v11274_v16 = vadd.f32 %v3300_v62, %v14439_v42  ;;  %v3551_v24 = vrot.slane %v3511_v52, 4  ;;  %v14441_v35 = vrot.slane %v14440_v26, 7  ;;  %v5413_v6 = vpop.permute.xlu0 %5412 }
 0x5ef   : > { %14436 = vst [vmem:[#allocation93_spill] sm:$0xff] %v11263_v22  ;;  %14437 = vst [vmem:[#allocation71_spill] sm:$0xff] %v11266_v30  ;;  %v14442_v9 = vrot.slane %v10722_v12, 7  ;;  %v5397_v1 = vadd.f32 %v5389_v58, %v11266_v30  ;;  %v13718_v5 = vrot.slane %v11263_v22, 4  ;;  %v13720_v38 = vrot.slane %v11271_v10, 4  ;;  %v14463_v30 = vld [vmem:[#allocation82_spill] sm:$0xff] }
 0x5f0   : > { %v13719_v63 = vrot.slane %v11268_v21, 4  ;;  %v14443_v57 = vrot.slane %v10517_v20, 4  ;;  %v14444_v62 = vrot.slane %v10961_v54, 4  ;;  %v11299_v39 = vadd.f32 %v3301_v51, %v14445_v28 }
 0x5f1   : > { %v5533_v56 = vsel %vm1163_vm7, %v14442_v9, %v14441_v35  ;;  %v3932_v35 = vmul.f32 %v3921_v41, %v11271_v10  ;;  %v11310_v9 = vmul.f32 %v5413_v6, %v5397_v1  ;;  %v14450_v6 = vld [vmem:[#allocation113_spill] sm:$0xff]  ;;  %v14533_v43 = vrot.slane %v14357_v36, 7 }
 0x5f2   : > { %v3565_v15 = vsel %vm3130_vm5, %v3551_v24, %v14443_v57  ;;  %v3566_v12 = vsel %vm3130_vm5, %v14444_v62, %v3551_v24  ;;  %v5584_v58 = vmul.f32 %v14440_v26, %v5533_v56  ;;  %14446 = vst [vmem:[#allocation99_spill] sm:$0xff] %v11299_v39  ;;  %v3541_v42 = vsel %vm3130_vm5, %v13719_v63, %v13718_v5  ;;  %v14448_v56 = vld [vmem:[#allocation171_spill] sm:$0xff]  ;;  %v14454_v39 = vld [vmem:[#allocation128_spill] sm:$0xff] }
 0x5f3   : > { %v3567_v24 = vsel %vm3114_vm2, %v3566_v12, 0.0  ;;  %v3576_v41 = vmul.f32 %v3565_v15, %v11263_v22  ;;  %14447 = vst [vmem:[#allocation85_spill] sm:$0xff] %v11310_v9  ;;  %v3592_v51 = vmul.f32 %v3541_v42, %v11263_v22  ;;  %v14449_v57 = vrot.slane %v14448_v56, 4  ;;  %v14451_v63 = vld [vmem:[#allocation95_spill] sm:$0xff] }
 0x5f4   : > { %v3575_v26 = vmul.f32 %v3567_v24, %v11268_v21  ;;  %v13723_v12 = vrot.slane %v10770_v8, 6  ;;  %v5592_v15 = vrot.slane %v5584_v58, 6  ;;  %v14452_v42 = vrot.slane %v14451_v63, 6 }
 0x5f5   : > { %v3897_v62 = vsel %vm3130_vm5, %v14449_v57, %v13720_v38  ;;  %v3584_v28 = vadd.f32 %v3576_v41, %v10517_v20  ;;  %v14453_v9 = vrot.slane %v10738_v60, 6  ;;  %v4095_v57 = vrot.slane %v14454_v39, 7  ;;  %v14455_v38 = vld [vmem:[#allocation54_spill] sm:$0xff] }
 0x5f6   : > { %v3948_v5 = vmul.f32 %v3897_v62, %v11271_v10  ;;  %v11323_v1 = vadd.f32 %v3575_v26, %v3511_v52  ;;  %v5605_v41 = vsel %vm2129_vm15, %v13723_v12, %v5592_v15  ;;  %v14456_v26 = vld [vmem:[#allocation83_spill] sm:$0xff]  ;;  %v14457_v10 = vrot.slane %v14450_v6, 6 }
 0x5f7   : > { %v5629_v56 = vsel %vm2129_vm15, %v14453_v9, %v14452_v42  ;;  %v13728_v62 = vrot.slane %v14456_v26, 7  ;;  %v11344_v9 = vmul.f32 %v5605_v41, %v5584_v58  ;;  %v14458_v42 = vrot.slane %v10916_v50, 7  ;;  %v14460_v41 = vld [vmem:[#allocation34_spill] sm:$0xff] }
 0x5f8   : > { %v3964_v20 = vmul.f32 %v3948_v5, %v14455_v38  ;;  %v5640_v52 = vmul.f32 %v5629_v56, %v5584_v58  ;;  %v3608_v24 = vmul.f32 %v3592_v51, %v11323_v1  ;;  %v5604_v22 = vsel %vm2129_vm15, %v5592_v15, %v14457_v10  ;;  %v11350_v38 = vpop.permute.xlu1 %5052 }
 0x5f9   : > { %v4110_v5 = vsel %vm1163_vm7, %v14458_v42, %v4095_v57  ;;  %v3940_v56 = vadd.f32 %v3932_v35, %v10703_v17  ;;  %v5609_v12 = vsel %vm2115_vm4, %v5604_v22, 1.0  ;;  %v4109_v10 = vsel %vm1163_vm7, %v4095_v57, %v13728_v62 }
 0x5fa   : > { %v11356_v51 = vadd.f32 %v5640_v52, %v14451_v63  ;;  %v3616_v58 = vadd.f32 %v3608_v24, %v3584_v28  ;;  %v11363_v50 = vmul.f32 %v5609_v12, %v14450_v6  ;;  %v13727_v15 = vrot.slane %v11344_v9, 4  ;;  %v14461_v63 = vld [vmem:[#allocation125_spill] sm:$0xff] }
 0x5fb   : > { %v4111_v17 = vsel %vm1147_vm8, %v4110_v5, 1.0  ;;  %v3972_v35 = vadd.f32 %v3964_v20, %v3940_v56  ;;  %v11371_v52 = vadd.f32 %v14461_v63, %v14460_v41  ;;  %v11377_v12 = vmul.f32 %v14456_v26, %v4109_v10  ;;  %v14465_v20 = vld [vmem:[#allocation118_spill] sm:$0xff] }
 0x5fc   : > { %14459 = vst [vmem:[#allocation109_spill] sm:$0xff] %v11363_v50  ;;  %v13726_v22 = vrot.slane %v11356_v51, 4  ;;  %v4159_v42 = vmul.f32 %v14454_v39, %v4111_v17  ;;  %v3656_v57 = vmul.f32 %v14463_v30, %v3616_v58  ;;  %v13725_v28 = vrot.slane %v11363_v50, 4  ;;  %v11399_v63 = vpop.permute.xlu1 %3624 }
 0x5fd   : > { %14462 = vst [vmem:[#allocation92_spill] sm:$0xff] %v11371_v52  ;;  %14464 = vst [vmem:[#allocation117_spill] sm:$0xff] %v11377_v12  ;;  %v4207_v24 = vsel %vm2113_vm6, %v11094_v49, 0.0  ;;  %v14466_v5 = vrot.slane %v14465_v20, 4  ;;  %v13730_v39 = vrot.slane %v11371_v52, 6  ;;  %v4012_v58 = vmul.f32 %v11246_v46, %v3972_v35 }
 0x5fe   : > { %v4167_v41 = vrot.slane %v4159_v42, 6  ;;  %v4215_v30 = vmul.f32 %v4207_v24, %v4159_v42  ;;  %v5676_v49 = vsel %vm3130_vm5, %v13727_v15, %v13725_v28  ;;  %v13731_v17 = vrot.slane %v11377_v12, 6 }
 0x5ff   : > { %v5700_v56 = vsel %vm3130_vm5, %v13726_v22, %v14466_v5  ;;  %v5681_v5 = vsel %vm3116_vm12, %v5676_v49, 1.0  ;;  %v14467_v46 = vrot.slane %v11022_v29, 6  ;;  %v14468_v28 = vrot.slane %v14403_v14, 6 }
 0x600   : > { %v5705_v10 = vsel %vm3116_vm12, %v5700_v56, 0.0  ;;  %v3664_v22 = vadd.f32 %v3656_v57, %v11274_v16  ;;  %v5729_v15 = vmul.f32 %v5681_v5, %v11363_v50  ;;  %v4181_v49 = vsel %vm2129_vm15, %v4167_v41, %v13731_v17  ;;  %v14475_v17 = vld [vmem:[#allocation177_spill] sm:$0xff] }
 0x601   : > { %v5713_v24 = vmul.f32 %v5705_v10, %v11363_v50  ;;  %v4182_v35 = vsel %vm2129_vm15, %v14467_v46, %v4167_v41  ;;  %v4205_v56 = vsel %vm2129_vm15, %v14468_v28, %v13730_v39  ;;  %v4223_v6 = vadd.f32 %v4215_v30, %v14403_v14  ;;  %v14472_v39 = vld [vmem:[#allocation174_spill] sm:$0xff] }
 0x602   : > { %v4183_v10 = vsel %vm2113_vm6, %v4182_v35, 1.0  ;;  %v4216_v62 = vmul.f32 %v4205_v56, %v11377_v12  ;;  %v5745_v16 = vmul.f32 0.0, %v5729_v15  ;;  %v11430_v57 = vmul.f32 %v4181_v49, %v11377_v12  ;;  %v14507_v12 = vld [vmem:[#allocation156_spill] sm:$0xff] }
 0x603   : > { %v11423_v46 = vadd.f32 %v5713_v24, %v14465_v20  ;;  %v11427_v28 = vmul.f32 %v4183_v10, %v4159_v42  ;;  %v14471_v5 = vrot.slane %v10299_v61, 6  ;;  %v14473_v41 = vrot.slane %v14472_v39, 6 }
 0x604   : > { %14470 = vst [vmem:[#allocation72_spill] sm:$0xff] %v11430_v57  ;;  %v14474_v24 = vrot.slane %v10781_v44, 4  ;;  %v14476_v50 = vrot.slane %v14475_v17, 4  ;;  %v11445_v15 = vadd.f32 %v4216_v62, %v11371_v52  ;;  %v4263_v30 = vrot.slane %v4223_v6, 4  ;;  %v11459_v62 = vpop.permute.xlu1 %4336  ;;  %v14494_v52 = vld [vmem:[#allocation150_spill] sm:$0xff] }
 0x605   : > { %14469 = vst [vmem:[#allocation170_spill] sm:$0xff] %v11423_v46  ;;  %v4537_v35 = vsel %vm2129_vm15, %v14473_v41, %v14471_v5  ;;  %v4020_v39 = vadd.f32 %v4012_v58, %v3664_v22  ;;  %v5753_v49 = vadd.f32 %v5745_v16, %v11423_v46  ;;  %v14479_v5 = vld [vmem:[#allocation88_spill] sm:$0xff]  ;;  %v14481_v41 = vld [vmem:[#allocation157_spill] sm:$0xff] }
 0x606   : > { %v4633_v14 = vsel %vm3130_vm5, %v14476_v50, %v14474_v24  ;;  %14477 = vst [vmem:[#allocation173_spill] sm:$0xff] %v11445_v15  ;;  %v11449_v56 = vmul.f32 %v4537_v35, %v10299_v61  ;;  %v14480_v17 = vrot.slane %v14479_v5, 7  ;;  %v14482_v20 = vrot.slane %v14481_v41, 7  ;;  %v5769_v24 = vpop.permute.xlu0 %5768  ;;  %v7126_v35 = vld [vmem:[%s7615_s24 + $0x18] sm:$0xff]   ;;  %v14488_v46 = vld [vmem:[#allocation32_spill] sm:$0xff] }
 0x607   : > { %v14483_v61 = vrot.slane %v11081_v47, 4  ;;  %v11469_v10 = vmul.f32 %v5769_v24, %v5753_v49  ;;  %v14485_v41 = vrot.slane %v11430_v57, 4  ;;  %v14487_v47 = vld [vmem:[#allocation123_spill] sm:$0xff]  ;;  %v14490_v58 = vrot.slane %v11445_v15, 4  ;;  %6901 = vmatprep.subr.bf16.mxu0 %v7126_v35 }
 0x608   : > { %14478 = vst [vmem:[#allocation56_spill] sm:$0xff] %v11449_v56  ;;  %v4817_v50 = vsel %vm1163_vm7, %v14482_v20, %v14480_v17  ;;  %v4644_v16 = vmul.f32 %v4633_v14, %v11449_v56  ;;  %v14486_v20 = vrot.slane %v11427_v28, 4  ;;  %6902 = vmatpush3.bf16.msra.mxu0 %v7126_v35 }
 0x609   : > { %v4278_v22 = vsel %vm3130_vm5, %v14483_v61, %v4263_v30  ;;  %14484 = vst [vmem:[#allocation87_spill] sm:$0xff] %v11469_v10  ;;  %v11481_v61 = vadd.f32 %v14488_v46, %v14487_v47  ;;  %v4277_v14 = vsel %vm3130_vm5, %v4263_v30, %v14490_v58  ;;  %v14491_v10 = vrot.slane %v11449_v56, 4  ;;  %v14495_v30 = vld [vmem:[#allocation98_spill] sm:$0xff] }
 0x60a   : > { %v4253_v17 = vsel %vm3130_vm5, %v14486_v20, %v14485_v41  ;;  %v4279_v42 = vsel %vm3114_vm2, %v4278_v22, 0.0  ;;  %v14493_v41 = vrot.slane %v14492_v55, 4  ;;  %v4288_v47 = vmul.f32 %v4277_v14, %v11430_v57 }
 0x60b   : > { %14489 = vst [vmem:[#allocation55_spill] sm:$0xff] %v11481_v61  ;;  %v4287_v49 = vmul.f32 %v4279_v42, %v11427_v28  ;;  %v4304_v24 = vmul.f32 %v4253_v17, %v11430_v57  ;;  %v4652_v46 = vadd.f32 %v4644_v16, %v10781_v44  ;;  %v11500_v58 = vmul.f32 %v14495_v30, %v14494_v52  ;;  %v14497_v17 = vld [vmem:[#allocation9_spill] sm:$0xff]  ;;  %v14500_v16 = vld [vmem:[#allocation74_spill] sm:$0xff]  ;;  %v14501_v52 = vld [vmem:[#allocation164_spill] sm:$0xff] }
 0x60c   : > { %v4609_v22 = vsel %vm3130_vm5, %v14493_v41, %v14491_v10  ;;  %vm3118_vm8 = vcmp.ge.s32.totalorder %v14497_v17, 4  ;;  %v11506_v55 = vmul.f32 %v14479_v5, %v4817_v50  ;;  %v14499_v10 = vld [vmem:[#allocation163_spill] sm:$0xff]  ;;  %v13745_v14 = vrot.slane %v11481_v61, 6  ;;  %v14502_v50 = vld [vmem:[#allocation162_spill] sm:$0xff] }
 0x60d   : > { %v4660_v20 = vmul.f32 %v4609_v22, %v11449_v56  ;;  %14496 = vst [vmem:[#allocation171_spill] sm:$0xff] %v11500_v58  ;;  %v11502_v42 = vadd.f32 %v4287_v49, %v4223_v6  ;;  %v4883_v41 = vrot.slane %v14499_v10, 6  ;;  %v4296_v44 = vadd.f32 %v4288_v47, %v11445_v15  ;;  %v11515_v6 = vpop.permute.xlu1 %5404  ;;  %v14504_v57 = vld [vmem:[#allocation66_spill] sm:$0xff] }
 0x60e   : > { %14498 = vst [vmem:[#allocation95_spill] sm:$0xff] %v11506_v55  ;;  %v4930_v35 = vmul.f32 %v14501_v52, %v11500_v58  ;;  %v14503_v30 = vrot.slane %v14502_v50, 6  ;;  %v14506_v15 = vrot.slane %v11500_v58, 6  ;;  %v14509_v50 = vrot.slane %v11506_v55, 6 }
 0x60f   : > { %v4676_v22 = vmul.f32 %v4660_v20, %v14500_v16  ;;  %v4320_v49 = vmul.f32 %v4304_v24, %v11502_v42  ;;  %v14505_v20 = vld [vmem:[#allocation65_spill] sm:$0xff] }
 0x610   : > { %v4913_v47 = vsel %vm2129_vm15, %v14503_v30, %v13745_v14  ;;  %v4744_v16 = vmul.f32 %v14505_v20, %v14504_v57  ;;  %v4890_v52 = vsel %vm2129_vm15, %v14506_v15, %v4883_v41  ;;  %v11533_v5 = vadd.f32 %v4930_v35, %v14507_v12  ;;  %v14513_v35 = vld [vmem:[#allocation29_spill] sm:$0xff] }
 0x611   : > { %v4684_v56 = vadd.f32 %v4676_v22, %v4652_v46  ;;  %v4932_v24 = vmul.f32 %v4913_v47, %v11506_v55  ;;  %v4328_v54 = vadd.f32 %v4320_v49, %v4296_v44  ;;  %v4889_v30 = vsel %vm2129_vm15, %v4883_v41, %v14509_v50  ;;  %v14514_v47 = vld [vmem:[#allocation30_spill] sm:$0xff] }
 0x612   : > { %14508 = vst [vmem:[#allocation128_spill] sm:$0xff] %v11533_v5  ;;  %v4899_v57 = vsel %vm2117_vm3, %v4890_v52, 1.0  ;;  %v4753_v46 = vmul.f32 1.442695, %v4744_v16  ;;  %v11549_v44 = vmul.f32 %v4889_v30, %v11506_v55  ;;  %v13747_v41 = vrot.slane %v11533_v5, 4  ;;  %v14516_v52 = vld [vmem:[#allocation31_spill] sm:$0xff] }
 0x613   : > { %v4724_v22 = vmul.f32 %v11296_v53, %v4684_v56  ;;  %v11543_v15 = vadd.f32 %v4932_v24, %v11481_v61  ;;  %v11546_v12 = vmul.f32 %v4899_v57, %v14499_v10  ;;  %v4368_v49 = vmul.f32 %v14513_v35, %v4328_v54  ;;  %v11565_v54 = vpop.permute.xlu1 %5760  ;;  %v7127_v30 = vld [vmem:[%s7615_s24 + $0x10] sm:$0xff]   ;;  %v7128_v57 = vld [vmem:[%s7615_s24 + $0x8] sm:$0xff]   ;;  %v14519_v35 = vld [vmem:[#allocation84_spill] sm:$0xff] }
 0x614   : > { %14512 = vst [vmem:[#allocation34_spill] sm:$0xff] %v11549_v44  ;;  %7352 = vpow2.f32 %v4753_v46  ;;  %v14515_v20 = vrot.slane %v14514_v47, 7  ;;  %v14517_v16 = vrot.slane %v14516_v52, 7  ;;  %14518 = vst [vmem:[#allocation125_spill] sm:$0xff] %v11565_v54  ;;  %v14520_v14 = vrot.slane %v14519_v35, 4  ;;  %v14524_v50 = vld [vmem:[#allocation186_spill] sm:$0xff]  ;;  %6903 = vmatprep.subr.bf16.mxu0 %v7127_v30 }
 0x615   : > { %14510 = vst [vmem:[#allocation54_spill] sm:$0xff] %v11543_v15  ;;  %14511 = vst [vmem:[#allocation83_spill] sm:$0xff] %v11546_v12  ;;  %v4376_v46 = vadd.f32 %v4368_v49, %v4020_v39  ;;  %v14521_v52 = vrot.slane %v11193_v23, 4  ;;  %v14525_v39 = vrot.slane %v11549_v44, 4  ;;  %v14526_v49 = vrot.slane %v11546_v12, 4  ;;  %6904 = vmatpush3.bf16.msra.mxu0 %v7127_v30 }
 0x616   : > { %v11559_v53 = vsel %vm1163_vm7, %v14517_v16, %v14515_v20  ;;  %v4986_v20 = vsel %vm3130_vm5, %v13747_v41, %v14520_v14  ;;  %v14522_v16 = vld [vmem:[#allocation91_spill] sm:$0xff]  ;;  %v14527_v14 = vrot.slane %v11543_v15, 4  ;;  %v14528_v41 = vrot.slane %v14519_v35, 4  ;;  %6905 = vmatprep.subr.bf16.mxu0 %v7128_v57 }
 0x617   : > { %v14523_v56 = vrot.slane %v14522_v16, 4  ;;  %v11583_v10 = vadd.f32 %v14524_v50, %v14522_v16  ;;  %v4961_v61 = vsel %vm3130_vm5, %v14526_v49, %v14525_v39  ;;  %v14529_v50 = vrot.slane %v11195_v2, 4 }
 0x618   : > { %v4985_v55 = vsel %vm3130_vm5, %v14528_v41, %v14527_v14  ;;  %v11605_v5 = vadd.f32 %v4724_v22, %v4376_v46  ;;  %v5020_v58 = vmul.f32 %v4961_v61, %v11549_v44  ;;  %v14531_v14 = vld [vmem:[#allocation106_spill] sm:$0xff]  ;;  %v3045_v22 = vrot.slane %v11098_v45, 6  ;;  %v7129_v46 = vld [vmem:[%s7615_s24] sm:$0xff]  }
 0x619   : > { %v5345_v24 = vsel %vm3130_vm5, %v14523_v56, %v14521_v52  ;;  %v4995_v56 = vsel %vm3118_vm8, %v4986_v20, 0.0  ;;  %v14530_v52 = vrot.slane %v10604_v48, 4  ;;  %v5004_v49 = vmul.f32 %v4985_v55, %v11549_v44  ;;  %6906 = vmatpush3.bf16.msra.mxu0 %v7128_v57 }
 0x61a   : > { %v5003_v39 = vmul.f32 %v4995_v56, %v11546_v12  ;;  %v5356_v41 = vmul.f32 %v5345_v24, %v11195_v2  ;;  %v14532_v54 = vrot.slane %v14531_v14, 7  ;;  %v14537_v56 = vrot.slane %v11104_v32, 6  ;;  %6907 = vmatprep.subr.bf16.mxu0 %v7129_v46 }
 0x61b   : > { %v5321_v16 = vsel %vm3130_vm5, %v14530_v52, %v14529_v50  ;;  %v5012_v61 = vadd.f32 %v5004_v49, %v11543_v15 }
 0x61c   : > { %v5372_v20 = vmul.f32 %v5321_v16, %v11195_v2  ;;  %v2981_v50 = vsel %vm1163_vm7, %v14533_v43, %v14532_v54  ;;  %v11621_v55 = vadd.f32 %v5003_v39, %v14519_v35  ;;  %v14535_v2 = vld [vmem:[#allocation111_spill] sm:$0xff]  ;;  %v5364_v43 = vadd.f32 %v5356_v41, %v11193_v23  ;;  %v11641_v39 = vpop.permute.xlu1 %3276 }
 0x61d   : > { %v2990_v24 = vsel %vm1151_vm9, %v2981_v50, 1.0  ;;  %v14536_v30 = vrot.slane %v14535_v2, 6  ;;  %v14538_v35 = vrot.slane %v11088_v34, 6  ;;  %v11648_v23 = vadd.f32 %v11144_v0, %v11104_v32  ;;  %6908 = vmatpush3.bf16.msra.mxu0 %v7129_v46 }
 0x61e   : > { %14534 = vst [vmem:[#allocation82_spill] sm:$0xff] %v11621_v55  ;;  %v5388_v54 = vmul.f32 %v5372_v20, %v11583_v10  ;;  %v11635_v52 = vmul.f32 %v14531_v14, %v2990_v24  ;;  %v5036_v49 = vmul.f32 %v5020_v58, %v11621_v55  ;;  %v5069_v20 = vpop.permute.xlu0 %5068  ;;  %v14540_v58 = vrot.slane %v10896_v18, 6 }
 0x61f   : > { %v3077_v36 = vsel %vm2129_vm15, %v14537_v56, %v14536_v30  ;;  %v3054_v16 = vsel %vm2129_vm15, %v14538_v35, %v3045_v22  ;;  %v14539_v30 = vrot.slane %v10901_v11, 6 }
 0x620   : > { %v3086_v50 = vsel %vm2117_vm3, %v3077_v36, 0.0  ;;  %v11651_v41 = vmul.f32 %v3054_v16, %v11098_v45  ;;  %v5396_v34 = vadd.f32 %v5388_v54, %v5364_v43  ;;  %v13755_v14 = vrot.slane %v11635_v52, 6  ;;  %v14541_v36 = vld [vmem:[#allocation86_spill] sm:$0xff]  ;;  %v14542_v16 = vld [vmem:[#allocation145_spill] sm:$0xff] }
 0x621   : > { %v3094_v24 = vmul.f32 %v3086_v50, %v11635_v52  ;;  %v3463_v56 = vsel %vm2129_vm15, %v14540_v58, %v14539_v30  ;;  %v5044_v32 = vadd.f32 %v5036_v49, %v5012_v61  ;;  %v13759_v45 = vrot.slane %v11648_v23, 4  ;;  %v14544_v30 = vld [vmem:[#allocation147_spill] sm:$0xff] }
 0x622   : > { %v11664_v57 = vmul.f32 %v3463_v56, %v10901_v11  ;;  %v11667_v43 = vmul.f32 %v14541_v36, %v5396_v34  ;;  %v3053_v54 = vsel %vm2129_vm15, %v3045_v22, %v13755_v14  ;;  %v13754_v61 = vrot.slane %v14542_v16, 6  ;;  %v11688_v22 = vpop.eup %7352 }
 0x623   : > { %v11674_v35 = vadd.f32 %v3094_v24, %v14535_v2  ;;  %v11677_v49 = vmul.f32 %v5069_v20, %v5044_v32  ;;  %v3062_v50 = vsel %vm2117_vm3, %v3053_v54, 1.0  ;;  %v14545_v34 = vrot.slane %v14544_v30, 4  ;;  %v14547_v24 = vld [vmem:[#allocation42_spill] sm:$0xff]  ;;  %v11702_v54 = vpop.permute.xlu1 %4348 }
 0x624   : > { %v13756_v11 = vrot.slane %v11664_v57, 4  ;;  %v14546_v58 = vrot.slane %v10891_v33, 4  ;;  %v11691_v2 = vmul.f32 %v3062_v50, %v11635_v52  ;;  %v14548_v32 = vrot.slane %v14547_v24, 6 }
 0x625   : > { %14543 = vst [vmem:[#allocation174_spill] sm:$0xff] %v11677_v49  ;;  %v13757_v20 = vrot.slane %v11674_v35, 4  ;;  %v13758_v46 = vrot.slane %v11688_v22, 7  ;;  %v4856_v50 = vmul.f32 %v11688_v22, %v11559_v53 }
 0x626   : > { %v3918_v56 = vsel %vm3130_vm5, %v14546_v58, %v14545_v34  ;;  %v3822_v36 = vsel %vm2129_vm15, %v14548_v32, %v13754_v61  ;;  %v14549_v34 = vrot.slane %v11268_v21, 4  ;;  %v13760_v32 = vrot.slane %v11691_v2, 4 }
 0x627   : > { %v3927_v33 = vsel %vm3118_vm8, %v3918_v56, 0.0  ;;  %v3831_v24 = vsel %vm2117_vm3, %v3822_v36, 1.0  ;;  %v3174_v56 = vsel %vm3130_vm5, %v13759_v45, %v13757_v20 }
 0x628   : > { %v3542_v58 = vsel %vm3130_vm5, %v13756_v11, %v14549_v34  ;;  %v11725_v61 = vmul.f32 %v3831_v24, %v14542_v16  ;;  %v14551_v34 = vld [vmem:[#allocation180_spill] sm:$0xff]  ;;  %v11734_v11 = vadd.f32 %v4856_v50, %v14514_v47  ;;  %v3183_v0 = vsel %vm3118_vm8, %v3174_v56, 0.0  ;;  %v11765_v50 = vpop.permute.xlu1 %5060 }
 0x629   : > { %v3543_v53 = vsel %vm3114_vm2, %v3542_v58, 1.0  ;;  %v14552_v14 = vrot.slane %v14551_v34, 7  ;;  %v14553_v24 = vrot.slane %v11651_v41, 4 }
 0x62a   : > { %14550 = vst [vmem:[#allocation177_spill] sm:$0xff] %v11725_v61  ;;  %v3591_v20 = vmul.f32 %v3543_v53, %v11268_v21  ;;  %v13762_v47 = vrot.slane %v11725_v61, 4  ;;  %v3282_v21 = vpop.permute.xlu0 %3281 }
 0x62b   : > { %v4821_v36 = vsel %vm1163_vm7, %v14552_v14, %v13758_v46  ;;  %v3134_v34 = vsel %vm3130_vm5, %v14553_v24, %v13760_v32  ;;  %v3191_v14 = vmul.f32 %v3183_v0, %v11691_v2  ;;  %v14555_v0 = vrot.slane %v10894_v4, 4 }
 0x62c   : > { %v11740_v58 = vmul.f32 %v11688_v22, %v4821_v36  ;;  %v3159_v56 = vsel %vm3118_vm8, %v3134_v34, 1.0  ;;  %v3607_v53 = vmul.f32 0.0, %v3591_v20  ;;  %v3935_v36 = vmul.f32 %v3927_v33, %v11725_v61  ;;  %v14557_v34 = vld [vmem:[#allocation43_spill] sm:$0xff] }
 0x62d   : > { %v11756_v45 = vadd.f32 %v3191_v14, %v11674_v35  ;;  %v3207_v24 = vmul.f32 %v3159_v56, %v11691_v2  ;;  %v3894_v32 = vsel %vm3130_vm5, %v14555_v0, %v13762_v47  ;;  %v14556_v20 = vrot.slane %v11734_v11, 6  ;;  %v14561_v0 = vld [vmem:[#allocation81_spill] sm:$0xff] }
 0x62e   : > { %v14558_v33 = vrot.slane %v14557_v34, 6  ;;  %v3615_v14 = vadd.f32 %v3607_v53, %v11323_v1  ;;  %v3903_v56 = vsel %vm3118_vm8, %v3894_v32, 1.0  ;;  %v11777_v44 = vadd.f32 %v3935_v36, %v14544_v30 }
 0x62f   : > { %14554 = vst [vmem:[#allocation88_spill] sm:$0xff] %v11756_v45  ;;  %v14560_v4 = vrot.slane %v11740_v58, 6  ;;  %v14562_v47 = vrot.slane %v14561_v0, 6  ;;  %v3247_v49 = vmul.f32 0.0, %v3207_v24  ;;  %v14563_v53 = vrot.slane %v11022_v29, 6  ;;  %v14565_v0 = vld [vmem:[#allocation100_spill] sm:$0xff] }
 0x630   : > { %v4917_v46 = vsel %vm2129_vm15, %v14558_v33, %v14556_v20  ;;  %14559 = vst [vmem:[#allocation157_spill] sm:$0xff] %v11777_v44  ;;  %v3951_v20 = vmul.f32 %v3903_v56, %v11725_v61  ;;  %v3655_v32 = vmul.f32 %v11399_v63, %v3615_v14  ;;  %v14564_v36 = vrot.slane %v11019_v7, 6  ;;  %v14567_v14 = vld [vmem:[#allocation126_spill] sm:$0xff]  ;;  %v14568_v7 = vld [vmem:[#allocation96_spill] sm:$0xff]  ;;  %v11818_v63 = vpop.permute.xlu1 %5416 }
 0x631   : > { %v4893_v15 = vsel %vm2129_vm15, %v14562_v47, %v14560_v4  ;;  %v4928_v34 = vmul.f32 %v4917_v46, %v11740_v58  ;;  %v4097_v55 = vrot.slane %v14565_v0, 7  ;;  %v3255_v46 = vadd.f32 %v3247_v49, %v11756_v45  ;;  %v3997_v4 = vpop.permute.xlu0 %3996 }
 0x632   : > { %v11788_v1 = vmul.f32 %v4893_v15, %v11740_v58  ;;  %v4175_v33 = vsel %vm2129_vm15, %v14564_v36, %v14563_v53  ;;  %v3967_v24 = vmul.f32 0.0, %v3951_v20  ;;  %v3663_v56 = vadd.f32 %v3655_v32, %v14567_v14  ;;  %v14572_v14 = vld [vmem:[#allocation119_spill] sm:$0xff] }
 0x633   : > { %v11799_v47 = vadd.f32 %v4928_v34, %v11734_v11  ;;  %v11803_v15 = vmul.f32 %v4175_v33, %v11022_v29  ;;  %v14569_v12 = vrot.slane %v14568_v7, 7  ;;  %v14570_v36 = vrot.slane %v14456_v26, 7  ;;  %v14574_v26 = vld [vmem:[#allocation179_spill] sm:$0xff] }
 0x634   : > { %v3303_v20 = vmul.f32 %v3282_v21, %v3255_v46  ;;  %v3975_v29 = vadd.f32 %v3967_v24, %v11777_v44  ;;  %v14571_v32 = vrot.slane %v11788_v1, 4  ;;  %v14573_v30 = vrot.slane %v14572_v14, 4  ;;  %v14576_v46 = vld [vmem:[#allocation122_spill] sm:$0xff]  ;;  %v14578_v44 = vld [vmem:[#allocation57_spill] sm:$0xff] }
 0x635   : > { %14566 = vst [vmem:[#allocation123_spill] sm:$0xff] %v11803_v15  ;;  %v4107_v53 = vsel %vm1163_vm7, %v4097_v55, %v14569_v12  ;;  %v4108_v34 = vsel %vm1163_vm7, %v14570_v36, %v4097_v55  ;;  %v13773_v49 = vrot.slane %v11799_v47, 4  ;;  %v4019_v61 = vadd.f32 %v14574_v26, %v3663_v56  ;;  %v14575_v36 = vld [vmem:[#allocation37_spill] sm:$0xff] }
 0x636   : > { %v4965_v12 = vsel %vm3130_vm5, %v14573_v30, %v14571_v32  ;;  %v4113_v55 = vsel %vm1149_vm10, %v4108_v34, 1.0  ;;  %v4145_v21 = vmul.f32 %v14565_v0, %v14575_v36  ;;  %v14577_v24 = vrot.slane %v14576_v46, 4  ;;  %v14583_v36 = vld [vmem:[#allocation73_spill] sm:$0xff] }
 0x637   : > { %v5016_v14 = vmul.f32 %v4965_v12, %v11788_v1  ;;  %v11839_v16 = vadd.f32 %v3303_v20, %v14578_v44  ;;  %v11841_v30 = vmul.f32 %v3997_v4, %v3975_v29  ;;  %v14581_v34 = vrot.slane %v11427_v28, 4  ;;  %v14584_v12 = vld [vmem:[#allocation181_spill] sm:$0xff]  ;;  %v14585_v29 = vld [vmem:[#allocation154_spill] sm:$0xff] }
 0x638   : > { %v4989_v33 = vsel %vm3130_vm5, %v14577_v24, %v13773_v49  ;;  %v14582_v32 = vrot.slane %v11803_v15, 4  ;;  %v11851_v46 = vadd.f32 %v4145_v21, %v14583_v36  ;;  %v11854_v24 = vmul.f32 %v14565_v0, %v4113_v55  ;;  %v14586_v0 = vld [vmem:[#allocation182_spill] sm:$0xff]  ;;  %v14587_v36 = vld [vmem:[#allocation160_spill] sm:$0xff] }
 0x639   : > { %14579 = vst [vmem:[#allocation32_spill] sm:$0xff] %v11839_v16  ;;  %14580 = vst [vmem:[#allocation178_spill] sm:$0xff] %v11841_v30  ;;  %v5000_v56 = vmul.f32 %v4989_v33, %v11788_v1  ;;  %v5032_v44 = vmul.f32 %v5016_v14, %v14584_v12  ;;  %v4162_v20 = vmul.f32 %v14568_v7, %v4107_v53  ;;  %v13777_v33 = vrot.slane %v14585_v29, 6  ;;  %v14588_v12 = vld [vmem:[#allocation70_spill] sm:$0xff]  ;;  %v11873_v53 = vpop.permute.xlu1 %5772 }
 0x63a   : > { %v4254_v26 = vsel %vm3130_vm5, %v14582_v32, %v14581_v34  ;;  %v13776_v21 = vrot.slane %v11851_v46, 6  ;;  %v14589_v30 = vrot.slane %v14588_v12, 4 }
 0x63b   : > { %v4255_v4 = vsel %vm3114_vm2, %v4254_v26, 1.0  ;;  %v5008_v49 = vadd.f32 %v5000_v56, %v11799_v47  ;;  %v4170_v32 = vrot.slane %v4162_v20, 6  ;;  %v14590_v26 = vrot.slane %v11016_v13, 4 }
 0x63c   : > { %v4303_v15 = vmul.f32 %v4255_v4, %v11427_v28  ;;  %v14591_v4 = vld [vmem:[#allocation69_spill] sm:$0xff] }
 0x63d   : > { %v4630_v7 = vsel %vm3130_vm5, %v14590_v26, %v14589_v30  ;;  %v5040_v56 = vadd.f32 %v5032_v44, %v5008_v49  ;;  %v14592_v34 = vrot.slane %v14591_v4, 6  ;;  %v4178_v13 = vsel %vm2129_vm15, %v4170_v32, %v13777_v33 }
 0x63e   : > { %v4319_v28 = vmul.f32 0.0, %v4303_v15  ;;  %v4639_v14 = vsel %vm3118_vm8, %v4630_v7, 0.0  ;;  %v14593_v30 = vrot.slane %v11854_v24, 6  ;;  %v14594_v44 = vrot.slane %v10604_v48, 4 }
 0x63f   : > { %v4203_v55 = vsel %vm2129_vm15, %v13776_v21, %v14592_v34  ;;  %v14595_v26 = vrot.slane %v14586_v0, 4  ;;  %v5080_v7 = vmul.f32 %v11350_v38, %v5040_v56  ;;  %v4187_v33 = vsel %vm2117_vm3, %v4178_v13, 1.0 }
 0x640   : > { %v4179_v15 = vsel %vm2129_vm15, %v14593_v30, %v4170_v32  ;;  %v4218_v49 = vmul.f32 %v4203_v55, %v4162_v20  ;;  %v4327_v21 = vadd.f32 %v4319_v28, %v11502_v42  ;;  %v11907_v32 = vmul.f32 %v4187_v33, %v14585_v29 }
 0x641   : > { %v5322_v34 = vsel %vm3130_vm5, %v14595_v26, %v14594_v44  ;;  %v11901_v16 = vmul.f32 %v4179_v15, %v4162_v20  ;;  %v14597_v30 = vrot.slane %v14587_v36, 6  ;;  %v14598_v38 = vrot.slane %v10964_v25, 6  ;;  %v11931_v26 = vpop.permute.xlu1 %3632 }
 0x642   : > { %v11904_v45 = vadd.f32 %v4218_v49, %v14591_v4  ;;  %14596 = vst [vmem:[#allocation150_spill] sm:$0xff] %v11907_v32  ;;  %v5323_v55 = vsel %vm3114_vm2, %v5322_v34, 1.0  ;;  %v5088_v56 = vadd.f32 %v5080_v7, %v11605_v5  ;;  %v4367_v20 = vmul.f32 %v11459_v62, %v4327_v21  ;;  %v14600_v49 = vld [vmem:[#allocation101_spill] sm:$0xff] }
 0x643   : > { %v4534_v42 = vsel %vm2129_vm15, %v14598_v38, %v14597_v30  ;;  %v13782_v28 = vrot.slane %v11901_v16, 4  ;;  %v5371_v4 = vmul.f32 %v5323_v55, %v10604_v48  ;;  %v13779_v33 = vrot.slane %v11907_v32, 4  ;;  %v14602_v55 = vld [vmem:[#allocation158_spill] sm:$0xff]  ;;  %v14604_v38 = vld [vmem:[#allocation33_spill] sm:$0xff] }
 0x644   : > { %v13780_v13 = vrot.slane %v11904_v45, 4  ;;  %v4543_v15 = vsel %vm2117_vm3, %v4534_v42, 1.0  ;;  %v14599_v25 = vrot.slane %v10770_v8, 6  ;;  %v14601_v44 = vrot.slane %v14600_v49, 6 }
 0x645   : > { %v11934_v62 = vadd.f32 %v11667_v43, %v5088_v56  ;;  %v4375_v48 = vadd.f32 %v4367_v20, %v4019_v61  ;;  %v5387_v21 = vmul.f32 0.0, %v5371_v4  ;;  %v11937_v34 = vmul.f32 %v4543_v15, %v14587_v36  ;;  %v14605_v56 = vld [vmem:[#allocation75_spill] sm:$0xff] }
 0x646   : > { %v5606_v5 = vsel %vm2129_vm15, %v14601_v44, %v14599_v25  ;;  %v4250_v7 = vsel %vm3130_vm5, %v13782_v28, %v13779_v33  ;;  %v14603_v30 = vrot.slane %v14602_v55, 4  ;;  %v5631_v42 = vsel %vm2113_vm6, %v14604_v38, 0.0  ;;  %v4353_v33 = vpop.permute.xlu0 %4352  ;;  %v14606_v38 = vld [vmem:[#allocation67_spill] sm:$0xff] }
 0x647   : > { %v5607_v61 = vsel %vm2113_vm6, %v5606_v5, 1.0  ;;  %v4731_v20 = vadd.f32 %v14605_v56, %v4375_v48  ;;  %v4259_v4 = vsel %vm3118_vm8, %v4250_v7, 1.0  ;;  %v5395_v25 = vadd.f32 %v5387_v21, %v11583_v10 }
 0x648   : > { %v4274_v43 = vsel %vm3130_vm5, %v13780_v13, %v14603_v30  ;;  %v4307_v44 = vmul.f32 %v4259_v4, %v11907_v32  ;;  %v13781_v5 = vrot.slane %v11937_v34, 4  ;;  %v4647_v30 = vmul.f32 %v4639_v14, %v11937_v34 }
 0x649   : > { %v4283_v15 = vsel %vm3118_vm8, %v4274_v43, 0.0  ;;  %v5087_v13 = vadd.f32 %v14606_v38, %v4731_v20  ;;  %v5435_v48 = vmul.f32 %v11515_v6, %v5395_v25  ;;  %v5639_v7 = vmul.f32 %v5631_v42, %v10770_v8  ;;  %v11982_v20 = vpop.permute.xlu1 %3988 }
 0x64a   : > { %v4291_v49 = vmul.f32 %v4283_v15, %v11907_v32  ;;  %v5655_v56 = vmul.f32 %v5607_v61, %v10770_v8  ;;  %v4323_v10 = vmul.f32 0.0, %v4307_v44  ;;  %v14608_v21 = vrot.slane %v11003_v3, 4  ;;  %v14609_v3 = vld [vmem:[#allocation59_spill] sm:$0xff] }
 0x64b   : > { %v11980_v4 = vadd.f32 %v4647_v30, %v14588_v12  ;;  %v5443_v6 = vadd.f32 %v5435_v48, %v5087_v13  ;;  %v5647_v61 = vadd.f32 %v5639_v7, %v10738_v60  ;;  %v14610_v44 = vld [vmem:[#allocation107_spill] sm:$0xff]  ;;  %v14611_v30 = vrot.slane %v11344_v9, 4  ;;  %v14612_v48 = vld [vmem:[#allocation112_spill] sm:$0xff] }
 0x64c   : > { %v11971_v43 = vadd.f32 %v4291_v49, %v14602_v55  ;;  %v4606_v14 = vsel %vm3130_vm5, %v14608_v21, %v13781_v5  ;;  %v5663_v42 = vrot.slane %v5655_v56, 4  ;;  %v13785_v49 = vrot.slane %v14609_v3, 4 }
 0x64d   : > { %v4615_v8 = vsel %vm3118_vm8, %v4606_v14, 1.0  ;;  %v5238_v38 = vrot.slane %v14610_v44, 6  ;;  %v5687_v13 = vrot.slane %v5647_v61, 4  ;;  %v14613_v14 = vrot.slane %v11651_v41, 4 }
 0x64e   : > { %14607 = vst [vmem:[#allocation98_spill] sm:$0xff] %v11971_v43  ;;  %v4331_v15 = vadd.f32 %v4323_v10, %v11971_v43  ;;  %v4663_v25 = vmul.f32 %v4615_v8, %v11937_v34  ;;  %v5677_v21 = vsel %vm3130_vm5, %v5663_v42, %v14611_v30  ;;  %v14614_v60 = vrot.slane %v11138_v37, 4  ;;  %v4709_v43 = vpop.permute.xlu0 %4708 }
 0x64f   : > { %v5678_v28 = vsel %vm3130_vm5, %v13785_v49, %v5663_v42  ;;  %v5728_v30 = vmul.f32 %v5677_v21, %v11344_v9  ;;  %v14616_v32 = vrot.slane %v11356_v51, 4 }
 0x650   : > { %v3135_v7 = vsel %vm3130_vm5, %v14614_v60, %v14613_v14  ;;  %v12002_v10 = vmul.f32 %v4353_v33, %v4331_v15  ;;  %v4679_v8 = vmul.f32 0.0, %v4663_v25  ;;  %v5679_v5 = vsel %vm3114_vm2, %v5678_v28, 1.0  ;;  %v14617_v14 = vld [vmem:[#allocation102_spill] sm:$0xff]  ;;  %v14619_v25 = vld [vmem:[#allocation115_spill] sm:$0xff] }
 0x651   : > { %v5701_v37 = vsel %vm3130_vm5, %v5687_v13, %v14616_v32  ;;  %v14618_v33 = vrot.slane %v14617_v14, 4  ;;  %v14620_v60 = vrot.slane %v14619_v25, 6  ;;  %v5727_v3 = vmul.f32 %v5679_v5, %v5655_v56 }
 0x652   : > { %14615 = vst [vmem:[#allocation9_spill] sm:$0xff] %v12002_v10  ;;  %v4687_v21 = vadd.f32 %v4679_v8, %v11980_v4  ;;  %v5712_v49 = vmul.f32 %v5701_v37, %v11344_v9  ;;  %v12027_v10 = vpop.permute.xlu1 %4344  ;;  %v14621_v14 = vrot.slane %v14411_v40, 6  ;;  %v14624_v8 = vrot.slane %v14612_v48, 4 }
 0x653   : > { %v5702_v15 = vsel %vm3130_vm5, %v14618_v33, %v5687_v13  ;;  %v5246_v42 = vsel %vm2129_vm15, %v5238_v38, %v14620_v60  ;;  %v14622_v60 = vld [vmem:[#allocation120_spill] sm:$0xff] }
 0x654   : > { %v5703_v28 = vsel %vm3114_vm2, %v5702_v15, 0.0  ;;  %v5247_v13 = vsel %vm2129_vm15, %v14621_v14, %v5238_v38  ;;  %v5255_v33 = vsel %vm2117_vm3, %v5246_v42, 1.0  ;;  %v14623_v55 = vrot.slane %v14622_v60, 4 }
 0x655   : > { %v5711_v32 = vmul.f32 %v5703_v28, %v5655_v56  ;;  %v12041_v9 = vmul.f32 %v4709_v43, %v4687_v21  ;;  %v5720_v5 = vadd.f32 %v5712_v49, %v11356_v51  ;;  %v5743_v56 = vmul.f32 0.0, %v5727_v3 }
 0x656   : > { %v5342_v27 = vsel %vm3130_vm5, %v14624_v8, %v14623_v55  ;;  %v12045_v40 = vmul.f32 %v5247_v13, %v14610_v44  ;;  %v12048_v38 = vmul.f32 %v5255_v33, %v14619_v25  ;;  %v14627_v15 = vrot.slane %v11648_v23, 4  ;;  %v14631_v33 = vld [vmem:[#allocation137_spill] sm:$0xff] }
 0x657   : > { %14625 = vst [vmem:[#allocation163_spill] sm:$0xff] %v12041_v9  ;;  %v5719_v37 = vadd.f32 %v5711_v32, %v5647_v61  ;;  %v5351_v14 = vsel %vm3118_vm8, %v5342_v27, 0.0  ;;  %v14628_v42 = vrot.slane %v11171_v59, 4  ;;  %v3206_v3 = vmul.f32 %v3135_v7, %v11651_v41  ;;  %v14629_v61 = vld [vmem:[#allocation10_spill] sm:$0xff]  ;;  %v14630_v59 = vld [vmem:[#allocation80_spill] sm:$0xff]  ;;  %v14632_v27 = vld [vmem:[#allocation141_spill] sm:$0xff] }
 0x658   : > { %14626 = vst [vmem:[#allocation74_spill] sm:$0xff] %v12048_v38  ;;  %v13789_v51 = vrot.slane %v12045_v40, 4  ;;  %vm3120_vm9 = vcmp.ge.s32.totalorder %v14629_v61, 4  ;;  %v13788_v21 = vrot.slane %v12048_v38, 4  ;;  %v5359_v28 = vmul.f32 %v5351_v14, %v12048_v38 }
 0x659   : > { %v3175_v55 = vsel %vm3130_vm5, %v14628_v42, %v14627_v15  ;;  %v5744_v49 = vmul.f32 %v5728_v30, %v5719_v37  ;;  %v5751_v44 = vadd.f32 %v5743_v56, %v5719_v37  ;;  %v3246_v13 = vmul.f32 %v3206_v3, %v14630_v59  ;;  %v12068_v42 = vpop.permute.xlu1 %4700 }
 0x65a   : > { %v3190_v43 = vmul.f32 %v3175_v55, %v11651_v41  ;;  %v13790_v8 = vrot.slane %v14631_v33, 6  ;;  %v13791_v15 = vrot.slane %v14632_v27, 4  ;;  %v14633_v41 = vld [vmem:[#allocation125_spill] sm:$0xff]  ;;  %v5318_v30 = vsel %vm3130_vm5, %v13789_v51, %v13788_v21 }
 0x65b   : > { %v5752_v55 = vadd.f32 %v5744_v49, %v5720_v5  ;;  %v5791_v7 = vmul.f32 %v14633_v41, %v5751_v44  ;;  %v5327_v56 = vsel %vm3118_vm8, %v5318_v30, 1.0  ;;  %v14635_v14 = vrot.slane %v10896_v18, 6  ;;  %v14638_v49 = vld [vmem:[#allocation78_spill] sm:$0xff] }
 0x65c   : > { %v3198_v32 = vadd.f32 %v3190_v43, %v11648_v23  ;;  %v12078_v23 = vadd.f32 %v5359_v28, %v14622_v60  ;;  %v14636_v43 = vld [vmem:[#allocation94_spill] sm:$0xff]  ;;  %v14639_v44 = vrot.slane %v14638_v49, 4  ;;  %v14640_v28 = vld [vmem:[#allocation168_spill] sm:$0xff]  ;;  %v5375_v30 = vmul.f32 %v5327_v56, %v12048_v38 }
 0x65d   : > { %v3464_v5 = vsel %vm2129_vm15, %v13790_v8, %v14635_v14  ;;  %v14637_v3 = vrot.slane %v14636_v43, 4  ;;  %v5792_v41 = vmul.f32 %v14640_v28, %v5752_v55  ;;  %v5799_v21 = vadd.f32 %v5791_v7, %v5443_v6  ;;  %v14643_v6 = vld [vmem:[#allocation47_spill] sm:$0xff] }
 0x65e   : > { %14634 = vst [vmem:[#allocation164_spill] sm:$0xff] %v12078_v23  ;;  %v3254_v37 = vadd.f32 %v3246_v13, %v3198_v32  ;;  %v3477_v32 = vsel %vm2119_vm0, %v3464_v5, 1.0  ;;  %v14642_v14 = vmov %v14639_v44  ;;  %v5391_v56 = vmul.f32 0.0, %v5375_v30 }
 0x65f   : > { %v3559_v59 = vsel %vm3130_vm5, %v14639_v44, %v14637_v3  ;;  %v12100_v51 = vmul.f32 %v3477_v32, %v10896_v18  ;;  %v3560_v3 = vsel %vm3130_vm5, %v13791_v15, %v14642_v14  ;;  %v5863_v7 = vmul.f32 %v14643_v6, %v5799_v21  ;;  %v14644_v18 = vld [vmem:[#allocation58_spill] sm:$0xff]  ;;  %v12117_v14 = vpop.permute.xlu1 %5056  ;;  %v14645_v21 = vld [vmem:[#allocation49_spill] sm:$0xff] }
 0x660   : > { %v3302_v13 = vmul.f32 %v11641_v39, %v3254_v37  ;;  %v3582_v55 = vmul.f32 %v3559_v59, %v11664_v57  ;;  %v3573_v5 = vsel %vm3120_vm9, %v3560_v3, 0.0  ;;  %v5800_v39 = vadd.f32 %v5792_v41, %v11934_v62  ;;  %v5421_v37 = vpop.permute.xlu0 %5420  ;;  %v14647_v3 = vld [vmem:[#allocation117_spill] sm:$0xff] }
 0x661   : > { %14641 = vst [vmem:[#allocation162_spill] sm:$0xff] %v12100_v51  ;;  %v13792_v28 = vrot.slane %v12100_v51, 4  ;;  %v3581_v32 = vmul.f32 %v3573_v5, %v12100_v51  ;;  %v5399_v59 = vadd.f32 %v5391_v56, %v12078_v23  ;;  %v14646_v6 = vrot.slane %v11854_v24, 6 }
 0x662   : > { %v3310_v44 = vadd.f32 %v3302_v13, %v14644_v18  ;;  %v3590_v8 = vadd.f32 %v3582_v55, %v14636_v43  ;;  %v5864_v30 = vmul.f32 %v14645_v21, %v5800_v39  ;;  %v14648_v15 = vrot.slane %v14647_v3, 6  ;;  %v14650_v13 = vld [vmem:[#allocation92_spill] sm:$0xff]  ;;  %v14652_v55 = vld [vmem:[#allocation19_spill] sm:$0xff] }
 0x663   : > { %v14649_v41 = vrot.slane %v11851_v46, 6  ;;  %v14651_v18 = vrot.slane %v14650_v13, 6  ;;  %v14653_v56 = vrot.slane %v11664_v57, 4  ;;  %v12141_v21 = vadd.f32 %v3581_v32, %v14638_v49  ;;  %v14656_v13 = vld [vmem:[#allocation35_spill] sm:$0xff]  ;;  %v14657_v49 = vld [vmem:[#allocation161_spill] sm:$0xff] }
 0x664   : > { %v4180_v62 = vsel %vm2129_vm15, %v14648_v15, %v14646_v6  ;;  %v3666_v5 = vadd.f32 %v14652_v55, %v3310_v44  ;;  %v12145_v6 = vmul.f32 %v5421_v37, %v5399_v59  ;;  %v14658_v37 = vld [vmem:[#allocation134_spill] sm:$0xff]  ;;  %v14674_v51 = vrot.slane %v11734_v11, 6 }
 0x665   : > { %v4204_v43 = vsel %vm2129_vm15, %v14651_v18, %v14649_v41  ;;  %v3535_v39 = vsel %vm3130_vm5, %v13792_v28, %v14653_v56  ;;  %14654 = vst [vmem:[#allocation66_spill] sm:$0xff] %v12141_v21  ;;  %v4185_v15 = vsel %vm2115_vm4, %v4180_v62, 1.0  ;;  %v5871_v41 = vpack.c.bf16 %v5864_v30, %v5863_v7  ;;  %v14660_v7 = vld [vmem:[#allocation159_spill] sm:$0xff]  ;;  %v14666_v28 = vld [vmem:[#allocation89_spill] sm:$0xff] }
 0x666   : > { %14655 = vst [vmem:[#allocation65_spill] sm:$0xff] %v12145_v6  ;;  %v3598_v3 = vmul.f32 %v3535_v39, %v11664_v57  ;;  %v4209_v44 = vsel %vm2115_vm4, %v4204_v43, 0.0  ;;  %v12151_v18 = vadd.f32 %v14656_v13, %v3666_v5  ;;  %v12155_v56 = vmul.f32 %v4185_v15, %v11854_v24  ;;  %v14662_v43 = vld [vmem:[#allocation165_spill] sm:$0xff]  ;;  %v14663_v39 = vld [vmem:[#allocation104_spill] sm:$0xff]  ;;  %v3653_v13 = vpop.permute.xlu0 %3652  ;;  %v12183_v5 = vpop.permute.xlu1 %3286 }
 0x667   : > { %v4217_v55 = vmul.f32 %v4209_v44, %v11854_v24  ;;  %6909 = vmatprep.mubr.msk.bf16.mxu0 %vm1318_vm11, %v5871_v41  ;;  %v14659_v57 = vrot.slane %v14658_v37, 6  ;;  %v14661_v59 = vrot.slane %v14660_v7, 6  ;;  %v14664_v44 = vrot.slane %v14663_v39, 7 }
 0x668   : > { %v3614_v62 = vmul.f32 %v3598_v3, %v12141_v21  ;;  %v14665_v24 = vrot.slane %v11688_v22, 7  ;;  %v13796_v41 = vrot.slane %v12155_v56, 4  ;;  %v14667_v32 = vrot.slane %v14666_v28, 6 }
 0x669   : > { %v4556_v30 = vsel %vm2129_vm15, %v14661_v59, %v14659_v57  ;;  %v4225_v3 = vadd.f32 %v4217_v55, %v11851_v46  ;;  %v14668_v7 = vrot.slane %v14657_v49, 6 }
 0x66a   : > { %v4820_v15 = vsel %vm1163_vm7, %v14665_v24, %v14664_v44  ;;  %v4569_v59 = vsel %vm2119_vm0, %v4556_v30, 0.0  ;;  %v3622_v22 = vadd.f32 %v3614_v62, %v3590_v8  ;;  %v14669_v24 = vrot.slane %v11901_v16, 4 }
 0x66b   : > { %v4532_v57 = vsel %vm2129_vm15, %v14668_v7, %v14667_v32  ;;  %v4577_v46 = vmul.f32 %v4569_v59, %v14666_v28  ;;  %v4825_v55 = vsel %vm1149_vm10, %v4820_v15, 1.0  ;;  %v4265_v7 = vrot.slane %v4225_v3, 4  ;;  %v14672_v15 = vld [vmem:[#allocation155_spill] sm:$0xff] }
 0x66c   : > { %v4545_v44 = vsel %vm2119_vm0, %v4532_v57, 1.0  ;;  %v4251_v32 = vsel %vm3130_vm5, %v13796_v41, %v14669_v24  ;;  %v4873_v8 = vmul.f32 %v14663_v39, %v4825_v55  ;;  %v12200_v62 = vmul.f32 %v3653_v13, %v3622_v22  ;;  %v14683_v41 = vld [vmem:[#allocation176_spill] sm:$0xff] }
 0x66d   : > { %v12197_v30 = vmul.f32 %v4545_v44, %v14666_v28  ;;  %v4306_v57 = vmul.f32 %v4251_v32, %v11901_v16  ;;  %v4585_v59 = vadd.f32 %v4577_v46, %v14658_v37  ;;  %v14673_v21 = vrot.slane %v14672_v15, 6  ;;  %v14676_v44 = vld [vmem:[#allocation173_spill] sm:$0xff]  ;;  %v14678_v32 = vld [vmem:[#allocation175_spill] sm:$0xff] }
 0x66e   : > { %14671 = vst [vmem:[#allocation29_spill] sm:$0xff] %v12200_v62  ;;  %v14675_v24 = vrot.slane %v11904_v45, 4  ;;  %v14677_v39 = vrot.slane %v14676_v44, 4  ;;  %v4881_v37 = vrot.slane %v4873_v8, 6  ;;  %v14680_v44 = vld [vmem:[#allocation171_spill] sm:$0xff]  ;;  %v14684_v62 = vrot.slane %v14683_v41, 4 }
 0x66f   : > { %14670 = vst [vmem:[#allocation156_spill] sm:$0xff] %v12197_v30  ;;  %v4916_v6 = vsel %vm2129_vm15, %v14674_v51, %v14673_v21  ;;  %v13797_v22 = vrot.slane %v12197_v30, 4  ;;  %v4625_v55 = vrot.slane %v4585_v59, 4 }
 0x670   : > { %v4275_v28 = vsel %vm3130_vm5, %v4265_v7, %v14675_v24  ;;  %v4276_v13 = vsel %vm3130_vm5, %v14677_v39, %v4265_v7  ;;  %v4921_v51 = vsel %vm2115_vm4, %v4916_v6, 0.0  ;;  %v14679_v24 = vrot.slane %v14678_v32, 4  ;;  %v12239_v6 = vpop.permute.xlu1 %3644 }
 0x671   : > { %v4281_v46 = vsel %vm3116_vm12, %v4276_v13, 0.0  ;;  %v4290_v11 = vmul.f32 %v4275_v28, %v11901_v16  ;;  %v14681_v39 = vrot.slane %v14680_v44, 6  ;;  %v14682_v16 = vrot.slane %v11740_v58, 6 }
 0x672   : > { %v4289_v21 = vmul.f32 %v4281_v46, %v12155_v56  ;;  %v4603_v7 = vsel %vm3130_vm5, %v13797_v22, %v14679_v24  ;;  %v4627_v9 = vsel %vm3130_vm5, %v4625_v55, %v14684_v62  ;;  %v14685_v24 = vrot.slane %v14662_v43, 4 }
 0x673   : > { %v4891_v13 = vsel %vm2129_vm15, %v4881_v37, %v14681_v39  ;;  %v4892_v28 = vsel %vm2129_vm15, %v14682_v16, %v4881_v37  ;;  %v4298_v46 = vadd.f32 %v4290_v11, %v11904_v45  ;;  %v4666_v39 = vmul.f32 %v4603_v7, %v14678_v32 }
 0x674   : > { %v4628_v22 = vsel %vm3130_vm5, %v14685_v24, %v4625_v55  ;;  %v12251_v58 = vadd.f32 %v4289_v21, %v4225_v3  ;;  %v4650_v16 = vmul.f32 %v4627_v9, %v14678_v32  ;;  %v4897_v45 = vsel %vm2115_vm4, %v4892_v28, 1.0  ;;  %v14687_v21 = vld [vmem:[#allocation116_spill] sm:$0xff]  ;;  %v14690_v9 = vld [vmem:[#allocation121_spill] sm:$0xff] }
 0x675   : > { %v4641_v37 = vsel %vm3120_vm9, %v4628_v22, 0.0  ;;  %v4929_v62 = vmul.f32 %v4921_v51, %v4873_v8  ;;  %v12259_v23 = vmul.f32 %v4897_v45, %v4873_v8  ;;  %v12262_v38 = vmul.f32 %v4891_v13, %v14680_v44  ;;  %v14688_v22 = vld [vmem:[#allocation133_spill] sm:$0xff]  ;;  %v14693_v13 = vld [vmem:[#allocation130_spill] sm:$0xff] }
 0x676   : > { %v4649_v11 = vmul.f32 %v4641_v37, %v12197_v30  ;;  %v4322_v55 = vmul.f32 %v4306_v57, %v12251_v58  ;;  %v4658_v3 = vadd.f32 %v4650_v16, %v14683_v41  ;;  %v3047_v7 = vrot.slane %v14687_v21, 6 }
 0x677   : > { %14686 = vst [vmem:[#allocation30_spill] sm:$0xff] %v12262_v38  ;;  %v14689_v24 = vrot.slane %v14688_v22, 4  ;;  %v14691_v32 = vrot.slane %v14690_v9, 4  ;;  %v4937_v8 = vadd.f32 %v4929_v62, %v14672_v15  ;;  %v13803_v51 = vrot.slane %v12259_v23, 4 }
 0x678   : > { %v12273_v37 = vadd.f32 %v4649_v11, %v4585_v59  ;;  %v13802_v44 = vrot.slane %v12262_v38, 4  ;;  %v4330_v57 = vadd.f32 %v4322_v55, %v4298_v46  ;;  %v14694_v41 = vrot.slane %v14693_v13, 6  ;;  %v12288_v11 = vpop.permute.xlu1 %4000 }
 0x679   : > { %v3172_v28 = vsel %vm3130_vm5, %v14691_v32, %v14689_v24  ;;  %v14695_v45 = vrot.slane %v11635_v52, 6  ;;  %14696 = vst [vmem:[#allocation84_spill] sm:$0xff] %v12288_v11  ;;  %v4977_v62 = vrot.slane %v4937_v8, 4 }
 0x67a   : > { %14692 = vst [vmem:[#allocation31_spill] sm:$0xff] %v12273_v37  ;;  %v3051_v16 = vsel %vm2129_vm15, %v3047_v7, %v14694_v41  ;;  %v3185_v59 = vsel %vm3120_vm9, %v3172_v28, 0.0  ;;  %v4682_v15 = vmul.f32 %v4666_v39, %v12273_v37  ;;  %v4963_v46 = vsel %vm3130_vm5, %v13803_v51, %v13802_v44  ;;  %v14698_v41 = vld [vmem:[#allocation128_spill] sm:$0xff] }
 0x67b   : > { %v3052_v30 = vsel %vm2129_vm15, %v14695_v45, %v3047_v7  ;;  %v3064_v52 = vsel %vm2119_vm0, %v3051_v16, 1.0  ;;  %v4370_v55 = vmul.f32 %v11702_v54, %v4330_v57  ;;  %v4721_v7 = vpop.permute.xlu0 %4720  ;;  %v5018_v24 = vmul.f32 %v4963_v46, %v12262_v38  ;;  %v14702_v16 = vld [vmem:[#allocation97_spill] sm:$0xff] }
 0x67c   : > { %v12302_v32 = vmul.f32 %v3052_v30, %v14687_v21  ;;  %v12305_v39 = vmul.f32 %v3064_v52, %v14693_v13  ;;  %v4690_v28 = vadd.f32 %v4682_v15, %v4658_v3  ;;  %v14699_v45 = vrot.slane %v14698_v41, 4 }
 0x67d   : > { %v14700_v51 = vrot.slane %v11799_v47, 4  ;;  %v14701_v57 = vrot.slane %v12045_v40, 4  ;;  %v14703_v46 = vrot.slane %v14702_v16, 4  ;;  %v4378_v21 = vadd.f32 %v4370_v55, %v12151_v18  ;;  %v14707_v55 = vld [vmem:[#allocation114_spill] sm:$0xff] }
 0x67e   : > { %14697 = vst [vmem:[#allocation91_spill] sm:$0xff] %v12305_v39  ;;  %v4987_v44 = vsel %vm3130_vm5, %v4977_v62, %v14699_v45  ;;  %v13806_v15 = vrot.slane %v12302_v32, 4  ;;  %v12326_v47 = vmul.f32 %v4721_v7, %v4690_v28  ;;  %v3193_v52 = vmul.f32 %v3185_v59, %v12305_v39  ;;  %v14705_v45 = vld [vmem:[#allocation148_spill] sm:$0xff]  ;;  %v12340_v28 = vpop.permute.xlu1 %4356 }
 0x67f   : > { %v4988_v54 = vsel %vm3130_vm5, %v14700_v51, %v4977_v62  ;;  %v5319_v30 = vsel %vm3130_vm5, %v14703_v46, %v14701_v57  ;;  %v5002_v13 = vmul.f32 %v4987_v44, %v12262_v38  ;;  %v13805_v62 = vrot.slane %v12305_v39, 4  ;;  %14709 = vst [vmem:[#allocation106_spill] sm:$0xff] %v12340_v28 }
 0x680   : > { %v4993_v3 = vsel %vm3116_vm12, %v4988_v54, 0.0  ;;  %14704 = vst [vmem:[#allocation186_spill] sm:$0xff] %v12326_v47  ;;  %v4734_v16 = vadd.f32 %v14705_v45, %v4378_v21  ;;  %v14706_v18 = vrot.slane %v14612_v48, 4  ;;  %v14708_v54 = vrot.slane %v14707_v55, 4  ;;  %v14711_v45 = vld [vmem:[#allocation142_spill] sm:$0xff] }
 0x681   : > { %v5001_v51 = vmul.f32 %v4993_v3, %v12259_v23  ;;  %v5010_v57 = vadd.f32 %v5002_v13, %v14698_v41  ;;  %v5374_v7 = vmul.f32 %v5319_v30, %v12045_v40  ;;  %v3132_v59 = vsel %vm3130_vm5, %v13806_v15, %v13805_v62  ;;  %v14710_v30 = vld [vmem:[#allocation71_spill] sm:$0xff]  ;;  %v14717_v62 = vld [vmem:[#allocation146_spill] sm:$0xff] }
 0x682   : > { %v5343_v44 = vsel %vm3130_vm5, %v14708_v54, %v14706_v18  ;;  %v12351_v41 = vadd.f32 %v3193_v52, %v14688_v22  ;;  %v3161_v3 = vsel %vm3120_vm9, %v3132_v59, 1.0  ;;  %v14715_v54 = vld [vmem:[#allocation183_spill] sm:$0xff]  ;;  %v14718_v15 = vrot.slane %v14717_v62, 4  ;;  %v12396_v38 = vpop.permute.xlu1 %4712 }
 0x683   : > { %v12342_v46 = vadd.f32 %v5001_v51, %v4937_v8  ;;  %v5358_v21 = vmul.f32 %v5343_v44, %v12045_v40  ;;  %v5390_v13 = vmul.f32 %v5374_v7, %v14710_v30  ;;  %v14712_v8 = vrot.slane %v14711_v45, 6  ;;  %v14713_v51 = vld [vmem:[#allocation132_spill] sm:$0xff] }
 0x684   : > { %v14714_v18 = vrot.slane %v14713_v51, 6  ;;  %v14716_v37 = vrot.slane %v14715_v54, 4  ;;  %v3209_v44 = vmul.f32 %v3161_v3, %v12305_v39  ;;  %v14725_v3 = vld [vmem:[#allocation23_spill] sm:$0xff]  ;;  %v3292_v39 = vpop.permute.xlu0 %3291 }
 0x685   : > { %v5034_v40 = vmul.f32 %v5018_v24, %v12342_v46  ;;  %v5366_v7 = vadd.f32 %v5358_v21, %v14612_v48  ;;  %v14723_v24 = vld [vmem:[#allocation105_spill] sm:$0xff]  ;;  %v14726_v28 = vrot.slane %v14725_v3, 7 }
 0x686   : > { %v5244_v55 = vsel %vm2129_vm15, %v14714_v18, %v14712_v8  ;;  %v5339_v52 = vsel %vm3130_vm5, %v14718_v15, %v14716_v37  ;;  %v14720_v8 = vmov %v14718_v15  ;;  %v14721_v18 = vld [vmem:[#allocation40_spill] sm:$0xff]  ;;  %v14724_v15 = vrot.slane %v14723_v24, 7 }
 0x687   : > { %v5257_v59 = vsel %vm2119_vm0, %v5244_v55, 1.0  ;;  %v14722_v47 = vrot.slane %v14721_v18, 4  ;;  %v5362_v37 = vmul.f32 %v5339_v52, %v14586_v0  ;;  %v5042_v21 = vadd.f32 %v5034_v40, %v5010_v57 }
 0x688   : > { %v12375_v30 = vmul.f32 %v5257_v59, %v14711_v45  ;;  %v5531_v48 = vsel %vm1163_vm7, %v14726_v28, %v14724_v15  ;;  %v3249_v55 = vmul.f32 0.0, %v3209_v44  ;;  %v5398_v45 = vadd.f32 %v5390_v13, %v5366_v7  ;;  %v14727_v13 = vld [vmem:[#allocation110_spill] sm:$0xff] }
 0x689   : > { %v5340_v22 = vsel %vm3130_vm5, %v14722_v47, %v14720_v8  ;;  %v5370_v52 = vadd.f32 %v5362_v37, %v14715_v54  ;;  %v5586_v8 = vmul.f32 %v14723_v24, %v5531_v48  ;;  %v5082_v3 = vmul.f32 %v11765_v50, %v5042_v21 }
 0x68a   : > { %14719 = vst [vmem:[#allocation111_spill] sm:$0xff] %v12375_v30  ;;  %v5353_v59 = vsel %vm3120_vm9, %v5340_v22, 0.0  ;;  %v13812_v11 = vrot.slane %v12375_v30, 4  ;;  %v3257_v57 = vadd.f32 %v3249_v55, %v12351_v41  ;;  %v5438_v28 = vmul.f32 %v11818_v63, %v5398_v45  ;;  %v14729_v22 = vld [vmem:[#allocation108_spill] sm:$0xff]  ;;  %v14733_v55 = vld [vmem:[#allocation166_spill] sm:$0xff] }
 0x68b   : > { %v5361_v47 = vmul.f32 %v5353_v59, %v12375_v30  ;;  %v14728_v40 = vrot.slane %v14727_v13, 6  ;;  %v14730_v44 = vrot.slane %v14729_v22, 6  ;;  %v14731_v15 = vrot.slane %v14586_v0, 4  ;;  %v14735_v59 = vld [vmem:[#allocation22_spill] sm:$0xff] }
 0x68c   : > { %v5594_v37 = vrot.slane %v5586_v8, 6  ;;  %v5090_v63 = vadd.f32 %v5082_v3, %v4734_v16  ;;  %v3305_v48 = vmul.f32 %v3292_v39, %v3257_v57  ;;  %v14734_v45 = vrot.slane %v14733_v55, 7  ;;  %v14743_v39 = vld [vmem:[#allocation60_spill] sm:$0xff] }
 0x68d   : > { %v5627_v7 = vsel %vm2129_vm15, %v14730_v44, %v14728_v40  ;;  %v5315_v54 = vsel %vm3130_vm5, %v13812_v11, %v14731_v15  ;;  %v12414_v50 = vadd.f32 %v5361_v47, %v14717_v62  ;;  %v14736_v40 = vrot.slane %v14735_v59, 7  ;;  %v14737_v44 = vld [vmem:[#allocation113_spill] sm:$0xff]  ;;  %v14739_v47 = vld [vmem:[#allocation127_spill] sm:$0xff]  ;;  %v5433_v59 = vpop.permute.xlu0 %5432 }
 0x68e   : > { %v5642_v24 = vmul.f32 %v5627_v7, %v5586_v8  ;;  %v5378_v21 = vmul.f32 %v5315_v54, %v14586_v0  ;;  %v14738_v30 = vrot.slane %v14737_v44, 6  ;;  %v14740_v7 = vld [vmem:[#allocation8_spill] sm:$0xff]  ;;  %v12436_v3 = vadd.f32 %v3305_v48, %v14743_v39 }
 0x68f   : > { %14732 = vst [vmem:[#allocation86_spill] sm:$0xff] %v12414_v50  ;;  %v5529_v22 = vsel %vm1163_vm7, %v14736_v40, %v14734_v45  ;;  %v12430_v16 = vadd.f32 %v14740_v7, %v14739_v47  ;;  %v5446_v57 = vadd.f32 %v5438_v28, %v5090_v63  ;;  %v12444_v47 = vpop.permute.xlu1 %5424  ;;  %v14747_v48 = vld [vmem:[#allocation36_spill] sm:$0xff]  ;;  %v14749_v28 = vld [vmem:[#allocation93_spill] sm:$0xff] }
 0x690   : > { %v5603_v15 = vsel %vm2129_vm15, %v14738_v30, %v5594_v37  ;;  %v5650_v62 = vadd.f32 %v5642_v24, %v14727_v13  ;;  %v12433_v0 = vmul.f32 %v14733_v55, %v5529_v22  ;;  %14744 = vst [vmem:[#allocation43_spill] sm:$0xff] %v12436_v3  ;;  %v5394_v54 = vmul.f32 %v5378_v21, %v12414_v50  ;;  %v14745_v30 = vld [vmem:[#allocation167_spill] sm:$0xff]  ;;  %v14751_v21 = vld [vmem:[#allocation41_spill] sm:$0xff]  ;;  %v14753_v39 = vld [vmem:[#allocation76_spill] sm:$0xff] }
 0x691   : > { %14741 = vst [vmem:[#allocation42_spill] sm:$0xff] %v12430_v16  ;;  %v12439_v45 = vmul.f32 %v5603_v15, %v5586_v8  ;;  %v5595_v44 = vrot.slane %v14745_v30, 6  ;;  %14746 = vst [vmem:[#allocation81_spill] sm:$0xff] %v12444_v47  ;;  %v14748_v7 = vrot.slane %v14747_v48, 4  ;;  %v14750_v63 = vrot.slane %v14749_v28, 4  ;;  %v14755_v24 = vld [vmem:[#allocation118_spill] sm:$0xff] }
 0x692   : > { %14742 = vst [vmem:[#allocation180_spill] sm:$0xff] %v12433_v0  ;;  %v5690_v40 = vrot.slane %v5650_v62, 4  ;;  %v5402_v55 = vadd.f32 %v5394_v54, %v5370_v52  ;;  %v14752_v15 = vrot.slane %v14751_v21, 4  ;;  %v14754_v11 = vrot.slane %v14753_v39, 4  ;;  %v14759_v22 = vld [vmem:[#allocation27_spill] sm:$0xff] }
 0x693   : > { %v3540_v8 = vsel %vm3130_vm5, %v14750_v63, %v14748_v7  ;;  %v14756_v50 = vrot.slane %v14755_v24, 4  ;;  %v14757_v54 = vrot.slane %v12433_v0, 6  ;;  %v5602_v7 = vsel %vm2129_vm15, %v5594_v37, %v5595_v44 }
 0x694   : > { %v3896_v13 = vsel %vm3130_vm5, %v14754_v11, %v14752_v15  ;;  %v14758_v63 = vrot.slane %v12430_v16, 6  ;;  %v14760_v39 = vrot.slane %v14759_v22, 6  ;;  %v12475_v15 = vmul.f32 %v5433_v59, %v5402_v55 }
 0x695   : > { %v5699_v52 = vsel %vm3130_vm5, %v14756_v50, %v5690_v40  ;;  %v5601_v28 = vsel %vm2129_vm15, %v5595_v44, %v14757_v54  ;;  %v14762_v24 = vrot.slane %v12439_v45, 4  ;;  %v14763_v50 = vld [vmem:[#allocation109_spill] sm:$0xff]  ;;  %v5611_v37 = vsel %vm2117_vm3, %v5602_v7, 1.0  ;;  %v14767_v7 = vld [vmem:[#allocation170_spill] sm:$0xff] }
 0x696   : > { %v5625_v11 = vsel %vm2129_vm15, %v14760_v39, %v14758_v63  ;;  %14761 = vst [vmem:[#allocation100_spill] sm:$0xff] %v12475_v15  ;;  %v14764_v3 = vrot.slane %v14763_v50, 4  ;;  %v5714_v54 = vmul.f32 %v5699_v52, %v12439_v45  ;;  %v12489_v63 = vmul.f32 %v5611_v37, %v14745_v30  ;;  %v14765_v39 = vld [vmem:[#allocation124_spill] sm:$0xff] }
 0x697   : > { %v5644_v22 = vmul.f32 %v5625_v11, %v12433_v0  ;;  %v12492_v59 = vmul.f32 %v5601_v28, %v12433_v0  ;;  %v14766_v50 = vrot.slane %v14765_v39, 4  ;;  %v3545_v52 = vsel %vm3116_vm12, %v3540_v8, 1.0  ;;  %v14769_v37 = vld [vmem:[#allocation72_spill] sm:$0xff] }
 0x698   : > { %v5675_v47 = vsel %vm3130_vm5, %v14764_v3, %v14762_v24  ;;  %v5722_v55 = vadd.f32 %v5714_v54, %v5650_v62  ;;  %v13815_v28 = vrot.slane %v12489_v63, 4  ;;  %v12508_v24 = vpop.permute.xlu1 %3640  ;;  %v3593_v54 = vmul.f32 %v3545_v52, %v14747_v48 }
 0x699   : > { %v5730_v44 = vmul.f32 %v5675_v47, %v12439_v45  ;;  %v5698_v3 = vsel %vm3130_vm5, %v5690_v40, %v14766_v50  ;;  %v3901_v47 = vsel %vm3116_vm12, %v3896_v13, 1.0  ;;  %v12504_v30 = vadd.f32 %v5644_v22, %v12430_v16 }
 0x69a   : > { %v13814_v62 = vrot.slane %v12492_v59, 4  ;;  %v5707_v40 = vsel %vm3118_vm8, %v5698_v3, 0.0  ;;  %v3949_v8 = vmul.f32 %v3901_v47, %v14751_v21  ;;  %v14768_v13 = vrot.slane %v12155_v56, 4 }
 0x69b   : > { %v5746_v11 = vmul.f32 %v5730_v44, %v14767_v7  ;;  %v14770_v44 = vrot.slane %v14769_v37, 4  ;;  %v5692_v3 = vrot.slane %v12504_v30, 4  ;;  %v5715_v48 = vmul.f32 %v5707_v40, %v12489_v63 }
 0x69c   : > { %v5673_v7 = vsel %vm3130_vm5, %v13815_v28, %v13814_v62  ;;  %v3609_v52 = vmul.f32 0.0, %v3593_v54  ;;  %v3965_v47 = vmul.f32 0.0, %v3949_v8  ;;  %v14772_v8 = vld [vmem:[#allocation44_spill] sm:$0xff]  ;;  %v14773_v62 = vld [vmem:[#allocation39_spill] sm:$0xff]  ;;  %v14774_v28 = vld [vmem:[#allocation90_spill] sm:$0xff] }
 0x69d   : > { %v4252_v22 = vsel %vm3130_vm5, %v14770_v44, %v14768_v13  ;;  %v5754_v50 = vadd.f32 %v5746_v11, %v5722_v55  ;;  %v5732_v21 = vmul.f32 %v5673_v7, %v12492_v59  ;;  %v14771_v11 = vrot.slane %v14765_v39, 4 }
 0x69e   : > { %v4257_v37 = vsel %vm3116_vm12, %v4252_v22, 1.0  ;;  %v12539_v44 = vadd.f32 %v5715_v48, %v14765_v39  ;;  %v3617_v7 = vadd.f32 %v3609_v52, %v14772_v8  ;;  %v3973_v22 = vadd.f32 %v3965_v47, %v14773_v62  ;;  %v12554_v48 = vpop.permute.xlu1 %5064 }
 0x69f   : > { %v5794_v55 = vmul.f32 %v11873_v53, %v5754_v50  ;;  %v5697_v13 = vsel %vm3130_vm5, %v14771_v11, %v5692_v3  ;;  %v4305_v40 = vmul.f32 %v4257_v37, %v12155_v56  ;;  %v14775_v53 = vrot.slane %v14774_v28, 4  ;;  %v14776_v50 = vld [vmem:[#allocation56_spill] sm:$0xff] }
 0x6a0   : > { %v5716_v54 = vmul.f32 %v5697_v13, %v12492_v59  ;;  %v14777_v15 = vrot.slane %v14776_v50, 4  ;;  %v5748_v11 = vmul.f32 %v5732_v21, %v12539_v44  ;;  %v3657_v62 = vmul.f32 %v11931_v26, %v3617_v7  ;;  %v14778_v13 = vld [vmem:[#allocation48_spill] sm:$0xff] }
 0x6a1   : > { %v5802_v0 = vadd.f32 %v5794_v55, %v5446_v57  ;;  %v4321_v39 = vmul.f32 0.0, %v4305_v40  ;;  %v4013_v47 = vmul.f32 %v11982_v20, %v3973_v22  ;;  %v5781_v57 = vpop.permute.xlu0 %5780  ;;  %v14779_v21 = vrot.slane %v12259_v23, 4 }
 0x6a2   : > { %v4608_v16 = vsel %vm3130_vm5, %v14777_v15, %v14775_v53  ;;  %v5724_v52 = vadd.f32 %v5716_v54, %v12504_v30  ;;  %v14781_v40 = vrot.slane %v12302_v32, 4  ;;  %v14782_v26 = vrot.slane %v11691_v2, 4 }
 0x6a3   : > { %v4613_v56 = vsel %vm3116_vm12, %v4608_v16, 1.0  ;;  %v12561_v8 = vmul.f32 %v14778_v13, %v5802_v0  ;;  %v4329_v15 = vadd.f32 %v4321_v39, %v12251_v58  ;;  %v14780_v16 = vrot.slane %v11788_v1, 4  ;;  %v14783_v0 = vld [vmem:[#allocation99_spill] sm:$0xff] }
 0x6a4   : > { %v4661_v37 = vmul.f32 %v4613_v56, %v14774_v28  ;;  %v3133_v20 = vsel %vm3130_vm5, %v14782_v26, %v14781_v40  ;;  %v5756_v28 = vadd.f32 %v5748_v11, %v5724_v52  ;;  %v3665_v54 = vadd.f32 %v3657_v62, %v14783_v0  ;;  %v14786_v52 = vld [vmem:[#allocation135_spill] sm:$0xff]  ;;  %v12600_v40 = vpop.permute.xlu1 %3296 }
 0x6a5   : > { %v4964_v55 = vsel %vm3130_vm5, %v14780_v16, %v14779_v21  ;;  %v4369_v22 = vmul.f32 %v12027_v10, %v4329_v15  ;;  %v14784_v53 = vrot.slane %v14690_v9, 4  ;;  %v14785_v50 = vrot.slane %v11674_v35, 4  ;;  %v14787_v10 = vld [vmem:[#allocation88_spill] sm:$0xff] }
 0x6a6   : > { %v4677_v7 = vmul.f32 0.0, %v4661_v37  ;;  %v4969_v58 = vsel %vm3116_vm12, %v4964_v55, 1.0  ;;  %v3208_v39 = vmul.f32 %v3133_v20, %v12302_v32  ;;  %v12588_v11 = vmul.f32 %v5781_v57, %v5756_v28  ;;  %v14790_v35 = vld [vmem:[#allocation140_spill] sm:$0xff]  ;;  %v14793_v20 = vld [vmem:[#allocation187_spill] sm:$0xff] }
 0x6a7   : > { %v5017_v1 = vmul.f32 %v4969_v58, %v12259_v23  ;;  %v3173_v2 = vsel %vm3130_vm5, %v14785_v50, %v14784_v53  ;;  %v4021_v56 = vadd.f32 %v4013_v47, %v3665_v54  ;;  %v14788_v23 = vld [vmem:[#allocation136_spill] sm:$0xff]  ;;  %v14789_v21 = vrot.slane %v14632_v27, 4 }
 0x6a8   : > { %v4685_v62 = vadd.f32 %v4677_v7, %v14786_v52  ;;  %v3192_v31 = vmul.f32 %v3173_v2, %v12302_v32  ;;  %v3248_v13 = vmul.f32 %v3208_v39, %v14787_v10  ;;  %v3459_v15 = vrot.slane %v14788_v23, 6  ;;  %v14798_v52 = vld [vmem:[#allocation64_spill] sm:$0xff] }
 0x6a9   : > { %v5033_v37 = vmul.f32 0.0, %v5017_v1  ;;  %v14791_v16 = vrot.slane %v14790_v35, 4  ;;  %v4377_v57 = vadd.f32 %v4369_v22, %v4021_v56  ;;  %v14794_v28 = vrot.slane %v14793_v20, 4  ;;  %v14796_v1 = vld [vmem:[#allocation184_spill] sm:$0xff]  ;;  %v12649_v20 = vpop.permute.xlu1 %4008 }
 0x6aa   : > { %v4725_v47 = vmul.f32 %v12068_v42, %v4685_v62  ;;  %v3200_v26 = vadd.f32 %v3192_v31, %v14690_v9  ;;  %v14795_v7 = vrot.slane %v14631_v33, 6  ;;  %v14797_v22 = vrot.slane %v14796_v1, 6  ;;  %v14800_v31 = vld [vmem:[#allocation139_spill] sm:$0xff] }
 0x6ab   : > { %v3561_v55 = vsel %vm3130_vm5, %v14791_v16, %v14789_v21  ;;  %v14792_v32 = vmov %v14791_v16  ;;  %v5041_v54 = vadd.f32 %v5033_v37, %v12342_v46  ;;  %v14799_v62 = vrot.slane %v14798_v52, 7 }
 0x6ac   : > { %v3562_v0 = vsel %vm3130_vm5, %v14794_v28, %v14792_v32  ;;  %v3465_v58 = vsel %vm2129_vm15, %v3459_v15, %v14795_v7  ;;  %v3466_v42 = vsel %vm2129_vm15, %v14797_v22, %v3459_v15  ;;  %v4733_v53 = vadd.f32 %v4725_v47, %v4377_v57  ;;  %v14802_v15 = vld [vmem:[#allocation103_spill] sm:$0xff]  ;;  %v14804_v28 = vld [vmem:[#allocation61_spill] sm:$0xff] }
 0x6ad   : > { %v3571_v9 = vsel %vm3118_vm8, %v3562_v0, 0.0  ;;  %v3256_v50 = vadd.f32 %v3248_v13, %v3200_v26  ;;  %v3475_v2 = vsel %vm2117_vm3, %v3466_v42, 1.0  ;;  %v12624_v46 = vmul.f32 %v3465_v58, %v14631_v33  ;;  %v14803_v13 = vld [vmem:[#allocation79_spill] sm:$0xff]  ;;  %v14805_v7 = vld [vmem:[#allocation149_spill] sm:$0xff]  ;;  %v14807_v58 = vld [vmem:[#allocation38_spill] sm:$0xff] }
 0x6ae   : > { %v5081_v39 = vmul.f32 %v12117_v14, %v5041_v54  ;;  %v12628_v56 = vmul.f32 %v3475_v2, %v14788_v23  ;;  %v14801_v37 = vrot.slane %v14800_v31, 7  ;;  %v12638_v21 = vadd.f32 %v14803_v13, %v14802_v15  ;;  %v14809_v42 = vld [vmem:[#allocation85_spill] sm:$0xff]  ;;  %v14814_v15 = vld [vmem:[#allocation87_spill] sm:$0xff] }
 0x6af   : > { %v3304_v16 = vmul.f32 %v12183_v5, %v3256_v50  ;;  %v3532_v33 = vrot.slane %v12624_v46, 4  ;;  %v3580_v14 = vmul.f32 %v3561_v55, %v12624_v46  ;;  %v14806_v55 = vrot.slane %v14805_v7, 7  ;;  %v14810_v50 = vld [vmem:[#allocation144_spill] sm:$0xff] }
 0x6b0   : > { %v3749_v10 = vsel %vm1163_vm7, %v14801_v37, %v14799_v62  ;;  %v5089_v57 = vadd.f32 %v5081_v39, %v4733_v53  ;;  %v3531_v47 = vrot.slane %v12628_v56, 4  ;;  %v3579_v26 = vmul.f32 %v3571_v9, %v12628_v56  ;;  %v14812_v62 = vld [vmem:[#allocation145_spill] sm:$0xff] }
 0x6b1   : > { %v12644_v23 = vmul.f32 %v14798_v52, %v3749_v10  ;;  %v3840_v32 = vrot.slane %v12638_v21, 6  ;;  %v3312_v0 = vadd.f32 %v3304_v16, %v14804_v28  ;;  %v3588_v5 = vadd.f32 %v3580_v14, %v14632_v27  ;;  %v14815_v14 = vld [vmem:[#allocation153_spill] sm:$0xff] }
 0x6b2   : > { %v14808_v1 = vrot.slane %v14807_v58, 7  ;;  %v5445_v53 = vadd.f32 %v14809_v42, %v5089_v57  ;;  %v3537_v9 = vsel %vm3130_vm5, %v3531_v47, %v3532_v33  ;;  %v12668_v27 = vadd.f32 %v3579_v26, %v14790_v35  ;;  %v14817_v26 = vld [vmem:[#allocation152_spill] sm:$0xff] }
 0x6b3   : > { %v3816_v54 = vrot.slane %v12644_v23, 6  ;;  %v14811_v2 = vrot.slane %v14810_v50, 6  ;;  %v3596_v52 = vmul.f32 %v3537_v9, %v12624_v46  ;;  %v14813_v31 = vrot.slane %v14812_v62, 6  ;;  %v14821_v50 = vld [vmem:[#allocation45_spill] sm:$0xff] }
 0x6b4   : > { %v4105_v22 = vsel %vm1163_vm7, %v14808_v1, %v14806_v55  ;;  %v5801_v13 = vadd.f32 %v14814_v15, %v5445_v53  ;;  %v14816_v57 = vrot.slane %v14815_v14, 6  ;;  %v14818_v28 = vrot.slane %v14817_v26, 6  ;;  %v14825_v26 = vld [vmem:[#allocation177_spill] sm:$0xff] }
 0x6b5   : > { %v3845_v39 = vsel %vm2129_vm15, %v14811_v2, %v3840_v32  ;;  %v3821_v37 = vsel %vm2129_vm15, %v14813_v31, %v3816_v54  ;;  %v12685_v35 = vmul.f32 %v14805_v7, %v4105_v22  ;;  %v14819_v58 = vrot.slane %v14657_v49, 6 }
 0x6b6   : > { %v3864_v10 = vmul.f32 %v3845_v39, %v12644_v23  ;;  %v12689_v16 = vmul.f32 %v3821_v37, %v12644_v23  ;;  %v4201_v55 = vsel %vm2129_vm15, %v14818_v28, %v14816_v57  ;;  %v14820_v1 = vrot.slane %v14587_v36, 6  ;;  %v12720_v37 = vpop.permute.xlu1 %4364 }
 0x6b7   : > { %v3612_v22 = vmul.f32 %v3596_v52, %v12668_v27  ;;  %v4172_v53 = vrot.slane %v12685_v35, 6  ;;  %v4220_v9 = vmul.f32 %v4201_v55, %v12685_v35  ;;  %v5865_v2 = vmul.f32 %v14821_v50, %v5801_v13 }
 0x6b8   : > { %v4533_v7 = vsel %vm2129_vm15, %v14820_v1, %v14819_v58  ;;  %v12705_v42 = vadd.f32 %v3864_v10, %v12638_v21  ;;  %v3888_v39 = vrot.slane %v12689_v16, 4  ;;  %v14822_v36 = vrot.slane %v14662_v43, 4  ;;  %v14865_v21 = vld [vmem:[#allocation174_spill] sm:$0xff] }
 0x6b9   : > { %v12712_v62 = vmul.f32 %v4533_v7, %v14657_v49  ;;  %v14823_v31 = vrot.slane %v14588_v12, 4  ;;  %v3620_v10 = vadd.f32 %v3612_v22, %v3588_v5  ;;  %v14824_v13 = vrot.slane %v14585_v29, 6 }
 0x6ba   : > { %v3912_v15 = vrot.slane %v12705_v42, 4  ;;  %v12730_v57 = vadd.f32 %v4220_v9, %v14815_v14  ;;  %v5872_v12 = vpack.c.bf16 %v12561_v8, %v5865_v2  ;;  %v14826_v28 = vrot.slane %v14825_v26, 4  ;;  %v14827_v14 = vld [vmem:[#allocation147_spill] sm:$0xff] }
 0x6bb   : > { %v4629_v52 = vsel %vm3130_vm5, %v14823_v31, %v14822_v36  ;;  %v4177_v49 = vsel %vm2129_vm15, %v14824_v13, %v4172_v53  ;;  %v4600_v29 = vrot.slane %v12712_v62, 4  ;;  %v3660_v58 = vmul.f32 %v12239_v6, %v3620_v10  ;;  %v14830_v10 = vld [vmem:[#allocation157_spill] sm:$0xff] }
 0x6bc   : > { %v3893_v5 = vsel %vm3130_vm5, %v14826_v28, %v3888_v39  ;;  %v12740_v55 = vmul.f32 %v4177_v49, %v12685_v35  ;;  %v14828_v1 = vrot.slane %v14827_v14, 4  ;;  %v4268_v22 = vrot.slane %v12730_v57, 4  ;;  %6910 = vmatmul.mubr.msk.bf16.vlgmr.msra.gmra.mxu0 %vm1318_vm11, %v5872_v12  ;;  %v14831_v49 = vld [vmem:[#allocation158_spill] sm:$0xff] }
 0x6bd   : > { %v3952_v7 = vmul.f32 %v3893_v5, %v12689_v16  ;;  %v14829_v6 = vrot.slane %v11937_v34, 4  ;;  %v4648_v36 = vmul.f32 %v4629_v52, %v12712_v62  ;;  %v3668_v31 = vadd.f32 %v3660_v58, %v3312_v0  ;;  %v14833_v34 = vld [vmem:[#allocation150_spill] sm:$0xff] }
 0x6be   : > { %v3917_v8 = vsel %vm3130_vm5, %v14828_v1, %v3912_v15  ;;  %v4244_v50 = vrot.slane %v12740_v55, 4  ;;  %v14832_v12 = vrot.slane %v14831_v49, 4  ;;  %v14834_v14 = vrot.slane %v14833_v34, 4  ;;  %v12779_v1 = vpop.permute.xlu1 %5076  ;;  %v14841_v34 = vld [vmem:[#allocation98_spill] sm:$0xff] }
 0x6bf   : > { %v3936_v9 = vmul.f32 %v3917_v8, %v12689_v16  ;;  %v4605_v2 = vsel %vm3130_vm5, %v14829_v6, %v4600_v29  ;;  %v3968_v13 = vmul.f32 %v3952_v7, %v14830_v10  ;;  %v4656_v58 = vadd.f32 %v4648_v36, %v14662_v43 }
 0x6c0   : > { %v4273_v26 = vsel %vm3130_vm5, %v14832_v12, %v4268_v22  ;;  %v4664_v28 = vmul.f32 %v4605_v2, %v12712_v62  ;;  %v4249_v0 = vsel %vm3130_vm5, %v14834_v14, %v4244_v50  ;;  %v14835_v6 = vrot.slane %v14713_v51, 6 }
 0x6c1   : > { %v3944_v5 = vadd.f32 %v3936_v9, %v12705_v42  ;;  %v4292_v52 = vmul.f32 %v4273_v26, %v12740_v55  ;;  %v4308_v8 = vmul.f32 %v4249_v0, %v12740_v55  ;;  %v14836_v9 = vrot.slane %v14619_v25, 6 }
 0x6c2   : > { %v4680_v7 = vmul.f32 %v4664_v28, %v11980_v4  ;;  %v14837_v10 = vrot.slane %v14721_v18, 4  ;;  %v14838_v49 = vrot.slane %v14622_v60, 4  ;;  %v14839_v4 = vld [vmem:[#allocation185_spill] sm:$0xff] }
 0x6c3   : > { %v5245_v2 = vsel %vm2129_vm15, %v14836_v9, %v14835_v6  ;;  %v3976_v36 = vadd.f32 %v3968_v13, %v3944_v5  ;;  %v4300_v12 = vadd.f32 %v4292_v52, %v12730_v57  ;;  %v14840_v25 = vrot.slane %v14839_v4, 4  ;;  %v14842_v6 = vld [vmem:[#allocation83_spill] sm:$0xff]  ;;  %v14844_v5 = vld [vmem:[#allocation30_spill] sm:$0xff]  ;;  %v14846_v9 = vld [vmem:[#allocation84_spill] sm:$0xff] }
 0x6c4   : > { %v5341_v43 = vsel %vm3130_vm5, %v14838_v49, %v14837_v10  ;;  %v12797_v26 = vmul.f32 %v5245_v2, %v14713_v51  ;;  %v4324_v14 = vmul.f32 %v4308_v8, %v14841_v34  ;;  %v4688_v0 = vadd.f32 %v4680_v7, %v4656_v58  ;;  %v14847_v4 = vld [vmem:[#allocation28_spill] sm:$0xff] }
 0x6c5   : > { %v3538_v28 = vsel %vm3130_vm5, %v14840_v25, %v3531_v47  ;;  %v14843_v13 = vrot.slane %v14842_v6, 4  ;;  %v14845_v52 = vrot.slane %v14844_v5, 4  ;;  %v4016_v2 = vmul.f32 %v14846_v9, %v3976_v36  ;;  %v14851_v5 = vld [vmem:[#allocation74_spill] sm:$0xff]  ;;  %v14854_v9 = vld [vmem:[#allocation129_spill] sm:$0xff] }
 0x6c6   : > { %v3547_v60 = vsel %vm3118_vm8, %v3538_v28, 1.0  ;;  %v5312_v10 = vrot.slane %v12797_v26, 4  ;;  %v5360_v49 = vmul.f32 %v5341_v43, %v12797_v26  ;;  %v4332_v8 = vadd.f32 %v4324_v14, %v4300_v12  ;;  %v14849_v28 = vld [vmem:[#allocation91_spill] sm:$0xff]  ;;  %v12834_v14 = vpop.permute.xlu1 %5776 }
 0x6c7   : > { %v4962_v51 = vsel %vm3130_vm5, %v14845_v52, %v14843_v13  ;;  %v3595_v47 = vmul.f32 %v3547_v60, %v12628_v56  ;;  %v4728_v58 = vmul.f32 %v12396_v38, %v4688_v0  ;;  %v14848_v25 = vrot.slane %v14847_v4, 4  ;;  %v14853_v0 = vld [vmem:[#allocation106_spill] sm:$0xff] }
 0x6c8   : > { %v4971_v7 = vsel %vm3118_vm8, %v4962_v51, 1.0  ;;  %v14850_v34 = vrot.slane %v14849_v28, 4  ;;  %v4024_v36 = vadd.f32 %v4016_v2, %v3668_v31  ;;  %v14852_v43 = vrot.slane %v14851_v5, 4  ;;  %v14856_v2 = vld [vmem:[#allocation133_spill] sm:$0xff] }
 0x6c9   : > { %v5368_v38 = vadd.f32 %v5360_v49, %v14721_v18  ;;  %v3611_v12 = vmul.f32 0.0, %v3595_v47  ;;  %v4372_v60 = vmul.f32 %v14853_v0, %v4332_v8  ;;  %v5019_v51 = vmul.f32 %v4971_v7, %v14842_v6  ;;  %v14858_v47 = vld [vmem:[#allocation24_spill] sm:$0xff] }
 0x6ca   : > { %v3131_v13 = vsel %vm3130_vm5, %v14850_v34, %v14848_v25  ;;  %v5317_v56 = vsel %vm3130_vm5, %v14852_v43, %v5312_v10  ;;  %v14855_v31 = vrot.slane %v14854_v9, 4  ;;  %v14857_v25 = vrot.slane %v14856_v2, 4  ;;  %v14860_v7 = vld [vmem:[#allocation164_spill] sm:$0xff] }
 0x6cb   : > { %v5376_v52 = vmul.f32 %v5317_v56, %v12797_v26  ;;  %v3619_v34 = vadd.f32 %v3611_v12, %v12668_v27  ;;  %v3210_v49 = vmul.f32 %v3131_v13, %v14847_v4  ;;  %v14859_v5 = vrot.slane %v14858_v47, 6  ;;  %v14861_v13 = vld [vmem:[#allocation131_spill] sm:$0xff]  ;;  %v14864_v2 = vld [vmem:[#allocation32_spill] sm:$0xff] }
 0x6cc   : > { %v3171_v28 = vsel %vm3130_vm5, %v14857_v25, %v14855_v31  ;;  %v4380_v8 = vadd.f32 %v4372_v60, %v4024_v36  ;;  %v5035_v56 = vmul.f32 0.0, %v5019_v51  ;;  %v14862_v31 = vrot.slane %v14861_v13, 6  ;;  %v14863_v60 = vld [vmem:[#allocation82_spill] sm:$0xff] }
 0x6cd   : > { %v3194_v18 = vmul.f32 %v3171_v28, %v14847_v4  ;;  %v3820_v6 = vsel %vm2129_vm15, %v3816_v54, %v14859_v5  ;;  %v5392_v43 = vmul.f32 %v5376_v52, %v14860_v7  ;;  %v3659_v27 = vmul.f32 %v12508_v24, %v3619_v34  ;;  %v12874_v28 = vpop.permute.xlu1 %3648 }
 0x6ce   : > { %v3833_v0 = vsel %vm2119_vm0, %v3820_v6, 1.0  ;;  %v3250_v4 = vmul.f32 %v3210_v49, %v12351_v41  ;;  %v3844_v23 = vsel %vm2129_vm15, %v3840_v32, %v14862_v31  ;;  %v4736_v54 = vadd.f32 %v4728_v58, %v4380_v8  ;;  %v14866_v32 = vld [vmem:[#allocation81_spill] sm:$0xff]  ;;  %v14869_v6 = vld [vmem:[#allocation178_spill] sm:$0xff] }
 0x6cf   : > { %v3202_v12 = vadd.f32 %v3194_v18, %v14854_v9  ;;  %v5400_v36 = vadd.f32 %v5392_v43, %v5368_v38  ;;  %v5043_v52 = vadd.f32 %v5035_v56, %v14863_v60  ;;  %v3857_v51 = vsel %vm2119_vm0, %v3844_v23, 0.0  ;;  %v14867_v18 = vld [vmem:[#allocation26_spill] sm:$0xff] }
 0x6d0   : > { %v3667_v24 = vadd.f32 %v3659_v27, %v14864_v2  ;;  %v3865_v9 = vmul.f32 %v3857_v51, %v14858_v47  ;;  %v12872_v41 = vmul.f32 %v3833_v0, %v14858_v47  ;;  %v5092_v34 = vadd.f32 %v14865_v21, %v4736_v54  ;;  %v14876_v23 = vld [vmem:[#allocation62_spill] sm:$0xff]  ;;  %v14880_v21 = vld [vmem:[#allocation29_spill] sm:$0xff] }
 0x6d1   : > { %v3258_v25 = vadd.f32 %v3250_v4, %v3202_v12  ;;  %v5440_v58 = vmul.f32 %v14866_v32, %v5400_v36  ;;  %v5083_v38 = vmul.f32 %v12554_v48, %v5043_v52  ;;  %v14868_v49 = vrot.slane %v14867_v18, 6  ;;  %v14870_v48 = vld [vmem:[#allocation143_spill] sm:$0xff]  ;;  %v14877_v36 = vld [vmem:[#allocation172_spill] sm:$0xff]  ;;  %v14881_v32 = vld [vmem:[#allocation169_spill] sm:$0xff] }
 0x6d2   : > { %v4023_v8 = vadd.f32 %v14869_v6, %v3667_v24  ;;  %v3873_v7 = vadd.f32 %v3865_v9, %v14861_v13  ;;  %v3889_v43 = vrot.slane %v12872_v41, 4  ;;  %v14871_v27 = vrot.slane %v14870_v48, 4  ;;  %v14872_v12 = vld [vmem:[#allocation51_spill] sm:$0xff]  ;;  %v14875_v13 = vld [vmem:[#allocation9_spill] sm:$0xff] }
 0x6d3   : > { %v4176_v5 = vsel %vm2129_vm15, %v4172_v53, %v14868_v49  ;;  %v3306_v47 = vmul.f32 %v12600_v40, %v3258_v25  ;;  %v5448_v56 = vadd.f32 %v5440_v58, %v5092_v34  ;;  %v14873_v4 = vrot.slane %v14872_v12, 4 }
 0x6d4   : > { %v4189_v0 = vsel %vm2119_vm0, %v4176_v5, 1.0  ;;  %v4379_v31 = vadd.f32 %v14875_v13, %v4023_v8  ;;  %v14878_v60 = vrot.slane %v14877_v36, 4  ;;  %v3913_v51 = vrot.slane %v3873_v7, 4  ;;  %v12924_v5 = vpop.permute.xlu1 %4004 }
 0x6d5   : > { %v4271_v35 = vsel %vm3130_vm5, %v14873_v4, %v14871_v27  ;;  %v14874_v53 = vmov %v14873_v4  ;;  %v3314_v54 = vadd.f32 %v3306_v47, %v14876_v23  ;;  %v5804_v2 = vadd.f32 %v12588_v11, %v5448_v56 }
 0x6d6   : > { %v4272_v40 = vsel %vm3130_vm5, %v4268_v22, %v14874_v53  ;;  %v3891_v52 = vsel %vm3130_vm5, %v3889_v43, %v14878_v60  ;;  %v4237_v25 = vmul.f32 %v4189_v0, %v14867_v18  ;;  %v14879_v22 = vld [vmem:[#allocation163_spill] sm:$0xff]  ;;  %v14882_v58 = vrot.slane %v14881_v32, 4  ;;  %v14883_v18 = vld [vmem:[#allocation53_spill] sm:$0xff] }
 0x6d7   : > { %v3954_v24 = vmul.f32 %v3891_v52, %v14877_v36  ;;  %v4285_v57 = vsel %vm3120_vm9, %v4272_v40, 0.0  ;;  %v4735_v9 = vadd.f32 %v14879_v22, %v4379_v31  ;;  %v3670_v34 = vadd.f32 %v14880_v21, %v3314_v54  ;;  %v14884_v53 = vld [vmem:[#allocation123_spill] sm:$0xff] }
 0x6d8   : > { %v3915_v49 = vsel %vm3130_vm5, %v3913_v51, %v14882_v58  ;;  %v3916_v11 = vsel %vm3130_vm5, %v3912_v15, %v3913_v51  ;;  %v12927_v6 = vmul.f32 %v14883_v18, %v5804_v2  ;;  %v4245_v56 = vrot.slane %v4237_v25, 4  ;;  %v14886_v31 = vld [vmem:[#allocation63_spill] sm:$0xff] }
 0x6d9   : > { %v3929_v8 = vsel %vm3120_vm9, %v3916_v11, 0.0  ;;  %v3938_v47 = vmul.f32 %v3915_v49, %v14877_v36  ;;  %v5091_v0 = vadd.f32 %v5083_v38, %v4735_v9  ;;  %v4293_v4 = vmul.f32 %v4285_v57, %v4237_v25  ;;  %v14888_v54 = vld [vmem:[#allocation95_spill] sm:$0xff]  ;;  %v14890_v38 = vld [vmem:[#allocation138_spill] sm:$0xff]  ;;  %v14894_v49 = vld [vmem:[#allocation65_spill] sm:$0xff] }
 0x6da   : > { %v3937_v27 = vmul.f32 %v3929_v8, %v12872_v41  ;;  %v4294_v42 = vmul.f32 %v4271_v35, %v14884_v53  ;;  %v14885_v15 = vrot.slane %v14884_v53, 4  ;;  %v14887_v23 = vrot.slane %v14886_v31, 6  ;;  %v14892_v51 = vld [vmem:[#allocation55_spill] sm:$0xff] }
 0x6db   : > { %v3946_v40 = vadd.f32 %v3938_v47, %v14881_v32  ;;  %v14889_v60 = vrot.slane %v14888_v54, 6  ;;  %v14891_v52 = vrot.slane %v14890_v38, 6  ;;  %v14893_v2 = vrot.slane %v14892_v51, 6  ;;  %v14901_v51 = vld [vmem:[#allocation25_spill] sm:$0xff] }
 0x6dc   : > { %v4247_v13 = vsel %vm3130_vm5, %v4245_v56, %v14885_v15  ;;  %v3945_v57 = vadd.f32 %v3937_v27, %v3873_v7  ;;  %v4301_v22 = vadd.f32 %v4293_v4, %v14872_v12  ;;  %v4302_v9 = vadd.f32 %v4294_v42, %v14870_v48  ;;  %v4361_v4 = vpop.permute.xlu1 %4360  ;;  %v14897_v42 = vld [vmem:[#allocation162_spill] sm:$0xff] }
 0x6dd   : > { %v4888_v36 = vsel %vm2129_vm15, %v14889_v60, %v14887_v23  ;;  %v4912_v35 = vsel %vm2129_vm15, %v14893_v2, %v14891_v52  ;;  %v4310_v21 = vmul.f32 %v4247_v13, %v14884_v53  ;;  %v5447_v11 = vadd.f32 %v14894_v49, %v5091_v0 }
 0x6de   : > { %v4901_v32 = vsel %vm2119_vm0, %v4888_v36, 1.0  ;;  %v4925_v58 = vsel %vm2119_vm0, %v4912_v35, 0.0  ;;  %v14895_v18 = vrot.slane %v12489_v63, 4  ;;  %v14896_v8 = vrot.slane %v12439_v45, 4 }
 0x6df   : > { %v3970_v12 = vmul.f32 %v3954_v24, %v3945_v57  ;;  %v4326_v47 = vmul.f32 %v4310_v21, %v4301_v22  ;;  %v4933_v48 = vmul.f32 %v4925_v58, %v14886_v31  ;;  %v4949_v27 = vmul.f32 %v4901_v32, %v14886_v31 }
 0x6e0   : > { %v5674_v7 = vsel %vm3130_vm5, %v14896_v8, %v14895_v18  ;;  %v14898_v15 = vrot.slane %v14897_v42, 4  ;;  %v3892_v24 = vsel %vm3130_vm5, %v3888_v39, %v3889_v43  ;;  %v4248_v0 = vsel %vm3130_vm5, %v4244_v50, %v4245_v56  ;;  %v14899_v43 = vld [vmem:[#allocation68_spill] sm:$0xff]  ;;  %v4717_v32 = vpop.permute.xlu1 %4716 }
 0x6e1   : > { %v5683_v53 = vsel %vm3118_vm8, %v5674_v7, 1.0  ;;  %v3978_v13 = vadd.f32 %v3970_v12, %v3946_v40  ;;  %v4334_v17 = vadd.f32 %v4326_v47, %v4302_v9  ;;  %v4941_v31 = vadd.f32 %v4933_v48, %v14890_v38 }
 0x6e2   : > { %v3536_v45 = vsel %vm3130_vm5, %v3532_v33, %v14898_v15  ;;  %v4957_v23 = vrot.slane %v4949_v27, 4  ;;  %v5731_v46 = vmul.f32 %v5683_v53, %v12489_v63  ;;  %v3905_v16 = vsel %vm3120_vm9, %v3892_v24, 1.0  ;;  %v14905_v53 = vld [vmem:[#allocation66_spill] sm:$0xff] }
 0x6e3   : > { %v3549_v33 = vsel %vm3120_vm9, %v3536_v45, 1.0  ;;  %v4261_v39 = vsel %vm3120_vm9, %v4248_v0, 1.0  ;;  %v4018_v55 = vmul.f32 %v12649_v20, %v3978_v13  ;;  %v4374_v50 = vmul.f32 %v12720_v37, %v4334_v17  ;;  %v14903_v37 = vld [vmem:[#allocation54_spill] sm:$0xff] }
 0x6e4   : > { %v14900_v56 = vrot.slane %v14899_v43, 4  ;;  %v4981_v54 = vrot.slane %v4941_v31, 4  ;;  %v5747_v60 = vmul.f32 0.0, %v5731_v46  ;;  %v3597_v36 = vmul.f32 %v3549_v33, %v14897_v42  ;;  %v14908_v24 = vld [vmem:[#allocation186_spill] sm:$0xff] }
 0x6e5   : > { %v3953_v38 = vmul.f32 %v3905_v16, %v12872_v41  ;;  %v4026_v52 = vadd.f32 %v4018_v55, %v3670_v34  ;;  %v14902_v2 = vrot.slane %v14901_v51, 4  ;;  %v14904_v35 = vrot.slane %v14903_v37, 4  ;;  %v14909_v16 = vld [vmem:[#allocation34_spill] sm:$0xff] }
 0x6e6   : > { %v4959_v40 = vsel %vm3130_vm5, %v4957_v23, %v14900_v56  ;;  %v4309_v21 = vmul.f32 %v4261_v39, %v4237_v25  ;;  %v5755_v41 = vadd.f32 %v5747_v60, %v12539_v44  ;;  %v3613_v34 = vmul.f32 0.0, %v3597_v36  ;;  %v14906_v25 = vld [vmem:[#allocation156_spill] sm:$0xff] }
 0x6e7   : > { %v5022_v63 = vmul.f32 %v4959_v40, %v14899_v43  ;;  %v4983_v20 = vsel %vm3130_vm5, %v4981_v54, %v14902_v2  ;;  %v4984_v9 = vsel %vm3130_vm5, %v14904_v35, %v4981_v54  ;;  %v4382_v18 = vadd.f32 %v4374_v50, %v4026_v52  ;;  %v14913_v40 = vld [vmem:[#allocation111_spill] sm:$0xff] }
 0x6e8   : > { %v4997_v58 = vsel %vm3120_vm9, %v4984_v9, 0.0  ;;  %v5006_v49 = vmul.f32 %v4983_v20, %v14899_v43  ;;  %v3969_v7 = vmul.f32 0.0, %v3953_v38  ;;  %v4325_v12 = vmul.f32 0.0, %v4309_v21  ;;  %v14917_v20 = vld [vmem:[#allocation180_spill] sm:$0xff]  ;;  %v14919_v35 = vld [vmem:[#allocation31_spill] sm:$0xff] }
 0x6e9   : > { %v5005_v8 = vmul.f32 %v4997_v58, %v4949_v27  ;;  %v5795_v48 = vmul.f32 %v12834_v14, %v5755_v41  ;;  %v3621_v42 = vadd.f32 %v3613_v34, %v14905_v53  ;;  %v14907_v15 = vrot.slane %v14906_v25, 4  ;;  %v14922_v34 = vld [vmem:[#allocation42_spill] sm:$0xff] }
 0x6ea   : > { %v5014_v47 = vadd.f32 %v5006_v49, %v14901_v51  ;;  %v4738_v44 = vadd.f32 %v14908_v24, %v4382_v18  ;;  %v3977_v13 = vadd.f32 %v3969_v7, %v3945_v57  ;;  %v4333_v17 = vadd.f32 %v4325_v12, %v4301_v22  ;;  %v14911_v57 = vld [vmem:[#allocation52_spill] sm:$0xff]  ;;  %v14915_v51 = vld [vmem:[#allocation77_spill] sm:$0xff]  ;;  %v14920_v49 = vld [vmem:[#allocation151_spill] sm:$0xff] }
 0x6eb   : > { %v4604_v45 = vsel %vm3130_vm5, %v4600_v29, %v14907_v15  ;;  %v5013_v0 = vadd.f32 %v5005_v8, %v4941_v31  ;;  %v5803_v46 = vadd.f32 %v5795_v48, %v5447_v11  ;;  %v3661_v33 = vmul.f32 %v12874_v28, %v3621_v42  ;;  %v5073_v31 = vpop.permute.xlu1 %5072  ;;  %v14912_v11 = vld [vmem:[#allocation43_spill] sm:$0xff]  ;;  %v14924_v42 = vld [vmem:[#allocation46_spill] sm:$0xff] }
 0x6ec   : > { %v4617_v14 = vsel %vm3120_vm9, %v4604_v45, 1.0  ;;  %v14910_v39 = vrot.slane %v14909_v16, 4  ;;  %v4017_v50 = vmul.f32 %v12924_v5, %v3977_v13  ;;  %v4373_v29 = vmul.f32 %v4361_v4, %v4333_v17 }
 0x6ed   : > { %v5038_v62 = vmul.f32 %v5022_v63, %v5013_v0  ;;  %v4665_v43 = vmul.f32 %v4617_v14, %v14906_v25  ;;  %v5867_v22 = vmul.f32 %v14911_v57, %v5803_v46  ;;  %v3669_v56 = vadd.f32 %v3661_v33, %v14912_v11  ;;  %v14925_v25 = vld [vmem:[#allocation86_spill] sm:$0xff]  ;;  %v14926_v46 = vld [vmem:[#allocation100_spill] sm:$0xff] }
 0x6ee   : > { %v4960_v55 = vsel %vm3130_vm5, %v14910_v39, %v4957_v23  ;;  %v14914_v54 = vrot.slane %v14913_v40, 4  ;;  %v14916_v2 = vrot.slane %v14915_v51, 6  ;;  %v14918_v37 = vrot.slane %v14917_v20, 6  ;;  %v14927_v14 = vld [vmem:[#allocation50_spill] sm:$0xff] }
 0x6ef   : > { %v4973_v28 = vsel %vm3120_vm9, %v4960_v55, 1.0  ;;  %v5046_v63 = vadd.f32 %v5038_v62, %v5014_v47  ;;  %v4681_v5 = vmul.f32 0.0, %v4665_v43  ;;  %v5873_v36 = vpack.c.bf16 %v12927_v6, %v5867_v22  ;;  %v5429_v48 = vpop.permute.xlu1 %5428 }
 0x6f0   : > { %v5316_v23 = vsel %vm3130_vm5, %v5312_v10, %v14914_v54  ;;  %v5021_v4 = vmul.f32 %v4973_v28, %v4949_v27  ;;  %v4025_v38 = vadd.f32 %v4017_v50, %v3669_v56  ;;  %v5600_v26 = vsel %vm2129_vm15, %v14918_v37, %v14916_v2  ;;  %v14931_v56 = vld [vmem:[#allocation59_spill] sm:$0xff]  ;;  %v14933_v2 = vld [vmem:[#allocation20_spill] sm:$0xff] }
 0x6f1   : > { %v5329_v60 = vsel %vm3120_vm9, %v5316_v23, 1.0  ;;  %v5086_v10 = vmul.f32 %v12779_v1, %v5046_v63  ;;  %v4689_v9 = vadd.f32 %v4681_v5, %v14919_v35  ;;  %v5613_v21 = vsel %vm2119_vm0, %v5600_v26, 1.0  ;;  %6913 = vmatprep.mubr.msk.bf16.mxu0 %vm1318_vm11, %v5873_v36  ;;  %v14934_v26 = vld [vmem:[#allocation21_spill] sm:$0xff] }
 0x6f2   : > { %v5377_v52 = vmul.f32 %v5329_v60, %v14913_v40  ;;  %v5037_v27 = vmul.f32 0.0, %v5021_v4  ;;  %v4381_v6 = vadd.f32 %v4373_v29, %v4025_v38  ;;  %v14921_v41 = vrot.slane %v14920_v49, 6 }
 0x6f3   : > { %v14923_v18 = vrot.slane %v14922_v34, 6  ;;  %v5661_v7 = vmul.f32 %v5613_v21, %v14915_v51  ;;  %v5094_v1 = vadd.f32 %v5086_v10, %v4738_v44  ;;  %v4729_v12 = vmul.f32 %v4717_v32, %v4689_v9  ;;  %v5785_v11 = vpop.permute.xlu1 %5784 }
 0x6f4   : > { %v5393_v58 = vmul.f32 0.0, %v5377_v52  ;;  %v5045_v47 = vadd.f32 %v5037_v27, %v5013_v0  ;;  %7354 = vrcp.f32 %v14924_v42  ;;  %v14928_v0 = vrot.slane %v12492_v59, 4 }
 0x6f5   : > { %v5624_v8 = vsel %vm2129_vm15, %v14923_v18, %v14921_v41  ;;  %v5669_v24 = vrot.slane %v5661_v7, 4  ;;  %v4737_v13 = vadd.f32 %v4729_v12, %v4381_v6  ;;  %v5450_v33 = vadd.f32 %v14926_v46, %v5094_v1  ;;  %v13102_v6 = vld [vmem:[%s14936_s11] ss:$0 sm:$0xff] }
 0x6f6   : > { %v5637_v53 = vsel %vm2119_vm0, %v5624_v8, 0.0  ;;  %v5401_v15 = vadd.f32 %v5393_v58, %v14925_v25  ;;  %v5085_v17 = vmul.f32 %v5073_v31, %v5045_v47  ;;  %7356 = vrcp.f32 %v14927_v14  ;;  %v14929_v31 = vld [vmem:[#allocation102_spill] sm:$0xff] }
 0x6f7   : > { %v5645_v45 = vmul.f32 %v5637_v53, %v14915_v51  ;;  %v5672_v16 = vsel %vm3130_vm5, %v14928_v0, %v5669_v24  ;;  %v14930_v57 = vrot.slane %v14929_v31, 4  ;;  %v14932_v28 = vrot.slane %v14931_v56, 4  ;;  %v5789_v36 = vpop.permute.xlu1 %5788 }
 0x6f8   : > { %v5441_v44 = vmul.f32 %v5429_v48, %v5401_v15  ;;  %v5093_v39 = vadd.f32 %v5085_v17, %v4737_v13  ;;  %v5685_v55 = vsel %vm3120_vm9, %v5672_v16, 1.0  ;;  %v13143_v16 = vld [vmem:[%s14938_s17] ss:$0 sm:$0xff] }
 0x6f9   : > { %v5653_v32 = vadd.f32 %v5645_v45, %v14920_v49  ;;  %v5733_v50 = vmul.f32 %v5685_v55, %v5661_v7  ;;  %v5671_v40 = vsel %vm3130_vm5, %v5669_v24, %v14932_v28 }
 0x6fa   : > { %v5449_v29 = vadd.f32 %v5441_v44, %v5093_v39  ;;  %v5734_v5 = vmul.f32 %v5671_v40, %v14931_v56 }
 0x6fb   : > { %v5693_v62 = vrot.slane %v5653_v32, 4  ;;  %v5749_v63 = vmul.f32 0.0, %v5733_v50 }
 0x6fd   : > { %v5696_v43 = vsel %vm3130_vm5, %v5692_v3, %v5693_v62  ;;  %v5695_v59 = vsel %vm3130_vm5, %v5693_v62, %v14930_v57 }
 0x6fe   : > { %v5709_v22 = vsel %vm3120_vm9, %v5696_v43, 0.0  ;;  %v5718_v54 = vmul.f32 %v5695_v59, %v14931_v56 }
 0x6ff   : > { %v5717_v30 = vmul.f32 %v5709_v22, %v5661_v7 }
 0x700   : > { %v5726_v3 = vadd.f32 %v5718_v54, %v14929_v31 }
 0x701   : > { %v5725_v23 = vadd.f32 %v5717_v30, %v5653_v32  ;;  %v7355_v61 = vpop.eup %7354 }
 0x702   : > { %v5861_v19 = vmul.f32 %v7355_v61, %v14933_v2 }
 0x703   : > { %v5757_v4 = vadd.f32 %v5749_v63, %v5725_v23  ;;  %v5750_v60 = vmul.f32 %v5734_v5, %v5725_v23  ;;  %v7357_v51 = vpop.eup %7356 }
 0x704   : > { %v5862_v10 = vmul.f32 %v7357_v51, %v14934_v26 }
 0x705   : > { %v5797_v38 = vmul.f32 %v5785_v11, %v5757_v4  ;;  %v5758_v52 = vadd.f32 %v5750_v60, %v5726_v3 }
 0x707   : > { %v5805_v20 = vadd.f32 %v5797_v38, %v5449_v29  ;;  %v5798_v37 = vmul.f32 %v5789_v36, %v5758_v52 }
 0x709   : > { %v5869_v35 = vmul.f32 %v5861_v19, %v5805_v20  ;;  %v5806_v9 = vadd.f32 %v5798_v37, %v5450_v33 }
 0x70b   : > { %v5870_v27 = vmul.f32 %v5862_v10, %v5806_v9 }
 0x70d   : > { %v5874_v21 = vpack.c.bf16 %v5870_v27, %v5869_v35 }
 0x70f   : > { %6914 = vmatmul.mubr.msk.bf16.gmra.mxu0 %vm1318_vm11, %v5874_v21 }
 0x77c   : > { %v13104_v58 = vpop.f32.mrf.mxu0 }
 0x77d   : > { %v5998_v49 = vmul.f32 %v13104_v58, %v13102_v6 }
 0x77e   : > { %v5953_v41 = vpop.f32.mrf.mxu0 }
 0x77f   : > { %v5996_v34 = vmul.f32 %v13102_v6, %v5953_v41  ;;  %v6006_v18 = vsel %vm1309_vm1, %v5998_v49, 0.0 }
 0x780   : > { %6007 = vadd.xlane.f32.xlu0 %v6006_v18  ;;  %v13110_v8 = vpop.f32.mrf.mxu0 }
 0x781   : > { %v5999_v1 = vmul.f32 %v13110_v8, %v13102_v6  ;;  %v6000_v47 = vsel %vm1309_vm1, %v5996_v34, 0.0 }
 0x782   : > { %v5956_v7 = vpop.f32.mrf.mxu0 }
 0x783   : > { %v5997_v12 = vmul.f32 %v13102_v6, %v5956_v7  ;;  %v6009_v53 = vsel %vm1309_vm1, %v5999_v1, 0.0 }
 0x784   : > { %6001 = vadd.xlane.f32.xlu0 %v6000_v47 }
 0x785   : > { %v6003_v48 = vsel %vm1309_vm1, %v5997_v12, 0.0 }
 0x786   : > { %6004 = vadd.xlane.f32.xlu1 %v6003_v48 }
 0x788   : > { %6010 = vadd.xlane.f32.xlu0 %v6009_v53 }
 0x7cf   : > { %v13118_v42 = vpop.f32.mrf.mxu0 }
 0x7d0   : > { %v6128_v24 = vmul.f32 %v13118_v42, %v13102_v6 }
 0x7d1   : > { %v13120_v25 = vpop.f32.mrf.mxu0 }
 0x7d2   : > { %v6126_v15 = vmul.f32 %v13102_v6, %v13120_v25  ;;  %v6136_v14 = vsel %vm1309_vm1, %v6128_v24, 0.0 }
 0x7d3   : > { %v13124_v45 = vpop.f32.mrf.mxu0 }
 0x7d4   : > { %v6130_v13 = vsel %vm1309_vm1, %v6126_v15, 0.0  ;;  %v6129_v33 = vmul.f32 %v13124_v45, %v13102_v6 }
 0x7d5   : > { %6131 = vadd.xlane.f32.xlu1 %v6130_v13  ;;  %v13129_v17 = vpop.f32.mrf.mxu0 }
 0x7d6   : > { %v6127_v46 = vmul.f32 %v13102_v6, %v13129_v17  ;;  %v6139_v32 = vsel %vm1309_vm1, %v6129_v33, 0.0 }
 0x7d8   : > { %v6133_v44 = vsel %vm1309_vm1, %v6127_v46, 0.0 }
 0x7d9   : > { %6137 = vadd.xlane.f32.xlu1 %v6136_v14  ;;  %6134 = vadd.xlane.f32.xlu0 %v6133_v44 }
 0x7dd   : > { %6140 = vadd.xlane.f32.xlu0 %v6139_v32 }
 0x809   : > { %v6008_v0 = vpop.xlane.xlu0 %6007 }
 0x80a   : > { %v6020_v29 = vmul.f32 %v13143_v16, %v6008_v0 }
 0x80d   : > { %v6002_v39 = vpop.xlane.xlu0 %6001 }
 0x80e   : > { %v6018_v55 = vmul.f32 %v13143_v16, %v6002_v39 }
 0x80f   : > { %v6005_v62 = vpop.xlane.xlu1 %6004 }
 0x810   : > { %v6019_v50 = vmul.f32 %v13143_v16, %v6005_v62  ;;  %6024 = vperm.xlu1 %7104, %v6018_v55  }
 0x811   : > { %v6011_v43 = vpop.xlane.xlu0 %6010 }
 0x812   : > { %6029 = vperm.xlu0 %7105, %v6019_v50   ;;  %v6021_v31 = vmul.f32 %v13143_v16, %v6011_v43 }
 0x814   : > { %6034 = vperm.xlu1 %7104, %v6020_v29  }
 0x818   : > { %6039 = vperm.xlu1 %7104, %v6021_v31  }
 0x85e   : > { %v6132_v57 = vpop.xlane.xlu1 %6131 }
 0x85f   : > { %v6142_v56 = vmul.f32 %v13143_v16, %v6132_v57 }
 0x862   : > { %v6138_v59 = vpop.xlane.xlu1 %6137  ;;  %v6135_v11 = vpop.xlane.xlu0 %6134 }
 0x863   : > { %v6144_v22 = vmul.f32 %v13143_v16, %v6138_v59  ;;  %v6143_v28 = vmul.f32 %v13143_v16, %v6135_v11 }
 0x865   : > { %6158 = vperm.xlu1 %7104, %v6144_v22  }
 0x866   : > { %v6141_v40 = vpop.xlane.xlu0 %6140 }
 0x867   : > { %v6145_v54 = vmul.f32 %v13143_v16, %v6141_v40 }
 0x869   : > { %6148 = vperm.xlu1 %7104, %v6142_v56  }
 0x86d   : > { %6153 = vperm.xlu1 %7104, %v6143_v28  }
 0x871   : > { %6163 = vperm.xlu1 %7104, %v6145_v54  }
 0x88b   : > { %v6025_v30 = vpop.permute.xlu1 %6024 }
 0x88c   : > { %v6042_v23 = vsub.f32 %v5953_v41, %v6025_v30 }
 0x88d   : > { %v6030_v63 = vpop.permute.xlu0 %6029 }
 0x88e   : > { %v13155_v4 = vmul.f32 %v13102_v6, %v6042_v23  ;;  %v6043_v60 = vsub.f32 %v5956_v7, %v6030_v63 }
 0x88f   : > { %v6035_v3 = vpop.permute.xlu1 %6034 }
 0x890   : > { %v6044_v5 = vsub.f32 %v13104_v58, %v6035_v3  ;;  %v13164_v51 = vmul.f32 %v13102_v6, %v6043_v60  ;;  %v6050_v20 = vmul.f32 %v13155_v4, %v13155_v4 }
 0x892   : > { %v13158_v61 = vmul.f32 %v13102_v6, %v6044_v5  ;;  %v6051_v10 = vmul.f32 %v13164_v51, %v13164_v51  ;;  %v6054_v35 = vsel %vm1309_vm1, %v6050_v20, 0.0 }
 0x893   : > { %v6040_v36 = vpop.permute.xlu1 %6039 }
 0x894   : > { %v6045_v38 = vsub.f32 %v13110_v8, %v6040_v36  ;;  %v6052_v52 = vmul.f32 %v13158_v61, %v13158_v61  ;;  %v6057_v9 = vsel %vm1309_vm1, %v6051_v10, 0.0  ;;  %v6618_v10 = vld [vmem:[%s7625_s10] ss:$0 sm:$0xff] }
 0x896   : > { %v13167_v2 = vmul.f32 %v13102_v6, %v6045_v38  ;;  %v6060_v19 = vsel %vm1309_vm1, %v6052_v52, 0.0 }
 0x897   : > { %6061 = vadd.xlane.f32.xlu1 %v6060_v19 }
 0x898   : > { %v6053_v37 = vmul.f32 %v13167_v2, %v13167_v2 }
 0x89a   : > { %v6063_v26 = vsel %vm1309_vm1, %v6053_v37, 0.0  ;;  %v6617_v37 = vld [vmem:[%s7620_s6] ss:$0 sm:$0xff] }
 0x89b   : > { %6064 = vadd.xlane.f32.xlu0 %v6063_v26  ;;  %6055 = vadd.xlane.f32.xlu1 %v6054_v35 }
 0x89f   : > { %6058 = vadd.xlane.f32.xlu0 %v6057_v9 }
 0x8e0   : > { %v6159_v27 = vpop.permute.xlu1 %6158 }
 0x8e1   : > { %v6168_v21 = vsub.f32 %v13118_v42, %v6159_v27  ;;  %v14939_v27 = vld [vmem:[#allocation13_spill] sm:$0xff] }
 0x8e3   : > { %v13182_v41 = vmul.f32 %v13102_v6, %v6168_v21 }
 0x8e4   : > { %v6149_v58 = vpop.permute.xlu1 %6148 }
 0x8e5   : > { %v6166_v49 = vsub.f32 %v13120_v25, %v6149_v58  ;;  %v6176_v47 = vmul.f32 %v13182_v41, %v13182_v41 }
 0x8e7   : > { %v13185_v34 = vmul.f32 %v13102_v6, %v6166_v49  ;;  %v6184_v15 = vsel %vm1309_vm1, %v6176_v47, 0.0  ;;  %v14940_v47 = vld [vmem:[#allocation12_spill] sm:$0xff] }
 0x8e8   : > { %v6154_v18 = vpop.permute.xlu1 %6153 }
 0x8e9   : > { %v6167_v8 = vsub.f32 %v13129_v17, %v6154_v18  ;;  %v6174_v7 = vmul.f32 %v13185_v34, %v13185_v34 }
 0x8eb   : > { %v13191_v1 = vmul.f32 %v13102_v6, %v6167_v8  ;;  %v6178_v12 = vsel %vm1309_vm1, %v6174_v7, 0.0 }
 0x8ec   : > { %6179 = vadd.xlane.f32.xlu1 %v6178_v12  ;;  %v6164_v48 = vpop.permute.xlu1 %6163 }
 0x8ed   : > { %v6169_v53 = vsub.f32 %v13124_v45, %v6164_v48  ;;  %v6175_v42 = vmul.f32 %v13191_v1, %v13191_v1 }
 0x8ef   : > { %v13200_v25 = vmul.f32 %v13102_v6, %v6169_v53  ;;  %v6181_v24 = vsel %vm1309_vm1, %v6175_v42, 0.0  ;;  %v14941_v42 = vld [vmem:[#allocation11_spill] sm:$0xff] }
 0x8f0   : > { %6185 = vadd.xlane.f32.xlu1 %v6184_v15  ;;  %6182 = vadd.xlane.f32.xlu0 %v6181_v24  ;;  %v14942_v24 = vld [vmem:[#allocation14_spill] sm:$0xff] }
 0x8f1   : > { %v6177_v13 = vmul.f32 %v13200_v25, %v13200_v25 }
 0x8f3   : > { %v6187_v17 = vsel %vm1309_vm1, %v6177_v13, 0.0 }
 0x8f4   : > { %6188 = vadd.xlane.f32.xlu0 %v6187_v17 }
 0x920   : > { %v6062_v46 = vpop.xlane.xlu1 %6061 }
 0x921   : > { %v6068_v45 = vmul.f32 %v13143_v16, %v6062_v46 }
 0x923   : > { %v6072_v33 = vadd.f32 1e-06, %v6068_v45  ;;  %v6620_v45 = vld [vmem:[%s7625_s10 + $0x1] ss:$0 sm:$0xff] }
 0x924   : > { %v6065_v14 = vpop.xlane.xlu0 %6064  ;;  %v6056_v44 = vpop.xlane.xlu1 %6055 }
 0x925   : > { %7358 = vrsqrt.f32 %v6072_v33  ;;  %v6066_v6 = vmul.f32 %v13143_v16, %v6056_v44  ;;  %v6069_v32 = vmul.f32 %v13143_v16, %v6065_v14 }
 0x927   : > { %v6070_v0 = vadd.f32 1e-06, %v6066_v6  ;;  %v6073_v62 = vadd.f32 1e-06, %v6069_v32 }
 0x928   : > { %v6059_v39 = vpop.xlane.xlu0 %6058 }
 0x929   : > { %v6067_v55 = vmul.f32 %v13143_v16, %v6059_v39  ;;  %7360 = vrsqrt.f32 %v6070_v0  ;;  %v14943_v39 = vld [vmem:[#allocation16_spill] sm:$0xff] }
 0x92b   : > { %v6071_v50 = vadd.f32 1e-06, %v6067_v55 }
 0x92d   : > { %7362 = vrsqrt.f32 %v6071_v50 }
 0x92e   : > { %7364 = vrsqrt.f32 %v6073_v62 }
 0x932   : > { %v7359_v29 = vpop.eup %7358 }
 0x933   : > { %6090 = vperm.xlu1 %7104, %v7359_v29  }
 0x936   : > { %v7361_v43 = vpop.eup %7360 }
 0x937   : > { %6080 = vperm.xlu1 %7104, %v7361_v43  }
 0x93a   : > { %v7363_v31 = vpop.eup %7362 }
 0x93b   : > { %v7365_v57 = vpop.eup %7364  ;;  %6085 = vperm.xlu0 %7105, %v7363_v31  }
 0x93c   : > { %6095 = vperm.xlu1 %7104, %v7365_v57   ;;  %v14944_v57 = vld [vmem:[#allocation15_spill] sm:$0xff] }
 0x975   : > { %v6180_v59 = vpop.xlane.xlu1 %6179 }
 0x976   : > { %v6190_v22 = vmul.f32 %v13143_v16, %v6180_v59 }
 0x978   : > { %v6194_v11 = vadd.f32 1e-06, %v6190_v22  ;;  %v14945_v22 = vld [vmem:[#allocation18_spill] sm:$0xff] }
 0x979   : > { %v6186_v56 = vpop.xlane.xlu1 %6185  ;;  %v6183_v28 = vpop.xlane.xlu0 %6182 }
 0x97a   : > { %7366 = vrsqrt.f32 %v6194_v11  ;;  %v6192_v40 = vmul.f32 %v13143_v16, %v6186_v56  ;;  %v6191_v54 = vmul.f32 %v13143_v16, %v6183_v28  ;;  %v14946_v56 = vld [vmem:[#allocation17_spill] sm:$0xff] }
 0x97c   : > { %v6196_v30 = vadd.f32 1e-06, %v6192_v40  ;;  %v6195_v23 = vadd.f32 1e-06, %v6191_v54 }
 0x97d   : > { %v6189_v63 = vpop.xlane.xlu0 %6188 }
 0x97e   : > { %7368 = vrsqrt.f32 %v6196_v30  ;;  %v6193_v3 = vmul.f32 %v13143_v16, %v6189_v63 }
 0x97f   : > { %7370 = vrsqrt.f32 %v6195_v23 }
 0x980   : > { %v6197_v5 = vadd.f32 1e-06, %v6193_v3 }
 0x982   : > { %7372 = vrsqrt.f32 %v6197_v5 }
 0x987   : > { %v7367_v60 = vpop.eup %7366 }
 0x988   : > { %6204 = vperm.xlu0 %7105, %v7367_v60  }
 0x98b   : > { %v7369_v36 = vpop.eup %7368 }
 0x98c   : > { %v7371_v38 = vpop.eup %7370  ;;  %6214 = vperm.xlu0 %7105, %v7369_v36  }
 0x98d   : > { %6209 = vperm.xlu1 %7104, %v7371_v38  }
 0x98f   : > { %v7373_v52 = vpop.eup %7372 }
 0x991   : > { %6219 = vperm.xlu1 %7104, %v7373_v52  }
 0x9ae   : > { %v6091_v19 = vpop.permute.xlu1 %6090 }
 0x9af   : > { %v6100_v20 = vmul.f32 %v6091_v19, %v13158_v61 }
 0x9b1   : > { %v6110_v26 = vmul.f32 %v6617_v37, %v6100_v20 }
 0x9b2   : > { %v6081_v16 = vpop.permute.xlu1 %6080 }
 0x9b3   : > { %v6120_v35 = vadd.f32 %v6618_v10, %v6110_v26  ;;  %v6098_v9 = vmul.f32 %v6081_v16, %v13155_v4 }
 0x9b5   : > { %v6124_v21 = vadd.f32 %v6120_v35, %v14939_v27  ;;  %v6108_v49 = vmul.f32 %v6617_v37, %v6098_v9 }
 0x9b6   : > { %v6086_v58 = vpop.permute.xlu0 %6085 }
 0x9b7   : > { %v6099_v18 = vmul.f32 %v6086_v58, %v13164_v51  ;;  %6252 = vst.msk [vmem:[%s13869_s20 + $0x10] sm:$0xff] %vm1309_vm1, %v6124_v21  ;;  %v6096_v61 = vpop.permute.xlu1 %6095  ;;  %v6118_v8 = vadd.f32 %v6618_v10, %v6108_v49 }
 0x9b8   : > { %v6101_v7 = vmul.f32 %v6096_v61, %v13167_v2  ;;  %v6619_v2 = vld [vmem:[%s7620_s6 + $0x1] ss:$0 sm:$0xff] }
 0x9b9   : > { %v6109_v12 = vmul.f32 %v6617_v37, %v6099_v18  ;;  %v6122_v4 = vadd.f32 %v6118_v8, %v14940_v47 }
 0x9ba   : > { %v6111_v48 = vmul.f32 %v6617_v37, %v6101_v7 }
 0x9bb   : > { %v6119_v53 = vadd.f32 %v6618_v10, %v6109_v12  ;;  %6250 = vst.msk [vmem:[%s13869_s20] sm:$0xff] %vm1309_vm1, %v6122_v4 }
 0x9bc   : > { %v6121_v51 = vadd.f32 %v6618_v10, %v6111_v48 }
 0x9bd   : > { %v6123_v15 = vadd.f32 %v6119_v53, %v14941_v42 }
 0x9be   : > { %v6125_v13 = vadd.f32 %v6121_v51, %v14942_v24 }
 0x9bf   : > { %6251 = vst.msk [vmem:[%s13869_s20 + $0x8] sm:$0xff] %vm1309_vm1, %v6123_v15 }
 0x9c0   : > { %6253 = vst.msk [vmem:[%s13869_s20 + $0x18] sm:$0xff] %vm1309_vm1, %v6125_v13 }
 0xa03   : > { %v6205_v17 = vpop.permute.xlu0 %6204 }
 0xa04   : > { %v6222_v46 = vmul.f32 %v6205_v17, %v13185_v34 }
 0xa06   : > { %v6232_v33 = vmul.f32 %v6619_v2, %v6222_v46 }
 0xa07   : > { %v6215_v14 = vpop.permute.xlu0 %6214 }
 0xa08   : > { %v6242_v44 = vadd.f32 %v6620_v45, %v6232_v33  ;;  %v6210_v6 = vpop.permute.xlu1 %6209  ;;  %v6224_v32 = vmul.f32 %v6215_v14, %v13182_v41 }
 0xa09   : > { %v6223_v0 = vmul.f32 %v6210_v6, %v13191_v1 }
 0xa0a   : > { %v6246_v55 = vadd.f32 %v6242_v44, %v14943_v39  ;;  %v6234_v62 = vmul.f32 %v6619_v2, %v6224_v32 }
 0xa0b   : > { %v6233_v50 = vmul.f32 %v6619_v2, %v6223_v0 }
 0xa0c   : > { %6254 = vst.msk [vmem:[%s13869_s20 + $0x20] sm:$0xff] %vm1309_vm1, %v6246_v55  ;;  %v6244_v29 = vadd.f32 %v6620_v45, %v6234_v62  ;;  %v6220_v34 = vpop.permute.xlu1 %6219 }
 0xa0d   : > { %v6243_v43 = vadd.f32 %v6620_v45, %v6233_v50  ;;  %v6225_v31 = vmul.f32 %v6220_v34, %v13200_v25 }
 0xa0e   : > { %v6248_v59 = vadd.f32 %v6244_v29, %v14944_v57 }
 0xa0f   : > { %v6247_v41 = vadd.f32 %v6243_v43, %v14945_v22  ;;  %v6235_v11 = vmul.f32 %v6619_v2, %v6225_v31 }
 0xa10   : > { %6256 = vst.msk [vmem:[%s13869_s20 + $0x30] sm:$0xff] %vm1309_vm1, %v6248_v59 }
 0xa11   : > { %6255 = vst.msk [vmem:[%s13869_s20 + $0x28] sm:$0xff] %vm1309_vm1, %v6247_v41  ;;  %v6245_v1 = vadd.f32 %v6620_v45, %v6235_v11 }
 0xa13   : > { %v6249_v28 = vadd.f32 %v6245_v1, %v14946_v56 }
 0xa15   : > { %6257 = vst.msk [vmem:[%s13869_s20 + $0x38] sm:$0xff] %vm1309_vm1, %v6249_v28 }
 0xa16 PF: > { %s14947_s9 = sld [smem:[#allocation2_spill]] }
 0xa1c   : > { %s32_s3 = sadd.s32 1, %s14947_s9  }
 0xa1d   : > { %p29_p5 = scmp.ge.s32.totalorder %s32_s3, 5  }
 0xa1f   :  { %31 = sbr.rel (!%p29_p5) target bundleno = 23 (0x17), region = 198 }

</bundles_post_ra>
